<compile_context>
chip_gen: v6e
topology: v6e:2x2x1
jax: 0.10.0
libtpu: 0.0.40
codegen_flags: <defaults>
</compile_context>

<pallas_src>
import jax
import jax.numpy as jnp
from jax import lax
from jax.experimental import pallas as pl
from jax.experimental.pallas import tpu as pltpu

# ----------------------------- configuration ---------------------------------
IMG_SIZE = 32        # square input image
PATCH = 8            # patch size -> Hp = Wp = 4 tokens per side
EMBED = 32           # transformer width
DEPTH = 2            # number of transformer blocks
NUM_HEADS = 4
OUT_CHANS = 16       # neck output channels
MLP_RATIO = 4
IN_CHANS = 3
HEAD_DIM = EMBED // NUM_HEADS
HIDDEN = MLP_RATIO * EMBED
SCALE = HEAD_DIM ** -0.5
EPS = 1e-6           # SAM uses eps=1e-6 for LayerNorm and LayerNorm2d

_PER_BLOCK = 14      # kernel operands per transformer block
_NECK = 7            # kernel operands for the neck


def _vspec():
    # whole-array VMEM-resident operand (total footprint here is < 1 MiB)
    return pl.BlockSpec(memory_space=pltpu.MemorySpace.VMEM)


# --------------------------- in-kernel helpers --------------------------------
def _f32dot(a, b):
    return jnp.dot(a, b, preferred_element_type=jnp.float32)


def _layer_norm(x, g, b):
    mu = jnp.mean(x, axis=-1, keepdims=True)
    var = jnp.mean((x - mu) ** 2, axis=-1, keepdims=True)
    return (x - mu) * lax.rsqrt(var + EPS) * g + b


def _erf(x):
    # Abramowitz & Stegun 7.1.26 (max abs err 1.5e-7, below f32 visibility),
    # built only from ops with guaranteed Mosaic lowerings.
    # TODO(synk): switch to lax.erf if its Mosaic lowering is guaranteed on all
    # target TPU generations.
    a1, a2, a3, a4, a5 = (0.254829592, -0.284496736, 1.421413741,
                          -1.453152027, 1.061405429)
    p = 0.3275911
    sgn = jnp.where(x >= 0.0, 1.0, -1.0)
    ax = jnp.abs(x)
    t = 1.0 / (1.0 + p * ax)
    poly = ((((a5 * t + a4) * t + a3) * t + a2) * t + a1) * t
    return sgn * (1.0 - poly * jnp.exp(-ax * ax))


def _gelu_exact(x):
    # torch nn.GELU() default (erf based)
    return 0.5 * x * (1.0 + _erf(x * 0.7071067811865476))


# ------------------------------ fused kernel ----------------------------------
def _pixel_encoder_kernel(cols_ref, pos_ref, tmat_ref, mh_ref, mw_ref,
                          negm_ref, wpe_ref, bpe_ref, *rest):
    """Whole network in one kernel: patch-embed -> DEPTH blocks -> neck."""
    out_ref = rest[-1]
    refs = rest[:-1]
    bn = cols_ref.shape[0]                       # B * Hp * Wp tokens

    # ---- patch embed (stride=PATCH conv as im2col matmul) + abs pos embed ----
    x = _f32dot(cols_ref[...], wpe_ref[...]) + bpe_ref[...] + pos_ref[...]

    tmat = tmat_ref[...]     # (HEAD_DIM, Hp*HEAD_DIM) column-tiling matrix
    mh = mh_ref[...]         # (BN, Hp*HEAD_DIM) mask selecting row's i-block
    mw = mw_ref[...]         # (BN, Wp*HEAD_DIM) mask selecting row's j-block
    negm = negm_ref[...]     # (BN, BN): 0 within batch, -1e30 across batches

    for blk in range(DEPTH):
        (n1g, n1b, qkvw, qkvb, rhe, rwe, projw, projb,
         n2g, n2b, w1, b1, w2, b2) = refs[blk * _PER_BLOCK:(blk + 1) * _PER_BLOCK]

        shortcut = x
        xn = _layer_norm(x, n1g[...], n1b[...])
        qkv = _f32dot(xn, qkvw[...]) + qkvb[...]            # (BN, 3*EMBED)
        rhe_v = rhe[...]                                    # (Hp*HD, BN)
        rwe_v = rwe[...]                                    # (Wp*HD, BN)

        # attention: heads unrolled, both batch elements processed jointly;
        # cross-batch score entries are killed with -1e30 (prob -> exactly 0).
        attn_proj = jnp.zeros((bn, EMBED), jnp.float32)
        for h in range(NUM_HEADS):
            c0 = h * HEAD_DIM
            q = qkv[:, c0:c0 + HEAD_DIM]
            k = qkv[:, EMBED + c0:EMBED + c0 + HEAD_DIM]
            v = qkv[:, 2 * EMBED + c0:2 * EMBED + c0 + HEAD_DIM]

            # q @ k^T without materialising a transpose (NT dot_general)
            s = lax.dot_general(q, k, (((1,), (1,)), ((), ())),
                                preferred_element_type=jnp.float32) * SCALE

            # decomposed relative-position bias from the UN-scaled q (SAM
            # semantics), as two matmuls against precomputed tables.
            qt = _f32dot(q, tmat)                           # (BN, Hp*HD)
            s = s + _f32dot(qt * mh, rhe_v) + _f32dot(qt * mw, rwe_v) + negm

            s = s - jnp.max(s, axis=-1, keepdims=True)
            p = jnp.exp(s)
            denom = jnp.sum(p, axis=-1, keepdims=True)
            o = _f32dot(p, v) / denom                       # (BN, HEAD_DIM)
            # fold the head-concat straight into the output projection
            attn_proj = attn_proj + _f32dot(o, projw[c0:c0 + HEAD_DIM, :])

        x = shortcut + attn_proj + projb[...]

        # ---- MLP (linear -> exact GELU -> linear), fused ----
        xn = _layer_norm(x, n2g[...], n2b[...])
        hmid = _gelu_exact(_f32dot(xn, w1[...]) + b1[...])
        x = x + _f32dot(hmid, w2[...]) + b2[...]

    # -------------------------------- neck ------------------------------------
    nw1, ln1g, ln1b, smat, w3, ln2g, ln2b = refs[DEPTH * _PER_BLOCK:
                                                 DEPTH * _PER_BLOCK + _NECK]
    y = _f32dot(x, nw1[...])                                # 1x1 conv, no bias
    y = _layer_norm(y, ln1g[...], ln1b[...])                # LayerNorm2d
    # 3x3 conv (padding=1, no bias) as 9 shift-select matmuls:
    #   out = sum_k  S_k @ (y @ W_k)
    acc = jnp.zeros((bn, OUT_CHANS), jnp.float32)
    for t in range(9):
        acc = acc + _f32dot(smat[t], _f32dot(y, w3[t]))
    out_ref[...] = _layer_norm(acc, ln2g[...], ln2b[...])   # LayerNorm2d


# --------------------- parameter-only operand preparation ---------------------
def _get_rel_pos(q_size, k_size, rel_pos):
    # q_size == k_size and rel_pos.shape[0] == 2*size-1 -> no interpolation path
    coords = (jnp.arange(q_size)[:, None] - jnp.arange(k_size)[None, :]
              + (k_size - 1))
    return rel_pos[coords]                                   # (q, k, HEAD_DIM)


def _build_const_operands(params, B, Hp, Wp):
    """Kernel operands that depend only on parameters / geometry."""
    N = Hp * Wp
    BN = B * N
    f32 = jnp.float32

    # absolute position embedding, tiled over the batch rows
    pos_t = jnp.tile(params["pos_embed"].reshape(N, EMBED), (B, 1))

    # geometry constants for the in-kernel decomposed rel-pos bias
    tmat = jnp.tile(jnp.eye(HEAD_DIM, dtype=f32), (1, Hp))   # (HD, Hp*HD)
    r = jnp.arange(BN)
    b_r, t_r = r // N, r % N
    i_r, j_r = t_r // Wp, t_r % Wp
    blk_col = jnp.arange(Hp * HEAD_DIM) // HEAD_DIM
    m_h = (i_r[:, None] == blk_col[None, :]).astype(f32)     # (BN, Hp*HD)
    m_w = (j_r[:, None] == blk_col[None, :]).astype(f32)     # (BN, Wp*HD)
    negm = jnp.where(b_r[:, None] == b_r[None, :], 0.0, -1e30).astype(f32)

    # patch-embed conv as a matmul (im2col channel/kh/kw order matches below)
    w_pe = params["patch_w"].reshape(EMBED, IN_CHANS * PATCH * PATCH).T
    b_pe = params["patch_b"].reshape(1, EMBED)

    ops = [pos_t, tmat, m_h, m_w, negm, w_pe, b_pe]

    # per-block rel-pos tables: fold gather + (k,l) expansion + batch tiling
    # into two (Hp*HD, BN) matrices so the kernel needs only matmuls.
    e_h = jnp.tile(jnp.repeat(jnp.eye(Hp, dtype=f32), Wp, axis=1), (1, B))
    e_w = jnp.tile(jnp.tile(jnp.eye(Wp, dtype=f32), (1, Hp)), (1, B))
    for bp in params["blocks"]:
        Rh = _get_rel_pos(Hp, Hp, bp["rel_h"])               # (Hp, Hp, HD)
        Rw = _get_rel_pos(Wp, Wp, bp["rel_w"])
        rhs = Rh.transpose(0, 2, 1).reshape(Hp * HEAD_DIM, Hp)
        rws = Rw.transpose(0, 2, 1).reshape(Wp * HEAD_DIM, Wp)
        rhe = rhs @ e_h                                      # (Hp*HD, BN)
        rwe = rws @ e_w                                      # (Wp*HD, BN)
        ops += [
            bp["n1_g"].reshape(1, EMBED), bp["n1_b"].reshape(1, EMBED),
            bp["qkv_w"], bp["qkv_b"].reshape(1, 3 * EMBED),
            rhe, rwe,
            bp["proj_w"], bp["proj_b"].reshape(1, EMBED),
            bp["n2_g"].reshape(1, EMBED), bp["n2_b"].reshape(1, EMBED),
            bp["mlp_w1"], bp["mlp_b1"].reshape(1, HIDDEN),
            bp["mlp_w2"], bp["mlp_b2"].reshape(1, EMBED),
        ]

    # neck weights + constant shift/zero-pad selection matrices for the 3x3 conv
    nw1 = params["neck_w1"].reshape(OUT_CHANS, EMBED).T      # (EMBED, OUT)
    s_taps = []
    for di in range(3):
        for dj in range(3):
            si, sj = i_r + di - 1, j_r + dj - 1
            valid = (si >= 0) & (si < Hp) & (sj >= 0) & (sj < Wp)
            src = b_r * N + jnp.clip(si, 0, Hp - 1) * Wp + jnp.clip(sj, 0, Wp - 1)
            onehot = (jnp.arange(BN)[None, :] == src[:, None]) & valid[:, None]
            s_taps.append(onehot.astype(f32))
    smat = jnp.stack(s_taps, axis=0)                         # (9, BN, BN)
    w3 = params["neck_w2"].transpose(2, 3, 1, 0).reshape(9, OUT_CHANS, OUT_CHANS)
    ops += [nw1,
            params["neck_ln1_g"].reshape(1, OUT_CHANS),
            params["neck_ln1_b"].reshape(1, OUT_CHANS),
            smat, w3,
            params["neck_ln2_g"].reshape(1, OUT_CHANS),
            params["neck_ln2_b"].reshape(1, OUT_CHANS)]
    return ops


# --------------------------------- forward ------------------------------------
def pixel_encoder_forward(params, x):
    """x: (B, 1, H, W) float32 NCHW -> (B, OUT_CHANS, H//PATCH, W//PATCH)."""
    B, _, H, W = x.shape
    Hp, Wp = H // PATCH, W // PATCH
    BN = B * Hp * Wp

    # channel repeat (== torch x.repeat(1, 3, 1, 1)) + im2col for the patch conv
    x3 = jnp.tile(x, (1, IN_CHANS, 1, 1))
    cols = (x3.reshape(B, IN_CHANS, Hp, PATCH, Wp, PATCH)
              .transpose(0, 2, 4, 1, 3, 5)
              .reshape(BN, IN_CHANS * PATCH * PATCH))

    operands = [cols] + _build_const_operands(params, B, Hp, Wp)

    out = pl.pallas_call(
        _pixel_encoder_kernel,
        out_shape=jax.ShapeDtypeStruct((BN, OUT_CHANS), jnp.float32),
        in_specs=[_vspec()] * len(operands),
        out_specs=_vspec(),
    )(*operands)

    return out.reshape(B, Hp, Wp, OUT_CHANS).transpose(0, 3, 1, 2)  # NCHW


# -------------------------- pure-JAX reference model --------------------------
def _ref_ln(x, g, b):
    mu = jnp.mean(x, axis=-1, keepdims=True)
    var = jnp.mean((x - mu) ** 2, axis=-1, keepdims=True)
    return (x - mu) / jnp.sqrt(var + EPS) * g + b


def _ref_block(bp, x):
    B, H, W, C = x.shape
    N = H * W
    shortcut = x
    xn = _ref_ln(x.reshape(B * N, C), bp["n1_g"], bp["n1_b"]).reshape(B, N, C)
    qkv = xn @ bp["qkv_w"] + bp["qkv_b"]
    qkv = (qkv.reshape(B, N, 3, NUM_HEADS, HEAD_DIM)
              .transpose(2, 0, 3, 1, 4)
              .reshape(3, B * NUM_HEADS, N, HEAD_DIM))
    q, k, v = qkv[0], qkv[1], qkv[2]
    attn = (q * SCALE) @ jnp.swapaxes(k, -1, -2)
    Rh = _get_rel_pos(H, H, bp["rel_h"])
    Rw = _get_rel_pos(W, W, bp["rel_w"])
    r_q = q.reshape(B * NUM_HEADS, H, W, HEAD_DIM)
    rel_h = jnp.einsum("bhwc,hkc->bhwk", r_q, Rh)
    rel_w = jnp.einsum("bhwc,wkc->bhwk", r_q, Rw)
    attn = (attn.reshape(B * NUM_HEADS, H, W, H, W)
            + rel_h[:, :, :, :, None] + rel_w[:, :, :, None, :]
            ).reshape(B * NUM_HEADS, N, N)
    attn = jax.nn.softmax(attn, axis=-1)
    out = (attn @ v).reshape(B, NUM_HEADS, H, W, HEAD_DIM)
    out = out.transpose(0, 2, 3, 1, 4).reshape(B * N, C)
    out = out @ bp["proj_w"] + bp["proj_b"]
    x = shortcut + out.reshape(B, H, W, C)
    xn = _ref_ln(x.reshape(B * N, C), bp["n2_g"], bp["n2_b"])
    h = jax.nn.gelu(xn @ bp["mlp_w1"] + bp["mlp_b1"], approximate=False)
    x = x + (h @ bp["mlp_w2"] + bp["mlp_b2"]).reshape(B, H, W, C)
    return x


def reference_forward(params, x):
    B, _, H, W = x.shape
    Hp, Wp = H // PATCH, W // PATCH
    x3 = jnp.tile(x, (1, IN_CHANS, 1, 1))
    cols = (x3.reshape(B, IN_CHANS, Hp, PATCH, Wp, PATCH)
              .transpose(0, 2, 4, 1, 3, 5)
              .reshape(B * Hp * Wp, IN_CHANS * PATCH * PATCH))
    w_pe = params["patch_w"].reshape(EMBED, -1).T
    tok = (cols @ w_pe + params["patch_b"]).reshape(B, Hp, Wp, EMBED)
    tok = tok + params["pos_embed"]
    for bp in params["blocks"]:
        tok = _ref_block(bp, tok)
    y = tok.reshape(-1, EMBED) @ params["neck_w1"].reshape(OUT_CHANS, EMBED).T
    y = _ref_ln(y, params["neck_ln1_g"], params["neck_ln1_b"])
    y = y.reshape(B, Hp, Wp, OUT_CHANS)
    yp = jnp.pad(y, ((0, 0), (1, 1), (1, 1), (0, 0)))
    out = jnp.zeros((B, Hp, Wp, OUT_CHANS), jnp.float32)
    for di in range(3):
        for dj in range(3):
            out = out + yp[:, di:di + Hp, dj:dj + Wp, :] @ params["neck_w2"][:, :, di, dj].T
    out = _ref_ln(out.reshape(-1, OUT_CHANS),
                  params["neck_ln2_g"], params["neck_ln2_b"])
    return out.reshape(B, Hp, Wp, OUT_CHANS).transpose(0, 3, 1, 2)


# ------------------------------ parameter init --------------------------------
def _nrm(key, shape, scale):
    return scale * jax.random.normal(key, shape, jnp.float32)


def init_params(key):
    n_needed = 5 + DEPTH * 10
    ks = iter(jax.random.split(key, n_needed + 4))   # spare keys -> no StopIteration
    Hp = IMG_SIZE // PATCH
    params = {
        "patch_w": _nrm(next(ks), (EMBED, IN_CHANS, PATCH, PATCH), 0.1),
        "patch_b": _nrm(next(ks), (EMBED,), 0.1),
        "pos_embed": _nrm(next(ks), (1, Hp, Hp, EMBED), 0.5),
        "neck_w1": _nrm(next(ks), (OUT_CHANS, EMBED, 1, 1), 0.1),
        "neck_ln1_g": jnp.ones((OUT_CHANS,), jnp.float32),
        "neck_ln1_b": jnp.zeros((OUT_CHANS,), jnp.float32),
        "neck_w2": _nrm(next(ks), (OUT_CHANS, OUT_CHANS, 3, 3), 0.1),
        "neck_ln2_g": jnp.ones((OUT_CHANS,), jnp.float32),
        "neck_ln2_b": jnp.zeros((OUT_CHANS,), jnp.float32),
        "blocks": [],
    }
    for _ in range(DEPTH):
        params["blocks"].append({
            "n1_g": jnp.ones((EMBED,), jnp.float32),
            "n1_b": jnp.zeros((EMBED,), jnp.float32),
            "qkv_w": _nrm(next(ks), (EMBED, 3 * EMBED), 0.1),
            "qkv_b": _nrm(next(ks), (3 * EMBED,), 0.1),
            "rel_h": _nrm(next(ks), (2 * Hp - 1, HEAD_DIM), 0.5),
            "rel_w": _nrm(next(ks), (2 * Hp - 1, HEAD_DIM), 0.5),
            "proj_w": _nrm(next(ks), (EMBED, EMBED), 0.1),
            "proj_b": _nrm(next(ks), (EMBED,), 0.1),
            "n2_g": jnp.ones((EMBED,), jnp.float32),
            "n2_b": jnp.zeros((EMBED,), jnp.float32),
            "mlp_w1": _nrm(next(ks), (EMBED, HIDDEN), 0.1),
            "mlp_b1": _nrm(next(ks), (HIDDEN,), 0.1),
            "mlp_w2": _nrm(next(ks), (HIDDEN, EMBED), 0.1),
            "mlp_b2": _nrm(next(ks), (EMBED,), 0.1),
        })
    return params


# ------------------------------------ main -------------------------------------
if __name__ == "__main__":
    key = jax.random.PRNGKey(0)
    pkey, xkey = jax.random.split(key)
    params = init_params(pkey)

    # The PyTorch module takes a single-channel NCHW image (repeats it to 3ch).
    x = jax.random.normal(xkey, (2, 1, IMG_SIZE, IMG_SIZE), jnp.float32)

    fwd = jax.jit(pixel_encoder_forward)
    out = jax.block_until_ready(fwd(params, x))

    expected = (2, OUT_CHANS, IMG_SIZE // PATCH, IMG_SIZE // PATCH)
    assert out.shape == expected, (out.shape, expected)
    assert out.dtype == jnp.float32
    assert bool(jnp.all(jnp.isfinite(out)))

    # pure-JAX reference check (loose tolerance absorbs MXU f32 accumulation
    # order and the 1.5e-7 erf approximation; structural bugs would be O(1)).
    ref = jax.block_until_ready(reference_forward(params, x))
    max_err = float(jnp.max(jnp.abs(out - ref)))
    assert max_err < 5e-2, f"mismatch vs reference: max abs err {max_err}"

    print("KERNEL_OK")
</pallas_src>

<mosaic_0001>
module attributes {stable_mosaic.version = 11 : i64} {
  func.func @_pixel_encoder_kernel(%arg0: memref<32x192xf32, #tpu.memory_space<vmem>>, %arg1: memref<32x32xf32, #tpu.memory_space<vmem>>, %arg2: memref<8x32xf32, #tpu.memory_space<vmem>>, %arg3: memref<32x32xf32, #tpu.memory_space<vmem>>, %arg4: memref<32x32xf32, #tpu.memory_space<vmem>>, %arg5: memref<32x32xf32, #tpu.memory_space<vmem>>, %arg6: memref<192x32xf32, #tpu.memory_space<vmem>>, %arg7: memref<1x32xf32, #tpu.memory_space<vmem>>, %arg8: memref<1x32xf32, #tpu.memory_space<vmem>>, %arg9: memref<1x32xf32, #tpu.memory_space<vmem>>, %arg10: memref<32x96xf32, #tpu.memory_space<vmem>>, %arg11: memref<1x96xf32, #tpu.memory_space<vmem>>, %arg12: memref<32x32xf32, #tpu.memory_space<vmem>>, %arg13: memref<32x32xf32, #tpu.memory_space<vmem>>, %arg14: memref<32x32xf32, #tpu.memory_space<vmem>>, %arg15: memref<1x32xf32, #tpu.memory_space<vmem>>, %arg16: memref<1x32xf32, #tpu.memory_space<vmem>>, %arg17: memref<1x32xf32, #tpu.memory_space<vmem>>, %arg18: memref<32x128xf32, #tpu.memory_space<vmem>>, %arg19: memref<1x128xf32, #tpu.memory_space<vmem>>, %arg20: memref<128x32xf32, #tpu.memory_space<vmem>>, %arg21: memref<1x32xf32, #tpu.memory_space<vmem>>, %arg22: memref<1x32xf32, #tpu.memory_space<vmem>>, %arg23: memref<1x32xf32, #tpu.memory_space<vmem>>, %arg24: memref<32x96xf32, #tpu.memory_space<vmem>>, %arg25: memref<1x96xf32, #tpu.memory_space<vmem>>, %arg26: memref<32x32xf32, #tpu.memory_space<vmem>>, %arg27: memref<32x32xf32, #tpu.memory_space<vmem>>, %arg28: memref<32x32xf32, #tpu.memory_space<vmem>>, %arg29: memref<1x32xf32, #tpu.memory_space<vmem>>, %arg30: memref<1x32xf32, #tpu.memory_space<vmem>>, %arg31: memref<1x32xf32, #tpu.memory_space<vmem>>, %arg32: memref<32x128xf32, #tpu.memory_space<vmem>>, %arg33: memref<1x128xf32, #tpu.memory_space<vmem>>, %arg34: memref<128x32xf32, #tpu.memory_space<vmem>>, %arg35: memref<1x32xf32, #tpu.memory_space<vmem>>, %arg36: memref<32x16xf32, #tpu.memory_space<vmem>>, %arg37: memref<1x16xf32, #tpu.memory_space<vmem>>, %arg38: memref<1x16xf32, #tpu.memory_space<vmem>>, %arg39: memref<9x32x32xf32, #tpu.memory_space<vmem>>, %arg40: memref<9x16x16xf32, #tpu.memory_space<vmem>>, %arg41: memref<1x16xf32, #tpu.memory_space<vmem>>, %arg42: memref<1x16xf32, #tpu.memory_space<vmem>>, %arg43: memref<32x16xf32, #tpu.memory_space<vmem>>) attributes {dimension_semantics = [], scalar_prefetch = 0 : i64, scratch_operands = 0 : i64, tpu.core_type = #tpu.core_type<tc>} {
    %c0 = arith.constant 0 : index
    %c0_0 = arith.constant 0 : index
    %0 = vector.load %arg0[%c0, %c0_0] : memref<32x192xf32, #tpu.memory_space<vmem>>, vector<32x192xf32>
    %c0_1 = arith.constant 0 : index
    %c0_2 = arith.constant 0 : index
    %1 = vector.load %arg6[%c0_1, %c0_2] : memref<192x32xf32, #tpu.memory_space<vmem>>, vector<192x32xf32>
    %cst = arith.constant dense<0.000000e+00> : vector<32x32xf32>
    %2 = tpu.matmul %0, %1, %cst {dimension_numbers = #tpu.dot_dimension_numbers<[1], [0], [0], [1], [0, 0, 1, 1], [], []>} : vector<32x192xf32>, vector<192x32xf32>, vector<32x32xf32> -> vector<32x32xf32>
    %c0_3 = arith.constant 0 : index
    %c0_4 = arith.constant 0 : index
    %3 = vector.load %arg7[%c0_3, %c0_4] : memref<1x32xf32, #tpu.memory_space<vmem>>, vector<1x32xf32>
    %4 = vector.broadcast %3 : vector<1x32xf32> to vector<32x32xf32>
    %5 = arith.addf %2, %4 : vector<32x32xf32>
    %c0_5 = arith.constant 0 : index
    %c0_6 = arith.constant 0 : index
    %6 = vector.load %arg1[%c0_5, %c0_6] : memref<32x32xf32, #tpu.memory_space<vmem>>, vector<32x32xf32>
    %7 = arith.addf %5, %6 : vector<32x32xf32>
    %c0_7 = arith.constant 0 : index
    %c0_8 = arith.constant 0 : index
    %8 = vector.load %arg2[%c0_7, %c0_8] : memref<8x32xf32, #tpu.memory_space<vmem>>, vector<8x32xf32>
    %c0_9 = arith.constant 0 : index
    %c0_10 = arith.constant 0 : index
    %9 = vector.load %arg3[%c0_9, %c0_10] : memref<32x32xf32, #tpu.memory_space<vmem>>, vector<32x32xf32>
    %c0_11 = arith.constant 0 : index
    %c0_12 = arith.constant 0 : index
    %10 = vector.load %arg4[%c0_11, %c0_12] : memref<32x32xf32, #tpu.memory_space<vmem>>, vector<32x32xf32>
    %c0_13 = arith.constant 0 : index
    %c0_14 = arith.constant 0 : index
    %11 = vector.load %arg5[%c0_13, %c0_14] : memref<32x32xf32, #tpu.memory_space<vmem>>, vector<32x32xf32>
    %c0_15 = arith.constant 0 : index
    %c0_16 = arith.constant 0 : index
    %12 = vector.load %arg8[%c0_15, %c0_16] : memref<1x32xf32, #tpu.memory_space<vmem>>, vector<1x32xf32>
    %c0_17 = arith.constant 0 : index
    %c0_18 = arith.constant 0 : index
    %13 = vector.load %arg9[%c0_17, %c0_18] : memref<1x32xf32, #tpu.memory_space<vmem>>, vector<1x32xf32>
    %cst_19 = arith.constant dense<0.000000e+00> : vector<32xf32>
    %14 = vector.multi_reduction <add>, %7, %cst_19 [1] : vector<32x32xf32> to vector<32xf32>
    %15 = vector.shape_cast %14 : vector<32xf32> to vector<32x1xf32>
    %cst_20 = arith.constant 3.200000e+01 : f32
    %16 = vector.broadcast %cst_20 : f32 to vector<32x1xf32>
    %17 = arith.divf %15, %16 : vector<32x1xf32>
    %18 = vector.broadcast %17 : vector<32x1xf32> to vector<32x32xf32>
    %19 = arith.subf %7, %18 : vector<32x32xf32>
    %20 = arith.mulf %19, %19 : vector<32x32xf32>
    %cst_21 = arith.constant dense<0.000000e+00> : vector<32xf32>
    %21 = vector.multi_reduction <add>, %20, %cst_21 [1] : vector<32x32xf32> to vector<32xf32>
    %22 = vector.shape_cast %21 : vector<32xf32> to vector<32x1xf32>
    %cst_22 = arith.constant 3.200000e+01 : f32
    %23 = vector.broadcast %cst_22 : f32 to vector<32x1xf32>
    %24 = arith.divf %22, %23 : vector<32x1xf32>
    %25 = vector.broadcast %17 : vector<32x1xf32> to vector<32x32xf32>
    %26 = arith.subf %7, %25 : vector<32x32xf32>
    %cst_23 = arith.constant 9.99999997E-7 : f32
    %27 = vector.broadcast %cst_23 : f32 to vector<32x1xf32>
    %28 = arith.addf %24, %27 : vector<32x1xf32>
    %29 = math.rsqrt %28 : vector<32x1xf32>
    %30 = vector.broadcast %29 : vector<32x1xf32> to vector<32x32xf32>
    %31 = arith.mulf %26, %30 : vector<32x32xf32>
    %32 = vector.broadcast %12 : vector<1x32xf32> to vector<32x32xf32>
    %33 = arith.mulf %31, %32 : vector<32x32xf32>
    %34 = vector.broadcast %13 : vector<1x32xf32> to vector<32x32xf32>
    %35 = arith.addf %33, %34 : vector<32x32xf32>
    %c0_24 = arith.constant 0 : index
    %c0_25 = arith.constant 0 : index
    %36 = vector.load %arg10[%c0_24, %c0_25] : memref<32x96xf32, #tpu.memory_space<vmem>>, vector<32x96xf32>
    %cst_26 = arith.constant dense<0.000000e+00> : vector<32x96xf32>
    %37 = tpu.matmul %35, %36, %cst_26 {dimension_numbers = #tpu.dot_dimension_numbers<[1], [0], [0], [1], [0, 0, 1, 1], [], []>} : vector<32x32xf32>, vector<32x96xf32>, vector<32x96xf32> -> vector<32x96xf32>
    %c0_27 = arith.constant 0 : index
    %c0_28 = arith.constant 0 : index
    %38 = vector.load %arg11[%c0_27, %c0_28] : memref<1x96xf32, #tpu.memory_space<vmem>>, vector<1x96xf32>
    %39 = vector.broadcast %38 : vector<1x96xf32> to vector<32x96xf32>
    %40 = arith.addf %37, %39 : vector<32x96xf32>
    %c0_29 = arith.constant 0 : index
    %c0_30 = arith.constant 0 : index
    %41 = vector.load %arg12[%c0_29, %c0_30] : memref<32x32xf32, #tpu.memory_space<vmem>>, vector<32x32xf32>
    %c0_31 = arith.constant 0 : index
    %c0_32 = arith.constant 0 : index
    %42 = vector.load %arg13[%c0_31, %c0_32] : memref<32x32xf32, #tpu.memory_space<vmem>>, vector<32x32xf32>
    %cst_33 = arith.constant 0.000000e+00 : f32
    %43 = vector.broadcast %cst_33 : f32 to vector<32x32xf32>
    %44 = vector.extract_strided_slice %40 {offsets = [0, 0], sizes = [32, 8], strides = [1, 1]} : vector<32x96xf32> to vector<32x8xf32>
    %45 = vector.extract_strided_slice %40 {offsets = [0, 32], sizes = [32, 8], strides = [1, 1]} : vector<32x96xf32> to vector<32x8xf32>
    %46 = vector.extract_strided_slice %40 {offsets = [0, 64], sizes = [32, 8], strides = [1, 1]} : vector<32x96xf32> to vector<32x8xf32>
    %cst_34 = arith.constant dense<0.000000e+00> : vector<32x32xf32>
    %47 = tpu.matmul %44, %45, %cst_34 {dimension_numbers = #tpu.dot_dimension_numbers<[1], [1], [0], [0], [0, 0, 1, 0], [], []>} : vector<32x8xf32>, vector<32x8xf32>, vector<32x32xf32> -> vector<32x32xf32>
    %cst_35 = arith.constant 0.353553385 : f32
    %48 = vector.broadcast %cst_35 : f32 to vector<32x32xf32>
    %49 = arith.mulf %47, %48 : vector<32x32xf32>
    %cst_36 = arith.constant dense<0.000000e+00> : vector<32x32xf32>
    %50 = tpu.matmul %44, %8, %cst_36 {dimension_numbers = #tpu.dot_dimension_numbers<[1], [0], [0], [1], [0, 0, 1, 1], [], []>} : vector<32x8xf32>, vector<8x32xf32>, vector<32x32xf32> -> vector<32x32xf32>
    %51 = arith.mulf %50, %9 : vector<32x32xf32>
    %cst_37 = arith.constant dense<0.000000e+00> : vector<32x32xf32>
    %52 = tpu.matmul %51, %41, %cst_37 {dimension_numbers = #tpu.dot_dimension_numbers<[1], [0], [0], [1], [0, 0, 1, 1], [], []>} : vector<32x32xf32>, vector<32x32xf32>, vector<32x32xf32> -> vector<32x32xf32>
    %53 = arith.addf %49, %52 : vector<32x32xf32>
    %54 = arith.mulf %50, %10 : vector<32x32xf32>
    %cst_38 = arith.constant dense<0.000000e+00> : vector<32x32xf32>
    %55 = tpu.matmul %54, %42, %cst_38 {dimension_numbers = #tpu.dot_dimension_numbers<[1], [0], [0], [1], [0, 0, 1, 1], [], []>} : vector<32x32xf32>, vector<32x32xf32>, vector<32x32xf32> -> vector<32x32xf32>
    %56 = arith.addf %53, %55 : vector<32x32xf32>
    %57 = arith.addf %56, %11 : vector<32x32xf32>
    %cst_39 = arith.constant dense<0xFF800000> : vector<32xf32>
    %58 = vector.multi_reduction <maximumf>, %57, %cst_39 [1] : vector<32x32xf32> to vector<32xf32>
    %59 = vector.shape_cast %58 : vector<32xf32> to vector<32x1xf32>
    %60 = vector.broadcast %59 : vector<32x1xf32> to vector<32x32xf32>
    %61 = arith.subf %57, %60 : vector<32x32xf32>
    %62 = math.exp %61 : vector<32x32xf32>
    %cst_40 = arith.constant dense<0.000000e+00> : vector<32xf32>
    %63 = vector.multi_reduction <add>, %62, %cst_40 [1] : vector<32x32xf32> to vector<32xf32>
    %64 = vector.shape_cast %63 : vector<32xf32> to vector<32x1xf32>
    %cst_41 = arith.constant dense<0.000000e+00> : vector<32x8xf32>
    %65 = tpu.matmul %62, %46, %cst_41 {dimension_numbers = #tpu.dot_dimension_numbers<[1], [0], [0], [1], [0, 0, 1, 1], [], []>} : vector<32x32xf32>, vector<32x8xf32>, vector<32x8xf32> -> vector<32x8xf32>
    %66 = vector.broadcast %64 : vector<32x1xf32> to vector<32x8xf32>
    %67 = arith.divf %65, %66 : vector<32x8xf32>
    %c0_42 = arith.constant 0 : index
    %c0_43 = arith.constant 0 : index
    %68 = vector.load %arg14[%c0_42, %c0_43] : memref<32x32xf32, #tpu.memory_space<vmem>>, vector<8x32xf32>
    %cst_44 = arith.constant dense<0.000000e+00> : vector<32x32xf32>
    %69 = tpu.matmul %67, %68, %cst_44 {dimension_numbers = #tpu.dot_dimension_numbers<[1], [0], [0], [1], [0, 0, 1, 1], [], []>} : vector<32x8xf32>, vector<8x32xf32>, vector<32x32xf32> -> vector<32x32xf32>
    %70 = arith.addf %43, %69 : vector<32x32xf32>
    %71 = vector.extract_strided_slice %40 {offsets = [0, 8], sizes = [32, 8], strides = [1, 1]} : vector<32x96xf32> to vector<32x8xf32>
    %72 = vector.extract_strided_slice %40 {offsets = [0, 40], sizes = [32, 8], strides = [1, 1]} : vector<32x96xf32> to vector<32x8xf32>
    %73 = vector.extract_strided_slice %40 {offsets = [0, 72], sizes = [32, 8], strides = [1, 1]} : vector<32x96xf32> to vector<32x8xf32>
    %cst_45 = arith.constant dense<0.000000e+00> : vector<32x32xf32>
    %74 = tpu.matmul %71, %72, %cst_45 {dimension_numbers = #tpu.dot_dimension_numbers<[1], [1], [0], [0], [0, 0, 1, 0], [], []>} : vector<32x8xf32>, vector<32x8xf32>, vector<32x32xf32> -> vector<32x32xf32>
    %cst_46 = arith.constant 0.353553385 : f32
    %75 = vector.broadcast %cst_46 : f32 to vector<32x32xf32>
    %76 = arith.mulf %74, %75 : vector<32x32xf32>
    %cst_47 = arith.constant dense<0.000000e+00> : vector<32x32xf32>
    %77 = tpu.matmul %71, %8, %cst_47 {dimension_numbers = #tpu.dot_dimension_numbers<[1], [0], [0], [1], [0, 0, 1, 1], [], []>} : vector<32x8xf32>, vector<8x32xf32>, vector<32x32xf32> -> vector<32x32xf32>
    %78 = arith.mulf %77, %9 : vector<32x32xf32>
    %cst_48 = arith.constant dense<0.000000e+00> : vector<32x32xf32>
    %79 = tpu.matmul %78, %41, %cst_48 {dimension_numbers = #tpu.dot_dimension_numbers<[1], [0], [0], [1], [0, 0, 1, 1], [], []>} : vector<32x32xf32>, vector<32x32xf32>, vector<32x32xf32> -> vector<32x32xf32>
    %80 = arith.addf %76, %79 : vector<32x32xf32>
    %81 = arith.mulf %77, %10 : vector<32x32xf32>
    %cst_49 = arith.constant dense<0.000000e+00> : vector<32x32xf32>
    %82 = tpu.matmul %81, %42, %cst_49 {dimension_numbers = #tpu.dot_dimension_numbers<[1], [0], [0], [1], [0, 0, 1, 1], [], []>} : vector<32x32xf32>, vector<32x32xf32>, vector<32x32xf32> -> vector<32x32xf32>
    %83 = arith.addf %80, %82 : vector<32x32xf32>
    %84 = arith.addf %83, %11 : vector<32x32xf32>
    %cst_50 = arith.constant dense<0xFF800000> : vector<32xf32>
    %85 = vector.multi_reduction <maximumf>, %84, %cst_50 [1] : vector<32x32xf32> to vector<32xf32>
    %86 = vector.shape_cast %85 : vector<32xf32> to vector<32x1xf32>
    %87 = vector.broadcast %86 : vector<32x1xf32> to vector<32x32xf32>
    %88 = arith.subf %84, %87 : vector<32x32xf32>
    %89 = math.exp %88 : vector<32x32xf32>
    %cst_51 = arith.constant dense<0.000000e+00> : vector<32xf32>
    %90 = vector.multi_reduction <add>, %89, %cst_51 [1] : vector<32x32xf32> to vector<32xf32>
    %91 = vector.shape_cast %90 : vector<32xf32> to vector<32x1xf32>
    %cst_52 = arith.constant dense<0.000000e+00> : vector<32x8xf32>
    %92 = tpu.matmul %89, %73, %cst_52 {dimension_numbers = #tpu.dot_dimension_numbers<[1], [0], [0], [1], [0, 0, 1, 1], [], []>} : vector<32x32xf32>, vector<32x8xf32>, vector<32x8xf32> -> vector<32x8xf32>
    %93 = vector.broadcast %91 : vector<32x1xf32> to vector<32x8xf32>
    %94 = arith.divf %92, %93 : vector<32x8xf32>
    %c8 = arith.constant 8 : index
    %c0_53 = arith.constant 0 : index
    %95 = vector.load %arg14[%c8, %c0_53] : memref<32x32xf32, #tpu.memory_space<vmem>>, vector<8x32xf32>
    %cst_54 = arith.constant dense<0.000000e+00> : vector<32x32xf32>
    %96 = tpu.matmul %94, %95, %cst_54 {dimension_numbers = #tpu.dot_dimension_numbers<[1], [0], [0], [1], [0, 0, 1, 1], [], []>} : vector<32x8xf32>, vector<8x32xf32>, vector<32x32xf32> -> vector<32x32xf32>
    %97 = arith.addf %70, %96 : vector<32x32xf32>
    %98 = vector.extract_strided_slice %40 {offsets = [0, 16], sizes = [32, 8], strides = [1, 1]} : vector<32x96xf32> to vector<32x8xf32>
    %99 = vector.extract_strided_slice %40 {offsets = [0, 48], sizes = [32, 8], strides = [1, 1]} : vector<32x96xf32> to vector<32x8xf32>
    %100 = vector.extract_strided_slice %40 {offsets = [0, 80], sizes = [32, 8], strides = [1, 1]} : vector<32x96xf32> to vector<32x8xf32>
    %cst_55 = arith.constant dense<0.000000e+00> : vector<32x32xf32>
    %101 = tpu.matmul %98, %99, %cst_55 {dimension_numbers = #tpu.dot_dimension_numbers<[1], [1], [0], [0], [0, 0, 1, 0], [], []>} : vector<32x8xf32>, vector<32x8xf32>, vector<32x32xf32> -> vector<32x32xf32>
    %cst_56 = arith.constant 0.353553385 : f32
    %102 = vector.broadcast %cst_56 : f32 to vector<32x32xf32>
    %103 = arith.mulf %101, %102 : vector<32x32xf32>
    %cst_57 = arith.constant dense<0.000000e+00> : vector<32x32xf32>
    %104 = tpu.matmul %98, %8, %cst_57 {dimension_numbers = #tpu.dot_dimension_numbers<[1], [0], [0], [1], [0, 0, 1, 1], [], []>} : vector<32x8xf32>, vector<8x32xf32>, vector<32x32xf32> -> vector<32x32xf32>
    %105 = arith.mulf %104, %9 : vector<32x32xf32>
    %cst_58 = arith.constant dense<0.000000e+00> : vector<32x32xf32>
    %106 = tpu.matmul %105, %41, %cst_58 {dimension_numbers = #tpu.dot_dimension_numbers<[1], [0], [0], [1], [0, 0, 1, 1], [], []>} : vector<32x32xf32>, vector<32x32xf32>, vector<32x32xf32> -> vector<32x32xf32>
    %107 = arith.addf %103, %106 : vector<32x32xf32>
    %108 = arith.mulf %104, %10 : vector<32x32xf32>
    %cst_59 = arith.constant dense<0.000000e+00> : vector<32x32xf32>
    %109 = tpu.matmul %108, %42, %cst_59 {dimension_numbers = #tpu.dot_dimension_numbers<[1], [0], [0], [1], [0, 0, 1, 1], [], []>} : vector<32x32xf32>, vector<32x32xf32>, vector<32x32xf32> -> vector<32x32xf32>
    %110 = arith.addf %107, %109 : vector<32x32xf32>
    %111 = arith.addf %110, %11 : vector<32x32xf32>
    %cst_60 = arith.constant dense<0xFF800000> : vector<32xf32>
    %112 = vector.multi_reduction <maximumf>, %111, %cst_60 [1] : vector<32x32xf32> to vector<32xf32>
    %113 = vector.shape_cast %112 : vector<32xf32> to vector<32x1xf32>
    %114 = vector.broadcast %113 : vector<32x1xf32> to vector<32x32xf32>
    %115 = arith.subf %111, %114 : vector<32x32xf32>
    %116 = math.exp %115 : vector<32x32xf32>
    %cst_61 = arith.constant dense<0.000000e+00> : vector<32xf32>
    %117 = vector.multi_reduction <add>, %116, %cst_61 [1] : vector<32x32xf32> to vector<32xf32>
    %118 = vector.shape_cast %117 : vector<32xf32> to vector<32x1xf32>
    %cst_62 = arith.constant dense<0.000000e+00> : vector<32x8xf32>
    %119 = tpu.matmul %116, %100, %cst_62 {dimension_numbers = #tpu.dot_dimension_numbers<[1], [0], [0], [1], [0, 0, 1, 1], [], []>} : vector<32x32xf32>, vector<32x8xf32>, vector<32x8xf32> -> vector<32x8xf32>
    %120 = vector.broadcast %118 : vector<32x1xf32> to vector<32x8xf32>
    %121 = arith.divf %119, %120 : vector<32x8xf32>
    %c16 = arith.constant 16 : index
    %c0_63 = arith.constant 0 : index
    %122 = vector.load %arg14[%c16, %c0_63] : memref<32x32xf32, #tpu.memory_space<vmem>>, vector<8x32xf32>
    %cst_64 = arith.constant dense<0.000000e+00> : vector<32x32xf32>
    %123 = tpu.matmul %121, %122, %cst_64 {dimension_numbers = #tpu.dot_dimension_numbers<[1], [0], [0], [1], [0, 0, 1, 1], [], []>} : vector<32x8xf32>, vector<8x32xf32>, vector<32x32xf32> -> vector<32x32xf32>
    %124 = arith.addf %97, %123 : vector<32x32xf32>
    %125 = vector.extract_strided_slice %40 {offsets = [0, 24], sizes = [32, 8], strides = [1, 1]} : vector<32x96xf32> to vector<32x8xf32>
    %126 = vector.extract_strided_slice %40 {offsets = [0, 56], sizes = [32, 8], strides = [1, 1]} : vector<32x96xf32> to vector<32x8xf32>
    %127 = vector.extract_strided_slice %40 {offsets = [0, 88], sizes = [32, 8], strides = [1, 1]} : vector<32x96xf32> to vector<32x8xf32>
    %cst_65 = arith.constant dense<0.000000e+00> : vector<32x32xf32>
    %128 = tpu.matmul %125, %126, %cst_65 {dimension_numbers = #tpu.dot_dimension_numbers<[1], [1], [0], [0], [0, 0, 1, 0], [], []>} : vector<32x8xf32>, vector<32x8xf32>, vector<32x32xf32> -> vector<32x32xf32>
    %cst_66 = arith.constant 0.353553385 : f32
    %129 = vector.broadcast %cst_66 : f32 to vector<32x32xf32>
    %130 = arith.mulf %128, %129 : vector<32x32xf32>
    %cst_67 = arith.constant dense<0.000000e+00> : vector<32x32xf32>
    %131 = tpu.matmul %125, %8, %cst_67 {dimension_numbers = #tpu.dot_dimension_numbers<[1], [0], [0], [1], [0, 0, 1, 1], [], []>} : vector<32x8xf32>, vector<8x32xf32>, vector<32x32xf32> -> vector<32x32xf32>
    %132 = arith.mulf %131, %9 : vector<32x32xf32>
    %cst_68 = arith.constant dense<0.000000e+00> : vector<32x32xf32>
    %133 = tpu.matmul %132, %41, %cst_68 {dimension_numbers = #tpu.dot_dimension_numbers<[1], [0], [0], [1], [0, 0, 1, 1], [], []>} : vector<32x32xf32>, vector<32x32xf32>, vector<32x32xf32> -> vector<32x32xf32>
    %134 = arith.addf %130, %133 : vector<32x32xf32>
    %135 = arith.mulf %131, %10 : vector<32x32xf32>
    %cst_69 = arith.constant dense<0.000000e+00> : vector<32x32xf32>
    %136 = tpu.matmul %135, %42, %cst_69 {dimension_numbers = #tpu.dot_dimension_numbers<[1], [0], [0], [1], [0, 0, 1, 1], [], []>} : vector<32x32xf32>, vector<32x32xf32>, vector<32x32xf32> -> vector<32x32xf32>
    %137 = arith.addf %134, %136 : vector<32x32xf32>
    %138 = arith.addf %137, %11 : vector<32x32xf32>
    %cst_70 = arith.constant dense<0xFF800000> : vector<32xf32>
    %139 = vector.multi_reduction <maximumf>, %138, %cst_70 [1] : vector<32x32xf32> to vector<32xf32>
    %140 = vector.shape_cast %139 : vector<32xf32> to vector<32x1xf32>
    %141 = vector.broadcast %140 : vector<32x1xf32> to vector<32x32xf32>
    %142 = arith.subf %138, %141 : vector<32x32xf32>
    %143 = math.exp %142 : vector<32x32xf32>
    %cst_71 = arith.constant dense<0.000000e+00> : vector<32xf32>
    %144 = vector.multi_reduction <add>, %143, %cst_71 [1] : vector<32x32xf32> to vector<32xf32>
    %145 = vector.shape_cast %144 : vector<32xf32> to vector<32x1xf32>
    %cst_72 = arith.constant dense<0.000000e+00> : vector<32x8xf32>
    %146 = tpu.matmul %143, %127, %cst_72 {dimension_numbers = #tpu.dot_dimension_numbers<[1], [0], [0], [1], [0, 0, 1, 1], [], []>} : vector<32x32xf32>, vector<32x8xf32>, vector<32x8xf32> -> vector<32x8xf32>
    %147 = vector.broadcast %145 : vector<32x1xf32> to vector<32x8xf32>
    %148 = arith.divf %146, %147 : vector<32x8xf32>
    %c24 = arith.constant 24 : index
    %c0_73 = arith.constant 0 : index
    %149 = vector.load %arg14[%c24, %c0_73] : memref<32x32xf32, #tpu.memory_space<vmem>>, vector<8x32xf32>
    %cst_74 = arith.constant dense<0.000000e+00> : vector<32x32xf32>
    %150 = tpu.matmul %148, %149, %cst_74 {dimension_numbers = #tpu.dot_dimension_numbers<[1], [0], [0], [1], [0, 0, 1, 1], [], []>} : vector<32x8xf32>, vector<8x32xf32>, vector<32x32xf32> -> vector<32x32xf32>
    %151 = arith.addf %124, %150 : vector<32x32xf32>
    %152 = arith.addf %7, %151 : vector<32x32xf32>
    %c0_75 = arith.constant 0 : index
    %c0_76 = arith.constant 0 : index
    %153 = vector.load %arg15[%c0_75, %c0_76] : memref<1x32xf32, #tpu.memory_space<vmem>>, vector<1x32xf32>
    %154 = vector.broadcast %153 : vector<1x32xf32> to vector<32x32xf32>
    %155 = arith.addf %152, %154 : vector<32x32xf32>
    %c0_77 = arith.constant 0 : index
    %c0_78 = arith.constant 0 : index
    %156 = vector.load %arg16[%c0_77, %c0_78] : memref<1x32xf32, #tpu.memory_space<vmem>>, vector<1x32xf32>
    %c0_79 = arith.constant 0 : index
    %c0_80 = arith.constant 0 : index
    %157 = vector.load %arg17[%c0_79, %c0_80] : memref<1x32xf32, #tpu.memory_space<vmem>>, vector<1x32xf32>
    %cst_81 = arith.constant dense<0.000000e+00> : vector<32xf32>
    %158 = vector.multi_reduction <add>, %155, %cst_81 [1] : vector<32x32xf32> to vector<32xf32>
    %159 = vector.shape_cast %158 : vector<32xf32> to vector<32x1xf32>
    %cst_82 = arith.constant 3.200000e+01 : f32
    %160 = vector.broadcast %cst_82 : f32 to vector<32x1xf32>
    %161 = arith.divf %159, %160 : vector<32x1xf32>
    %162 = vector.broadcast %161 : vector<32x1xf32> to vector<32x32xf32>
    %163 = arith.subf %155, %162 : vector<32x32xf32>
    %164 = arith.mulf %163, %163 : vector<32x32xf32>
    %cst_83 = arith.constant dense<0.000000e+00> : vector<32xf32>
    %165 = vector.multi_reduction <add>, %164, %cst_83 [1] : vector<32x32xf32> to vector<32xf32>
    %166 = vector.shape_cast %165 : vector<32xf32> to vector<32x1xf32>
    %cst_84 = arith.constant 3.200000e+01 : f32
    %167 = vector.broadcast %cst_84 : f32 to vector<32x1xf32>
    %168 = arith.divf %166, %167 : vector<32x1xf32>
    %169 = vector.broadcast %161 : vector<32x1xf32> to vector<32x32xf32>
    %170 = arith.subf %155, %169 : vector<32x32xf32>
    %cst_85 = arith.constant 9.99999997E-7 : f32
    %171 = vector.broadcast %cst_85 : f32 to vector<32x1xf32>
    %172 = arith.addf %168, %171 : vector<32x1xf32>
    %173 = math.rsqrt %172 : vector<32x1xf32>
    %174 = vector.broadcast %173 : vector<32x1xf32> to vector<32x32xf32>
    %175 = arith.mulf %170, %174 : vector<32x32xf32>
    %176 = vector.broadcast %156 : vector<1x32xf32> to vector<32x32xf32>
    %177 = arith.mulf %175, %176 : vector<32x32xf32>
    %178 = vector.broadcast %157 : vector<1x32xf32> to vector<32x32xf32>
    %179 = arith.addf %177, %178 : vector<32x32xf32>
    %c0_86 = arith.constant 0 : index
    %c0_87 = arith.constant 0 : index
    %180 = vector.load %arg18[%c0_86, %c0_87] : memref<32x128xf32, #tpu.memory_space<vmem>>, vector<32x128xf32>
    %cst_88 = arith.constant dense<0.000000e+00> : vector<32x128xf32>
    %181 = tpu.matmul %179, %180, %cst_88 {dimension_numbers = #tpu.dot_dimension_numbers<[1], [0], [0], [1], [0, 0, 1, 1], [], []>} : vector<32x32xf32>, vector<32x128xf32>, vector<32x128xf32> -> vector<32x128xf32>
    %c0_89 = arith.constant 0 : index
    %c0_90 = arith.constant 0 : index
    %182 = vector.load %arg19[%c0_89, %c0_90] : memref<1x128xf32, #tpu.memory_space<vmem>>, vector<1x128xf32>
    %183 = vector.broadcast %182 : vector<1x128xf32> to vector<32x128xf32>
    %184 = arith.addf %181, %183 : vector<32x128xf32>
    %cst_91 = arith.constant 5.000000e-01 : f32
    %185 = vector.broadcast %cst_91 : f32 to vector<32x128xf32>
    %186 = arith.mulf %185, %184 : vector<32x128xf32>
    %cst_92 = arith.constant 0.707106769 : f32
    %187 = vector.broadcast %cst_92 : f32 to vector<32x128xf32>
    %188 = arith.mulf %184, %187 : vector<32x128xf32>
    %cst_93 = arith.constant 0.000000e+00 : f32
    %189 = vector.broadcast %cst_93 : f32 to vector<32x128xf32>
    %190 = arith.cmpf oge, %188, %189 : vector<32x128xf32>
    %cst_94 = arith.constant 1.000000e+00 : f32
    %cst_95 = arith.constant -1.000000e+00 : f32
    %191 = vector.broadcast %cst_94 : f32 to vector<32x128xf32>
    %192 = vector.broadcast %cst_95 : f32 to vector<32x128xf32>
    %193 = arith.select %190, %191, %192 : vector<32x128xi1>, vector<32x128xf32>
    %194 = math.absf %188 : vector<32x128xf32>
    %cst_96 = arith.constant 0.327591091 : f32
    %195 = vector.broadcast %cst_96 : f32 to vector<32x128xf32>
    %196 = arith.mulf %195, %194 : vector<32x128xf32>
    %cst_97 = arith.constant 1.000000e+00 : f32
    %197 = vector.broadcast %cst_97 : f32 to vector<32x128xf32>
    %198 = arith.addf %197, %196 : vector<32x128xf32>
    %cst_98 = arith.constant 1.000000e+00 : f32
    %199 = vector.broadcast %cst_98 : f32 to vector<32x128xf32>
    %200 = arith.divf %199, %198 : vector<32x128xf32>
    %cst_99 = arith.constant 1.06140542 : f32
    %201 = vector.broadcast %cst_99 : f32 to vector<32x128xf32>
    %202 = arith.mulf %201, %200 : vector<32x128xf32>
    %cst_100 = arith.constant -1.45315206 : f32
    %203 = vector.broadcast %cst_100 : f32 to vector<32x128xf32>
    %204 = arith.addf %202, %203 : vector<32x128xf32>
    %205 = arith.mulf %204, %200 : vector<32x128xf32>
    %cst_101 = arith.constant 1.42141378 : f32
    %206 = vector.broadcast %cst_101 : f32 to vector<32x128xf32>
    %207 = arith.addf %205, %206 : vector<32x128xf32>
    %208 = arith.mulf %207, %200 : vector<32x128xf32>
    %cst_102 = arith.constant -0.284496725 : f32
    %209 = vector.broadcast %cst_102 : f32 to vector<32x128xf32>
    %210 = arith.addf %208, %209 : vector<32x128xf32>
    %211 = arith.mulf %210, %200 : vector<32x128xf32>
    %cst_103 = arith.constant 0.254829586 : f32
    %212 = vector.broadcast %cst_103 : f32 to vector<32x128xf32>
    %213 = arith.addf %211, %212 : vector<32x128xf32>
    %214 = arith.mulf %213, %200 : vector<32x128xf32>
    %cst_104 = arith.constant 0.000000e+00 : f32
    %215 = vector.broadcast %cst_104 : f32 to vector<32x128xf32>
    %216 = arith.subf %215, %194 : vector<32x128xf32>
    %217 = arith.mulf %216, %194 : vector<32x128xf32>
    %218 = math.exp %217 : vector<32x128xf32>
    %219 = arith.mulf %214, %218 : vector<32x128xf32>
    %cst_105 = arith.constant 1.000000e+00 : f32
    %220 = vector.broadcast %cst_105 : f32 to vector<32x128xf32>
    %221 = arith.subf %220, %219 : vector<32x128xf32>
    %222 = arith.mulf %193, %221 : vector<32x128xf32>
    %cst_106 = arith.constant 1.000000e+00 : f32
    %223 = vector.broadcast %cst_106 : f32 to vector<32x128xf32>
    %224 = arith.addf %223, %222 : vector<32x128xf32>
    %225 = arith.mulf %186, %224 : vector<32x128xf32>
    %c0_107 = arith.constant 0 : index
    %c0_108 = arith.constant 0 : index
    %226 = vector.load %arg20[%c0_107, %c0_108] : memref<128x32xf32, #tpu.memory_space<vmem>>, vector<128x32xf32>
    %cst_109 = arith.constant dense<0.000000e+00> : vector<32x32xf32>
    %227 = tpu.matmul %225, %226, %cst_109 {dimension_numbers = #tpu.dot_dimension_numbers<[1], [0], [0], [1], [0, 0, 1, 1], [], []>} : vector<32x128xf32>, vector<128x32xf32>, vector<32x32xf32> -> vector<32x32xf32>
    %228 = arith.addf %155, %227 : vector<32x32xf32>
    %c0_110 = arith.constant 0 : index
    %c0_111 = arith.constant 0 : index
    %229 = vector.load %arg21[%c0_110, %c0_111] : memref<1x32xf32, #tpu.memory_space<vmem>>, vector<1x32xf32>
    %230 = vector.broadcast %229 : vector<1x32xf32> to vector<32x32xf32>
    %231 = arith.addf %228, %230 : vector<32x32xf32>
    %c0_112 = arith.constant 0 : index
    %c0_113 = arith.constant 0 : index
    %232 = vector.load %arg22[%c0_112, %c0_113] : memref<1x32xf32, #tpu.memory_space<vmem>>, vector<1x32xf32>
    %c0_114 = arith.constant 0 : index
    %c0_115 = arith.constant 0 : index
    %233 = vector.load %arg23[%c0_114, %c0_115] : memref<1x32xf32, #tpu.memory_space<vmem>>, vector<1x32xf32>
    %cst_116 = arith.constant dense<0.000000e+00> : vector<32xf32>
    %234 = vector.multi_reduction <add>, %231, %cst_116 [1] : vector<32x32xf32> to vector<32xf32>
    %235 = vector.shape_cast %234 : vector<32xf32> to vector<32x1xf32>
    %cst_117 = arith.constant 3.200000e+01 : f32
    %236 = vector.broadcast %cst_117 : f32 to vector<32x1xf32>
    %237 = arith.divf %235, %236 : vector<32x1xf32>
    %238 = vector.broadcast %237 : vector<32x1xf32> to vector<32x32xf32>
    %239 = arith.subf %231, %238 : vector<32x32xf32>
    %240 = arith.mulf %239, %239 : vector<32x32xf32>
    %cst_118 = arith.constant dense<0.000000e+00> : vector<32xf32>
    %241 = vector.multi_reduction <add>, %240, %cst_118 [1] : vector<32x32xf32> to vector<32xf32>
    %242 = vector.shape_cast %241 : vector<32xf32> to vector<32x1xf32>
    %cst_119 = arith.constant 3.200000e+01 : f32
    %243 = vector.broadcast %cst_119 : f32 to vector<32x1xf32>
    %244 = arith.divf %242, %243 : vector<32x1xf32>
    %245 = vector.broadcast %237 : vector<32x1xf32> to vector<32x32xf32>
    %246 = arith.subf %231, %245 : vector<32x32xf32>
    %cst_120 = arith.constant 9.99999997E-7 : f32
    %247 = vector.broadcast %cst_120 : f32 to vector<32x1xf32>
    %248 = arith.addf %244, %247 : vector<32x1xf32>
    %249 = math.rsqrt %248 : vector<32x1xf32>
    %250 = vector.broadcast %249 : vector<32x1xf32> to vector<32x32xf32>
    %251 = arith.mulf %246, %250 : vector<32x32xf32>
    %252 = vector.broadcast %232 : vector<1x32xf32> to vector<32x32xf32>
    %253 = arith.mulf %251, %252 : vector<32x32xf32>
    %254 = vector.broadcast %233 : vector<1x32xf32> to vector<32x32xf32>
    %255 = arith.addf %253, %254 : vector<32x32xf32>
    %c0_121 = arith.constant 0 : index
    %c0_122 = arith.constant 0 : index
    %256 = vector.load %arg24[%c0_121, %c0_122] : memref<32x96xf32, #tpu.memory_space<vmem>>, vector<32x96xf32>
    %cst_123 = arith.constant dense<0.000000e+00> : vector<32x96xf32>
    %257 = tpu.matmul %255, %256, %cst_123 {dimension_numbers = #tpu.dot_dimension_numbers<[1], [0], [0], [1], [0, 0, 1, 1], [], []>} : vector<32x32xf32>, vector<32x96xf32>, vector<32x96xf32> -> vector<32x96xf32>
    %c0_124 = arith.constant 0 : index
    %c0_125 = arith.constant 0 : index
    %258 = vector.load %arg25[%c0_124, %c0_125] : memref<1x96xf32, #tpu.memory_space<vmem>>, vector<1x96xf32>
    %259 = vector.broadcast %258 : vector<1x96xf32> to vector<32x96xf32>
    %260 = arith.addf %257, %259 : vector<32x96xf32>
    %c0_126 = arith.constant 0 : index
    %c0_127 = arith.constant 0 : index
    %261 = vector.load %arg26[%c0_126, %c0_127] : memref<32x32xf32, #tpu.memory_space<vmem>>, vector<32x32xf32>
    %c0_128 = arith.constant 0 : index
    %c0_129 = arith.constant 0 : index
    %262 = vector.load %arg27[%c0_128, %c0_129] : memref<32x32xf32, #tpu.memory_space<vmem>>, vector<32x32xf32>
    %cst_130 = arith.constant 0.000000e+00 : f32
    %263 = vector.broadcast %cst_130 : f32 to vector<32x32xf32>
    %264 = vector.extract_strided_slice %260 {offsets = [0, 0], sizes = [32, 8], strides = [1, 1]} : vector<32x96xf32> to vector<32x8xf32>
    %265 = vector.extract_strided_slice %260 {offsets = [0, 32], sizes = [32, 8], strides = [1, 1]} : vector<32x96xf32> to vector<32x8xf32>
    %266 = vector.extract_strided_slice %260 {offsets = [0, 64], sizes = [32, 8], strides = [1, 1]} : vector<32x96xf32> to vector<32x8xf32>
    %cst_131 = arith.constant dense<0.000000e+00> : vector<32x32xf32>
    %267 = tpu.matmul %264, %265, %cst_131 {dimension_numbers = #tpu.dot_dimension_numbers<[1], [1], [0], [0], [0, 0, 1, 0], [], []>} : vector<32x8xf32>, vector<32x8xf32>, vector<32x32xf32> -> vector<32x32xf32>
    %cst_132 = arith.constant 0.353553385 : f32
    %268 = vector.broadcast %cst_132 : f32 to vector<32x32xf32>
    %269 = arith.mulf %267, %268 : vector<32x32xf32>
    %cst_133 = arith.constant dense<0.000000e+00> : vector<32x32xf32>
    %270 = tpu.matmul %264, %8, %cst_133 {dimension_numbers = #tpu.dot_dimension_numbers<[1], [0], [0], [1], [0, 0, 1, 1], [], []>} : vector<32x8xf32>, vector<8x32xf32>, vector<32x32xf32> -> vector<32x32xf32>
    %271 = arith.mulf %270, %9 : vector<32x32xf32>
    %cst_134 = arith.constant dense<0.000000e+00> : vector<32x32xf32>
    %272 = tpu.matmul %271, %261, %cst_134 {dimension_numbers = #tpu.dot_dimension_numbers<[1], [0], [0], [1], [0, 0, 1, 1], [], []>} : vector<32x32xf32>, vector<32x32xf32>, vector<32x32xf32> -> vector<32x32xf32>
    %273 = arith.addf %269, %272 : vector<32x32xf32>
    %274 = arith.mulf %270, %10 : vector<32x32xf32>
    %cst_135 = arith.constant dense<0.000000e+00> : vector<32x32xf32>
    %275 = tpu.matmul %274, %262, %cst_135 {dimension_numbers = #tpu.dot_dimension_numbers<[1], [0], [0], [1], [0, 0, 1, 1], [], []>} : vector<32x32xf32>, vector<32x32xf32>, vector<32x32xf32> -> vector<32x32xf32>
    %276 = arith.addf %273, %275 : vector<32x32xf32>
    %277 = arith.addf %276, %11 : vector<32x32xf32>
    %cst_136 = arith.constant dense<0xFF800000> : vector<32xf32>
    %278 = vector.multi_reduction <maximumf>, %277, %cst_136 [1] : vector<32x32xf32> to vector<32xf32>
    %279 = vector.shape_cast %278 : vector<32xf32> to vector<32x1xf32>
    %280 = vector.broadcast %279 : vector<32x1xf32> to vector<32x32xf32>
    %281 = arith.subf %277, %280 : vector<32x32xf32>
    %282 = math.exp %281 : vector<32x32xf32>
    %cst_137 = arith.constant dense<0.000000e+00> : vector<32xf32>
    %283 = vector.multi_reduction <add>, %282, %cst_137 [1] : vector<32x32xf32> to vector<32xf32>
    %284 = vector.shape_cast %283 : vector<32xf32> to vector<32x1xf32>
    %cst_138 = arith.constant dense<0.000000e+00> : vector<32x8xf32>
    %285 = tpu.matmul %282, %266, %cst_138 {dimension_numbers = #tpu.dot_dimension_numbers<[1], [0], [0], [1], [0, 0, 1, 1], [], []>} : vector<32x32xf32>, vector<32x8xf32>, vector<32x8xf32> -> vector<32x8xf32>
    %286 = vector.broadcast %284 : vector<32x1xf32> to vector<32x8xf32>
    %287 = arith.divf %285, %286 : vector<32x8xf32>
    %c0_139 = arith.constant 0 : index
    %c0_140 = arith.constant 0 : index
    %288 = vector.load %arg28[%c0_139, %c0_140] : memref<32x32xf32, #tpu.memory_space<vmem>>, vector<8x32xf32>
    %cst_141 = arith.constant dense<0.000000e+00> : vector<32x32xf32>
    %289 = tpu.matmul %287, %288, %cst_141 {dimension_numbers = #tpu.dot_dimension_numbers<[1], [0], [0], [1], [0, 0, 1, 1], [], []>} : vector<32x8xf32>, vector<8x32xf32>, vector<32x32xf32> -> vector<32x32xf32>
    %290 = arith.addf %263, %289 : vector<32x32xf32>
    %291 = vector.extract_strided_slice %260 {offsets = [0, 8], sizes = [32, 8], strides = [1, 1]} : vector<32x96xf32> to vector<32x8xf32>
    %292 = vector.extract_strided_slice %260 {offsets = [0, 40], sizes = [32, 8], strides = [1, 1]} : vector<32x96xf32> to vector<32x8xf32>
    %293 = vector.extract_strided_slice %260 {offsets = [0, 72], sizes = [32, 8], strides = [1, 1]} : vector<32x96xf32> to vector<32x8xf32>
    %cst_142 = arith.constant dense<0.000000e+00> : vector<32x32xf32>
    %294 = tpu.matmul %291, %292, %cst_142 {dimension_numbers = #tpu.dot_dimension_numbers<[1], [1], [0], [0], [0, 0, 1, 0], [], []>} : vector<32x8xf32>, vector<32x8xf32>, vector<32x32xf32> -> vector<32x32xf32>
    %cst_143 = arith.constant 0.353553385 : f32
    %295 = vector.broadcast %cst_143 : f32 to vector<32x32xf32>
    %296 = arith.mulf %294, %295 : vector<32x32xf32>
    %cst_144 = arith.constant dense<0.000000e+00> : vector<32x32xf32>
    %297 = tpu.matmul %291, %8, %cst_144 {dimension_numbers = #tpu.dot_dimension_numbers<[1], [0], [0], [1], [0, 0, 1, 1], [], []>} : vector<32x8xf32>, vector<8x32xf32>, vector<32x32xf32> -> vector<32x32xf32>
    %298 = arith.mulf %297, %9 : vector<32x32xf32>
    %cst_145 = arith.constant dense<0.000000e+00> : vector<32x32xf32>
    %299 = tpu.matmul %298, %261, %cst_145 {dimension_numbers = #tpu.dot_dimension_numbers<[1], [0], [0], [1], [0, 0, 1, 1], [], []>} : vector<32x32xf32>, vector<32x32xf32>, vector<32x32xf32> -> vector<32x32xf32>
    %300 = arith.addf %296, %299 : vector<32x32xf32>
    %301 = arith.mulf %297, %10 : vector<32x32xf32>
    %cst_146 = arith.constant dense<0.000000e+00> : vector<32x32xf32>
    %302 = tpu.matmul %301, %262, %cst_146 {dimension_numbers = #tpu.dot_dimension_numbers<[1], [0], [0], [1], [0, 0, 1, 1], [], []>} : vector<32x32xf32>, vector<32x32xf32>, vector<32x32xf32> -> vector<32x32xf32>
    %303 = arith.addf %300, %302 : vector<32x32xf32>
    %304 = arith.addf %303, %11 : vector<32x32xf32>
    %cst_147 = arith.constant dense<0xFF800000> : vector<32xf32>
    %305 = vector.multi_reduction <maximumf>, %304, %cst_147 [1] : vector<32x32xf32> to vector<32xf32>
    %306 = vector.shape_cast %305 : vector<32xf32> to vector<32x1xf32>
    %307 = vector.broadcast %306 : vector<32x1xf32> to vector<32x32xf32>
    %308 = arith.subf %304, %307 : vector<32x32xf32>
    %309 = math.exp %308 : vector<32x32xf32>
    %cst_148 = arith.constant dense<0.000000e+00> : vector<32xf32>
    %310 = vector.multi_reduction <add>, %309, %cst_148 [1] : vector<32x32xf32> to vector<32xf32>
    %311 = vector.shape_cast %310 : vector<32xf32> to vector<32x1xf32>
    %cst_149 = arith.constant dense<0.000000e+00> : vector<32x8xf32>
    %312 = tpu.matmul %309, %293, %cst_149 {dimension_numbers = #tpu.dot_dimension_numbers<[1], [0], [0], [1], [0, 0, 1, 1], [], []>} : vector<32x32xf32>, vector<32x8xf32>, vector<32x8xf32> -> vector<32x8xf32>
    %313 = vector.broadcast %311 : vector<32x1xf32> to vector<32x8xf32>
    %314 = arith.divf %312, %313 : vector<32x8xf32>
    %c8_150 = arith.constant 8 : index
    %c0_151 = arith.constant 0 : index
    %315 = vector.load %arg28[%c8_150, %c0_151] : memref<32x32xf32, #tpu.memory_space<vmem>>, vector<8x32xf32>
    %cst_152 = arith.constant dense<0.000000e+00> : vector<32x32xf32>
    %316 = tpu.matmul %314, %315, %cst_152 {dimension_numbers = #tpu.dot_dimension_numbers<[1], [0], [0], [1], [0, 0, 1, 1], [], []>} : vector<32x8xf32>, vector<8x32xf32>, vector<32x32xf32> -> vector<32x32xf32>
    %317 = arith.addf %290, %316 : vector<32x32xf32>
    %318 = vector.extract_strided_slice %260 {offsets = [0, 16], sizes = [32, 8], strides = [1, 1]} : vector<32x96xf32> to vector<32x8xf32>
    %319 = vector.extract_strided_slice %260 {offsets = [0, 48], sizes = [32, 8], strides = [1, 1]} : vector<32x96xf32> to vector<32x8xf32>
    %320 = vector.extract_strided_slice %260 {offsets = [0, 80], sizes = [32, 8], strides = [1, 1]} : vector<32x96xf32> to vector<32x8xf32>
    %cst_153 = arith.constant dense<0.000000e+00> : vector<32x32xf32>
    %321 = tpu.matmul %318, %319, %cst_153 {dimension_numbers = #tpu.dot_dimension_numbers<[1], [1], [0], [0], [0, 0, 1, 0], [], []>} : vector<32x8xf32>, vector<32x8xf32>, vector<32x32xf32> -> vector<32x32xf32>
    %cst_154 = arith.constant 0.353553385 : f32
    %322 = vector.broadcast %cst_154 : f32 to vector<32x32xf32>
    %323 = arith.mulf %321, %322 : vector<32x32xf32>
    %cst_155 = arith.constant dense<0.000000e+00> : vector<32x32xf32>
    %324 = tpu.matmul %318, %8, %cst_155 {dimension_numbers = #tpu.dot_dimension_numbers<[1], [0], [0], [1], [0, 0, 1, 1], [], []>} : vector<32x8xf32>, vector<8x32xf32>, vector<32x32xf32> -> vector<32x32xf32>
    %325 = arith.mulf %324, %9 : vector<32x32xf32>
    %cst_156 = arith.constant dense<0.000000e+00> : vector<32x32xf32>
    %326 = tpu.matmul %325, %261, %cst_156 {dimension_numbers = #tpu.dot_dimension_numbers<[1], [0], [0], [1], [0, 0, 1, 1], [], []>} : vector<32x32xf32>, vector<32x32xf32>, vector<32x32xf32> -> vector<32x32xf32>
    %327 = arith.addf %323, %326 : vector<32x32xf32>
    %328 = arith.mulf %324, %10 : vector<32x32xf32>
    %cst_157 = arith.constant dense<0.000000e+00> : vector<32x32xf32>
    %329 = tpu.matmul %328, %262, %cst_157 {dimension_numbers = #tpu.dot_dimension_numbers<[1], [0], [0], [1], [0, 0, 1, 1], [], []>} : vector<32x32xf32>, vector<32x32xf32>, vector<32x32xf32> -> vector<32x32xf32>
    %330 = arith.addf %327, %329 : vector<32x32xf32>
    %331 = arith.addf %330, %11 : vector<32x32xf32>
    %cst_158 = arith.constant dense<0xFF800000> : vector<32xf32>
    %332 = vector.multi_reduction <maximumf>, %331, %cst_158 [1] : vector<32x32xf32> to vector<32xf32>
    %333 = vector.shape_cast %332 : vector<32xf32> to vector<32x1xf32>
    %334 = vector.broadcast %333 : vector<32x1xf32> to vector<32x32xf32>
    %335 = arith.subf %331, %334 : vector<32x32xf32>
    %336 = math.exp %335 : vector<32x32xf32>
    %cst_159 = arith.constant dense<0.000000e+00> : vector<32xf32>
    %337 = vector.multi_reduction <add>, %336, %cst_159 [1] : vector<32x32xf32> to vector<32xf32>
    %338 = vector.shape_cast %337 : vector<32xf32> to vector<32x1xf32>
    %cst_160 = arith.constant dense<0.000000e+00> : vector<32x8xf32>
    %339 = tpu.matmul %336, %320, %cst_160 {dimension_numbers = #tpu.dot_dimension_numbers<[1], [0], [0], [1], [0, 0, 1, 1], [], []>} : vector<32x32xf32>, vector<32x8xf32>, vector<32x8xf32> -> vector<32x8xf32>
    %340 = vector.broadcast %338 : vector<32x1xf32> to vector<32x8xf32>
    %341 = arith.divf %339, %340 : vector<32x8xf32>
    %c16_161 = arith.constant 16 : index
    %c0_162 = arith.constant 0 : index
    %342 = vector.load %arg28[%c16_161, %c0_162] : memref<32x32xf32, #tpu.memory_space<vmem>>, vector<8x32xf32>
    %cst_163 = arith.constant dense<0.000000e+00> : vector<32x32xf32>
    %343 = tpu.matmul %341, %342, %cst_163 {dimension_numbers = #tpu.dot_dimension_numbers<[1], [0], [0], [1], [0, 0, 1, 1], [], []>} : vector<32x8xf32>, vector<8x32xf32>, vector<32x32xf32> -> vector<32x32xf32>
    %344 = arith.addf %317, %343 : vector<32x32xf32>
    %345 = vector.extract_strided_slice %260 {offsets = [0, 24], sizes = [32, 8], strides = [1, 1]} : vector<32x96xf32> to vector<32x8xf32>
    %346 = vector.extract_strided_slice %260 {offsets = [0, 56], sizes = [32, 8], strides = [1, 1]} : vector<32x96xf32> to vector<32x8xf32>
    %347 = vector.extract_strided_slice %260 {offsets = [0, 88], sizes = [32, 8], strides = [1, 1]} : vector<32x96xf32> to vector<32x8xf32>
    %cst_164 = arith.constant dense<0.000000e+00> : vector<32x32xf32>
    %348 = tpu.matmul %345, %346, %cst_164 {dimension_numbers = #tpu.dot_dimension_numbers<[1], [1], [0], [0], [0, 0, 1, 0], [], []>} : vector<32x8xf32>, vector<32x8xf32>, vector<32x32xf32> -> vector<32x32xf32>
    %cst_165 = arith.constant 0.353553385 : f32
    %349 = vector.broadcast %cst_165 : f32 to vector<32x32xf32>
    %350 = arith.mulf %348, %349 : vector<32x32xf32>
    %cst_166 = arith.constant dense<0.000000e+00> : vector<32x32xf32>
    %351 = tpu.matmul %345, %8, %cst_166 {dimension_numbers = #tpu.dot_dimension_numbers<[1], [0], [0], [1], [0, 0, 1, 1], [], []>} : vector<32x8xf32>, vector<8x32xf32>, vector<32x32xf32> -> vector<32x32xf32>
    %352 = arith.mulf %351, %9 : vector<32x32xf32>
    %cst_167 = arith.constant dense<0.000000e+00> : vector<32x32xf32>
    %353 = tpu.matmul %352, %261, %cst_167 {dimension_numbers = #tpu.dot_dimension_numbers<[1], [0], [0], [1], [0, 0, 1, 1], [], []>} : vector<32x32xf32>, vector<32x32xf32>, vector<32x32xf32> -> vector<32x32xf32>
    %354 = arith.addf %350, %353 : vector<32x32xf32>
    %355 = arith.mulf %351, %10 : vector<32x32xf32>
    %cst_168 = arith.constant dense<0.000000e+00> : vector<32x32xf32>
    %356 = tpu.matmul %355, %262, %cst_168 {dimension_numbers = #tpu.dot_dimension_numbers<[1], [0], [0], [1], [0, 0, 1, 1], [], []>} : vector<32x32xf32>, vector<32x32xf32>, vector<32x32xf32> -> vector<32x32xf32>
    %357 = arith.addf %354, %356 : vector<32x32xf32>
    %358 = arith.addf %357, %11 : vector<32x32xf32>
    %cst_169 = arith.constant dense<0xFF800000> : vector<32xf32>
    %359 = vector.multi_reduction <maximumf>, %358, %cst_169 [1] : vector<32x32xf32> to vector<32xf32>
    %360 = vector.shape_cast %359 : vector<32xf32> to vector<32x1xf32>
    %361 = vector.broadcast %360 : vector<32x1xf32> to vector<32x32xf32>
    %362 = arith.subf %358, %361 : vector<32x32xf32>
    %363 = math.exp %362 : vector<32x32xf32>
    %cst_170 = arith.constant dense<0.000000e+00> : vector<32xf32>
    %364 = vector.multi_reduction <add>, %363, %cst_170 [1] : vector<32x32xf32> to vector<32xf32>
    %365 = vector.shape_cast %364 : vector<32xf32> to vector<32x1xf32>
    %cst_171 = arith.constant dense<0.000000e+00> : vector<32x8xf32>
    %366 = tpu.matmul %363, %347, %cst_171 {dimension_numbers = #tpu.dot_dimension_numbers<[1], [0], [0], [1], [0, 0, 1, 1], [], []>} : vector<32x32xf32>, vector<32x8xf32>, vector<32x8xf32> -> vector<32x8xf32>
    %367 = vector.broadcast %365 : vector<32x1xf32> to vector<32x8xf32>
    %368 = arith.divf %366, %367 : vector<32x8xf32>
    %c24_172 = arith.constant 24 : index
    %c0_173 = arith.constant 0 : index
    %369 = vector.load %arg28[%c24_172, %c0_173] : memref<32x32xf32, #tpu.memory_space<vmem>>, vector<8x32xf32>
    %cst_174 = arith.constant dense<0.000000e+00> : vector<32x32xf32>
    %370 = tpu.matmul %368, %369, %cst_174 {dimension_numbers = #tpu.dot_dimension_numbers<[1], [0], [0], [1], [0, 0, 1, 1], [], []>} : vector<32x8xf32>, vector<8x32xf32>, vector<32x32xf32> -> vector<32x32xf32>
    %371 = arith.addf %344, %370 : vector<32x32xf32>
    %372 = arith.addf %231, %371 : vector<32x32xf32>
    %c0_175 = arith.constant 0 : index
    %c0_176 = arith.constant 0 : index
    %373 = vector.load %arg29[%c0_175, %c0_176] : memref<1x32xf32, #tpu.memory_space<vmem>>, vector<1x32xf32>
    %374 = vector.broadcast %373 : vector<1x32xf32> to vector<32x32xf32>
    %375 = arith.addf %372, %374 : vector<32x32xf32>
    %c0_177 = arith.constant 0 : index
    %c0_178 = arith.constant 0 : index
    %376 = vector.load %arg30[%c0_177, %c0_178] : memref<1x32xf32, #tpu.memory_space<vmem>>, vector<1x32xf32>
    %c0_179 = arith.constant 0 : index
    %c0_180 = arith.constant 0 : index
    %377 = vector.load %arg31[%c0_179, %c0_180] : memref<1x32xf32, #tpu.memory_space<vmem>>, vector<1x32xf32>
    %cst_181 = arith.constant dense<0.000000e+00> : vector<32xf32>
    %378 = vector.multi_reduction <add>, %375, %cst_181 [1] : vector<32x32xf32> to vector<32xf32>
    %379 = vector.shape_cast %378 : vector<32xf32> to vector<32x1xf32>
    %cst_182 = arith.constant 3.200000e+01 : f32
    %380 = vector.broadcast %cst_182 : f32 to vector<32x1xf32>
    %381 = arith.divf %379, %380 : vector<32x1xf32>
    %382 = vector.broadcast %381 : vector<32x1xf32> to vector<32x32xf32>
    %383 = arith.subf %375, %382 : vector<32x32xf32>
    %384 = arith.mulf %383, %383 : vector<32x32xf32>
    %cst_183 = arith.constant dense<0.000000e+00> : vector<32xf32>
    %385 = vector.multi_reduction <add>, %384, %cst_183 [1] : vector<32x32xf32> to vector<32xf32>
    %386 = vector.shape_cast %385 : vector<32xf32> to vector<32x1xf32>
    %cst_184 = arith.constant 3.200000e+01 : f32
    %387 = vector.broadcast %cst_184 : f32 to vector<32x1xf32>
    %388 = arith.divf %386, %387 : vector<32x1xf32>
    %389 = vector.broadcast %381 : vector<32x1xf32> to vector<32x32xf32>
    %390 = arith.subf %375, %389 : vector<32x32xf32>
    %cst_185 = arith.constant 9.99999997E-7 : f32
    %391 = vector.broadcast %cst_185 : f32 to vector<32x1xf32>
    %392 = arith.addf %388, %391 : vector<32x1xf32>
    %393 = math.rsqrt %392 : vector<32x1xf32>
    %394 = vector.broadcast %393 : vector<32x1xf32> to vector<32x32xf32>
    %395 = arith.mulf %390, %394 : vector<32x32xf32>
    %396 = vector.broadcast %376 : vector<1x32xf32> to vector<32x32xf32>
    %397 = arith.mulf %395, %396 : vector<32x32xf32>
    %398 = vector.broadcast %377 : vector<1x32xf32> to vector<32x32xf32>
    %399 = arith.addf %397, %398 : vector<32x32xf32>
    %c0_186 = arith.constant 0 : index
    %c0_187 = arith.constant 0 : index
    %400 = vector.load %arg32[%c0_186, %c0_187] : memref<32x128xf32, #tpu.memory_space<vmem>>, vector<32x128xf32>
    %cst_188 = arith.constant dense<0.000000e+00> : vector<32x128xf32>
    %401 = tpu.matmul %399, %400, %cst_188 {dimension_numbers = #tpu.dot_dimension_numbers<[1], [0], [0], [1], [0, 0, 1, 1], [], []>} : vector<32x32xf32>, vector<32x128xf32>, vector<32x128xf32> -> vector<32x128xf32>
    %c0_189 = arith.constant 0 : index
    %c0_190 = arith.constant 0 : index
    %402 = vector.load %arg33[%c0_189, %c0_190] : memref<1x128xf32, #tpu.memory_space<vmem>>, vector<1x128xf32>
    %403 = vector.broadcast %402 : vector<1x128xf32> to vector<32x128xf32>
    %404 = arith.addf %401, %403 : vector<32x128xf32>
    %cst_191 = arith.constant 5.000000e-01 : f32
    %405 = vector.broadcast %cst_191 : f32 to vector<32x128xf32>
    %406 = arith.mulf %405, %404 : vector<32x128xf32>
    %cst_192 = arith.constant 0.707106769 : f32
    %407 = vector.broadcast %cst_192 : f32 to vector<32x128xf32>
    %408 = arith.mulf %404, %407 : vector<32x128xf32>
    %cst_193 = arith.constant 0.000000e+00 : f32
    %409 = vector.broadcast %cst_193 : f32 to vector<32x128xf32>
    %410 = arith.cmpf oge, %408, %409 : vector<32x128xf32>
    %cst_194 = arith.constant 1.000000e+00 : f32
    %cst_195 = arith.constant -1.000000e+00 : f32
    %411 = vector.broadcast %cst_194 : f32 to vector<32x128xf32>
    %412 = vector.broadcast %cst_195 : f32 to vector<32x128xf32>
    %413 = arith.select %410, %411, %412 : vector<32x128xi1>, vector<32x128xf32>
    %414 = math.absf %408 : vector<32x128xf32>
    %cst_196 = arith.constant 0.327591091 : f32
    %415 = vector.broadcast %cst_196 : f32 to vector<32x128xf32>
    %416 = arith.mulf %415, %414 : vector<32x128xf32>
    %cst_197 = arith.constant 1.000000e+00 : f32
    %417 = vector.broadcast %cst_197 : f32 to vector<32x128xf32>
    %418 = arith.addf %417, %416 : vector<32x128xf32>
    %cst_198 = arith.constant 1.000000e+00 : f32
    %419 = vector.broadcast %cst_198 : f32 to vector<32x128xf32>
    %420 = arith.divf %419, %418 : vector<32x128xf32>
    %cst_199 = arith.constant 1.06140542 : f32
    %421 = vector.broadcast %cst_199 : f32 to vector<32x128xf32>
    %422 = arith.mulf %421, %420 : vector<32x128xf32>
    %cst_200 = arith.constant -1.45315206 : f32
    %423 = vector.broadcast %cst_200 : f32 to vector<32x128xf32>
    %424 = arith.addf %422, %423 : vector<32x128xf32>
    %425 = arith.mulf %424, %420 : vector<32x128xf32>
    %cst_201 = arith.constant 1.42141378 : f32
    %426 = vector.broadcast %cst_201 : f32 to vector<32x128xf32>
    %427 = arith.addf %425, %426 : vector<32x128xf32>
    %428 = arith.mulf %427, %420 : vector<32x128xf32>
    %cst_202 = arith.constant -0.284496725 : f32
    %429 = vector.broadcast %cst_202 : f32 to vector<32x128xf32>
    %430 = arith.addf %428, %429 : vector<32x128xf32>
    %431 = arith.mulf %430, %420 : vector<32x128xf32>
    %cst_203 = arith.constant 0.254829586 : f32
    %432 = vector.broadcast %cst_203 : f32 to vector<32x128xf32>
    %433 = arith.addf %431, %432 : vector<32x128xf32>
    %434 = arith.mulf %433, %420 : vector<32x128xf32>
    %cst_204 = arith.constant 0.000000e+00 : f32
    %435 = vector.broadcast %cst_204 : f32 to vector<32x128xf32>
    %436 = arith.subf %435, %414 : vector<32x128xf32>
    %437 = arith.mulf %436, %414 : vector<32x128xf32>
    %438 = math.exp %437 : vector<32x128xf32>
    %439 = arith.mulf %434, %438 : vector<32x128xf32>
    %cst_205 = arith.constant 1.000000e+00 : f32
    %440 = vector.broadcast %cst_205 : f32 to vector<32x128xf32>
    %441 = arith.subf %440, %439 : vector<32x128xf32>
    %442 = arith.mulf %413, %441 : vector<32x128xf32>
    %cst_206 = arith.constant 1.000000e+00 : f32
    %443 = vector.broadcast %cst_206 : f32 to vector<32x128xf32>
    %444 = arith.addf %443, %442 : vector<32x128xf32>
    %445 = arith.mulf %406, %444 : vector<32x128xf32>
    %c0_207 = arith.constant 0 : index
    %c0_208 = arith.constant 0 : index
    %446 = vector.load %arg34[%c0_207, %c0_208] : memref<128x32xf32, #tpu.memory_space<vmem>>, vector<128x32xf32>
    %cst_209 = arith.constant dense<0.000000e+00> : vector<32x32xf32>
    %447 = tpu.matmul %445, %446, %cst_209 {dimension_numbers = #tpu.dot_dimension_numbers<[1], [0], [0], [1], [0, 0, 1, 1], [], []>} : vector<32x128xf32>, vector<128x32xf32>, vector<32x32xf32> -> vector<32x32xf32>
    %448 = arith.addf %375, %447 : vector<32x32xf32>
    %c0_210 = arith.constant 0 : index
    %c0_211 = arith.constant 0 : index
    %449 = vector.load %arg35[%c0_210, %c0_211] : memref<1x32xf32, #tpu.memory_space<vmem>>, vector<1x32xf32>
    %450 = vector.broadcast %449 : vector<1x32xf32> to vector<32x32xf32>
    %451 = arith.addf %448, %450 : vector<32x32xf32>
    %c0_212 = arith.constant 0 : index
    %c0_213 = arith.constant 0 : index
    %452 = vector.load %arg36[%c0_212, %c0_213] : memref<32x16xf32, #tpu.memory_space<vmem>>, vector<32x16xf32>
    %cst_214 = arith.constant dense<0.000000e+00> : vector<32x16xf32>
    %453 = tpu.matmul %451, %452, %cst_214 {dimension_numbers = #tpu.dot_dimension_numbers<[1], [0], [0], [1], [0, 0, 1, 1], [], []>} : vector<32x32xf32>, vector<32x16xf32>, vector<32x16xf32> -> vector<32x16xf32>
    %c0_215 = arith.constant 0 : index
    %c0_216 = arith.constant 0 : index
    %454 = vector.load %arg37[%c0_215, %c0_216] : memref<1x16xf32, #tpu.memory_space<vmem>>, vector<1x16xf32>
    %c0_217 = arith.constant 0 : index
    %c0_218 = arith.constant 0 : index
    %455 = vector.load %arg38[%c0_217, %c0_218] : memref<1x16xf32, #tpu.memory_space<vmem>>, vector<1x16xf32>
    %cst_219 = arith.constant dense<0.000000e+00> : vector<32xf32>
    %456 = vector.multi_reduction <add>, %453, %cst_219 [1] : vector<32x16xf32> to vector<32xf32>
    %457 = vector.shape_cast %456 : vector<32xf32> to vector<32x1xf32>
    %cst_220 = arith.constant 1.600000e+01 : f32
    %458 = vector.broadcast %cst_220 : f32 to vector<32x1xf32>
    %459 = arith.divf %457, %458 : vector<32x1xf32>
    %460 = vector.broadcast %459 : vector<32x1xf32> to vector<32x16xf32>
    %461 = arith.subf %453, %460 : vector<32x16xf32>
    %462 = arith.mulf %461, %461 : vector<32x16xf32>
    %cst_221 = arith.constant dense<0.000000e+00> : vector<32xf32>
    %463 = vector.multi_reduction <add>, %462, %cst_221 [1] : vector<32x16xf32> to vector<32xf32>
    %464 = vector.shape_cast %463 : vector<32xf32> to vector<32x1xf32>
    %cst_222 = arith.constant 1.600000e+01 : f32
    %465 = vector.broadcast %cst_222 : f32 to vector<32x1xf32>
    %466 = arith.divf %464, %465 : vector<32x1xf32>
    %467 = vector.broadcast %459 : vector<32x1xf32> to vector<32x16xf32>
    %468 = arith.subf %453, %467 : vector<32x16xf32>
    %cst_223 = arith.constant 9.99999997E-7 : f32
    %469 = vector.broadcast %cst_223 : f32 to vector<32x1xf32>
    %470 = arith.addf %466, %469 : vector<32x1xf32>
    %471 = math.rsqrt %470 : vector<32x1xf32>
    %472 = vector.broadcast %471 : vector<32x1xf32> to vector<32x16xf32>
    %473 = arith.mulf %468, %472 : vector<32x16xf32>
    %474 = vector.broadcast %454 : vector<1x16xf32> to vector<32x16xf32>
    %475 = arith.mulf %473, %474 : vector<32x16xf32>
    %476 = vector.broadcast %455 : vector<1x16xf32> to vector<32x16xf32>
    %477 = arith.addf %475, %476 : vector<32x16xf32>
    %cst_224 = arith.constant 0.000000e+00 : f32
    %478 = vector.broadcast %cst_224 : f32 to vector<32x16xf32>
    %c0_225 = arith.constant 0 : index
    %c0_226 = arith.constant 0 : index
    %c0_227 = arith.constant 0 : index
    %479 = vector.load %arg39[%c0_225, %c0_226, %c0_227] : memref<9x32x32xf32, #tpu.memory_space<vmem>>, vector<1x32x32xf32>
    %480 = vector.shape_cast %479 : vector<1x32x32xf32> to vector<32x32xf32>
    %c0_228 = arith.constant 0 : index
    %c0_229 = arith.constant 0 : index
    %c0_230 = arith.constant 0 : index
    %481 = vector.load %arg40[%c0_228, %c0_229, %c0_230] : memref<9x16x16xf32, #tpu.memory_space<vmem>>, vector<1x16x16xf32>
    %482 = vector.shape_cast %481 : vector<1x16x16xf32> to vector<16x16xf32>
    %cst_231 = arith.constant dense<0.000000e+00> : vector<32x16xf32>
    %483 = tpu.matmul %477, %482, %cst_231 {dimension_numbers = #tpu.dot_dimension_numbers<[1], [0], [0], [1], [0, 0, 1, 1], [], []>} : vector<32x16xf32>, vector<16x16xf32>, vector<32x16xf32> -> vector<32x16xf32>
    %cst_232 = arith.constant dense<0.000000e+00> : vector<32x16xf32>
    %484 = tpu.matmul %480, %483, %cst_232 {dimension_numbers = #tpu.dot_dimension_numbers<[1], [0], [0], [1], [0, 0, 1, 1], [], []>} : vector<32x32xf32>, vector<32x16xf32>, vector<32x16xf32> -> vector<32x16xf32>
    %485 = arith.addf %478, %484 : vector<32x16xf32>
    %c1 = arith.constant 1 : index
    %c0_233 = arith.constant 0 : index
    %c0_234 = arith.constant 0 : index
    %486 = vector.load %arg39[%c1, %c0_233, %c0_234] : memref<9x32x32xf32, #tpu.memory_space<vmem>>, vector<1x32x32xf32>
    %487 = vector.shape_cast %486 : vector<1x32x32xf32> to vector<32x32xf32>
    %c1_235 = arith.constant 1 : index
    %c0_236 = arith.constant 0 : index
    %c0_237 = arith.constant 0 : index
    %488 = vector.load %arg40[%c1_235, %c0_236, %c0_237] : memref<9x16x16xf32, #tpu.memory_space<vmem>>, vector<1x16x16xf32>
    %489 = vector.shape_cast %488 : vector<1x16x16xf32> to vector<16x16xf32>
    %cst_238 = arith.constant dense<0.000000e+00> : vector<32x16xf32>
    %490 = tpu.matmul %477, %489, %cst_238 {dimension_numbers = #tpu.dot_dimension_numbers<[1], [0], [0], [1], [0, 0, 1, 1], [], []>} : vector<32x16xf32>, vector<16x16xf32>, vector<32x16xf32> -> vector<32x16xf32>
    %cst_239 = arith.constant dense<0.000000e+00> : vector<32x16xf32>
    %491 = tpu.matmul %487, %490, %cst_239 {dimension_numbers = #tpu.dot_dimension_numbers<[1], [0], [0], [1], [0, 0, 1, 1], [], []>} : vector<32x32xf32>, vector<32x16xf32>, vector<32x16xf32> -> vector<32x16xf32>
    %492 = arith.addf %485, %491 : vector<32x16xf32>
    %c2 = arith.constant 2 : index
    %c0_240 = arith.constant 0 : index
    %c0_241 = arith.constant 0 : index
    %493 = vector.load %arg39[%c2, %c0_240, %c0_241] : memref<9x32x32xf32, #tpu.memory_space<vmem>>, vector<1x32x32xf32>
    %494 = vector.shape_cast %493 : vector<1x32x32xf32> to vector<32x32xf32>
    %c2_242 = arith.constant 2 : index
    %c0_243 = arith.constant 0 : index
    %c0_244 = arith.constant 0 : index
    %495 = vector.load %arg40[%c2_242, %c0_243, %c0_244] : memref<9x16x16xf32, #tpu.memory_space<vmem>>, vector<1x16x16xf32>
    %496 = vector.shape_cast %495 : vector<1x16x16xf32> to vector<16x16xf32>
    %cst_245 = arith.constant dense<0.000000e+00> : vector<32x16xf32>
    %497 = tpu.matmul %477, %496, %cst_245 {dimension_numbers = #tpu.dot_dimension_numbers<[1], [0], [0], [1], [0, 0, 1, 1], [], []>} : vector<32x16xf32>, vector<16x16xf32>, vector<32x16xf32> -> vector<32x16xf32>
    %cst_246 = arith.constant dense<0.000000e+00> : vector<32x16xf32>
    %498 = tpu.matmul %494, %497, %cst_246 {dimension_numbers = #tpu.dot_dimension_numbers<[1], [0], [0], [1], [0, 0, 1, 1], [], []>} : vector<32x32xf32>, vector<32x16xf32>, vector<32x16xf32> -> vector<32x16xf32>
    %499 = arith.addf %492, %498 : vector<32x16xf32>
    %c3 = arith.constant 3 : index
    %c0_247 = arith.constant 0 : index
    %c0_248 = arith.constant 0 : index
    %500 = vector.load %arg39[%c3, %c0_247, %c0_248] : memref<9x32x32xf32, #tpu.memory_space<vmem>>, vector<1x32x32xf32>
    %501 = vector.shape_cast %500 : vector<1x32x32xf32> to vector<32x32xf32>
    %c3_249 = arith.constant 3 : index
    %c0_250 = arith.constant 0 : index
    %c0_251 = arith.constant 0 : index
    %502 = vector.load %arg40[%c3_249, %c0_250, %c0_251] : memref<9x16x16xf32, #tpu.memory_space<vmem>>, vector<1x16x16xf32>
    %503 = vector.shape_cast %502 : vector<1x16x16xf32> to vector<16x16xf32>
    %cst_252 = arith.constant dense<0.000000e+00> : vector<32x16xf32>
    %504 = tpu.matmul %477, %503, %cst_252 {dimension_numbers = #tpu.dot_dimension_numbers<[1], [0], [0], [1], [0, 0, 1, 1], [], []>} : vector<32x16xf32>, vector<16x16xf32>, vector<32x16xf32> -> vector<32x16xf32>
    %cst_253 = arith.constant dense<0.000000e+00> : vector<32x16xf32>
    %505 = tpu.matmul %501, %504, %cst_253 {dimension_numbers = #tpu.dot_dimension_numbers<[1], [0], [0], [1], [0, 0, 1, 1], [], []>} : vector<32x32xf32>, vector<32x16xf32>, vector<32x16xf32> -> vector<32x16xf32>
    %506 = arith.addf %499, %505 : vector<32x16xf32>
    %c4 = arith.constant 4 : index
    %c0_254 = arith.constant 0 : index
    %c0_255 = arith.constant 0 : index
    %507 = vector.load %arg39[%c4, %c0_254, %c0_255] : memref<9x32x32xf32, #tpu.memory_space<vmem>>, vector<1x32x32xf32>
    %508 = vector.shape_cast %507 : vector<1x32x32xf32> to vector<32x32xf32>
    %c4_256 = arith.constant 4 : index
    %c0_257 = arith.constant 0 : index
    %c0_258 = arith.constant 0 : index
    %509 = vector.load %arg40[%c4_256, %c0_257, %c0_258] : memref<9x16x16xf32, #tpu.memory_space<vmem>>, vector<1x16x16xf32>
    %510 = vector.shape_cast %509 : vector<1x16x16xf32> to vector<16x16xf32>
    %cst_259 = arith.constant dense<0.000000e+00> : vector<32x16xf32>
    %511 = tpu.matmul %477, %510, %cst_259 {dimension_numbers = #tpu.dot_dimension_numbers<[1], [0], [0], [1], [0, 0, 1, 1], [], []>} : vector<32x16xf32>, vector<16x16xf32>, vector<32x16xf32> -> vector<32x16xf32>
    %cst_260 = arith.constant dense<0.000000e+00> : vector<32x16xf32>
    %512 = tpu.matmul %508, %511, %cst_260 {dimension_numbers = #tpu.dot_dimension_numbers<[1], [0], [0], [1], [0, 0, 1, 1], [], []>} : vector<32x32xf32>, vector<32x16xf32>, vector<32x16xf32> -> vector<32x16xf32>
    %513 = arith.addf %506, %512 : vector<32x16xf32>
    %c5 = arith.constant 5 : index
    %c0_261 = arith.constant 0 : index
    %c0_262 = arith.constant 0 : index
    %514 = vector.load %arg39[%c5, %c0_261, %c0_262] : memref<9x32x32xf32, #tpu.memory_space<vmem>>, vector<1x32x32xf32>
    %515 = vector.shape_cast %514 : vector<1x32x32xf32> to vector<32x32xf32>
    %c5_263 = arith.constant 5 : index
    %c0_264 = arith.constant 0 : index
    %c0_265 = arith.constant 0 : index
    %516 = vector.load %arg40[%c5_263, %c0_264, %c0_265] : memref<9x16x16xf32, #tpu.memory_space<vmem>>, vector<1x16x16xf32>
    %517 = vector.shape_cast %516 : vector<1x16x16xf32> to vector<16x16xf32>
    %cst_266 = arith.constant dense<0.000000e+00> : vector<32x16xf32>
    %518 = tpu.matmul %477, %517, %cst_266 {dimension_numbers = #tpu.dot_dimension_numbers<[1], [0], [0], [1], [0, 0, 1, 1], [], []>} : vector<32x16xf32>, vector<16x16xf32>, vector<32x16xf32> -> vector<32x16xf32>
    %cst_267 = arith.constant dense<0.000000e+00> : vector<32x16xf32>
    %519 = tpu.matmul %515, %518, %cst_267 {dimension_numbers = #tpu.dot_dimension_numbers<[1], [0], [0], [1], [0, 0, 1, 1], [], []>} : vector<32x32xf32>, vector<32x16xf32>, vector<32x16xf32> -> vector<32x16xf32>
    %520 = arith.addf %513, %519 : vector<32x16xf32>
    %c6 = arith.constant 6 : index
    %c0_268 = arith.constant 0 : index
    %c0_269 = arith.constant 0 : index
    %521 = vector.load %arg39[%c6, %c0_268, %c0_269] : memref<9x32x32xf32, #tpu.memory_space<vmem>>, vector<1x32x32xf32>
    %522 = vector.shape_cast %521 : vector<1x32x32xf32> to vector<32x32xf32>
    %c6_270 = arith.constant 6 : index
    %c0_271 = arith.constant 0 : index
    %c0_272 = arith.constant 0 : index
    %523 = vector.load %arg40[%c6_270, %c0_271, %c0_272] : memref<9x16x16xf32, #tpu.memory_space<vmem>>, vector<1x16x16xf32>
    %524 = vector.shape_cast %523 : vector<1x16x16xf32> to vector<16x16xf32>
    %cst_273 = arith.constant dense<0.000000e+00> : vector<32x16xf32>
    %525 = tpu.matmul %477, %524, %cst_273 {dimension_numbers = #tpu.dot_dimension_numbers<[1], [0], [0], [1], [0, 0, 1, 1], [], []>} : vector<32x16xf32>, vector<16x16xf32>, vector<32x16xf32> -> vector<32x16xf32>
    %cst_274 = arith.constant dense<0.000000e+00> : vector<32x16xf32>
    %526 = tpu.matmul %522, %525, %cst_274 {dimension_numbers = #tpu.dot_dimension_numbers<[1], [0], [0], [1], [0, 0, 1, 1], [], []>} : vector<32x32xf32>, vector<32x16xf32>, vector<32x16xf32> -> vector<32x16xf32>
    %527 = arith.addf %520, %526 : vector<32x16xf32>
    %c7 = arith.constant 7 : index
    %c0_275 = arith.constant 0 : index
    %c0_276 = arith.constant 0 : index
    %528 = vector.load %arg39[%c7, %c0_275, %c0_276] : memref<9x32x32xf32, #tpu.memory_space<vmem>>, vector<1x32x32xf32>
    %529 = vector.shape_cast %528 : vector<1x32x32xf32> to vector<32x32xf32>
    %c7_277 = arith.constant 7 : index
    %c0_278 = arith.constant 0 : index
    %c0_279 = arith.constant 0 : index
    %530 = vector.load %arg40[%c7_277, %c0_278, %c0_279] : memref<9x16x16xf32, #tpu.memory_space<vmem>>, vector<1x16x16xf32>
    %531 = vector.shape_cast %530 : vector<1x16x16xf32> to vector<16x16xf32>
    %cst_280 = arith.constant dense<0.000000e+00> : vector<32x16xf32>
    %532 = tpu.matmul %477, %531, %cst_280 {dimension_numbers = #tpu.dot_dimension_numbers<[1], [0], [0], [1], [0, 0, 1, 1], [], []>} : vector<32x16xf32>, vector<16x16xf32>, vector<32x16xf32> -> vector<32x16xf32>
    %cst_281 = arith.constant dense<0.000000e+00> : vector<32x16xf32>
    %533 = tpu.matmul %529, %532, %cst_281 {dimension_numbers = #tpu.dot_dimension_numbers<[1], [0], [0], [1], [0, 0, 1, 1], [], []>} : vector<32x32xf32>, vector<32x16xf32>, vector<32x16xf32> -> vector<32x16xf32>
    %534 = arith.addf %527, %533 : vector<32x16xf32>
    %c8_282 = arith.constant 8 : index
    %c0_283 = arith.constant 0 : index
    %c0_284 = arith.constant 0 : index
    %535 = vector.load %arg39[%c8_282, %c0_283, %c0_284] : memref<9x32x32xf32, #tpu.memory_space<vmem>>, vector<1x32x32xf32>
    %536 = vector.shape_cast %535 : vector<1x32x32xf32> to vector<32x32xf32>
    %c8_285 = arith.constant 8 : index
    %c0_286 = arith.constant 0 : index
    %c0_287 = arith.constant 0 : index
    %537 = vector.load %arg40[%c8_285, %c0_286, %c0_287] : memref<9x16x16xf32, #tpu.memory_space<vmem>>, vector<1x16x16xf32>
    %538 = vector.shape_cast %537 : vector<1x16x16xf32> to vector<16x16xf32>
    %cst_288 = arith.constant dense<0.000000e+00> : vector<32x16xf32>
    %539 = tpu.matmul %477, %538, %cst_288 {dimension_numbers = #tpu.dot_dimension_numbers<[1], [0], [0], [1], [0, 0, 1, 1], [], []>} : vector<32x16xf32>, vector<16x16xf32>, vector<32x16xf32> -> vector<32x16xf32>
    %cst_289 = arith.constant dense<0.000000e+00> : vector<32x16xf32>
    %540 = tpu.matmul %536, %539, %cst_289 {dimension_numbers = #tpu.dot_dimension_numbers<[1], [0], [0], [1], [0, 0, 1, 1], [], []>} : vector<32x32xf32>, vector<32x16xf32>, vector<32x16xf32> -> vector<32x16xf32>
    %541 = arith.addf %534, %540 : vector<32x16xf32>
    %c0_290 = arith.constant 0 : index
    %c0_291 = arith.constant 0 : index
    %542 = vector.load %arg41[%c0_290, %c0_291] : memref<1x16xf32, #tpu.memory_space<vmem>>, vector<1x16xf32>
    %c0_292 = arith.constant 0 : index
    %c0_293 = arith.constant 0 : index
    %543 = vector.load %arg42[%c0_292, %c0_293] : memref<1x16xf32, #tpu.memory_space<vmem>>, vector<1x16xf32>
    %cst_294 = arith.constant dense<0.000000e+00> : vector<32xf32>
    %544 = vector.multi_reduction <add>, %541, %cst_294 [1] : vector<32x16xf32> to vector<32xf32>
    %545 = vector.shape_cast %544 : vector<32xf32> to vector<32x1xf32>
    %cst_295 = arith.constant 1.600000e+01 : f32
    %546 = vector.broadcast %cst_295 : f32 to vector<32x1xf32>
    %547 = arith.divf %545, %546 : vector<32x1xf32>
    %548 = vector.broadcast %547 : vector<32x1xf32> to vector<32x16xf32>
    %549 = arith.subf %541, %548 : vector<32x16xf32>
    %550 = arith.mulf %549, %549 : vector<32x16xf32>
    %cst_296 = arith.constant dense<0.000000e+00> : vector<32xf32>
    %551 = vector.multi_reduction <add>, %550, %cst_296 [1] : vector<32x16xf32> to vector<32xf32>
    %552 = vector.shape_cast %551 : vector<32xf32> to vector<32x1xf32>
    %cst_297 = arith.constant 1.600000e+01 : f32
    %553 = vector.broadcast %cst_297 : f32 to vector<32x1xf32>
    %554 = arith.divf %552, %553 : vector<32x1xf32>
    %555 = vector.broadcast %547 : vector<32x1xf32> to vector<32x16xf32>
    %556 = arith.subf %541, %555 : vector<32x16xf32>
    %cst_298 = arith.constant 9.99999997E-7 : f32
    %557 = vector.broadcast %cst_298 : f32 to vector<32x1xf32>
    %558 = arith.addf %554, %557 : vector<32x1xf32>
    %559 = math.rsqrt %558 : vector<32x1xf32>
    %560 = vector.broadcast %559 : vector<32x1xf32> to vector<32x16xf32>
    %561 = arith.mulf %556, %560 : vector<32x16xf32>
    %562 = vector.broadcast %542 : vector<1x16xf32> to vector<32x16xf32>
    %563 = arith.mulf %561, %562 : vector<32x16xf32>
    %564 = vector.broadcast %543 : vector<1x16xf32> to vector<32x16xf32>
    %565 = arith.addf %563, %564 : vector<32x16xf32>
    %c0_299 = arith.constant 0 : index
    %c0_300 = arith.constant 0 : index
    %566 = vector.load %arg43[%c0_299, %c0_300] : memref<32x16xf32, #tpu.memory_space<vmem>>, vector<32x16xf32>
    tpu.vector_store %arg43[%c0_299, %c0_300], %565 {strides = array<i32>} : memref<32x16xf32, #tpu.memory_space<vmem>>, vector<32x16xf32>,
    return
  }
}

</mosaic_0001>

<bundles_post_ra>
// kernel: tile.40
= control target key start
LH: loop header
LB: loop body
LE: loop exit
PB: predicated region body
PF: predicated region fallthrough
CT: control target
= control target key end

     0   :  { %vm43_vm0 = vcmask 1047556   ;;  %vm45_vm1 = vcmask 64512   ;;  %s94_s22 = smov 8   ;;  %s95_s25 = smov 16   ;;  %vm55_vm2 = vcmask 261312   ;;  %vm65_vm3 = vcmask 195712   ;;  %s147_s0 = inlined_call_operand.vmem [shape: f32[8,4,8], index: 0, kind: input, shape index: {}]   ;;  %s148_s1 = inlined_call_operand.vmem [shape: f32[8,32], index: 1, kind: output, shape index: {}]  }
   0x1   :  { %v83_v0 = vld [vmem:[%s147_s0 + $0x1c] sm:$0xf]  ;;  %v84_v1 = vld [vmem:[%s147_s0 + $0x18] sm:$0xf]  ;;  %v85_v2 = vld [vmem:[%s147_s0 + $0x14] sm:$0xf] }
   0x2   :  { %9 = vst [vmem:[#allocation0 + $0x38] sm:$0xf] %v83_v0  ;;  %14 = vst [vmem:[#allocation0 + $0x30] sm:$0xf] %v84_v1  ;;  %v86_v3 = vld [vmem:[%s147_s0 + $0x10] sm:$0xf] }
   0x3   :  { %19 = vst [vmem:[#allocation0 + $0x28] sm:$0xf] %v85_v2  ;;  %v87_v4 = vld [vmem:[%s147_s0 + $0xc] sm:$0xf]  ;;  %v88_v5 = vld [vmem:[%s147_s0 + $0x8] sm:$0xf] }
   0x4   :  { %24 = vst [vmem:[#allocation0 + $0x20] sm:$0xf] %v86_v3  ;;  %29 = vst [vmem:[#allocation0 + $0x18] sm:$0xf] %v87_v4  ;;  %v89_v6 = vld [vmem:[%s147_s0 + $0x4] sm:$0xf] }
   0x5   :  { %34 = vst [vmem:[#allocation0 + $0x10] sm:$0xf] %v88_v5  ;;  %v39_v7 = vld [vmem:[%s147_s0] sm:$0xf]  ;;  %38 = vst [vmem:[#allocation0 + $0x8] sm:$0xf] %v89_v6 }
   0x6   :  { %40 = vst [vmem:[#allocation0] sm:$0xf] %v39_v7  ;;  %s93_s0 = smov 24   ;;  %vm75_vm4 = vcmask 130112  }
   0xb   :  { %v50_v8 = vld [vmem:[#allocation0 + $0x3] ss:$8 sm:$0xf0]   ;;  %v60_v9 = vld [vmem:[#allocation0 + $0x2] ss:$8 sm:$0xf0]  }
   0xc   :  { %v70_v14 = vld [vmem:[#allocation0 + $0x1] ss:$8 sm:$0xf0]   ;;  %v42_v17 = vld [vmem:[#allocation0] ss:$8 sm:$0xf0]  }
   0xd   :  { %v48_v10 = vld [vmem:[#allocation0 + $0x3] ss:$8 sm:$0xf]   ;;  %v58_v11 = vld [vmem:[#allocation0 + $0x2] ss:$8 sm:$0xf]  }
   0xe   :  { %v52_v12 = vsel %vm43_vm0, %v50_v8, %v48_v10  ;;  %v68_v13 = vld [vmem:[#allocation0 + $0x1] ss:$8 sm:$0xf]   ;;  %v41_v16 = vld [vmem:[#allocation0] ss:$8 sm:$0xf]   ;;  %v62_v18 = vsel %vm43_vm0, %v60_v9, %v58_v11 }
   0xf   :  { %53 = vrot.lane.b32.xlu0 %v52_v12, %s93_s0  ;;  %v72_v15 = vsel %vm43_vm0, %v70_v14, %v68_v13  ;;  %v44_v19 = vsel %vm43_vm0, %v42_v17, %v41_v16 }
  0x10   :  { %73 = vrot.lane.b32.xlu1 %v72_v15, %s94_s22  ;;  %46 = vst.msk [vmem:[%s148_s1] sm:$0xff] %vm45_vm1, %v44_v19  }
  0x13   :  { %63 = vrot.lane.b32.xlu0 %v62_v18, %s95_s25 }
  0x81   :  { %v54_v20 = vpop.permute.xlu0 %53  }
  0x82   :  { %56 = vst.msk [vmem:[%s148_s1] sm:$0xff] %vm55_vm2, %v54_v20   ;;  %v74_v21 = vpop.permute.xlu1 %73  }
  0x85   :  { %v64_v22 = vpop.permute.xlu0 %63  }
  0x86   :  { %66 = vst.msk [vmem:[%s148_s1] sm:$0xff] %vm65_vm3, %v64_v22  }
  0x87   :  { %76 = vst.msk [vmem:[%s148_s1] sm:$0xff] %vm75_vm4, %v74_v21  }

// kernel: tile.44
= control target key start
LH: loop header
LB: loop body
LE: loop exit
PB: predicated region body
PF: predicated region fallthrough
CT: control target
= control target key end

     0   :  { %vm67_vm0 = vcmask 130048   ;;  %vm73_vm1 = vcmask 261248   ;;  %v93_v12 = vmov 0.0   ;;  %s119_s0 = inlined_call_operand.vmem [shape: bf16[4,2,16], index: 0, kind: input, shape index: {}]   ;;  %s120_s1 = inlined_call_operand.vmem [shape: bf16[4,32], index: 1, kind: output, shape index: {}]  }
   0x1   :  { %v87_v0 = vld [vmem:[%s119_s0 + $0x3] sm:$0x1]  ;;  %v88_v1 = vld [vmem:[%s119_s0 + $0x2] sm:$0x1]  ;;  %v89_v2 = vld [vmem:[%s119_s0 + $0x1] sm:$0x1] }
   0x2   :  { %v18_v3 = vunpack.c.l.bf16 %v87_v0  ;;  %v34_v4 = vunpack.c.l.bf16 %v88_v1  ;;  %v49_v5 = vunpack.c.l.bf16 %v89_v2  ;;  %v62_v6 = vld [vmem:[%s119_s0] sm:$0x1]  ;;  %s92_s0 = smov 16  }
   0x3   :  { %v63_v7 = vunpack.c.l.bf16 %v62_v6 }
   0x4   :  { %21 = vst [vmem:[#allocation1 + $0x18] sm:$0x3] %v18_v3  ;;  %37 = vst [vmem:[#allocation1 + $0x10] sm:$0x3] %v34_v4 }
   0x5   :  { %52 = vst [vmem:[#allocation1 + $0x8] sm:$0x3] %v49_v5  ;;  %65 = vst [vmem:[#allocation1] sm:$0x3] %v63_v7 }
   0xc   :  { %v70_v8 = vld [vmem:[#allocation1 + $0x1] ss:$8 sm:$0xf]   ;;  %v66_v9 = vld [vmem:[#allocation1] ss:$8 sm:$0xf]  }
   0xd   :  { %71 = vrot.lane.b32.xlu0 %v70_v8, %s92_s0  ;;  %68 = vst.msk [vmem:[#allocation0] sm:$0xf] %vm67_vm0, %v66_v9  }
  0x7f   :  { %v72_v10 = vpop.permute.xlu0 %71  }
  0x80   :  { %74 = vst.msk [vmem:[#allocation0] sm:$0xf] %vm73_vm1, %v72_v10  }
  0x87   :  { %v80_v11 = vld [vmem:[#allocation0] sm:$0xf] }
  0x88   :  { %v81_v13 = vpack.c.bf16 %v93_v12, %v80_v11 }
  0x8a   :  { %84 = vst [vmem:[%s120_s1] sm:$0x3] %v81_v13 }

// kernel: pixel_encoder_forward.1
= control target key start
LH: loop header
LB: loop body
LE: loop exit
PB: predicated region body
PF: predicated region fallthrough
CT: control target
= control target key end

     0   :  { %s11221_s6 = smov 1   ;;  %s11222_s10 = smov 2   ;;  %s13057_s0 = inlined_call_operand.smem [shape: u32[44], index: -1, kind: input, shape index: {}] }
   0x1   :  { %s11288_s5 = sld [smem:[%s13057_s0]]   ;;  %s11223_s14 = smov 3  }
   0x2   :  { %s11293_s9 = sld [smem:[%s13057_s0 + %s11221_s6]]   ;;  %s11224_s18 = smov 4  }
   0x3   :  { %s11298_s13 = sld [smem:[%s13057_s0 + %s11222_s10]]   ;;  %s11225_s22 = smov 5  }
   0x4   :  { %s11303_s17 = sld [smem:[%s13057_s0 + %s11223_s14]]   ;;  %s11226_s26 = smov 6  }
   0x5   :  { %s11308_s21 = sld [smem:[%s13057_s0 + %s11224_s18]]   ;;  %s11227_s30 = smov 7  }
   0x6   :  { %s11313_s25 = sld [smem:[%s13057_s0 + %s11225_s22]]   ;;  %s11228_s4 = smov 8  }
   0x7   :  { %s11318_s29 = sld [smem:[%s13057_s0 + %s11226_s26]]   ;;  %s11229_s10 = smov 9  }
   0x8   :  { %s11323_s3 = sld [smem:[%s13057_s0 + %s11227_s30]]   ;;  %s11230_s15 = smov 10  }
   0x9   :  { %s11328_s8 = sld [smem:[%s13057_s0 + %s11228_s4]]   ;;  %s11231_s20 = smov 11  }
   0xa   :  { %s11333_s14 = sld [smem:[%s13057_s0 + %s11229_s10]]   ;;  %s11232_s26 = smov 12  }
   0xb   :  { %s11338_s19 = sld [smem:[%s13057_s0 + %s11230_s15]]   ;;  %s11233_s1 = smov 13  }
   0xc   :  { %s11343_s24 = sld [smem:[%s13057_s0 + %s11231_s20]]   ;;  %s11234_s7 = smov 14  }
   0xd   :  { %s11348_s30 = sld [smem:[%s13057_s0 + %s11232_s26]]   ;;  %s11235_s15 = smov 15  }
   0xe   :  { %s11353_s6 = sld [smem:[%s13057_s0 + %s11233_s1]]   ;;  %s11236_s22 = smov 16  }
   0xf   :  { %s11358_s12 = sld [smem:[%s13057_s0 + %s11234_s7]]   ;;  %s11237_s28 = smov 17  }
  0x10   :  { %s11363_s20 = sld [smem:[%s13057_s0 + %s11235_s15]]   ;;  %s11238_s7 = smov 18  }
  0x11   :  { %s11368_s27 = sld [smem:[%s13057_s0 + %s11236_s22]]   ;;  %s11239_s15 = smov 19  }
  0x12   :  { %s11373_s4 = sld [smem:[%s13057_s0 + %s11237_s28]]   ;;  %s11240_s22 = smov 20  }
  0x13   :  { %s11241_s28 = smov 21  }
  0x15   :  { %13069 = sst [smem:[#allocation5_spill]] %s11358_s12 }
  0x16   :  { %13070 = sst [smem:[#allocation6_spill]] %s11363_s20 }
  0x17   :  { %13071 = sst [smem:[#allocation7_spill]] %s11368_s27 }
  0x18   :  { %13072 = sst [smem:[#allocation8_spill]] %s11373_s4 }
  0x19   :  { %s11378_s12 = sld [smem:[%s13057_s0 + %s11238_s7]]   ;;  %s11242_s7 = smov 22  }
  0x1a   :  { %s11383_s20 = sld [smem:[%s13057_s0 + %s11239_s15]]   ;;  %s11243_s15 = smov 23  }
  0x1b   :  { %s11388_s27 = sld [smem:[%s13057_s0 + %s11240_s22]]   ;;  %s11244_s22 = smov 24  }
  0x1c   :  { %s11393_s4 = sld [smem:[%s13057_s0 + %s11241_s28]]   ;;  %s11245_s28 = smov 25  }
  0x1f   :  { %13073 = sst [smem:[#allocation9_spill]] %s11378_s12 }
  0x20   :  { %13074 = sst [smem:[#allocation10_spill]] %s11383_s20 }
  0x21   :  { %13075 = sst [smem:[#allocation11_spill]] %s11388_s27 }
  0x22   :  { %13076 = sst [smem:[#allocation12_spill]] %s11393_s4 }
  0x23   :  { %s11398_s12 = sld [smem:[%s13057_s0 + %s11242_s7]]   ;;  %s11246_s7 = smov 26  }
  0x24   :  { %s11403_s20 = sld [smem:[%s13057_s0 + %s11243_s15]]   ;;  %s11247_s15 = smov 27  }
  0x25   :  { %s11408_s27 = sld [smem:[%s13057_s0 + %s11244_s22]]   ;;  %s11248_s22 = smov 28  }
  0x26   :  { %s11413_s4 = sld [smem:[%s13057_s0 + %s11245_s28]]   ;;  %s11249_s28 = smov 29  }
  0x29   :  { %13077 = sst [smem:[#allocation13_spill]] %s11398_s12 }
  0x2a   :  { %13078 = sst [smem:[#allocation14_spill]] %s11403_s20 }
  0x2b   :  { %13079 = sst [smem:[#allocation15_spill]] %s11408_s27 }
  0x2c   :  { %13080 = sst [smem:[#allocation16_spill]] %s11413_s4 }
  0x2d   :  { %s11418_s12 = sld [smem:[%s13057_s0 + %s11246_s7]]   ;;  %s11250_s7 = smov 30  }
  0x2e   :  { %s11423_s20 = sld [smem:[%s13057_s0 + %s11247_s15]]   ;;  %s11251_s15 = smov 31  }
  0x2f   :  { %s11428_s27 = sld [smem:[%s13057_s0 + %s11248_s22]]   ;;  %s11252_s22 = smov 32  }
  0x30   :  { %s11433_s4 = sld [smem:[%s13057_s0 + %s11249_s28]]   ;;  %s11253_s28 = smov 33  }
  0x33   :  { %13081 = sst [smem:[#allocation17_spill]] %s11418_s12 }
  0x34   :  { %13082 = sst [smem:[#allocation18_spill]] %s11423_s20 }
  0x35   :  { %13083 = sst [smem:[#allocation19_spill]] %s11428_s27 }
  0x36   :  { %13084 = sst [smem:[#allocation20_spill]] %s11433_s4 }
  0x37   :  { %s11438_s12 = sld [smem:[%s13057_s0 + %s11250_s7]]   ;;  %s11254_s7 = smov 34  }
  0x38   :  { %s11443_s20 = sld [smem:[%s13057_s0 + %s11251_s15]]   ;;  %s11255_s15 = smov 35  }
  0x39   :  { %s11448_s27 = sld [smem:[%s13057_s0 + %s11252_s22]]   ;;  %s11256_s22 = smov 36  }
  0x3a   :  { %s11453_s4 = sld [smem:[%s13057_s0 + %s11253_s28]]   ;;  %s11257_s28 = smov 37  }
  0x3d   :  { %13085 = sst [smem:[#allocation21_spill]] %s11438_s12 }
  0x3e   :  { %13086 = sst [smem:[#allocation22_spill]] %s11443_s20 }
  0x3f   :  { %13087 = sst [smem:[#allocation23_spill]] %s11448_s27 }
  0x40   :  { %13088 = sst [smem:[#allocation24_spill]] %s11453_s4 }
  0x41   :  { %s11458_s12 = sld [smem:[%s13057_s0 + %s11254_s7]]   ;;  %s11258_s7 = smov 38  }
  0x42   :  { %s11463_s20 = sld [smem:[%s13057_s0 + %s11255_s15]]   ;;  %s11259_s15 = smov 39  }
  0x43   :  { %s11468_s27 = sld [smem:[%s13057_s0 + %s11256_s22]]   ;;  %s11260_s22 = smov 40  }
  0x44   :  { %s11473_s4 = sld [smem:[%s13057_s0 + %s11257_s28]]   ;;  %s11261_s28 = smov 41  }
  0x47   :  { %13089 = sst [smem:[#allocation25_spill]] %s11458_s12 }
  0x48   :  { %13090 = sst [smem:[#allocation26_spill]] %s11463_s20 }
  0x49   :  { %13091 = sst [smem:[#allocation27_spill]] %s11468_s27 }
  0x4a   :  { %13092 = sst [smem:[#allocation28_spill]] %s11473_s4 }
  0x4b   :  { %s11478_s12 = sld [smem:[%s13057_s0 + %s11258_s7]]   ;;  %s11262_s7 = smov 42  }
  0x4c   :  { %s11483_s20 = sld [smem:[%s13057_s0 + %s11259_s15]]   ;;  %s11263_s15 = smov 43  }
  0x4d   :  { %s11488_s27 = sld [smem:[%s13057_s0 + %s11260_s22]]  }
  0x4e   :  { %s11493_s4 = sld [smem:[%s13057_s0 + %s11261_s28]]  }
  0x51   :  { %13093 = sst [smem:[#allocation29_spill]] %s11478_s12 }
  0x52   :  { %13094 = sst [smem:[#allocation30_spill]] %s11483_s20 }
  0x53   :  { %s11498_s12 = sld [smem:[%s13057_s0 + %s11262_s7]]  }
  0x54   :  { %s11503_s20 = sld [smem:[%s13057_s0 + %s11263_s15]]  }
  0x55   :  { %v202_v0 = vld [vmem:[%s11318_s29 + $0x78] sm:$0xff]  ;;  %v11264_v1 = vmov 0.0   ;;  %v201_v2 = vld [vmem:[%s11318_s29 + $0x70] sm:$0xff]  ;;  %v200_v3 = vld [vmem:[%s11318_s29 + $0x68] sm:$0xff]  ;;  %vm218_vm0 = vcmask 523264  }
  0x56   :  { %231 = vmatprep.subr.mxu0 %v11264_v1  ;;  %v199_v4 = vld [vmem:[%s11318_s29 + $0x60] sm:$0xff]  ;;  %v198_v5 = vld [vmem:[%s11318_s29 + $0x58] sm:$0xff]  ;;  %v180_v6 = vld [vmem:[%s11288_s5 + $0x8] sm:$0xff] }
  0x57   :  { %232 = vmatpush1.msra.mxu0 %v202_v0  ;;  %v197_v7 = vld [vmem:[%s11318_s29 + $0x50] sm:$0xff]  ;;  %9001 = vmatprep.mubr.msk.f32.mxu0 %vm218_vm0, %v180_v6  ;;  %v196_v8 = vld [vmem:[%s11318_s29 + $0x48] sm:$0xff] }
  0x58   :  { %233 = vmatprep.subr.mxu0 %v11264_v1 }
  0x59   :  { %234 = vmatpush1.msra.mxu0 %v201_v2 }
  0x5a   :  { %235 = vmatprep.subr.mxu0 %v11264_v1 }
  0x5b   :  { %236 = vmatpush1.msra.mxu0 %v200_v3 }
  0x5c   :  { %237 = vmatprep.subr.mxu0 %v11264_v1 }
  0x5d   :  { %238 = vmatpush1.msra.mxu0 %v199_v4 }
  0x5e   :  { %239 = vmatprep.subr.mxu0 %v11264_v1 }
  0x5f   :  { %240 = vmatpush1.msra.mxu0 %v198_v5 }
  0x60   :  { %241 = vmatprep.subr.mxu0 %v11264_v1 }
  0x61   :  { %92 = vsyncpa [#allocation3], 0  ;;  %242 = vmatpush1.msra.mxu0 %v197_v7  ;;  %v195_v9 = vld [vmem:[%s11318_s29 + $0x40] sm:$0xff]  ;;  %v194_v10 = vld [vmem:[%s11318_s29 + $0x38] sm:$0xff]  ;;  %vm339_vm1 = vcmask 261120   ;;  %vm541_vm2 = vcmask 64512  }
  0x62   :  { %243 = vmatprep.subr.mxu0 %v11264_v1  ;;  %v193_v11 = vld [vmem:[%s11318_s29 + $0x30] sm:$0xff]  ;;  %v192_v12 = vld [vmem:[%s11318_s29 + $0x28] sm:$0xff]  ;;  %v191_v13 = vld [vmem:[%s11318_s29 + $0x20] sm:$0xff]  ;;  %s11265_s0 = smov 96   ;;  %s11273_s22 = smov 104   ;;  %vm7041_vm11 = vcmask 130048  }
  0x63   :  { %244 = vmatpush1.msra.mxu0 %v196_v8  ;;  %v190_v14 = vld [vmem:[%s11318_s29 + $0x18] sm:$0xff]  ;;  %v189_v15 = vld [vmem:[%s11318_s29 + $0x10] sm:$0xff]  ;;  %v188_v16 = vld [vmem:[%s11318_s29 + $0x8] sm:$0xff]  ;;  %s11274_s23 = smov 72   ;;  %s13097_s26 = sld [smem:[#allocation9_spill]] }
  0x64   :  { %245 = vmatprep.subr.mxu0 %v11264_v1  ;;  %v187_v17 = vld [vmem:[%s11318_s29] sm:$0xff]  ;;  %v210_v18 = vld [vmem:[%s11318_s29 + $0xb8] sm:$0xff]  ;;  %v209_v19 = vld [vmem:[%s11318_s29 + $0xb0] sm:$0xff]  ;;  %s13098_s28 = sld [smem:[#allocation7_spill]] }
  0x65   :  { %246 = vmatpush1.msra.mxu0 %v195_v9  ;;  %v208_v20 = vld [vmem:[%s11318_s29 + $0xa8] sm:$0xff]  ;;  %v207_v21 = vld [vmem:[%s11318_s29 + $0xa0] sm:$0xff]  ;;  %v206_v22 = vld [vmem:[%s11318_s29 + $0x98] sm:$0xff]  ;;  %s13099_s1 = sld [smem:[#allocation8_spill]] }
  0x66   :  { %247 = vmatprep.subr.mxu0 %v11264_v1  ;;  %v205_v23 = vld [vmem:[%s11318_s29 + $0x90] sm:$0xff]  ;;  %v204_v24 = vld [vmem:[%s11318_s29 + $0x88] sm:$0xff]  ;;  %v203_v25 = vld [vmem:[%s11318_s29 + $0x80] sm:$0xff]  ;;  %s11268_s29 = smov 88   ;;  %s13100_s2 = sld [smem:[#allocation11_spill]] }
  0x67   :  { %248 = vmatpush1.msra.mxu0 %v194_v10  ;;  %v179_v26 = vld [vmem:[%s11288_s5] sm:$0xff]  ;;  %v182_v27 = vld [vmem:[%s11288_s5 + $0x18] sm:$0xff]  ;;  %v181_v28 = vld [vmem:[%s11288_s5 + $0x10] sm:$0xff]  ;;  %s13101_s7 = sld [smem:[#allocation10_spill]] }
  0x68   :  { %249 = vmatprep.subr.mxu0 %v11264_v1  ;;  %v184_v29 = vld [vmem:[%s11288_s5 + $0x28] sm:$0xff]  ;;  %v183_v30 = vld [vmem:[%s11288_s5 + $0x20] sm:$0xff]  ;;  %v186_v31 = vld [vmem:[%s11288_s5 + $0x38] sm:$0xff]  ;;  %s13102_s10 = sld [smem:[#allocation12_spill]] }
  0x69   :  { %250 = vmatpush1.msra.mxu0 %v193_v11  ;;  %v185_v32 = vld [vmem:[%s11288_s5 + $0x30] sm:$0xff]  ;;  %v9000_v33 = vld [vmem:[%s11323_s3] ss:$0 sm:$0xff]  ;;  %v317_v40 = vld [vmem:[%s11293_s9 + $0x8] sm:$0xff]  ;;  %s11266_s5 = smov 64   ;;  %s11269_s3 = smov 56  }
  0x6a   :  { %251 = vmatprep.subr.mxu0 %v11264_v1  ;;  %v316_v35 = vld [vmem:[%s11293_s9] sm:$0xff]  ;;  %v318_v46 = vld [vmem:[%s11293_s9 + $0x10] sm:$0xff]  ;;  %v319_v52 = vld [vmem:[%s11293_s9 + $0x18] sm:$0xff]  ;;  %s11267_s9 = smov 120   ;;  %s13103_s11 = sld [smem:[#allocation15_spill]] }
  0x6b   :  { %252 = vmatpush1.msra.mxu0 %v192_v12  ;;  %s13104_s15 = sld [smem:[#allocation13_spill]] }
  0x6c   :  { %253 = vmatprep.subr.mxu0 %v11264_v1  ;;  %s13105_s16 = sld [smem:[#allocation14_spill]] }
  0x6d   :  { %254 = vmatpush1.msra.mxu0 %v191_v13  ;;  %s13106_s18 = sld [smem:[#allocation16_spill]] }
  0x6e   :  { %255 = vmatprep.subr.mxu0 %v11264_v1 }
  0x6f   :  { %256 = vmatpush1.msra.mxu0 %v190_v14  ;;  %v416_v14 = vld [vmem:[%s11338_s19 + $0x18] sm:$0xff] }
  0x70   :  { %257 = vmatprep.subr.mxu0 %v11264_v1  ;;  %9931 = vmatprep.subr.mxu1 %v416_v14 }
  0x71   :  { %258 = vmatpush1.msra.mxu0 %v189_v15  ;;  %v415_v15 = vld [vmem:[%s11338_s19 + $0x10] sm:$0xff]  ;;  %9932 = vmatpush3.msra.mxu1 %v416_v14 }
  0x72   :  { %259 = vmatprep.subr.mxu0 %v11264_v1  ;;  %9933 = vmatprep.subr.mxu1 %v415_v15 }
  0x73   :  { %260 = vmatpush1.msra.mxu0 %v188_v16  ;;  %v414_v16 = vld [vmem:[%s11338_s19 + $0x8] sm:$0xff]  ;;  %9934 = vmatpush3.msra.mxu1 %v415_v15 }
  0x74   :  { %261 = vmatprep.subr.mxu0 %v11264_v1  ;;  %9935 = vmatprep.subr.mxu1 %v414_v16 }
  0x75   :  { %262 = vmatpush1.msra.mxu0 %v187_v17  ;;  %9936 = vmatpush3.msra.mxu1 %v414_v16  ;;  %v413_v17 = vld [vmem:[%s11338_s19] sm:$0xff]  ;;  %s11271_s19 = smov 80  }
  0x76   :  { %279 = vmatprep.subr.mxu0 %v11264_v1  ;;  %9937 = vmatprep.subr.mxu1 %v413_v17 }
  0x77   :  { %280 = vmatpush2.msra.mxu0 %v210_v18  ;;  %9938 = vmatpush3.msra.mxu1 %v413_v17 }
  0x78   :  { %281 = vmatprep.subr.mxu0 %v11264_v1 }
  0x79   :  { %282 = vmatpush2.msra.mxu0 %v209_v19 }
  0x7a   :  { %283 = vmatprep.subr.mxu0 %v11264_v1 }
  0x7b   :  { %284 = vmatpush2.msra.mxu0 %v208_v20 }
  0x7c   :  { %285 = vmatprep.subr.mxu0 %v11264_v1 }
  0x7d   :  { %286 = vmatpush2.msra.mxu0 %v207_v21 }
  0x7e   :  { %287 = vmatprep.subr.mxu0 %v11264_v1 }
  0x7f   :  { %288 = vmatpush2.msra.mxu0 %v206_v22 }
  0x80   :  { %289 = vmatprep.subr.mxu0 %v11264_v1 }
  0x81   :  { %290 = vmatpush2.msra.mxu0 %v205_v23 }
  0x82   :  { %291 = vmatprep.subr.mxu0 %v11264_v1 }
  0x83   :  { %292 = vmatpush2.msra.mxu0 %v204_v24 }
  0x84   :  { %293 = vmatprep.subr.mxu0 %v11264_v1 }
  0x85   :  { %294 = vmatpush2.msra.mxu0 %v203_v25 }
  0x86   :  { %296 = vmatmul.mubr.f32.vlgmr.msra.gmra.mxu0 %v179_v26 }
  0x87   :  { %9002 = vmatprep.mubr.msk.f32.mxu0 %vm218_vm0, %v182_v27 }
  0x8a   :  { %301 = vmatmul.mubr.f32.gmra.mxu0 %v181_v28 }
  0x8b   :  { %9003 = vmatprep.mubr.msk.f32.mxu0 %vm218_vm0, %v184_v29 }
  0x8e   :  { %306 = vmatmul.mubr.f32.gmra.mxu0 %v183_v30 }
  0x8f   :  { %9004 = vmatprep.mubr.msk.f32.mxu0 %vm218_vm0, %v186_v31  ;;  %v9005_v31 = vld [vmem:[%s11328_s8] ss:$0 sm:$0xff]  ;;  %s11270_s8 = smov 112  }
  0x92   :  { %311 = vmatmul.mubr.f32.gmra.mxu0 %v185_v32 }
 0x146   :  { %v297_v34 = vpop.f32.mrf.mxu0 }
 0x147   :  { %v298_v36 = vadd.f32 %v9000_v33, %v297_v34 }
 0x148   :  { %v299_v37 = vpop.f32.mrf.mxu0 }
 0x149   :  { %v11567_v38 = vadd.f32 %v316_v35, %v298_v36 }
 0x14a   :  { %v302_v39 = vpop.f32.mrf.mxu0 }
 0x14b   :  { %v303_v41 = vadd.f32 %v9000_v33, %v302_v39  ;;  %v340_v42 = vsel %vm339_vm1, %v11567_v38, 0.0 }
 0x14c   :  { %v304_v43 = vpop.f32.mrf.mxu0  ;;  %341 = vadd.xlane.f32.xlu0 %v340_v42 }
 0x14d   :  { %v11572_v44 = vadd.f32 %v317_v40, %v303_v41 }
 0x14e   :  { %v307_v45 = vpop.f32.mrf.mxu0 }
 0x14f   :  { %v308_v47 = vadd.f32 %v9000_v33, %v307_v45  ;;  %v343_v48 = vsel %vm339_vm1, %v11572_v44, 0.0 }
 0x150   :  { %v309_v49 = vpop.f32.mrf.mxu0  ;;  %344 = vadd.xlane.f32.xlu0 %v343_v48 }
 0x151   :  { %v11577_v50 = vadd.f32 %v318_v46, %v308_v47 }
 0x152   :  { %v312_v51 = vpop.f32.mrf.mxu0 }
 0x153   :  { %v313_v53 = vadd.f32 %v9000_v33, %v312_v51  ;;  %v346_v54 = vsel %vm339_vm1, %v11577_v50, 0.0  ;;  %v9006_v33 = vld [vmem:[%s11333_s14] ss:$0 sm:$0xff]  ;;  %s13095_s14 = sld [smem:[#allocation5_spill]] }
 0x154   :  { %v314_v55 = vpop.f32.mrf.mxu0  ;;  %347 = vadd.xlane.f32.xlu1 %v346_v54 }
 0x155   :  { %v11582_v56 = vadd.f32 %v319_v52, %v313_v53  ;;  %v9007_v52 = vld [vmem:[%s11343_s24] ss:$0 sm:$0xff]  ;;  %s11272_s24 = smov 48  }
 0x157   :  { %v349_v57 = vsel %vm339_vm1, %v11582_v56, 0.0 }
 0x158   :  { %350 = vadd.xlane.f32.xlu1 %v349_v57 }
 0x1d5   :  { %v342_v58 = vpop.xlane.xlu0 %341 }
 0x1d6   :  { %v353_v59 = vmul.f32 0.03125, %v342_v58 }
 0x1d8   :  { %v357_v60 = vsub.f32 %v11567_v38, %v353_v59 }
 0x1d9   :  { %v345_v61 = vpop.xlane.xlu0 %344 }
 0x1da   :  { %v354_v62 = vmul.f32 0.03125, %v345_v61  ;;  %v361_v63 = vmul.f32 %v357_v60, %v357_v60 }
 0x1dc   :  { %v358_v0 = vsub.f32 %v11572_v44, %v354_v62  ;;  %v365_v1 = vsel %vm339_vm1, %v361_v63, 0.0 }
 0x1dd   :  { %v348_v2 = vpop.xlane.xlu1 %347  ;;  %366 = vadd.xlane.f32.xlu0 %v365_v1  ;;  %v11631_v1 = vld [vmem:[%s11298_s13] sm:$0xff] }
 0x1de   :  { %v355_v3 = vmul.f32 0.03125, %v348_v2  ;;  %v362_v4 = vmul.f32 %v358_v0, %v358_v0  ;;  %v11651_v2 = vld [vmem:[%s11348_s30 + $0x18] sm:$0xff] }
 0x1e0   :  { %v359_v5 = vsub.f32 %v11577_v50, %v355_v3  ;;  %v368_v6 = vsel %vm339_vm1, %v362_v4, 0.0  ;;  %v11656_v3 = vld [vmem:[%s11348_s30 + $0x10] sm:$0xff]  ;;  %v11661_v4 = vld [vmem:[%s11348_s30 + $0x8] sm:$0xff] }
 0x1e1   :  { %v351_v7 = vpop.xlane.xlu1 %350  ;;  %369 = vadd.xlane.f32.xlu1 %v368_v6  ;;  %v11671_v6 = vld [vmem:[%s11353_s6 + $0x18] sm:$0xff] }
 0x1e2   :  { %v356_v8 = vmul.f32 0.03125, %v351_v7  ;;  %v363_v9 = vmul.f32 %v359_v5, %v359_v5 }
 0x1e4   :  { %v360_v10 = vsub.f32 %v11582_v56, %v356_v8  ;;  %v371_v11 = vsel %vm339_vm1, %v363_v9, 0.0 }
 0x1e5   :  { %372 = vadd.xlane.f32.xlu0 %v371_v11 }
 0x1e6   :  { %v364_v12 = vmul.f32 %v360_v10, %v360_v10 }
 0x1e8   :  { %v374_v13 = vsel %vm339_vm1, %v364_v12, 0.0  ;;  %v11675_v12 = vld [vmem:[%s11303_s17] sm:$0xff] }
 0x1e9   :  { %375 = vadd.xlane.f32.xlu1 %v374_v13  ;;  %v11678_v13 = vld [vmem:[%s11303_s17 + $0x8] sm:$0xff] }
 0x266   :  { %v367_v18 = vpop.xlane.xlu0 %366 }
 0x267   :  { %v377_v19 = vmul.f32 0.03125, %v367_v18  ;;  %v11683_v18 = vld [vmem:[%s11303_s17 + $0x10] sm:$0xff] }
 0x269   :  { %v381_v20 = vadd.f32 1e-06, %v377_v19  ;;  %v11686_v19 = vld [vmem:[%s11303_s17 + $0x18] sm:$0xff] }
 0x26a   :  { %v370_v21 = vpop.xlane.xlu1 %369 }
 0x26b   :  { %10936 = vrsqrt.f32 %v381_v20  ;;  %v378_v22 = vmul.f32 0.03125, %v370_v21  ;;  %v11690_v20 = vld [vmem:[%s11353_s6 + $0x10] sm:$0xff]  ;;  %v11693_v21 = vld [vmem:[%s11308_s21] sm:$0xff] }
 0x26d   :  { %v382_v23 = vadd.f32 1e-06, %v378_v22 }
 0x26e   :  { %v373_v24 = vpop.xlane.xlu0 %372 }
 0x26f   :  { %10938 = vrsqrt.f32 %v382_v23  ;;  %v379_v25 = vmul.f32 0.03125, %v373_v24  ;;  %v11699_v24 = vld [vmem:[%s11353_s6 + $0x8] sm:$0xff] }
 0x271   :  { %v383_v26 = vadd.f32 1e-06, %v379_v25 }
 0x272   :  { %v376_v27 = vpop.xlane.xlu1 %375 }
 0x273   :  { %10940 = vrsqrt.f32 %v383_v26  ;;  %v380_v28 = vmul.f32 0.03125, %v376_v27  ;;  %v11704_v26 = vld [vmem:[%s11308_s21 + $0x8] sm:$0xff] }
 0x275   :  { %v384_v29 = vadd.f32 1e-06, %v380_v28  ;;  %v11710_v28 = vld [vmem:[%s11353_s6] sm:$0xff] }
 0x277   :  { %10942 = vrsqrt.f32 %v384_v29  ;;  %v11713_v29 = vld [vmem:[%s11308_s21 + $0x10] sm:$0xff] }
 0x278   :  { %v10937_v30 = vpop.eup %10936 }
 0x279   :  { %v389_v32 = vmul.f32 %v10937_v30, %v357_v60 }
 0x27b   :  { %v399_v34 = vmul.f32 %v9005_v31, %v389_v32 }
 0x27c   :  { %v10939_v35 = vpop.eup %10938 }
 0x27d   :  { %v409_v36 = vadd.f32 %v9006_v33, %v399_v34  ;;  %v390_v37 = vmul.f32 %v10939_v35, %v358_v0 }
 0x27f   :  { %9939 = vmatprep.mubr.msk.f32.mxu1 %vm339_vm1, %v409_v36  ;;  %v400_v39 = vmul.f32 %v9005_v31, %v390_v37 }
 0x280   :  { %v10941_v40 = vpop.eup %10940 }
 0x281   :  { %v410_v41 = vadd.f32 %v9006_v33, %v400_v39  ;;  %v391_v42 = vmul.f32 %v10941_v40, %v359_v5  ;;  %v11666_v5 = vld [vmem:[%s11348_s30] sm:$0xff] }
 0x283   :  { %9940 = vmatmul.mubr.msk.f32.vlgmr.msra.gmra.mxu1 %vm339_vm1, %v410_v41  ;;  %v401_v43 = vmul.f32 %v9005_v31, %v391_v42 }
 0x284   :  { %v10943_v45 = vpop.eup %10942 }
 0x285   :  { %v411_v46 = vadd.f32 %v9006_v33, %v401_v43  ;;  %v392_v47 = vmul.f32 %v10943_v45, %v360_v10  ;;  %v11731_v43 = vld [vmem:[%s11313_s25 + $0x8] sm:$0xff] }
 0x287   :  { %9942 = vmatprep.mubr.msk.f32.mxu1 %vm339_vm1, %v411_v46  ;;  %v402_v48 = vmul.f32 %v9005_v31, %v392_v47  ;;  %v11722_v31 = vld [vmem:[%s11308_s21 + $0x18] sm:$0xff] }
 0x289   :  { %v412_v49 = vadd.f32 %v9006_v33, %v402_v48 }
 0x28b   :  { %9943 = vmatmul.mubr.msk.f32.gmra.mxu1 %vm339_vm1, %v412_v49  ;;  %v11734_v49 = vld [vmem:[%s11313_s25] sm:$0xff] }
 0x343   :  { %v9941_v51 = vpop.f32.mrf.mxu1 }
 0x344   :  { %v11617_v60 = vadd.f32 %v9941_v51, %v9007_v52 }
 0x345   :  { %v502_v53 = vpop.f32.mrf.mxu1 }
 0x346   :  { %v11605_v54 = vadd.f32 %v9007_v52, %v502_v53 }
 0x348   :  { %9953 = vmatprep.mubr.msk.f32.mxu1 %vm541_vm2, %v11605_v54 }
 0x34b   :  { %v9944_v55 = vpop.f32.mrf.mxu1 }
 0x34c   :  { %v11609_v57 = vadd.f32 %v9944_v55, %v9007_v52 }
 0x34d   :  { %v512_v58 = vpop.f32.mrf.mxu1 }
 0x34e   :  { %v11611_v59 = vadd.f32 %v9007_v52, %v512_v58  ;;  %539 = vrot.lane.b32.xlu0 %v11609_v57, %s11265_s0 }
 0x350   :  { %537 = vrot.lane.b32.xlu1 %v11611_v59, %s11265_s0 }
 0x354   :  { %535 = vrot.lane.b32.xlu1 %v11617_v60, %s11265_s0 }
 0x358   :  { %533 = vrot.lane.b32.xlu1 %v11605_v54, %s11265_s0 }
 0x3c0   :  { %v540_v61 = vpop.permute.xlu0 %539 }
 0x3c1   :  { %9945 = vmatprep.subr.msk.mxu1 %vm541_vm2, %v540_v61 }
 0x3c2   :  { %9946 = vmatpush3.xpose.msk.msra.mxu1 %vm541_vm2, %v540_v61  ;;  %v538_v62 = vpop.permute.xlu1 %537  ;;  %v11738_v61 = vld [vmem:[%s11313_s25 + $0x18] sm:$0xff] }
 0x3c3   :  { %9947 = vmatprep.subr.msk.mxu1 %vm541_vm2, %v538_v62 }
 0x3c6   :  { %9948 = vmatpush3.xpose.msk.msra.mxu1 %vm541_vm2, %v538_v62  ;;  %v536_v63 = vpop.permute.xlu1 %535 }
 0x3c7   :  { %9949 = vmatprep.subr.msk.mxu1 %vm541_vm2, %v536_v63 }
 0x3ca   :  { %9950 = vmatpush3.xpose.msk.msra.mxu1 %vm541_vm2, %v536_v63  ;;  %v534_v0 = vpop.permute.xlu1 %533 }
 0x3cb   :  { %9951 = vmatprep.subr.msk.mxu1 %vm541_vm2, %v534_v0 }
 0x3ce   :  { %9952 = vmatpush3.xpose.msk.msra.mxu1 %vm541_vm2, %v534_v0 }
 0x3cf   :  { %9959 = vmatprep.subr.mxu1 %v11631_v1 }
 0x3d1   :  { %9954 = vmatmul.mubr.msk.f32.vlgmr.msra.gmra.mxu1 %vm541_vm2, %v11617_v60 }
 0x3d2   :  { %9956 = vmatprep.mubr.msk.f32.mxu1 %vm541_vm2, %v11611_v59  ;;  %9960 = vmatpush3.msra.mxu1 %v11631_v1 }
 0x3d3   :  { %9967 = vmatprep.subr.mxu1 %v11651_v2 }
 0x3d5   :  { %9957 = vmatmul.mubr.msk.f32.gmra.mxu1 %vm541_vm2, %v11609_v57 }
 0x3d6   :  { %9961 = vmatprep.mubr.msk.f32.mxu1 %vm541_vm2, %v11605_v54 }
 0x3d9   :  { %9962 = vmatmul.mubr.msk.f32.vlgmr.msra.gmra.mxu1 %vm541_vm2, %v11617_v60 }
 0x3da   :  { %9964 = vmatprep.mubr.msk.f32.mxu1 %vm541_vm2, %v11611_v59  ;;  %9968 = vmatpush3.msra.mxu1 %v11651_v2 }
 0x3db   :  { %9969 = vmatprep.subr.mxu1 %v11656_v3 }
 0x3dc   :  { %9970 = vmatpush3.msra.mxu1 %v11656_v3 }
 0x3dd   :  { %9965 = vmatmul.mubr.msk.f32.gmra.mxu1 %vm541_vm2, %v11609_v57  ;;  %9971 = vmatprep.subr.mxu1 %v11661_v4 }
 0x3de   :  { %9972 = vmatpush3.msra.mxu1 %v11661_v4 }
 0x3df   :  { %9973 = vmatprep.subr.mxu1 %v11666_v5 }
 0x3e0   :  { %9974 = vmatpush3.msra.mxu1 %v11666_v5 }
 0x3e1   :  { %9981 = vmatprep.subr.mxu1 %v11671_v6 }
 0x491   :  { %v9955_v7 = vpop.f32.mrf.mxu1 }
 0x492   :  { %v644_v37 = vmul.f32 0.35355338, %v9955_v7 }
 0x493   :  { %v624_v8 = vpop.f32.mrf.mxu1 }
 0x494   :  { %v643_v40 = vmul.f32 0.35355338, %v624_v8 }
 0x495   :  { %v9958_v9 = vpop.f32.mrf.mxu1 }
 0x496   :  { %v646_v45 = vmul.f32 0.35355338, %v9958_v9 }
 0x497   :  { %v634_v10 = vpop.f32.mrf.mxu1 }
 0x498   :  { %v645_v51 = vmul.f32 0.35355338, %v634_v10 }
 0x499   :  { %v9963_v11 = vpop.f32.mrf.mxu1 }
 0x49a   :  { %v733_v16 = vmul.f32 %v9963_v11, %v11678_v13  ;;  %v838_v30 = vmul.f32 %v9963_v11, %v11704_v26 }
 0x49b   :  { %v713_v14 = vpop.f32.mrf.mxu1 }
 0x49c   :  { %v732_v15 = vmul.f32 %v713_v14, %v11675_v12  ;;  %v837_v27 = vmul.f32 %v713_v14, %v11693_v21  ;;  %v11745_v14 = vld [vmem:[%s11313_s25 + $0x10] sm:$0xff] }
 0x49d   :  { %v9966_v17 = vpop.f32.mrf.mxu1 }
 0x49e   :  { %9975 = vmatprep.mubr.msk.f32.mxu1 %vm339_vm1, %v732_v15  ;;  %v735_v25 = vmul.f32 %v9966_v17, %v11686_v19  ;;  %v840_v33 = vmul.f32 %v9966_v17, %v11722_v31 }
 0x49f   :  { %v723_v22 = vpop.f32.mrf.mxu1  ;;  %9976 = vmatmul.mubr.msk.f32.vlgmr.msra.gmra.mxu1 %vm339_vm1, %v733_v16 }
 0x4a0   :  { %v734_v23 = vmul.f32 %v723_v22, %v11683_v18  ;;  %9982 = vmatpush3.msra.mxu1 %v11671_v6  ;;  %v839_v32 = vmul.f32 %v723_v22, %v11713_v29 }
 0x4a1   :  { %9983 = vmatprep.subr.mxu1 %v11690_v20 }
 0x4a2   :  { %9978 = vmatprep.mubr.msk.f32.mxu1 %vm339_vm1, %v734_v23  ;;  %9984 = vmatpush3.msra.mxu1 %v11690_v20 }
 0x4a3   :  { %9979 = vmatmul.mubr.msk.f32.gmra.mxu1 %vm339_vm1, %v735_v25  ;;  %9985 = vmatprep.subr.mxu1 %v11699_v24 }
 0x4a4   :  { %9986 = vmatpush3.msra.mxu1 %v11699_v24  ;;  %9989 = vmatprep.mubr.msk.f32.mxu1 %vm339_vm1, %v837_v27 }
 0x4a5   :  { %9987 = vmatprep.subr.mxu1 %v11710_v28 }
 0x4a6   :  { %9988 = vmatpush3.msra.mxu1 %v11710_v28 }
 0x4a7   :  { %9990 = vmatmul.mubr.msk.f32.vlgmr.msra.gmra.mxu1 %vm339_vm1, %v838_v30 }
 0x4a8   :  { %9992 = vmatprep.mubr.msk.f32.mxu1 %vm339_vm1, %v839_v32 }
 0x4ab   :  { %9993 = vmatmul.mubr.msk.f32.gmra.mxu1 %vm339_vm1, %v840_v33 }
 0x55f   :  { %v9977_v34 = vpop.f32.mrf.mxu1 }
 0x560   :  { %v834_v41 = vadd.f32 %v9977_v34, %v644_v37 }
 0x561   :  { %v814_v35 = vpop.f32.mrf.mxu1 }
 0x562   :  { %v833_v46 = vadd.f32 %v814_v35, %v643_v40 }
 0x563   :  { %v9980_v36 = vpop.f32.mrf.mxu1 }
 0x564   :  { %v836_v52 = vadd.f32 %v9980_v36, %v646_v45 }
 0x565   :  { %v824_v39 = vpop.f32.mrf.mxu1 }
 0x566   :  { %v835_v62 = vadd.f32 %v824_v39, %v645_v51 }
 0x567   :  { %v9991_v42 = vpop.f32.mrf.mxu1 }
 0x568   :  { %v939_v47 = vadd.f32 %v9991_v42, %v834_v41 }
 0x569   :  { %v919_v48 = vpop.f32.mrf.mxu1 }
 0x56a   :  { %v938_v53 = vadd.f32 %v919_v48, %v833_v46  ;;  %v943_v55 = vadd.f32 %v939_v47, %v11731_v43 }
 0x56b   :  { %v9994_v58 = vpop.f32.mrf.mxu1 }
 0x56c   :  { %v941_v63 = vadd.f32 %v9994_v58, %v836_v52  ;;  %v949_v0 = vsel %vm339_vm1, %v943_v55, -inf  ;;  %v942_v7 = vadd.f32 %v938_v53, %v11734_v49 }
 0x56d   :  { %950 = vmax.xlane.f32.xlu1 %v949_v0  ;;  %v929_v8 = vpop.f32.mrf.mxu1 }
 0x56e   :  { %v940_v9 = vadd.f32 %v929_v8, %v835_v62  ;;  %v946_v11 = vsel %vm339_vm1, %v942_v7, -inf  ;;  %v945_v10 = vadd.f32 %v941_v63, %v11738_v61 }
 0x56f   :  { %947 = vmax.xlane.f32.xlu0 %v946_v11 }
 0x570   :  { %v955_v15 = vsel %vm339_vm1, %v945_v10, -inf  ;;  %v944_v16 = vadd.f32 %v940_v9, %v11745_v14 }
 0x572   :  { %v952_v17 = vsel %vm339_vm1, %v944_v16, -inf }
 0x573   :  { %956 = vmax.xlane.f32.xlu0 %v955_v15 }
 0x577   :  { %953 = vmax.xlane.f32.xlu0 %v952_v17 }
 0x57e   :  { %986 = vrot.lane.b32.xlu1 %v11611_v59, %s11266_s5 }
 0x582   :  { %984 = vrot.lane.b32.xlu1 %v11617_v60, %s11266_s5 }
 0x586   :  { %982 = vrot.lane.b32.xlu1 %v11605_v54, %s11266_s5 }
 0x58a   :  { %1102 = vrot.lane.b32.xlu1 %v11617_v60, %s11267_s9 }
 0x58d   :  { %988 = vrot.lane.b32.xlu0 %v11609_v57, %s11266_s5 }
 0x58e   :  { %1106 = vrot.lane.b32.xlu1 %v11609_v57, %s11267_s9 }
 0x591   :  { %1100 = vrot.lane.b32.xlu0 %v11605_v54, %s11267_s9 }
 0x592   :  { %1112 = vrot.lane.b32.xlu1 %v11611_v59, %s11268_s29 }
 0x595   :  { %1104 = vrot.lane.b32.xlu0 %v11611_v59, %s11267_s9 }
 0x596   :  { %1108 = vrot.lane.b32.xlu1 %v11605_v54, %s11268_s29 }
 0x599   :  { %1114 = vrot.lane.b32.xlu0 %v11609_v57, %s11268_s29 }
 0x59d   :  { %1110 = vrot.lane.b32.xlu0 %v11617_v60, %s11268_s29 }
 0x5f6   :  { %v951_v22 = vpop.xlane.xlu1 %950 }
 0x5f7   :  { %v959_v23 = vsub.f32 %v943_v55, %v951_v22 }
 0x5f8   :  { %v948_v25 = vpop.xlane.xlu0 %947 }
 0x5f9   :  { %v964_v27 = vmul.f32 1.442695, %v959_v23  ;;  %v958_v30 = vsub.f32 %v942_v7, %v948_v25 }
 0x5fa   :  { %v987_v32 = vpop.permute.xlu1 %986 }
 0x5fb   :  { %10944 = vpow2.f32 %v964_v27  ;;  %v962_v33 = vmul.f32 1.442695, %v958_v30 }
 0x5fc   :  { %v957_v34 = vpop.xlane.xlu0 %956 }
 0x5fd   :  { %10946 = vpow2.f32 %v962_v33  ;;  %v961_v35 = vsub.f32 %v945_v10, %v957_v34 }
 0x5fe   :  { %v985_v36 = vpop.permute.xlu1 %984 }
 0x5ff   :  { %v968_v37 = vmul.f32 1.442695, %v961_v35 }
 0x600   :  { %v954_v39 = vpop.xlane.xlu0 %953 }
 0x601   :  { %10948 = vpow2.f32 %v968_v37  ;;  %v960_v40 = vsub.f32 %v944_v16, %v954_v39 }
 0x602   :  { %v983_v41 = vpop.permute.xlu1 %982 }
 0x603   :  { %v966_v42 = vmul.f32 1.442695, %v960_v40 }
 0x604   :  { %v989_v45 = vpop.permute.xlu0 %988 }
 0x605   :  { %10950 = vpow2.f32 %v966_v42  ;;  %9995 = vmatprep.subr.mxu1 %v989_v45 }
 0x606   :  { %v1103_v46 = vpop.permute.xlu1 %1102  ;;  %9996 = vmatpush3.msra.mxu1 %v989_v45 }
 0x607   :  { %9997 = vmatprep.subr.mxu1 %v987_v32 }
 0x608   :  { %v10945_v47 = vpop.eup %10944  ;;  %9998 = vmatpush3.msra.mxu1 %v987_v32  ;;  %v1101_v48 = vpop.permute.xlu0 %1100 }
 0x609   :  { %9999 = vmatprep.subr.mxu1 %v985_v36  ;;  %10017 = vmatprep.mubr.msk.f32.mxu0 %vm541_vm2, %v1101_v48  ;;  %v973_v51 = vsel %vm339_vm1, %v10945_v47, 0.0 }
 0x60a   :  { %v10947_v52 = vpop.eup %10946  ;;  %974 = vadd.xlane.f32.xlu1 %v973_v51  ;;  %10000 = vmatpush3.msra.mxu1 %v985_v36  ;;  %v1107_v55 = vpop.permute.xlu1 %1106 }
 0x60b   :  { %10001 = vmatprep.subr.mxu1 %v983_v41  ;;  %10003 = vmatprep.mubr.msk.f32.mxu1 %vm339_vm1, %v10947_v52  ;;  %v970_v53 = vsel %vm339_vm1, %v10947_v52, 0.0 }
 0x60c   :  { %971 = vadd.xlane.f32.xlu0 %v970_v53  ;;  %10002 = vmatpush3.msra.mxu1 %v983_v41  ;;  %v1105_v58 = vpop.permute.xlu0 %1104 }
 0x60d   :  { %10004 = vmatmul.mubr.msk.f32.vlgmr.msra.gmra.mxu1 %vm339_vm1, %v10945_v47  ;;  %10023 = vmatprep.subr.mxu1 %v11631_v1 }
 0x60e   :  { %v10949_v62 = vpop.eup %10948  ;;  %10024 = vmatpush3.msra.mxu1 %v11631_v1  ;;  %v1113_v8 = vpop.permute.xlu1 %1112 }
 0x60f   :  { %v979_v63 = vsel %vm339_vm1, %v10949_v62, 0.0  ;;  %10045 = vmatprep.subr.mxu1 %v11671_v6 }
 0x610   :  { %980 = vadd.xlane.f32.xlu1 %v979_v63  ;;  %v1115_v0 = vpop.permute.xlu0 %1114 }
 0x611   :  { %10009 = vmatprep.subr.msk.mxu0 %vm541_vm2, %v1115_v0 }
 0x612   :  { %v10951_v7 = vpop.eup %10950  ;;  %10010 = vmatpush3.xpose.msk.msra.mxu0 %vm541_vm2, %v1115_v0  ;;  %v1109_v10 = vpop.permute.xlu1 %1108 }
 0x613   :  { %10006 = vmatprep.mubr.msk.f32.mxu1 %vm339_vm1, %v10951_v7  ;;  %10011 = vmatprep.subr.msk.mxu0 %vm541_vm2, %v1113_v8  ;;  %v976_v9 = vsel %vm339_vm1, %v10951_v7, 0.0 }
 0x614   :  { %977 = vadd.xlane.f32.xlu0 %v976_v9  ;;  %10007 = vmatmul.mubr.msk.f32.gmra.mxu1 %vm339_vm1, %v10949_v62  ;;  %v1111_v11 = vpop.permute.xlu0 %1110 }
 0x615   :  { %10025 = vmatprep.mubr.msk.f32.mxu1 %vm541_vm2, %v1101_v48 }
 0x616   :  { %10012 = vmatpush3.xpose.msk.msra.mxu0 %vm541_vm2, %v1113_v8 }
 0x617   :  { %10013 = vmatprep.subr.msk.mxu0 %vm541_vm2, %v1111_v11 }
 0x618   :  { %10026 = vmatmul.mubr.msk.f32.vlgmr.msra.gmra.mxu1 %vm541_vm2, %v1103_v46 }
 0x619   :  { %10028 = vmatprep.mubr.msk.f32.mxu1 %vm541_vm2, %v1105_v58  ;;  %10046 = vmatpush3.msra.mxu1 %v11671_v6 }
 0x61a   :  { %10014 = vmatpush3.xpose.msk.msra.mxu0 %vm541_vm2, %v1111_v11  ;;  %10047 = vmatprep.subr.mxu1 %v11690_v20 }
 0x61b   :  { %10015 = vmatprep.subr.msk.mxu0 %vm541_vm2, %v1109_v10  ;;  %10048 = vmatpush3.msra.mxu1 %v11690_v20 }
 0x61c   :  { %10029 = vmatmul.mubr.msk.f32.gmra.mxu1 %vm541_vm2, %v1107_v55  ;;  %10049 = vmatprep.subr.mxu1 %v11699_v24 }
 0x61d   :  { %10050 = vmatpush3.msra.mxu1 %v11699_v24 }
 0x61e   :  { %10016 = vmatpush3.xpose.msk.msra.mxu0 %vm541_vm2, %v1109_v10  ;;  %10051 = vmatprep.subr.mxu1 %v11710_v28 }
 0x61f   :  { %10031 = vmatprep.subr.mxu0 %v11651_v2  ;;  %10052 = vmatpush3.msra.mxu1 %v11710_v28 }
 0x621   :  { %10018 = vmatmul.mubr.msk.f32.vlgmr.msra.gmra.mxu0 %vm541_vm2, %v1103_v46 }
 0x622   :  { %10020 = vmatprep.mubr.msk.f32.mxu0 %vm541_vm2, %v1105_v58  ;;  %10032 = vmatpush3.msra.mxu0 %v11651_v2 }
 0x623   :  { %10033 = vmatprep.subr.mxu0 %v11656_v3 }
 0x624   :  { %10034 = vmatpush3.msra.mxu0 %v11656_v3 }
 0x625   :  { %10021 = vmatmul.mubr.msk.f32.gmra.mxu0 %vm541_vm2, %v1107_v55  ;;  %10035 = vmatprep.subr.mxu0 %v11661_v4 }
 0x626   :  { %10036 = vmatpush3.msra.mxu0 %v11661_v4 }
 0x627   :  { %10037 = vmatprep.subr.mxu0 %v11666_v5 }
 0x628   :  { %10038 = vmatpush3.msra.mxu0 %v11666_v5 }
 0x6cd   :  { %v11816_v15 = vpop.f32.mrf.mxu1 }
 0x6cf   :  { %v11818_v16 = vpop.f32.mrf.mxu1 }
 0x6d4   :  { %v11820_v17 = vpop.f32.mrf.mxu1 }
 0x6d6   :  { %v11822_v22 = vpop.f32.mrf.mxu1 }
 0x6d8   :  { %v10027_v23 = vpop.f32.mrf.mxu1 }
 0x6d9   :  { %v1307_v32 = vmul.f32 %v10027_v23, %v11678_v13  ;;  %v1412_v33 = vmul.f32 %v10027_v23, %v11704_v26 }
 0x6da   :  { %v1287_v25 = vpop.f32.mrf.mxu1 }
 0x6db   :  { %v1306_v27 = vmul.f32 %v1287_v25, %v11675_v12  ;;  %v1411_v30 = vmul.f32 %v1287_v25, %v11693_v21 }
 0x6dc   :  { %v10030_v34 = vpop.f32.mrf.mxu1 }
 0x6dd   :  { %10039 = vmatprep.mubr.msk.f32.mxu0 %vm339_vm1, %v1306_v27  ;;  %10053 = vmatprep.mubr.msk.f32.mxu1 %vm339_vm1, %v1411_v30  ;;  %v1309_v39 = vmul.f32 %v10030_v34, %v11686_v19  ;;  %v1414_v40 = vmul.f32 %v10030_v34, %v11722_v31 }
 0x6de   :  { %v1297_v35 = vpop.f32.mrf.mxu1  ;;  %10040 = vmatmul.mubr.msk.f32.vlgmr.msra.gmra.mxu0 %vm339_vm1, %v1307_v32  ;;  %10054 = vmatmul.mubr.msk.f32.vlgmr.msra.gmra.mxu1 %vm339_vm1, %v1412_v33 }
 0x6df   :  { %v1308_v36 = vmul.f32 %v1297_v35, %v11683_v18  ;;  %v1413_v37 = vmul.f32 %v1297_v35, %v11713_v29 }
 0x6e1   :  { %10042 = vmatprep.mubr.msk.f32.mxu0 %vm339_vm1, %v1308_v36  ;;  %10056 = vmatprep.mubr.msk.f32.mxu1 %vm339_vm1, %v1413_v37  ;;  %v10019_v41 = vpop.f32.mrf.mxu0 }
 0x6e2   :  { %10043 = vmatmul.mubr.msk.f32.gmra.mxu0 %vm339_vm1, %v1309_v39  ;;  %10057 = vmatmul.mubr.msk.f32.gmra.mxu1 %vm339_vm1, %v1414_v40  ;;  %v1218_v47 = vmul.f32 0.35355338, %v10019_v41 }
 0x6e3   :  { %v1198_v42 = vpop.f32.mrf.mxu0 }
 0x6e4   :  { %v1217_v52 = vmul.f32 0.35355338, %v1198_v42  ;;  %v975_v42 = vpop.xlane.xlu1 %974 }
 0x6e5   :  { %v10022_v45 = vpop.f32.mrf.mxu0 }
 0x6e6   :  { %v1220_v62 = vmul.f32 0.35355338, %v10022_v45  ;;  %v972_v45 = vpop.xlane.xlu0 %971 }
 0x6e7   :  { %v1208_v46 = vpop.f32.mrf.mxu0 }
 0x6e8   :  { %v1219_v9 = vmul.f32 0.35355338, %v1208_v46  ;;  %v981_v46 = vpop.xlane.xlu1 %980 }
 0x79e   :  { %v10041_v48 = vpop.f32.mrf.mxu0  ;;  %v10055_v51 = vpop.f32.mrf.mxu1 }
 0x79f   :  { %v1408_v53 = vadd.f32 %v10041_v48, %v1218_v47  ;;  %v978_v47 = vpop.xlane.xlu0 %977 }
 0x7a0   :  { %v1388_v55 = vpop.f32.mrf.mxu0  ;;  %v1493_v58 = vpop.f32.mrf.mxu1 }
 0x7a1   :  { %v1513_v63 = vadd.f32 %v10055_v51, %v1408_v53  ;;  %v1407_v0 = vadd.f32 %v1388_v55, %v1217_v52 }
 0x7a2   :  { %v10044_v7 = vpop.f32.mrf.mxu0  ;;  %v10058_v8 = vpop.f32.mrf.mxu1 }
 0x7a3   :  { %v1512_v11 = vadd.f32 %v1493_v58, %v1407_v0  ;;  %v1410_v10 = vadd.f32 %v10044_v7, %v1220_v62  ;;  %v1517_v23 = vadd.f32 %v1513_v63, %v11731_v43 }
 0x7a4   :  { %v1398_v25 = vpop.f32.mrf.mxu0  ;;  %v1503_v34 = vpop.f32.mrf.mxu1 }
 0x7a5   :  { %v1515_v27 = vadd.f32 %v10058_v8, %v1410_v10  ;;  %v1409_v30 = vadd.f32 %v1398_v25, %v1219_v9  ;;  %v1523_v32 = vsel %vm339_vm1, %v1517_v23, -inf  ;;  %v1516_v33 = vadd.f32 %v1512_v11, %v11734_v49 }
 0x7a6   :  { %1524 = vmax.xlane.f32.xlu1 %v1523_v32 }
 0x7a7   :  { %v1514_v35 = vadd.f32 %v1503_v34, %v1409_v30  ;;  %v1520_v36 = vsel %vm339_vm1, %v1516_v33, -inf  ;;  %v1519_v37 = vadd.f32 %v1515_v27, %v11738_v61 }
 0x7a8   :  { %1521 = vmax.xlane.f32.xlu0 %v1520_v36 }
 0x7a9   :  { %v1529_v39 = vsel %vm339_vm1, %v1519_v37, -inf  ;;  %v1518_v40 = vadd.f32 %v1514_v35, %v11745_v14  ;;  %v1099_v35 = vld [vmem:[%s13095_s14] sm:$0xff] }
 0x7ab   :  { %v1526_v41 = vsel %vm339_vm1, %v1518_v40, -inf }
 0x7ac   :  { %1530 = vmax.xlane.f32.xlu0 %v1529_v39 }
 0x7b0   :  { %1527 = vmax.xlane.f32.xlu0 %v1526_v41 }
 0x7b7   :  { %1560 = vrot.lane.b32.xlu1 %v11611_v59, %s11269_s3 }
 0x7bb   :  { %1558 = vrot.lane.b32.xlu1 %v11617_v60, %s11269_s3 }
 0x7bf   :  { %1556 = vrot.lane.b32.xlu1 %v11605_v54, %s11269_s3 }
 0x7c3   :  { %1870 = vrot.lane.b32.xlu1 %v11617_v60, %s11270_s8 }
 0x7c6   :  { %1562 = vrot.lane.b32.xlu0 %v11609_v57, %s11269_s3 }
 0x7c7   :  { %1874 = vrot.lane.b32.xlu1 %v11609_v57, %s11270_s8 }
 0x7ca   :  { %1868 = vrot.lane.b32.xlu0 %v11605_v54, %s11270_s8 }
 0x7ce   :  { %1872 = vrot.lane.b32.xlu0 %v11611_v59, %s11270_s8 }
 0x82f   :  { %v1525_v48 = vpop.xlane.xlu1 %1524 }
 0x830   :  { %v1533_v51 = vsub.f32 %v1517_v23, %v1525_v48 }
 0x831   :  { %v1522_v52 = vpop.xlane.xlu0 %1521 }
 0x832   :  { %v1538_v53 = vmul.f32 1.442695, %v1533_v51  ;;  %v1532_v55 = vsub.f32 %v1516_v33, %v1522_v52 }
 0x833   :  { %v1561_v0 = vpop.permute.xlu1 %1560 }
 0x834   :  { %10952 = vpow2.f32 %v1538_v53  ;;  %v1536_v58 = vmul.f32 1.442695, %v1532_v55 }
 0x835   :  { %v1531_v62 = vpop.xlane.xlu0 %1530 }
 0x836   :  { %10954 = vpow2.f32 %v1536_v58  ;;  %v1535_v63 = vsub.f32 %v1519_v37, %v1531_v62 }
 0x837   :  { %10956 = vrcp.f32 %v972_v45  ;;  %v1559_v10 = vpop.permute.xlu1 %1558 }
 0x838   :  { %v1542_v7 = vmul.f32 1.442695, %v1535_v63 }
 0x839   :  { %v1528_v8 = vpop.xlane.xlu0 %1527 }
 0x83a   :  { %10958 = vpow2.f32 %v1542_v7  ;;  %v1534_v9 = vsub.f32 %v1518_v40, %v1528_v8 }
 0x83b   :  { %10960 = vrcp.f32 %v975_v42  ;;  %v1557_v32 = vpop.permute.xlu1 %1556 }
 0x83c   :  { %10962 = vrcp.f32 %v978_v47  ;;  %v1540_v11 = vmul.f32 1.442695, %v1534_v9 }
 0x83d   :  { %v1563_v25 = vpop.permute.xlu0 %1562 }
 0x83e   :  { %10964 = vpow2.f32 %v1540_v11  ;;  %10059 = vmatprep.subr.mxu0 %v1563_v25  ;;  %10869 = vmatprep.subr.mxu1 %v1563_v25 }
 0x83f   :  { %10966 = vrcp.f32 %v981_v46  ;;  %10060 = vmatpush3.msra.mxu0 %v1563_v25  ;;  %10873 = vmatpush3.msra.mxu1 %v1563_v25 }
 0x840   :  { %10061 = vmatprep.subr.mxu0 %v1561_v0  ;;  %10870 = vmatprep.subr.mxu1 %v1561_v0 }
 0x841   :  { %v10953_v23 = vpop.eup %10952  ;;  %10062 = vmatpush3.msra.mxu0 %v1561_v0  ;;  %10874 = vmatpush3.msra.mxu1 %v1561_v0  ;;  %v11880_v51 = vpop.permute.xlu0 %1868 }
 0x842   :  { %10063 = vmatprep.subr.mxu0 %v1559_v10  ;;  %10871 = vmatprep.subr.mxu1 %v1559_v10  ;;  %v1547_v27 = vsel %vm339_vm1, %v10953_v23, 0.0 }
 0x843   :  { %v10955_v30 = vpop.eup %10954  ;;  %1548 = vadd.xlane.f32.xlu1 %v1547_v27  ;;  %10064 = vmatpush3.msra.mxu0 %v1559_v10 }
 0x844   :  { %10875 = vmatpush3.msra.mxu1 %v1559_v10  ;;  %10065 = vmatprep.subr.mxu0 %v1557_v32  ;;  %v1544_v33 = vsel %vm339_vm1, %v10955_v30, 0.0  ;;  %v10957_v34 = vpop.eup %10956 }
 0x845   :  { %10872 = vmatprep.subr.mxu1 %v1557_v32  ;;  %10067 = vmatprep.mubr.msk.f32.mxu0 %vm339_vm1, %v10955_v30  ;;  %v1092_v36 = vmul.f32 %v10957_v34, %v11818_v16 }
 0x846   :  { %1545 = vadd.xlane.f32.xlu0 %v1544_v33  ;;  %10066 = vmatpush3.msra.mxu0 %v1557_v32 }
 0x847   :  { %v10959_v37 = vpop.eup %10958  ;;  %10876 = vmatpush3.msra.mxu1 %v1557_v32  ;;  %10068 = vmatmul.mubr.msk.f32.vlgmr.msra.gmra.mxu0 %vm339_vm1, %v10953_v23 }
 0x848   :  { %v10961_v39 = vpop.eup %10960  ;;  %10083 = vmatprep.mubr.msk.f32.mxu0 %vm541_vm2, %v1092_v36  ;;  %10081 = vmatprep.subr.mxu0 %v1099_v35  ;;  %v1553_v40 = vsel %vm339_vm1, %v10959_v37, 0.0 }
 0x849   :  { %v10963_v41 = vpop.eup %10962  ;;  %v1094_v42 = vmul.f32 %v10961_v39, %v11816_v15  ;;  %10082 = vmatpush3.msra.mxu0 %v1099_v35  ;;  %v11886_v15 = vpop.permute.xlu1 %1870 }
 0x84a   :  { %v1096_v45 = vmul.f32 %v10963_v41, %v11822_v22  ;;  %1554 = vadd.xlane.f32.xlu0 %v1553_v40  ;;  %10103 = vmatprep.subr.mxu0 %v11631_v1  ;;  %v11890_v22 = vpop.permute.xlu0 %1872 }
 0x84b   :  { %v10965_v16 = vpop.eup %10964  ;;  %10084 = vmatmul.mubr.msk.f32.vlgmr.msra.gmra.mxu0 %vm541_vm2, %v1094_v42 }
 0x84c   :  { %v10967_v46 = vpop.eup %10966  ;;  %10086 = vmatprep.mubr.msk.f32.mxu0 %vm541_vm2, %v1096_v45  ;;  %10070 = vmatprep.mubr.msk.f32.mxu1 %vm339_vm1, %v10965_v16  ;;  %v1550_v47 = vsel %vm339_vm1, %v10965_v16, 0.0 }
 0x84d   :  { %v1098_v48 = vmul.f32 %v10967_v46, %v11820_v17  ;;  %10071 = vmatmul.mubr.msk.f32.vlgmr.msra.gmra.mxu1 %vm339_vm1, %v10959_v37  ;;  %10104 = vmatpush3.msra.mxu0 %v11631_v1  ;;  %v11899_v1 = vpop.permute.xlu1 %1874  ;;  %v1673_v17 = vld [vmem:[%s13095_s14 + $0x8] sm:$0xff] }
 0x84e   :  { %1551 = vadd.xlane.f32.xlu0 %v1550_v47  ;;  %10111 = vmatprep.subr.mxu0 %v11651_v2 }
 0x84f   :  { %10087 = vmatmul.mubr.msk.f32.gmra.mxu0 %vm541_vm2, %v1098_v48  ;;  %10073 = vmatprep.subr.mxu1 %v1673_v17 }
 0x850   :  { %10105 = vmatprep.mubr.msk.f32.mxu0 %vm541_vm2, %v11880_v51  ;;  %10074 = vmatpush3.msra.mxu1 %v1673_v17 }
 0x853   :  { %10106 = vmatmul.mubr.msk.f32.vlgmr.msra.gmra.mxu0 %vm541_vm2, %v11886_v15 }
 0x854   :  { %10108 = vmatprep.mubr.msk.f32.mxu0 %vm541_vm2, %v11890_v22  ;;  %1880 = vrot.lane.b32.xlu1 %v11611_v59, %s11271_s19 }
 0x855   :  { %10112 = vmatpush3.msra.mxu0 %v11651_v2 }
 0x856   :  { %10113 = vmatprep.subr.mxu0 %v11656_v3 }
 0x857   :  { %10109 = vmatmul.mubr.msk.f32.gmra.mxu0 %vm541_vm2, %v11899_v1 }
 0x858   :  { %1878 = vrot.lane.b32.xlu1 %v11617_v60, %s11271_s19  ;;  %10114 = vmatpush3.msra.mxu0 %v11656_v3 }
 0x859   :  { %10115 = vmatprep.subr.mxu0 %v11661_v4 }
 0x85a   :  { %10116 = vmatpush3.msra.mxu0 %v11661_v4 }
 0x85b   :  { %10117 = vmatprep.subr.mxu0 %v11666_v5 }
 0x85c   :  { %1876 = vrot.lane.b32.xlu1 %v11605_v54, %s11271_s19  ;;  %10118 = vmatpush3.msra.mxu0 %v11666_v5 }
 0x864   :  { %1882 = vrot.lane.b32.xlu0 %v11609_v57, %s11271_s19 }
 0x8cc   :  { %v1549_v55 = vpop.xlane.xlu1 %1548 }
 0x8cf   :  { %v1546_v2 = vpop.xlane.xlu0 %1545 }
 0x8d0   :  { %10968 = vrcp.f32 %v1546_v2  ;;  %v1881_v0 = vpop.permute.xlu1 %1880 }
 0x8d1   :  { %10970 = vrcp.f32 %v1549_v55 }
 0x8d3   :  { %v1555_v52 = vpop.xlane.xlu0 %1554 }
 0x8d4   :  { %v1879_v30 = vpop.permute.xlu1 %1878 }
 0x8d7   :  { %v1552_v53 = vpop.xlane.xlu0 %1551 }
 0x8d8   :  { %10972 = vrcp.f32 %v1552_v53  ;;  %v1877_v37 = vpop.permute.xlu1 %1876 }
 0x8d9   :  { %10974 = vrcp.f32 %v1555_v52 }
 0x8db   :  { %v1883_v3 = vpop.permute.xlu0 %1882 }
 0x8dc   :  { %10089 = vmatprep.subr.msk.mxu1 %vm541_vm2, %v1883_v3 }
 0x8dd   :  { %v10969_v58 = vpop.eup %10968 }
 0x8de   :  { %v10971_v63 = vpop.eup %10970 }
 0x8e5   :  { %v10973_v10 = vpop.eup %10972 }
 0x8e6   :  { %v10975_v27 = vpop.eup %10974 }
 0x907   :  { %v10069_v4 = vpop.f32.mrf.mxu0 }
 0x908   :  { %v1668_v7 = vmul.f32 %v10971_v63, %v10069_v4 }
 0x909   :  { %v1646_v62 = vpop.f32.mrf.mxu0 }
 0x90a   :  { %v1666_v5 = vmul.f32 %v10969_v58, %v1646_v62 }
 0x90b   :  { %v11917_v8 = vpop.f32.mrf.mxu0 }
 0x90c   :  { %10075 = vmatprep.mubr.msk.f32.mxu1 %vm541_vm2, %v1666_v5 }
 0x90d   :  { %10076 = vmatmul.mubr.msk.f32.vlgmr.msra.gmra.mxu1 %vm541_vm2, %v1668_v7  ;;  %v11921_v9 = vpop.f32.mrf.mxu0  ;;  %v10072_v11 = vpop.f32.mrf.mxu1 }
 0x90e   :  { %10090 = vmatpush3.xpose.msk.msra.mxu1 %vm541_vm2, %v1883_v3  ;;  %v1672_v33 = vmul.f32 %v10975_v27, %v10072_v11 }
 0x90f   :  { %10091 = vmatprep.subr.msk.mxu1 %vm541_vm2, %v1881_v0  ;;  %v11925_v25 = vpop.f32.mrf.mxu0  ;;  %v1656_v23 = vpop.f32.mrf.mxu1 }
 0x910   :  { %v1670_v32 = vmul.f32 %v10973_v10, %v1656_v23 }
 0x911   :  { %v11927_v34 = vpop.f32.mrf.mxu0 }
 0x912   :  { %10092 = vmatpush3.xpose.msk.msra.mxu1 %vm541_vm2, %v1881_v0  ;;  %10078 = vmatprep.mubr.msk.f32.mxu1 %vm541_vm2, %v1670_v32 }
 0x913   :  { %10093 = vmatprep.subr.msk.mxu1 %vm541_vm2, %v1879_v30  ;;  %v10107_v35 = vpop.f32.mrf.mxu0  ;;  %10079 = vmatmul.mubr.msk.f32.gmra.mxu1 %vm541_vm2, %v1672_v33 }
 0x914   :  { %10097 = vmatprep.mubr.msk.f32.mxu1 %vm541_vm2, %v11880_v51  ;;  %v2075_v40 = vmul.f32 %v10107_v35, %v11678_v13  ;;  %v2180_v13 = vmul.f32 %v10107_v35, %v11704_v26 }
 0x915   :  { %v2055_v36 = vpop.f32.mrf.mxu0 }
 0x916   :  { %10094 = vmatpush3.xpose.msk.msra.mxu1 %vm541_vm2, %v1879_v30  ;;  %v2074_v39 = vmul.f32 %v2055_v36, %v11675_v12  ;;  %v2179_v12 = vmul.f32 %v2055_v36, %v11693_v21 }
 0x917   :  { %10095 = vmatprep.subr.msk.mxu1 %vm541_vm2, %v1877_v37  ;;  %v10110_v41 = vpop.f32.mrf.mxu0 }
 0x918   :  { %10119 = vmatprep.mubr.msk.f32.mxu0 %vm339_vm1, %v2074_v39  ;;  %v2077_v16 = vmul.f32 %v10110_v41, %v11686_v19 }
 0x919   :  { %v2065_v42 = vpop.f32.mrf.mxu0  ;;  %10120 = vmatmul.mubr.msk.f32.vlgmr.msra.gmra.mxu0 %vm339_vm1, %v2075_v40 }
 0x91a   :  { %10096 = vmatpush3.xpose.msk.msra.mxu1 %vm541_vm2, %v1877_v37  ;;  %v2076_v45 = vmul.f32 %v2065_v42, %v11683_v18  ;;  %v2182_v18 = vmul.f32 %v10110_v41, %v11722_v31 }
 0x91b   :  { %10125 = vmatprep.subr.mxu1 %v11671_v6 }
 0x91c   :  { %10122 = vmatprep.mubr.msk.f32.mxu0 %vm339_vm1, %v2076_v45 }
 0x91d   :  { %10098 = vmatmul.mubr.msk.f32.vlgmr.msra.gmra.mxu1 %vm541_vm2, %v11886_v15  ;;  %10123 = vmatmul.mubr.msk.f32.gmra.mxu0 %vm339_vm1, %v2077_v16 }
 0x91e   :  { %10100 = vmatprep.mubr.msk.f32.mxu1 %vm541_vm2, %v11890_v22  ;;  %10126 = vmatpush3.msra.mxu1 %v11671_v6  ;;  %v2181_v6 = vmul.f32 %v2065_v42, %v11713_v29 }
 0x91f   :  { %10127 = vmatprep.subr.mxu1 %v11690_v20 }
 0x920   :  { %10128 = vmatpush3.msra.mxu1 %v11690_v20 }
 0x921   :  { %10101 = vmatmul.mubr.msk.f32.gmra.mxu1 %vm541_vm2, %v11899_v1  ;;  %10129 = vmatprep.subr.mxu1 %v11699_v24 }
 0x922   :  { %10130 = vmatpush3.msra.mxu1 %v11699_v24  ;;  %10133 = vmatprep.mubr.msk.f32.mxu1 %vm339_vm1, %v2179_v12 }
 0x923   :  { %10131 = vmatprep.subr.mxu1 %v11710_v28 }
 0x924   :  { %10132 = vmatpush3.msra.mxu1 %v11710_v28 }
 0x925   :  { %10134 = vmatmul.mubr.msk.f32.vlgmr.msra.gmra.mxu1 %vm339_vm1, %v2180_v13 }
 0x926   :  { %10136 = vmatprep.mubr.msk.f32.mxu1 %vm339_vm1, %v2181_v6 }
 0x929   :  { %10137 = vmatmul.mubr.msk.f32.gmra.mxu1 %vm339_vm1, %v2182_v18 }
 0x9cd   :  { %v11968_v19 = vpop.f32.mrf.mxu1 }
 0x9cf   :  { %v11970_v20 = vpop.f32.mrf.mxu1 }
 0x9d3   :  { %v11972_v21 = vpop.f32.mrf.mxu1 }
 0x9d5   :  { %v11974_v24 = vpop.f32.mrf.mxu1 }
 0x9d9   :  { %v10121_v26 = vpop.f32.mrf.mxu0 }
 0x9db   :  { %v2156_v47 = vpop.f32.mrf.mxu0 }
 0x9dd   :  { %v10099_v29 = vpop.f32.mrf.mxu1  ;;  %v10124_v1 = vpop.f32.mrf.mxu0 }
 0x9de   :  { %v1986_v28 = vmul.f32 0.35355338, %v10099_v29 }
 0x9df   :  { %v1966_v46 = vpop.f32.mrf.mxu1  ;;  %v2166_v62 = vpop.f32.mrf.mxu0 }
 0x9e0   :  { %v1985_v51 = vmul.f32 0.35355338, %v1966_v46  ;;  %v2176_v31 = vadd.f32 %v10121_v26, %v1986_v28 }
 0x9e1   :  { %v10102_v48 = vpop.f32.mrf.mxu1 }
 0x9e2   :  { %v1988_v22 = vmul.f32 0.35355338, %v10102_v48  ;;  %v2175_v53 = vadd.f32 %v2156_v47, %v1985_v51 }
 0x9e3   :  { %v1976_v15 = vpop.f32.mrf.mxu1 }
 0x9e4   :  { %v1987_v2 = vmul.f32 0.35355338, %v1976_v15  ;;  %v2178_v4 = vadd.f32 %v10124_v1, %v1988_v22  ;;  %v2441_v22 = vld [vmem:[%s13095_s14 + $0x10] sm:$0xff] }
 0x9e5   :  { %v10135_v17 = vpop.f32.mrf.mxu1  ;;  %10153 = vmatprep.subr.mxu1 %v2441_v22 }
 0x9e6   :  { %v2281_v52 = vadd.f32 %v10135_v17, %v2176_v31  ;;  %v2177_v7 = vadd.f32 %v2166_v62, %v1987_v2  ;;  %10154 = vmatpush3.msra.mxu1 %v2441_v22  ;;  %v11144_v31 = vld [vmem:[%s11298_s13] sm:$0xff]  ;;  %v11156_v22 = vld [vmem:[%s11308_s21 + $0x8] sm:$0xff] }
 0x9e7   :  { %v2261_v3 = vpop.f32.mrf.mxu1  ;;  %10175 = vmatprep.subr.mxu1 %v11144_v31 }
 0x9e8   :  { %v2280_v55 = vadd.f32 %v2261_v3, %v2175_v53  ;;  %v2285_v58 = vadd.f32 %v2281_v52, %v11731_v43 }
 0x9e9   :  { %v10138_v63 = vpop.f32.mrf.mxu1 }
 0x9ea   :  { %v2283_v0 = vadd.f32 %v10138_v63, %v2178_v4  ;;  %v2291_v5 = vsel %vm339_vm1, %v2285_v58, -inf  ;;  %v2284_v11 = vadd.f32 %v2280_v55, %v11734_v49 }
 0x9eb   :  { %2292 = vmax.xlane.f32.xlu1 %v2291_v5  ;;  %v2271_v10 = vpop.f32.mrf.mxu1  ;;  %v11145_v5 = vld [vmem:[%s11353_s6 + $0x18] sm:$0xff] }
 0x9ec   :  { %v2282_v23 = vadd.f32 %v2271_v10, %v2177_v7  ;;  %v2288_v27 = vsel %vm339_vm1, %v2284_v11, -inf  ;;  %v2287_v30 = vadd.f32 %v2283_v0, %v11738_v61  ;;  %v11146_v7 = vld [vmem:[%s11353_s6 + $0x10] sm:$0xff]  ;;  %v11148_v10 = vld [vmem:[%s11353_s6] sm:$0xff] }
 0x9ed   :  { %2289 = vmax.xlane.f32.xlu0 %v2288_v27 }
 0x9ee   :  { %v2297_v32 = vsel %vm339_vm1, %v2287_v30, -inf  ;;  %v2286_v43 = vadd.f32 %v2282_v23, %v11745_v14 }
 0x9f0   :  { %v2294_v33 = vsel %vm339_vm1, %v2286_v43, -inf }
 0x9f1   :  { %2298 = vmax.xlane.f32.xlu0 %v2297_v32 }
 0x9f5   :  { %2295 = vmax.xlane.f32.xlu0 %v2294_v33 }
 0x9fc   :  { %2328 = vrot.lane.b32.xlu1 %v11611_v59, %s11272_s24 }
 0xa00   :  { %2326 = vrot.lane.b32.xlu1 %v11617_v60, %s11272_s24 }
 0xa04   :  { %2324 = vrot.lane.b32.xlu1 %v11605_v54, %s11272_s24 }
 0xa0b   :  { %2330 = vrot.lane.b32.xlu0 %v11609_v57, %s11272_s24 }
 0xa74   :  { %v2293_v49 = vpop.xlane.xlu1 %2292 }
 0xa75   :  { %v2301_v61 = vsub.f32 %v2285_v58, %v2293_v49 }
 0xa76   :  { %v2290_v14 = vpop.xlane.xlu0 %2289 }
 0xa77   :  { %v2306_v35 = vmul.f32 1.442695, %v2301_v61  ;;  %v2300_v36 = vsub.f32 %v2284_v11, %v2290_v14  ;;  %v11147_v11 = vld [vmem:[%s11353_s6 + $0x8] sm:$0xff]  ;;  %v11149_v61 = vld [vmem:[%s11348_s30 + $0x18] sm:$0xff]  ;;  %s13096_s6 = sld [smem:[#allocation6_spill]] }
 0xa78   :  { %v2329_v40 = vpop.permute.xlu1 %2328 }
 0xa79   :  { %10976 = vpow2.f32 %v2306_v35  ;;  %v2304_v37 = vmul.f32 1.442695, %v2300_v36 }
 0xa7a   :  { %v2299_v39 = vpop.xlane.xlu0 %2298 }
 0xa7b   :  { %10978 = vpow2.f32 %v2304_v37  ;;  %v2303_v41 = vsub.f32 %v2287_v30, %v2299_v39 }
 0xa7c   :  { %v2327_v13 = vpop.permute.xlu1 %2326 }
 0xa7d   :  { %v2310_v16 = vmul.f32 1.442695, %v2303_v41  ;;  %v11151_v41 = vld [vmem:[%s11348_s30 + $0x8] sm:$0xff] }
 0xa7e   :  { %v2296_v42 = vpop.xlane.xlu0 %2295 }
 0xa7f   :  { %v2302_v45 = vsub.f32 %v2286_v43, %v2296_v42  ;;  %v11152_v42 = vld [vmem:[%s11348_s30] sm:$0xff] }
 0xa80   :  { %v2325_v46 = vpop.permute.xlu1 %2324 }
 0xa81   :  { %v2308_v12 = vmul.f32 1.442695, %v2302_v45  ;;  %v1855_v45 = vadd.f32 %v11917_v8, %v11968_v19  ;;  %v11154_v19 = vld [vmem:[%s11308_s21] sm:$0xff] }
 0xa82   :  { %v2331_v6 = vpop.permute.xlu0 %2330 }
 0xa83   :  { %10980 = vpow2.f32 %v2308_v12  ;;  %10139 = vmatprep.subr.mxu0 %v2331_v6 }
 0xa84   :  { %10982 = vpow2.f32 %v2310_v16  ;;  %10140 = vmatpush3.msra.mxu0 %v2331_v6  ;;  %v1865_v6 = vadd.f32 %v11925_v25, %v11972_v21 }
 0xa85   :  { %10141 = vmatprep.subr.mxu0 %v2329_v40 }
 0xa86   :  { %v10977_v18 = vpop.eup %10976  ;;  %10142 = vmatpush3.msra.mxu0 %v2329_v40  ;;  %v11150_v40 = vld [vmem:[%s11348_s30 + $0x10] sm:$0xff]  ;;  %s11275_s30 = smov 40  }
 0xa87   :  { %10143 = vmatprep.subr.mxu0 %v2327_v13  ;;  %v2315_v26 = vsel %vm339_vm1, %v10977_v18, 0.0 }
 0xa88   :  { %v10979_v29 = vpop.eup %10978  ;;  %2316 = vadd.xlane.f32.xlu1 %v2315_v26  ;;  %10144 = vmatpush3.msra.mxu0 %v2327_v13 }
 0xa89   :  { %10145 = vmatprep.subr.mxu0 %v2325_v46  ;;  %10147 = vmatprep.mubr.msk.f32.mxu0 %vm339_vm1, %v10979_v29  ;;  %v2312_v28 = vsel %vm339_vm1, %v10979_v29, 0.0 }
 0xa8a   :  { %2313 = vadd.xlane.f32.xlu0 %v2312_v28  ;;  %10146 = vmatpush3.msra.mxu0 %v2325_v46 }
 0xa8b   :  { %10148 = vmatmul.mubr.msk.f32.vlgmr.msra.gmra.mxu0 %vm339_vm1, %v10977_v18 }
 0xa90   :  { %v10981_v47 = vpop.eup %10980 }
 0xa91   :  { %v10983_v48 = vpop.eup %10982  ;;  %10150 = vmatprep.mubr.msk.f32.mxu0 %vm339_vm1, %v10981_v47  ;;  %v2318_v51 = vsel %vm339_vm1, %v10981_v47, 0.0  ;;  %v11153_v47 = vld [vmem:[%s11303_s17] sm:$0xff] }
 0xa92   :  { %2319 = vadd.xlane.f32.xlu0 %v2318_v51  ;;  %10151 = vmatmul.mubr.msk.f32.gmra.mxu0 %vm339_vm1, %v10983_v48  ;;  %v2321_v15 = vsel %vm339_vm1, %v10983_v48, 0.0  ;;  %v11155_v51 = vld [vmem:[%s11303_s17 + $0x8] sm:$0xff] }
 0xa96   :  { %2322 = vadd.xlane.f32.xlu0 %v2321_v15 }
 0xa99   :  { %2545 = vrot.lane.b32.xlu1 %v11617_v60, %s11273_s22 }
 0xa9d   :  { %2547 = vrot.lane.b32.xlu1 %v11611_v59, %s11273_s22 }
 0xaa1   :  { %2549 = vrot.lane.b32.xlu1 %v11609_v57, %s11273_s22 }
 0xaa5   :  { %2555 = vrot.lane.b32.xlu1 %v11611_v59, %s11274_s23 }
 0xaa9   :  { %2551 = vrot.lane.b32.xlu1 %v11605_v54, %s11274_s23 }
 0xaac   :  { %2543 = vrot.lane.b32.xlu0 %v11605_v54, %s11273_s22 }
 0xab0   :  { %2557 = vrot.lane.b32.xlu0 %v11609_v57, %s11274_s23 }
 0xab4   :  { %2553 = vrot.lane.b32.xlu0 %v11617_v60, %s11274_s23 }
 0xb11   :  { %v2317_v1 = vpop.xlane.xlu1 %2316 }
 0xb13   :  { %v2314_v17 = vpop.xlane.xlu0 %2313 }
 0xb14   :  { %10984 = vrcp.f32 %v2314_v17 }
 0xb15   :  { %v2546_v2 = vpop.permute.xlu1 %2545  ;;  %10986 = vrcp.f32 %v2317_v1  ;;  %v11157_v1 = vld [vmem:[%s11303_s17 + $0x10] sm:$0xff] }
 0xb19   :  { %v2548_v53 = vpop.permute.xlu1 %2547 }
 0xb1b   :  { %v2320_v52 = vpop.xlane.xlu0 %2319 }
 0xb1c   :  { %10988 = vrcp.f32 %v2320_v52 }
 0xb1d   :  { %v2550_v55 = vpop.permute.xlu1 %2549 }
 0xb1f   :  { %v2323_v3 = vpop.xlane.xlu0 %2322 }
 0xb20   :  { %10990 = vrcp.f32 %v2323_v3 }
 0xb21   :  { %v2556_v62 = vpop.permute.xlu1 %2555  ;;  %v10985_v27 = vpop.eup %10984 }
 0xb22   :  { %v10987_v32 = vpop.eup %10986 }
 0xb23   :  { %v2544_v4 = vpop.permute.xlu0 %2543 }
 0xb24   :  { %10169 = vmatprep.mubr.msk.f32.mxu0 %vm541_vm2, %v2544_v4 }
 0xb25   :  { %v2552_v0 = vpop.permute.xlu1 %2551 }
 0xb27   :  { %v2558_v58 = vpop.permute.xlu0 %2557 }
 0xb28   :  { %10161 = vmatprep.subr.msk.mxu0 %vm541_vm2, %v2558_v58 }
 0xb29   :  { %10162 = vmatpush3.xpose.msk.msra.mxu0 %vm541_vm2, %v2558_v58  ;;  %v10989_v14 = vpop.eup %10988 }
 0xb2a   :  { %10163 = vmatprep.subr.msk.mxu0 %vm541_vm2, %v2556_v62 }
 0xb2b   :  { %v2554_v63 = vpop.permute.xlu0 %2553 }
 0xb2d   :  { %10164 = vmatpush3.xpose.msk.msra.mxu0 %vm541_vm2, %v2556_v62  ;;  %v10991_v36 = vpop.eup %10990 }
 0xb2e   :  { %10165 = vmatprep.subr.msk.mxu0 %vm541_vm2, %v2554_v63 }
 0xb31   :  { %10166 = vmatpush3.xpose.msk.msra.mxu0 %vm541_vm2, %v2554_v63 }
 0xb32   :  { %10167 = vmatprep.subr.msk.mxu0 %vm541_vm2, %v2552_v0 }
 0xb35   :  { %10168 = vmatpush3.xpose.msk.msra.mxu0 %vm541_vm2, %v2552_v0 }
 0xb36   :  { %10197 = vmatprep.subr.mxu0 %v11145_v5 }
 0xb38   :  { %10170 = vmatmul.mubr.msk.f32.vlgmr.msra.gmra.mxu0 %vm541_vm2, %v2546_v2 }
 0xb39   :  { %10172 = vmatprep.mubr.msk.f32.mxu0 %vm541_vm2, %v2548_v53  ;;  %10198 = vmatpush3.msra.mxu0 %v11145_v5 }
 0xb3a   :  { %10199 = vmatprep.subr.mxu0 %v11146_v7 }
 0xb3b   :  { %10200 = vmatpush3.msra.mxu0 %v11146_v7 }
 0xb3c   :  { %10173 = vmatmul.mubr.msk.f32.gmra.mxu0 %vm541_vm2, %v2550_v55  ;;  %10201 = vmatprep.subr.mxu0 %v11147_v11 }
 0xb3d   :  { %10202 = vmatpush3.msra.mxu0 %v11147_v11 }
 0xb3e   :  { %10203 = vmatprep.subr.mxu0 %v11148_v10 }
 0xb3f   :  { %10204 = vmatpush3.msra.mxu0 %v11148_v10 }
 0xb4b   :  { %v10149_v23 = vpop.f32.mrf.mxu0 }
 0xb4c   :  { %v2436_v33 = vmul.f32 %v10987_v32, %v10149_v23 }
 0xb4d   :  { %v2414_v30 = vpop.f32.mrf.mxu0 }
 0xb4e   :  { %v2434_v43 = vmul.f32 %v10985_v27, %v2414_v30 }
 0xb50   :  { %10155 = vmatprep.mubr.msk.f32.mxu1 %vm541_vm2, %v2434_v43 }
 0xb51   :  { %10156 = vmatmul.mubr.msk.f32.vlgmr.msra.gmra.mxu1 %vm541_vm2, %v2436_v33 }
 0xb52   :  { %v10152_v49 = vpop.f32.mrf.mxu0  ;;  %10176 = vmatpush3.msra.mxu1 %v11144_v31 }
 0xb53   :  { %10183 = vmatprep.subr.mxu1 %v11149_v61  ;;  %v2440_v39 = vmul.f32 %v10991_v36, %v10152_v49 }
 0xb54   :  { %v2424_v35 = vpop.f32.mrf.mxu0 }
 0xb55   :  { %v2438_v37 = vmul.f32 %v10989_v14, %v2424_v35 }
 0xb57   :  { %10158 = vmatprep.mubr.msk.f32.mxu1 %vm541_vm2, %v2438_v37  ;;  %v11161_v37 = vld [vmem:[%s11313_s25 + $0x8] sm:$0xff] }
 0xb58   :  { %10159 = vmatmul.mubr.msk.f32.gmra.mxu1 %vm541_vm2, %v2440_v39 }
 0xb59   :  { %10177 = vmatprep.mubr.msk.f32.mxu1 %vm541_vm2, %v2544_v4 }
 0xb5c   :  { %10178 = vmatmul.mubr.msk.f32.vlgmr.msra.gmra.mxu1 %vm541_vm2, %v2546_v2  ;;  %v11158_v2 = vld [vmem:[%s11308_s21 + $0x10] sm:$0xff] }
 0xb5d   :  { %10180 = vmatprep.mubr.msk.f32.mxu1 %vm541_vm2, %v2548_v53  ;;  %10184 = vmatpush3.msra.mxu1 %v11149_v61  ;;  %v11159_v53 = vld [vmem:[%s11303_s17 + $0x18] sm:$0xff] }
 0xb5e   :  { %10185 = vmatprep.subr.mxu1 %v11150_v40 }
 0xb5f   :  { %10186 = vmatpush3.msra.mxu1 %v11150_v40 }
 0xb60   :  { %10181 = vmatmul.mubr.msk.f32.gmra.mxu1 %vm541_vm2, %v2550_v55  ;;  %10187 = vmatprep.subr.mxu1 %v11151_v41  ;;  %v11160_v55 = vld [vmem:[%s11308_s21 + $0x18] sm:$0xff] }
 0xb61   :  { %10188 = vmatpush3.msra.mxu1 %v11151_v41 }
 0xb62   :  { %10189 = vmatprep.subr.mxu1 %v11152_v42 }
 0xb63   :  { %10190 = vmatpush3.msra.mxu1 %v11152_v42 }
 0xbf8   :  { %v10171_v58 = vpop.f32.mrf.mxu0 }
 0xbf9   :  { %v2661_v5 = vmul.f32 0.35355338, %v10171_v58 }
 0xbfa   :  { %v2641_v62 = vpop.f32.mrf.mxu0 }
 0xbfb   :  { %v2660_v10 = vmul.f32 0.35355338, %v2641_v62 }
 0xbfc   :  { %v10174_v63 = vpop.f32.mrf.mxu0 }
 0xbfd   :  { %v2663_v32 = vmul.f32 0.35355338, %v10174_v63 }
 0xbfe   :  { %v2651_v0 = vpop.f32.mrf.mxu0 }
 0xbff   :  { %v2662_v14 = vmul.f32 0.35355338, %v2651_v0 }
 0xc11   :  { %v10157_v16 = vpop.f32.mrf.mxu1 }
 0xc12   :  { %v12048_v12 = vadd.f32 %v10157_v16, %v1855_v45  ;;  %v11162_v16 = vld [vmem:[%s11313_s25] sm:$0xff] }
 0xc13   :  { %v12050_v13 = vpop.f32.mrf.mxu1 }
 0xc18   :  { %v10160_v18 = vpop.f32.mrf.mxu1 }
 0xc19   :  { %v12054_v26 = vadd.f32 %v10160_v18, %v1865_v6 }
 0xc1a   :  { %v12056_v29 = vpop.f32.mrf.mxu1 }
 0xc1c   :  { %v10179_v46 = vpop.f32.mrf.mxu1 }
 0xc1d   :  { %v2750_v15 = vmul.f32 %v11155_v51, %v10179_v46  ;;  %v2855_v31 = vmul.f32 %v11156_v22, %v10179_v46 }
 0xc1e   :  { %v2730_v28 = vpop.f32.mrf.mxu1 }
 0xc1f   :  { %v2749_v8 = vmul.f32 %v11153_v47, %v2730_v28  ;;  %v2854_v48 = vmul.f32 %v11154_v19, %v2730_v28  ;;  %v11163_v47 = vld [vmem:[%s11313_s25 + $0x18] sm:$0xff] }
 0xc20   :  { %v10182_v25 = vpop.f32.mrf.mxu1 }
 0xc21   :  { %10191 = vmatprep.mubr.msk.f32.mxu1 %vm339_vm1, %v2749_v8  ;;  %10205 = vmatprep.mubr.msk.f32.mxu0 %vm339_vm1, %v2854_v48  ;;  %v2752_v3 = vmul.f32 %v11159_v53, %v10182_v25  ;;  %v2857_v4 = vmul.f32 %v11160_v55, %v10182_v25  ;;  %v11164_v48 = vld [vmem:[%s11313_s25 + $0x10] sm:$0xff] }
 0xc22   :  { %v2740_v21 = vpop.f32.mrf.mxu1  ;;  %10192 = vmatmul.mubr.msk.f32.vlgmr.msra.gmra.mxu1 %vm339_vm1, %v2750_v15  ;;  %10206 = vmatmul.mubr.msk.f32.vlgmr.msra.gmra.mxu0 %vm339_vm1, %v2855_v31 }
 0xc23   :  { %v2751_v17 = vmul.f32 %v11157_v1, %v2740_v21  ;;  %v2856_v52 = vmul.f32 %v11158_v2, %v2740_v21 }
 0xc25   :  { %10194 = vmatprep.mubr.msk.f32.mxu1 %vm339_vm1, %v2751_v17  ;;  %10208 = vmatprep.mubr.msk.f32.mxu0 %vm339_vm1, %v2856_v52 }
 0xc26   :  { %10195 = vmatmul.mubr.msk.f32.gmra.mxu1 %vm339_vm1, %v2752_v3  ;;  %10209 = vmatmul.mubr.msk.f32.gmra.mxu0 %vm339_vm1, %v2857_v4 }
 0xce2   :  { %v10193_v7 = vpop.f32.mrf.mxu1  ;;  %v10207_v11 = vpop.f32.mrf.mxu0 }
 0xce3   :  { %v2851_v23 = vadd.f32 %v10193_v7, %v2661_v5 }
 0xce4   :  { %v2831_v27 = vpop.f32.mrf.mxu1  ;;  %v2936_v30 = vpop.f32.mrf.mxu0 }
 0xce5   :  { %v2956_v43 = vadd.f32 %v10207_v11, %v2851_v23  ;;  %v2850_v33 = vadd.f32 %v2831_v27, %v2660_v10  ;;  %v3116_v23 = vld [vmem:[%s13095_s14 + $0x18] sm:$0xff]  ;;  %s13107_s14 = sld [smem:[#allocation17_spill]] }
 0xce6   :  { %v10196_v49 = vpop.f32.mrf.mxu1  ;;  %v10210_v61 = vpop.f32.mrf.mxu0  ;;  %10225 = vmatprep.subr.mxu0 %v3116_v23 }
 0xce7   :  { %v2955_v35 = vadd.f32 %v2936_v30, %v2850_v33  ;;  %v2853_v36 = vadd.f32 %v10196_v49, %v2663_v32  ;;  %v2960_v39 = vadd.f32 %v11161_v37, %v2956_v43  ;;  %10226 = vmatpush3.msra.mxu0 %v3116_v23  ;;  %v3308_v23 = vld [vmem:[%s13097_s26 + $0x8] sm:$0xff] }
 0xce8   :  { %v2841_v40 = vpop.f32.mrf.mxu1  ;;  %v2946_v18 = vpop.f32.mrf.mxu0 }
 0xce9   :  { %v2958_v41 = vadd.f32 %v10210_v61, %v2853_v36  ;;  %v2852_v42 = vadd.f32 %v2841_v40, %v2662_v14  ;;  %v2966_v45 = vsel %vm339_vm1, %v2960_v39, -inf  ;;  %v2959_v6 = vadd.f32 %v11162_v16, %v2955_v35 }
 0xcea   :  { %2967 = vmax.xlane.f32.xlu1 %v2966_v45  ;;  %v1850_v16 = vadd.f32 %v11921_v9, %v11970_v20 }
 0xceb   :  { %v2957_v46 = vadd.f32 %v2946_v18, %v2852_v42  ;;  %v2963_v28 = vsel %vm339_vm1, %v2959_v6, -inf  ;;  %v2962_v8 = vadd.f32 %v11163_v47, %v2958_v41 }
 0xcec   :  { %2964 = vmax.xlane.f32.xlu0 %v2963_v28  ;;  %v2539_v18 = vadd.f32 %v12050_v13, %v1850_v16  ;;  %v9124_v28 = vld [vmem:[%s13096_s6] ss:$0 sm:$0xff]  ;;  %s13108_s6 = sld [smem:[#allocation18_spill]] }
 0xced   :  { %v2972_v19 = vsel %vm339_vm1, %v2962_v8, -inf  ;;  %v2961_v51 = vadd.f32 %v11164_v48, %v2957_v46 }
 0xcef   :  { %v2969_v15 = vsel %vm339_vm1, %v2961_v51, -inf }
 0xcf0   :  { %2973 = vmax.xlane.f32.xlu0 %v2972_v19 }
 0xcf4   :  { %2970 = vmax.xlane.f32.xlu0 %v2969_v15  ;;  %v1860_v15 = vadd.f32 %v11927_v34, %v11974_v24 }
 0xcfb   :  { %3003 = vrot.lane.b32.xlu1 %v11611_v59, %s11275_s30 }
 0xcff   :  { %3001 = vrot.lane.b32.xlu1 %v11617_v60, %s11275_s30 }
 0xd03   :  { %2999 = vrot.lane.b32.xlu1 %v11605_v54, %s11275_s30 }
 0xd0a   :  { %3005 = vrot.lane.b32.xlu0 %v11609_v57, %s11275_s30 }
 0xd73   :  { %v2968_v22 = vpop.xlane.xlu1 %2967 }
 0xd74   :  { %v2976_v31 = vsub.f32 %v2960_v39, %v2968_v22 }
 0xd75   :  { %v2965_v25 = vpop.xlane.xlu0 %2964 }
 0xd76   :  { %v2981_v21 = vmul.f32 1.442695, %v2976_v31  ;;  %v2975_v1 = vsub.f32 %v2959_v6, %v2965_v25 }
 0xd77   :  { %v3004_v52 = vpop.permute.xlu1 %3003 }
 0xd78   :  { %10992 = vpow2.f32 %v2981_v21  ;;  %v2979_v17 = vmul.f32 1.442695, %v2975_v1 }
 0xd79   :  { %v2974_v2 = vpop.xlane.xlu0 %2973 }
 0xd7a   :  { %10994 = vpow2.f32 %v2979_v17  ;;  %v2978_v59 = vsub.f32 %v2962_v8, %v2974_v2 }
 0xd7b   :  { %v3002_v4 = vpop.permute.xlu1 %3001 }
 0xd7c   :  { %v2985_v60 = vmul.f32 1.442695, %v2978_v59 }
 0xd7d   :  { %v2971_v53 = vpop.xlane.xlu0 %2970 }
 0xd7e   :  { %v2977_v3 = vsub.f32 %v2961_v51, %v2971_v53 }
 0xd7f   :  { %v3000_v63 = vpop.permute.xlu1 %2999 }
 0xd80   :  { %v2983_v55 = vmul.f32 1.442695, %v2977_v3 }
 0xd81   :  { %v3006_v54 = vpop.permute.xlu0 %3005 }
 0xd82   :  { %10996 = vpow2.f32 %v2983_v55  ;;  %10211 = vmatprep.subr.mxu1 %v3006_v54 }
 0xd83   :  { %10998 = vpow2.f32 %v2985_v60  ;;  %10212 = vmatpush3.msra.mxu1 %v3006_v54 }
 0xd84   :  { %10213 = vmatprep.subr.mxu1 %v3004_v52 }
 0xd85   :  { %v10993_v57 = vpop.eup %10992  ;;  %10214 = vmatpush3.msra.mxu1 %v3004_v52 }
 0xd86   :  { %10215 = vmatprep.subr.mxu1 %v3002_v4  ;;  %v2990_v58 = vsel %vm339_vm1, %v10993_v57, 0.0 }
 0xd87   :  { %v10995_v62 = vpop.eup %10994  ;;  %2991 = vadd.xlane.f32.xlu1 %v2990_v58  ;;  %10216 = vmatpush3.msra.mxu1 %v3002_v4 }
 0xd88   :  { %10217 = vmatprep.subr.mxu1 %v3000_v63  ;;  %10219 = vmatprep.mubr.msk.f32.mxu1 %vm339_vm1, %v10995_v62  ;;  %v2987_v0 = vsel %vm339_vm1, %v10995_v62, 0.0 }
 0xd89   :  { %2988 = vadd.xlane.f32.xlu0 %v2987_v0  ;;  %10218 = vmatpush3.msra.mxu1 %v3000_v63 }
 0xd8a   :  { %10220 = vmatmul.mubr.msk.f32.vlgmr.msra.gmra.mxu1 %vm339_vm1, %v10993_v57 }
 0xd8f   :  { %v10997_v5 = vpop.eup %10996 }
 0xd90   :  { %v10999_v7 = vpop.eup %10998  ;;  %10222 = vmatprep.mubr.msk.f32.mxu1 %vm339_vm1, %v10997_v5  ;;  %v2993_v11 = vsel %vm339_vm1, %v10997_v5, 0.0 }
 0xd91   :  { %2994 = vadd.xlane.f32.xlu0 %v2993_v11  ;;  %10223 = vmatmul.mubr.msk.f32.gmra.mxu1 %vm339_vm1, %v10999_v7  ;;  %v2996_v10 = vsel %vm339_vm1, %v10999_v7, 0.0  ;;  %v3310_v11 = vld [vmem:[%s13097_s26 + $0x18] sm:$0xff] }
 0xd92   :  { %10233 = vmatprep.subr.mxu1 %v3310_v11 }
 0xd93   :  { %10234 = vmatpush3.msra.mxu1 %v3310_v11 }
 0xd95   :  { %2997 = vadd.xlane.f32.xlu0 %v2996_v10  ;;  %v3309_v10 = vld [vmem:[%s13097_s26 + $0x10] sm:$0xff] }
 0xd96   :  { %10235 = vmatprep.subr.mxu1 %v3309_v10 }
 0xd97   :  { %10236 = vmatpush3.msra.mxu1 %v3309_v10 }
 0xd98   :  { %10237 = vmatprep.subr.mxu1 %v3308_v23 }
 0xd99   :  { %10238 = vmatpush3.msra.mxu1 %v3308_v23 }
 0xe10   :  { %v2992_v30 = vpop.xlane.xlu1 %2991 }
 0xe12   :  { %v2989_v27 = vpop.xlane.xlu0 %2988 }
 0xe13   :  { %11000 = vrcp.f32 %v2989_v27  ;;  %v3307_v27 = vld [vmem:[%s13097_s26] sm:$0xff] }
 0xe14   :  { %11002 = vrcp.f32 %v2992_v30  ;;  %10239 = vmatprep.subr.mxu1 %v3307_v27 }
 0xe15   :  { %10240 = vmatpush3.msra.mxu1 %v3307_v27 }
 0xe1a   :  { %v2995_v32 = vpop.xlane.xlu0 %2994 }
 0xe1b   :  { %11004 = vrcp.f32 %v2995_v32 }
 0xe1e   :  { %v2998_v43 = vpop.xlane.xlu0 %2997 }
 0xe1f   :  { %11006 = vrcp.f32 %v2998_v43 }
 0xe20   :  { %v11001_v49 = vpop.eup %11000 }
 0xe21   :  { %v11003_v14 = vpop.eup %11002 }
 0xe28   :  { %v11005_v39 = vpop.eup %11004 }
 0xe2c   :  { %v11007_v41 = vpop.eup %11006 }
 0xe4a   :  { %v10221_v33 = vpop.f32.mrf.mxu1 }
 0xe4b   :  { %v3111_v36 = vmul.f32 %v11003_v14, %v10221_v33 }
 0xe4c   :  { %v3089_v61 = vpop.f32.mrf.mxu1 }
 0xe4d   :  { %v3109_v35 = vmul.f32 %v11001_v49, %v3089_v61 }
 0xe4f   :  { %10227 = vmatprep.mubr.msk.f32.mxu0 %vm541_vm2, %v3109_v35 }
 0xe50   :  { %10228 = vmatmul.mubr.msk.f32.vlgmr.msra.gmra.mxu0 %vm541_vm2, %v3111_v36 }
 0xe51   :  { %v10224_v37 = vpop.f32.mrf.mxu1 }
 0xe52   :  { %v3115_v45 = vmul.f32 %v11007_v41, %v10224_v37 }
 0xe53   :  { %v3099_v40 = vpop.f32.mrf.mxu1 }
 0xe54   :  { %v3113_v42 = vmul.f32 %v11005_v39, %v3099_v40 }
 0xe56   :  { %10230 = vmatprep.mubr.msk.f32.mxu0 %vm541_vm2, %v3113_v42 }
 0xe57   :  { %10231 = vmatmul.mubr.msk.f32.gmra.mxu0 %vm541_vm2, %v3115_v45  ;;  %v9125_v45 = vld [vmem:[%s13098_s28] ss:$0 sm:$0xff] }
 0xf10   :  { %v10229_v6 = vpop.f32.mrf.mxu0 }
 0xf11   :  { %v3215_v46 = vadd.f32 %v10229_v6, %v12048_v12  ;;  %v2541_v12 = vadd.f32 %v12056_v29, %v1860_v15 }
 0xf12   :  { %v3195_v47 = vpop.f32.mrf.mxu0 }
 0xf13   :  { %v3219_v8 = vadd.f32 %v3215_v46, %v11572_v44  ;;  %v3214_v19 = vadd.f32 %v3195_v47, %v2539_v18  ;;  %v9126_v46 = vld [vmem:[%s13099_s1] ss:$0 sm:$0xff] }
 0xf15   :  { %v12109_v48 = vadd.f32 %v9124_v28, %v3219_v8  ;;  %v3218_v51 = vadd.f32 %v3214_v19, %v11567_v38 }
 0xf17   :  { %v12114_v22 = vadd.f32 %v9124_v28, %v3218_v51  ;;  %v10232_v9 = vpop.f32.mrf.mxu0  ;;  %v3238_v20 = vsel %vm339_vm1, %v12109_v48, 0.0 }
 0xf18   :  { %v3217_v13 = vadd.f32 %v10232_v9, %v12054_v26  ;;  %3239 = vadd.xlane.f32.xlu1 %v3238_v20 }
 0xf19   :  { %v3205_v44 = vpop.f32.mrf.mxu0  ;;  %v3235_v31 = vsel %vm339_vm1, %v12114_v22, 0.0 }
 0xf1a   :  { %v3221_v38 = vadd.f32 %v3217_v13, %v11582_v56  ;;  %v3216_v25 = vadd.f32 %v3205_v44, %v2541_v12  ;;  %3236 = vadd.xlane.f32.xlu0 %v3235_v31  ;;  %v3538_v31 = vld [vmem:[%s13100_s2 + $0x78] sm:$0xff] }
 0xf1b   :  { %10247 = vmatprep.subr.mxu0 %v3538_v31 }
 0xf1c   :  { %v12123_v34 = vadd.f32 %v9124_v28, %v3221_v38  ;;  %v3220_v24 = vadd.f32 %v3216_v25, %v11577_v50  ;;  %10248 = vmatpush3.msra.mxu0 %v3538_v31  ;;  %v3537_v38 = vld [vmem:[%s13100_s2 + $0x70] sm:$0xff]  ;;  %v3536_v25 = vld [vmem:[%s13100_s2 + $0x68] sm:$0xff] }
 0xf1d   :  { %10249 = vmatprep.subr.mxu0 %v3537_v38 }
 0xf1e   :  { %v12126_v21 = vadd.f32 %v9124_v28, %v3220_v24  ;;  %v3244_v29 = vsel %vm339_vm1, %v12123_v34, 0.0  ;;  %10250 = vmatpush3.msra.mxu0 %v3537_v38  ;;  %v3535_v24 = vld [vmem:[%s13100_s2 + $0x60] sm:$0xff] }
 0xf1f   :  { %3245 = vadd.xlane.f32.xlu1 %v3244_v29  ;;  %10251 = vmatprep.subr.mxu0 %v3536_v25  ;;  %v3534_v29 = vld [vmem:[%s13100_s2 + $0x58] sm:$0xff] }
 0xf20   :  { %v3241_v26 = vsel %vm339_vm1, %v12126_v21, 0.0  ;;  %10252 = vmatpush3.msra.mxu0 %v3536_v25 }
 0xf21   :  { %3242 = vadd.xlane.f32.xlu0 %v3241_v26  ;;  %10253 = vmatprep.subr.mxu0 %v3535_v24  ;;  %v3533_v26 = vld [vmem:[%s13100_s2 + $0x50] sm:$0xff] }
 0xf22   :  { %10254 = vmatpush3.msra.mxu0 %v3535_v24 }
 0xf23   :  { %10255 = vmatprep.subr.mxu0 %v3534_v29 }
 0xf24   :  { %10256 = vmatpush3.msra.mxu0 %v3534_v29 }
 0xf25   :  { %10257 = vmatprep.subr.mxu0 %v3533_v26 }
 0xf26   :  { %10258 = vmatpush3.msra.mxu0 %v3533_v26 }
 0xfa1   :  { %v3240_v1 = vpop.xlane.xlu1 %3239 }
 0xfa2   :  { %v3248_v17 = vmul.f32 0.03125, %v3240_v1  ;;  %v3532_v1 = vld [vmem:[%s13100_s2 + $0x48] sm:$0xff] }
 0xfa3   :  { %v3237_v2 = vpop.xlane.xlu0 %3236  ;;  %10259 = vmatprep.subr.mxu0 %v3532_v1 }
 0xfa4   :  { %v3252_v56 = vsub.f32 %v12109_v48, %v3248_v17  ;;  %v3247_v52 = vmul.f32 0.03125, %v3237_v2  ;;  %10260 = vmatpush3.msra.mxu0 %v3532_v1  ;;  %v3531_v17 = vld [vmem:[%s13100_s2 + $0x40] sm:$0xff]  ;;  %v3530_v2 = vld [vmem:[%s13100_s2 + $0x38] sm:$0xff] }
 0xfa5   :  { %10261 = vmatprep.subr.mxu0 %v3531_v17 }
 0xfa6   :  { %v3251_v59 = vsub.f32 %v12114_v22, %v3247_v52  ;;  %v3256_v53 = vmul.f32 %v3252_v56, %v3252_v56  ;;  %10262 = vmatpush3.msra.mxu0 %v3531_v17  ;;  %v3528_v52 = vld [vmem:[%s13100_s2 + $0x28] sm:$0xff] }
 0xfa7   :  { %10263 = vmatprep.subr.mxu0 %v3530_v2 }
 0xfa8   :  { %v3246_v50 = vpop.xlane.xlu1 %3245  ;;  %v3262_v3 = vsel %vm339_vm1, %v3256_v53, 0.0  ;;  %v3255_v60 = vmul.f32 %v3251_v59, %v3251_v59  ;;  %10264 = vmatpush3.msra.mxu0 %v3530_v2  ;;  %v3526_v53 = vld [vmem:[%s13100_s2 + $0x18] sm:$0xff] }
 0xfa9   :  { %v3250_v55 = vmul.f32 0.03125, %v3246_v50  ;;  %3263 = vadd.xlane.f32.xlu1 %v3262_v3  ;;  %v3525_v50 = vld [vmem:[%s13100_s2 + $0x10] sm:$0xff]  ;;  %v3524_v3 = vld [vmem:[%s13100_s2 + $0x8] sm:$0xff] }
 0xfaa   :  { %v3243_v4 = vpop.xlane.xlu0 %3242  ;;  %v3259_v54 = vsel %vm339_vm1, %v3255_v60, 0.0  ;;  %v3523_v60 = vld [vmem:[%s13100_s2] sm:$0xff] }
 0xfab   :  { %v3254_v57 = vsub.f32 %v12123_v34, %v3250_v55  ;;  %v3249_v58 = vmul.f32 0.03125, %v3243_v4  ;;  %3260 = vadd.xlane.f32.xlu0 %v3259_v54  ;;  %v9127_v55 = vld [vmem:[%s13101_s7] ss:$0 sm:$0xff] }
 0xfad   :  { %v3253_v62 = vsub.f32 %v12126_v21, %v3249_v58  ;;  %v3258_v63 = vmul.f32 %v3254_v57, %v3254_v57 }
 0xfaf   :  { %v3268_v0 = vsel %vm339_vm1, %v3258_v63, 0.0  ;;  %v3257_v5 = vmul.f32 %v3253_v62, %v3253_v62 }
 0xfb0   :  { %3269 = vadd.xlane.f32.xlu1 %v3268_v0 }
 0xfb1   :  { %v3265_v7 = vsel %vm339_vm1, %v3257_v5, 0.0 }
 0xfb2   :  { %3266 = vadd.xlane.f32.xlu0 %v3265_v7 }
0x1032   :  { %v3264_v30 = vpop.xlane.xlu1 %3263 }
0x1033   :  { %v3272_v32 = vmul.f32 0.03125, %v3264_v30 }
0x1034   :  { %v3261_v43 = vpop.xlane.xlu0 %3260 }
0x1035   :  { %v3276_v33 = vadd.f32 1e-06, %v3272_v32  ;;  %v3271_v49 = vmul.f32 0.03125, %v3261_v43 }
0x1037   :  { %11008 = vrsqrt.f32 %v3276_v33  ;;  %v3275_v61 = vadd.f32 1e-06, %v3271_v49 }
0x1039   :  { %11010 = vrsqrt.f32 %v3275_v61  ;;  %v3270_v14 = vpop.xlane.xlu1 %3269 }
0x103a   :  { %v3274_v35 = vmul.f32 0.03125, %v3270_v14 }
0x103b   :  { %v3267_v36 = vpop.xlane.xlu0 %3266 }
0x103c   :  { %v3278_v37 = vadd.f32 1e-06, %v3274_v35  ;;  %v3273_v39 = vmul.f32 0.03125, %v3267_v36 }
0x103e   :  { %11012 = vrsqrt.f32 %v3278_v37  ;;  %v3277_v40 = vadd.f32 1e-06, %v3273_v39 }
0x1040   :  { %11014 = vrsqrt.f32 %v3277_v40 }
0x1044   :  { %v11009_v41 = vpop.eup %11008 }
0x1045   :  { %v3284_v42 = vmul.f32 %v11009_v41, %v3252_v56  ;;  %v3529_v56 = vld [vmem:[%s13100_s2 + $0x30] sm:$0xff] }
0x1046   :  { %v11011_v16 = vpop.eup %11010  ;;  %10265 = vmatprep.subr.mxu0 %v3529_v56 }
0x1047   :  { %v3283_v6 = vmul.f32 %v11011_v16, %v3251_v59  ;;  %v3294_v18 = vmul.f32 %v9125_v45, %v3284_v42  ;;  %10266 = vmatpush3.msra.mxu0 %v3529_v56  ;;  %v3527_v59 = vld [vmem:[%s13100_s2 + $0x20] sm:$0xff] }
0x1048   :  { %10267 = vmatprep.subr.mxu0 %v3528_v52 }
0x1049   :  { %v3293_v28 = vmul.f32 %v9125_v45, %v3283_v6  ;;  %v3304_v19 = vadd.f32 %v9126_v46, %v3294_v18  ;;  %10268 = vmatpush3.msra.mxu0 %v3528_v52 }
0x104a   :  { %10269 = vmatprep.subr.mxu0 %v3527_v59 }
0x104b   :  { %v11013_v47 = vpop.eup %11012  ;;  %v3303_v8 = vadd.f32 %v9126_v46, %v3293_v28  ;;  %10270 = vmatpush3.msra.mxu0 %v3527_v59 }
0x104c   :  { %v3286_v51 = vmul.f32 %v11013_v47, %v3254_v57  ;;  %10271 = vmatprep.subr.mxu0 %v3526_v53 }
0x104d   :  { %v11015_v15 = vpop.eup %11014  ;;  %10241 = vmatprep.mubr.msk.f32.mxu1 %vm339_vm1, %v3303_v8  ;;  %10272 = vmatpush3.msra.mxu0 %v3526_v53 }
0x104e   :  { %10242 = vmatmul.mubr.msk.f32.vlgmr.msra.gmra.mxu1 %vm339_vm1, %v3304_v19  ;;  %v3285_v9 = vmul.f32 %v11015_v15, %v3253_v62  ;;  %v3296_v20 = vmul.f32 %v9125_v45, %v3286_v51  ;;  %10273 = vmatprep.subr.mxu0 %v3525_v50 }
0x104f   :  { %10274 = vmatpush3.msra.mxu0 %v3525_v50 }
0x1050   :  { %v3295_v12 = vmul.f32 %v9125_v45, %v3285_v9  ;;  %v3306_v44 = vadd.f32 %v9126_v46, %v3296_v20  ;;  %10275 = vmatprep.subr.mxu0 %v3524_v3 }
0x1051   :  { %10276 = vmatpush3.msra.mxu0 %v3524_v3 }
0x1052   :  { %v3305_v13 = vadd.f32 %v9126_v46, %v3295_v12  ;;  %10277 = vmatprep.subr.mxu0 %v3523_v60 }
0x1053   :  { %10278 = vmatpush3.msra.mxu0 %v3523_v60 }
0x1054   :  { %10244 = vmatprep.mubr.msk.f32.mxu1 %vm339_vm1, %v3305_v13 }
0x1055   :  { %10245 = vmatmul.mubr.msk.f32.gmra.mxu1 %vm339_vm1, %v3306_v44 }
0x110e   :  { %v10243_v4 = vpop.f32.mrf.mxu1 }
0x110f   :  { %v12167_v54 = vadd.f32 %v10243_v4, %v9127_v55 }
0x1110   :  { %v3396_v57 = vpop.f32.mrf.mxu1 }
0x1111   :  { %v12170_v58 = vmul.f32 0.70710677, %v12167_v54  ;;  %v12172_v62 = vadd.f32 %v9127_v55, %v3396_v57 }
0x1113   :  { %v3432_v63 = vand.u32 2147483647, %v12170_v58  ;;  %v12176_v0 = vmul.f32 0.70710677, %v12172_v62  ;;  %vm3424_vm3 = vcmp.ge.f32.partialorder %v12170_v58, 0.0 }
0x1115   :  { %v3436_v5 = vmul.f32 0.3275911, %v3432_v63  ;;  %v3431_v7 = vand.u32 2147483647, %v12176_v0  ;;  %v10246_v11 = vpop.f32.mrf.mxu1  ;;  %v3488_v37 = vsub.f32 0.0, %v3432_v63  ;;  %vm3423_vm4 = vcmp.ge.f32.partialorder %v12176_v0, 0.0 }
0x1116   :  { %v12179_v10 = vadd.f32 %v10246_v11, %v9127_v55 }
0x1117   :  { %v3440_v23 = vadd.f32 1.0, %v3436_v5  ;;  %v3435_v27 = vmul.f32 0.3275911, %v3431_v7  ;;  %v3406_v30 = vpop.f32.mrf.mxu1  ;;  %v3487_v41 = vsub.f32 0.0, %v3431_v7  ;;  %v3492_v42 = vmul.f32 %v3488_v37, %v3432_v63 }
0x1118   :  { %v12182_v32 = vmul.f32 0.70710677, %v12179_v10  ;;  %v12184_v43 = vadd.f32 %v9127_v55, %v3406_v30 }
0x1119   :  { %11016 = vrcp.f32 %v3440_v23  ;;  %v3439_v33 = vadd.f32 1.0, %v3435_v27  ;;  %v3491_v16 = vmul.f32 %v3487_v41, %v3431_v7  ;;  %v3497_v46 = vmul.f32 1.442695, %v3492_v42 }
0x111a   :  { %v3434_v49 = vand.u32 2147483647, %v12182_v32  ;;  %v12188_v61 = vmul.f32 0.70710677, %v12184_v43  ;;  %vm3426_vm5 = vcmp.ge.f32.partialorder %v12182_v32, 0.0 }
0x111b   :  { %11018 = vrcp.f32 %v3439_v33  ;;  %v3495_v19 = vmul.f32 1.442695, %v3491_v16 }
0x111c   :  { %v3438_v14 = vmul.f32 0.3275911, %v3434_v49  ;;  %v3433_v35 = vand.u32 2147483647, %v12188_v61  ;;  %v3490_v6 = vsub.f32 0.0, %v3434_v49  ;;  %vm3425_vm6 = vcmp.ge.f32.partialorder %v12188_v61, 0.0 }
0x111e   :  { %v3442_v36 = vadd.f32 1.0, %v3438_v14  ;;  %v3437_v39 = vmul.f32 0.3275911, %v3433_v35  ;;  %v3489_v8 = vsub.f32 0.0, %v3433_v35  ;;  %v3494_v51 = vmul.f32 %v3490_v6, %v3434_v49 }
0x1120   :  { %11020 = vrcp.f32 %v3442_v36  ;;  %v3441_v40 = vadd.f32 1.0, %v3437_v39  ;;  %v3493_v44 = vmul.f32 %v3489_v8, %v3433_v35  ;;  %v3501_v31 = vmul.f32 1.442695, %v3494_v51 }
0x1121   :  { %v11276_v39 = vmov -1.0  }
0x1122   :  { %11022 = vrcp.f32 %v3441_v40  ;;  %v3499_v2 = vmul.f32 1.442695, %v3493_v44  ;;  %v3428_v40 = vsel %vm3424_vm3, 1.0, %v11276_v39  ;;  %v3427_v58 = vsel %vm3423_vm4, 1.0, %v11276_v39 }
0x1123   :  { %11024 = vpow2.f32 %v3497_v46  ;;  %v3430_v44 = vsel %vm3426_vm5, 1.0, %v11276_v39 }
0x1124   :  { %11026 = vpow2.f32 %v3495_v19 }
0x1125   :  { %11028 = vpow2.f32 %v3501_v31 }
0x1126   :  { %v11017_v45 = vpop.eup %11016  ;;  %11030 = vpow2.f32 %v3499_v2 }
0x1127   :  { %v3452_v18 = vmul.f32 1.0614054, %v11017_v45 }
0x1128   :  { %v11019_v28 = vpop.eup %11018 }
0x1129   :  { %v3456_v47 = vadd.f32 -1.4531521, %v3452_v18  ;;  %v3451_v15 = vmul.f32 1.0614054, %v11019_v28 }
0x112b   :  { %v3460_v9 = vmul.f32 %v11017_v45, %v3456_v47  ;;  %v3455_v20 = vadd.f32 -1.4531521, %v3451_v15 }
0x112d   :  { %v11021_v12 = vpop.eup %11020  ;;  %v3464_v13 = vadd.f32 1.4214138, %v3460_v9  ;;  %v3459_v38 = vmul.f32 %v11019_v28, %v3455_v20  ;;  %v3415_v9 = vmul.f32 0.5, %v12172_v62 }
0x112e   :  { %v3454_v25 = vmul.f32 1.0614054, %v11021_v12 }
0x112f   :  { %v3468_v24 = vmul.f32 %v11017_v45, %v3464_v13  ;;  %v11023_v29 = vpop.eup %11022  ;;  %v3463_v26 = vadd.f32 1.4214138, %v3459_v38  ;;  %v3416_v13 = vmul.f32 0.5, %v12167_v54  ;;  %v3418_v54 = vmul.f32 0.5, %v12179_v10 }
0x1130   :  { %v3458_v1 = vadd.f32 -1.4531521, %v3454_v25  ;;  %v3453_v56 = vmul.f32 1.0614054, %v11023_v29  ;;  %v11025_v11 = vpop.eup %11024 }
0x1131   :  { %v3472_v17 = vadd.f32 -0.28449672, %v3468_v24  ;;  %v3467_v52 = vmul.f32 %v11019_v28, %v3463_v26  ;;  %v11027_v35 = vpop.eup %11026  ;;  %v3429_v24 = vsel %vm3425_vm6, 1.0, %v11276_v39  ;;  %v3417_v26 = vmul.f32 0.5, %v12184_v43 }
0x1132   :  { %v3462_v59 = vmul.f32 %v11021_v12, %v3458_v1  ;;  %v3457_v50 = vadd.f32 -1.4531521, %v3453_v56  ;;  %v11029_v46 = vpop.eup %11028  ;;  %v9132_v56 = vld [vmem:[%s13102_s10] ss:$0 sm:$0xff] }
0x1133   :  { %v3476_v53 = vmul.f32 %v11017_v45, %v3472_v17  ;;  %v3471_v3 = vadd.f32 -0.28449672, %v3467_v52  ;;  %v11031_v15 = vpop.eup %11030 }
0x1134   :  { %v3466_v60 = vadd.f32 1.4214138, %v3462_v59  ;;  %v3461_v4 = vmul.f32 %v11023_v29, %v3457_v50 }
0x1135   :  { %v3480_v55 = vadd.f32 0.2548296, %v3476_v53  ;;  %v3475_v57 = vmul.f32 %v11019_v28, %v3471_v3 }
0x1136   :  { %v3470_v63 = vmul.f32 %v11021_v12, %v3466_v60  ;;  %v3465_v7 = vadd.f32 1.4214138, %v3461_v4 }
0x1137   :  { %v3484_v5 = vmul.f32 %v11017_v45, %v3480_v55  ;;  %v3479_v23 = vadd.f32 0.2548296, %v3475_v57 }
0x1138   :  { %v3474_v27 = vadd.f32 -0.28449672, %v3470_v63  ;;  %v3469_v33 = vmul.f32 %v11023_v29, %v3465_v7 }
0x1139   :  { %v3504_v30 = vmul.f32 %v11025_v11, %v3484_v5  ;;  %v3483_v49 = vmul.f32 %v11019_v28, %v3479_v23 }
0x113a   :  { %v3478_v14 = vmul.f32 %v11021_v12, %v3474_v27  ;;  %v3473_v37 = vadd.f32 -0.28449672, %v3469_v33 }
0x113b   :  { %v3508_v36 = vsub.f32 1.0, %v3504_v30  ;;  %v3503_v41 = vmul.f32 %v11027_v35, %v3483_v49 }
0x113c   :  { %v3482_v42 = vadd.f32 0.2548296, %v3478_v14  ;;  %v3477_v16 = vmul.f32 %v11023_v29, %v3473_v37 }
0x113d   :  { %v3512_v45 = vmul.f32 %v3508_v36, %v3428_v40  ;;  %v3507_v6 = vsub.f32 1.0, %v3503_v41 }
0x113e   :  { %v3486_v18 = vmul.f32 %v11021_v12, %v3482_v42  ;;  %v3481_v47 = vadd.f32 0.2548296, %v3477_v16 }
0x113f   :  { %v3511_v28 = vmul.f32 %v3507_v6, %v3427_v58  ;;  %v3516_v19 = vadd.f32 1.0, %v3512_v45  ;;  %v3715_v58 = vld [vmem:[%s13103_s11 + $0x10] sm:$0xff] }
0x1140   :  { %v3506_v8 = vmul.f32 %v11029_v46, %v3486_v18  ;;  %v3485_v51 = vmul.f32 %v11023_v29, %v3481_v47  ;;  %v3716_v46 = vld [vmem:[%s13103_s11 + $0x18] sm:$0xff]  ;;  %v3714_v47 = vld [vmem:[%s13103_s11 + $0x8] sm:$0xff] }
0x1141   :  { %v3515_v0 = vadd.f32 1.0, %v3511_v28  ;;  %v3520_v32 = vmul.f32 %v3516_v19, %v3416_v13  ;;  %10285 = vmatprep.subr.mxu1 %v3716_v46  ;;  %v3713_v28 = vld [vmem:[%s13103_s11] sm:$0xff] }
0x1142   :  { %v3510_v20 = vsub.f32 1.0, %v3506_v8  ;;  %v3505_v12 = vmul.f32 %v11031_v15, %v3485_v51  ;;  %10286 = vmatpush3.msra.mxu1 %v3716_v46 }
0x1143   :  { %v3519_v31 = vmul.f32 %v3515_v0, %v3415_v9  ;;  %10287 = vmatprep.subr.mxu1 %v3715_v58 }
0x1144   :  { %v3514_v38 = vmul.f32 %v3510_v20, %v3430_v44  ;;  %v3509_v25 = vsub.f32 1.0, %v3505_v12  ;;  %10288 = vmatpush3.msra.mxu1 %v3715_v58 }
0x1145   :  { %10279 = vmatprep.mubr.f32.mxu0 %v3519_v31  ;;  %10289 = vmatprep.subr.mxu1 %v3714_v47 }
0x1146   :  { %10280 = vmatmul.mubr.f32.vlgmr.msra.gmra.mxu0 %v3520_v32  ;;  %v3513_v29 = vmul.f32 %v3509_v25, %v3429_v24  ;;  %v3518_v62 = vadd.f32 1.0, %v3514_v38  ;;  %10290 = vmatpush3.msra.mxu1 %v3714_v47  ;;  %v9133_v24 = vld [vmem:[%s13104_s15] ss:$0 sm:$0xff] }
0x1147   :  { %10291 = vmatprep.subr.mxu1 %v3713_v28 }
0x1148   :  { %v3517_v1 = vadd.f32 1.0, %v3513_v29  ;;  %v3522_v2 = vmul.f32 %v3518_v62, %v3418_v54  ;;  %10292 = vmatpush3.msra.mxu1 %v3713_v28  ;;  %v12329_v28 = vld [vmem:[%s11303_s17] sm:$0xff] }
0x114a   :  { %v3521_v17 = vmul.f32 %v3517_v1, %v3417_v26  ;;  %v9134_v1 = vld [vmem:[%s13105_s16] ss:$0 sm:$0xff] }
0x114c   :  { %10282 = vmatprep.mubr.f32.mxu0 %v3521_v17 }
0x114d   :  { %10283 = vmatmul.mubr.f32.gmra.mxu0 %v3522_v2 }
0x1206   :  { %v10281_v61 = vpop.f32.mrf.mxu0 }
0x1207   :  { %v3625_v52 = vadd.f32 %v10281_v61, %v12109_v48 }
0x1208   :  { %v3605_v59 = vpop.f32.mrf.mxu0 }
0x1209   :  { %v12205_v53 = vadd.f32 %v9132_v56, %v3625_v52  ;;  %v3624_v50 = vadd.f32 %v3605_v59, %v12114_v22 }
0x120b   :  { %v12208_v3 = vadd.f32 %v9132_v56, %v3624_v50  ;;  %v3644_v43 = vsel %vm339_vm1, %v12205_v53, 0.0 }
0x120c   :  { %3645 = vadd.xlane.f32.xlu1 %v3644_v43 }
0x120d   :  { %v10284_v10 = vpop.f32.mrf.mxu0  ;;  %v3641_v60 = vsel %vm339_vm1, %v12208_v3, 0.0 }
0x120e   :  { %v3627_v55 = vadd.f32 %v10284_v10, %v12123_v34  ;;  %3642 = vadd.xlane.f32.xlu0 %v3641_v60 }
0x120f   :  { %v3615_v4 = vpop.f32.mrf.mxu0 }
0x1210   :  { %v12215_v48 = vadd.f32 %v9132_v56, %v3627_v55  ;;  %v3626_v57 = vadd.f32 %v3615_v4, %v12126_v21  ;;  %v9135_v4 = vld [vmem:[%s13106_s18] ss:$0 sm:$0xff] }
0x1212   :  { %v12218_v63 = vadd.f32 %v9132_v56, %v3626_v57  ;;  %v3650_v22 = vsel %vm339_vm1, %v12215_v48, 0.0 }
0x1213   :  { %3651 = vadd.xlane.f32.xlu1 %v3650_v22 }
0x1214   :  { %v3647_v5 = vsel %vm339_vm1, %v12218_v63, 0.0 }
0x1215   :  { %3648 = vadd.xlane.f32.xlu0 %v3647_v5 }
0x1295   :  { %v3646_v7 = vpop.xlane.xlu1 %3645 }
0x1296   :  { %v3654_v11 = vmul.f32 0.03125, %v3646_v7 }
0x1297   :  { %v3643_v23 = vpop.xlane.xlu0 %3642 }
0x1298   :  { %v3658_v34 = vsub.f32 %v12205_v53, %v3654_v11  ;;  %v3653_v27 = vmul.f32 0.03125, %v3643_v23 }
0x129a   :  { %v3657_v30 = vsub.f32 %v12208_v3, %v3653_v27  ;;  %v3662_v33 = vmul.f32 %v3658_v34, %v3658_v34 }
0x129c   :  { %v3652_v21 = vpop.xlane.xlu1 %3651  ;;  %v3668_v49 = vsel %vm339_vm1, %v3662_v33, 0.0  ;;  %v3661_v14 = vmul.f32 %v3657_v30, %v3657_v30 }
0x129d   :  { %v3656_v35 = vmul.f32 0.03125, %v3652_v21  ;;  %3669 = vadd.xlane.f32.xlu1 %v3668_v49  ;;  %v12270_v49 = vld [vmem:[%s11298_s13] sm:$0xff] }
0x129e   :  { %v3649_v36 = vpop.xlane.xlu0 %3648  ;;  %v3665_v37 = vsel %vm339_vm1, %v3661_v14, 0.0  ;;  %v12289_v14 = vld [vmem:[%s13107_s14 + $0x18] sm:$0xff] }
0x129f   :  { %v3660_v40 = vsub.f32 %v12215_v48, %v3656_v35  ;;  %v3655_v41 = vmul.f32 0.03125, %v3649_v36  ;;  %3666 = vadd.xlane.f32.xlu0 %v3665_v37  ;;  %v12292_v35 = vld [vmem:[%s13108_s6 + $0x18] sm:$0xff]  ;;  %10321 = vmatprep.subr.mxu0 %v12289_v14  ;;  %v12299_v36 = vld [vmem:[%s13107_s14 + $0x10] sm:$0xff] }
0x12a0   :  { %10322 = vmatpush3.msra.mxu0 %v12289_v14  ;;  %v12302_v37 = vld [vmem:[%s13108_s6 + $0x10] sm:$0xff] }
0x12a1   :  { %v3659_v42 = vsub.f32 %v12218_v63, %v3655_v41  ;;  %v3664_v45 = vmul.f32 %v3660_v40, %v3660_v40  ;;  %10323 = vmatprep.subr.mxu0 %v12299_v36  ;;  %v12312_v41 = vld [vmem:[%s13108_s6 + $0x8] sm:$0xff] }
0x12a2   :  { %10324 = vmatpush3.msra.mxu0 %v12299_v36 }
0x12a3   :  { %v3674_v16 = vsel %vm339_vm1, %v3664_v45, 0.0  ;;  %v3663_v6 = vmul.f32 %v3659_v42, %v3659_v42  ;;  %v12322_v45 = vld [vmem:[%s13108_s6] sm:$0xff] }
0x12a4   :  { %3675 = vadd.xlane.f32.xlu1 %v3674_v16 }
0x12a5   :  { %v3671_v18 = vsel %vm339_vm1, %v3663_v6, 0.0 }
0x12a6   :  { %3672 = vadd.xlane.f32.xlu0 %v3671_v18 }
0x1326   :  { %v3670_v8 = vpop.xlane.xlu1 %3669 }
0x1327   :  { %v3678_v19 = vmul.f32 0.03125, %v3670_v8 }
0x1328   :  { %v3667_v51 = vpop.xlane.xlu0 %3666 }
0x1329   :  { %v3682_v15 = vadd.f32 1e-06, %v3678_v19  ;;  %v3677_v9 = vmul.f32 0.03125, %v3667_v51  ;;  %v12333_v19 = vld [vmem:[%s11308_s21] sm:$0xff] }
0x132b   :  { %11032 = vrsqrt.f32 %v3682_v15  ;;  %v3681_v0 = vadd.f32 1e-06, %v3677_v9  ;;  %v12337_v15 = vld [vmem:[%s11303_s17 + $0x8] sm:$0xff] }
0x132d   :  { %11034 = vrsqrt.f32 %v3681_v0  ;;  %v3676_v20 = vpop.xlane.xlu1 %3675  ;;  %v12341_v0 = vld [vmem:[%s11308_s21 + $0x8] sm:$0xff] }
0x132e   :  { %v3680_v13 = vmul.f32 0.03125, %v3676_v20 }
0x132f   :  { %v3673_v44 = vpop.xlane.xlu0 %3672 }
0x1330   :  { %v3684_v12 = vadd.f32 1e-06, %v3680_v13  ;;  %v3679_v31 = vmul.f32 0.03125, %v3673_v44 }
0x1332   :  { %11036 = vrsqrt.f32 %v3684_v12  ;;  %v3683_v38 = vadd.f32 1e-06, %v3679_v31  ;;  %v12349_v12 = vld [vmem:[%s11303_s17 + $0x10] sm:$0xff] }
0x1334   :  { %11038 = vrsqrt.f32 %v3683_v38  ;;  %v12353_v38 = vld [vmem:[%s11308_s21 + $0x10] sm:$0xff] }
0x1338   :  { %v11033_v32 = vpop.eup %11032 }
0x1339   :  { %v3690_v25 = vmul.f32 %v11033_v32, %v3658_v34 }
0x133a   :  { %v11035_v29 = vpop.eup %11034 }
0x133b   :  { %v3689_v62 = vmul.f32 %v11035_v29, %v3657_v30  ;;  %v3700_v26 = vmul.f32 %v9133_v24, %v3690_v25  ;;  %v12357_v25 = vld [vmem:[%s11303_s17 + $0x18] sm:$0xff] }
0x133c   :  { %v12361_v29 = vld [vmem:[%s11308_s21 + $0x18] sm:$0xff] }
0x133d   :  { %v3699_v54 = vmul.f32 %v9133_v24, %v3689_v62  ;;  %v3710_v61 = vadd.f32 %v9134_v1, %v3700_v26 }
0x133f   :  { %v11037_v17 = vpop.eup %11036  ;;  %v3709_v2 = vadd.f32 %v9134_v1, %v3699_v54 }
0x1340   :  { %v3692_v56 = vmul.f32 %v11037_v17, %v3660_v40  ;;  %v12309_v40 = vld [vmem:[%s13107_s14 + $0x8] sm:$0xff] }
0x1341   :  { %v11039_v52 = vpop.eup %11038  ;;  %10293 = vmatprep.mubr.msk.f32.mxu1 %vm339_vm1, %v3709_v2  ;;  %10325 = vmatprep.subr.mxu0 %v12309_v40 }
0x1342   :  { %10294 = vmatmul.mubr.msk.f32.vlgmr.msra.gmra.mxu1 %vm339_vm1, %v3710_v61  ;;  %v3691_v59 = vmul.f32 %v11039_v52, %v3659_v42  ;;  %v3702_v50 = vmul.f32 %v9133_v24, %v3692_v56  ;;  %10326 = vmatpush3.msra.mxu0 %v12309_v40  ;;  %v12319_v42 = vld [vmem:[%s13107_s14] sm:$0xff] }
0x1343   :  { %10327 = vmatprep.subr.mxu0 %v12319_v42 }
0x1344   :  { %v3701_v43 = vmul.f32 %v9133_v24, %v3691_v59  ;;  %v3712_v60 = vadd.f32 %v9134_v1, %v3702_v50  ;;  %10328 = vmatpush3.msra.mxu0 %v12319_v42 }
0x1346   :  { %v3711_v10 = vadd.f32 %v9134_v1, %v3701_v43 }
0x1348   :  { %10296 = vmatprep.mubr.msk.f32.mxu1 %vm339_vm1, %v3711_v10 }
0x1349   :  { %10297 = vmatmul.mubr.msk.f32.gmra.mxu1 %vm339_vm1, %v3712_v60 }
0x1402   :  { %v10295_v55 = vpop.f32.mrf.mxu1 }
0x1403   :  { %v12255_v34 = vadd.f32 %v10295_v55, %v9135_v4  ;;  %v12369_v55 = vld [vmem:[%s11313_s25 + $0x8] sm:$0xff] }
0x1404   :  { %v3802_v57 = vpop.f32.mrf.mxu1 }
0x1405   :  { %v12243_v22 = vadd.f32 %v9135_v4, %v3802_v57 }
0x1407   :  { %10307 = vmatprep.mubr.msk.f32.mxu1 %vm541_vm2, %v12243_v22 }
0x1409   :  { %v10298_v5 = vpop.f32.mrf.mxu1 }
0x140a   :  { %v12247_v7 = vadd.f32 %v10298_v5, %v9135_v4 }
0x140b   :  { %v3812_v11 = vpop.f32.mrf.mxu1 }
0x140c   :  { %v12249_v23 = vadd.f32 %v9135_v4, %v3812_v11  ;;  %3839 = vrot.lane.b32.xlu0 %v12247_v7, %s11265_s0 }
0x140e   :  { %3837 = vrot.lane.b32.xlu1 %v12249_v23, %s11265_s0 }
0x1412   :  { %3835 = vrot.lane.b32.xlu1 %v12255_v34, %s11265_s0 }
0x1416   :  { %3833 = vrot.lane.b32.xlu1 %v12243_v22, %s11265_s0  ;;  %s13109_s0 = sld [smem:[#allocation19_spill]] }
0x147e   :  { %v3840_v27 = vpop.permute.xlu0 %3839 }
0x147f   :  { %10299 = vmatprep.subr.msk.mxu1 %vm541_vm2, %v3840_v27 }
0x1480   :  { %10300 = vmatpush3.xpose.msk.msra.mxu1 %vm541_vm2, %v3840_v27  ;;  %v3838_v30 = vpop.permute.xlu1 %3837  ;;  %v12373_v27 = vld [vmem:[%s11313_s25] sm:$0xff] }
0x1481   :  { %10301 = vmatprep.subr.msk.mxu1 %vm541_vm2, %v3838_v30 }
0x1484   :  { %10302 = vmatpush3.xpose.msk.msra.mxu1 %vm541_vm2, %v3838_v30  ;;  %v3836_v33 = vpop.permute.xlu1 %3835 }
0x1485   :  { %10303 = vmatprep.subr.msk.mxu1 %vm541_vm2, %v3836_v33 }
0x1488   :  { %10304 = vmatpush3.xpose.msk.msra.mxu1 %vm541_vm2, %v3836_v33  ;;  %v3834_v21 = vpop.permute.xlu1 %3833 }
0x1489   :  { %10305 = vmatprep.subr.msk.mxu1 %vm541_vm2, %v3834_v21 }
0x148c   :  { %10306 = vmatpush3.xpose.msk.msra.mxu1 %vm541_vm2, %v3834_v21 }
0x148d   :  { %10313 = vmatprep.subr.mxu1 %v12270_v49 }
0x148f   :  { %10308 = vmatmul.mubr.msk.f32.vlgmr.msra.gmra.mxu1 %vm541_vm2, %v12255_v34 }
0x1490   :  { %10310 = vmatprep.mubr.msk.f32.mxu1 %vm541_vm2, %v12249_v23  ;;  %10314 = vmatpush3.msra.mxu1 %v12270_v49 }
0x1491   :  { %10335 = vmatprep.subr.mxu1 %v12292_v35 }
0x1493   :  { %10311 = vmatmul.mubr.msk.f32.gmra.mxu1 %vm541_vm2, %v12247_v7 }
0x1494   :  { %10315 = vmatprep.mubr.msk.f32.mxu1 %vm541_vm2, %v12243_v22 }
0x1497   :  { %10316 = vmatmul.mubr.msk.f32.vlgmr.msra.gmra.mxu1 %vm541_vm2, %v12255_v34 }
0x1498   :  { %10318 = vmatprep.mubr.msk.f32.mxu1 %vm541_vm2, %v12249_v23  ;;  %10336 = vmatpush3.msra.mxu1 %v12292_v35 }
0x1499   :  { %10337 = vmatprep.subr.mxu1 %v12302_v37 }
0x149a   :  { %10338 = vmatpush3.msra.mxu1 %v12302_v37 }
0x149b   :  { %10319 = vmatmul.mubr.msk.f32.gmra.mxu1 %vm541_vm2, %v12247_v7  ;;  %10339 = vmatprep.subr.mxu1 %v12312_v41 }
0x149c   :  { %10340 = vmatpush3.msra.mxu1 %v12312_v41 }
0x149d   :  { %10341 = vmatprep.subr.mxu1 %v12322_v45 }
0x149e   :  { %10342 = vmatpush3.msra.mxu1 %v12322_v45 }
0x154f   :  { %v10309_v16 = vpop.f32.mrf.mxu1 }
0x1550   :  { %v3943_v26 = vmul.f32 0.35355338, %v10309_v16 }
0x1551   :  { %v3923_v6 = vpop.f32.mrf.mxu1 }
0x1552   :  { %v3942_v17 = vmul.f32 0.35355338, %v3923_v6 }
0x1553   :  { %v10312_v18 = vpop.f32.mrf.mxu1 }
0x1554   :  { %v3945_v52 = vmul.f32 0.35355338, %v10312_v18  ;;  %v12378_v18 = vld [vmem:[%s11313_s25 + $0x18] sm:$0xff] }
0x1555   :  { %v3933_v46 = vpop.f32.mrf.mxu1 }
0x1556   :  { %v3944_v60 = vmul.f32 0.35355338, %v3933_v46 }
0x1557   :  { %v10317_v58 = vpop.f32.mrf.mxu1 }
0x1558   :  { %v4032_v9 = vmul.f32 %v12337_v15, %v10317_v58  ;;  %v4137_v20 = vmul.f32 %v12341_v0, %v10317_v58 }
0x1559   :  { %v4012_v47 = vpop.f32.mrf.mxu1 }
0x155a   :  { %v4031_v8 = vmul.f32 %v12329_v28, %v4012_v47  ;;  %v4136_v51 = vmul.f32 %v12333_v19, %v4012_v47 }
0x155b   :  { %v10320_v13 = vpop.f32.mrf.mxu1 }
0x155c   :  { %10329 = vmatprep.mubr.msk.f32.mxu0 %vm339_vm1, %v4031_v8  ;;  %10343 = vmatprep.mubr.msk.f32.mxu1 %vm339_vm1, %v4136_v51  ;;  %v4034_v24 = vmul.f32 %v12357_v25, %v10320_v13  ;;  %v4139_v62 = vmul.f32 %v12361_v29, %v10320_v13  ;;  %v12383_v8 = vld [vmem:[%s11313_s25 + $0x10] sm:$0xff] }
0x155d   :  { %v4022_v44 = vpop.f32.mrf.mxu1  ;;  %10330 = vmatmul.mubr.msk.f32.vlgmr.msra.gmra.mxu0 %vm339_vm1, %v4032_v9  ;;  %10344 = vmatmul.mubr.msk.f32.vlgmr.msra.gmra.mxu1 %vm339_vm1, %v4137_v20 }
0x155e   :  { %v4033_v31 = vmul.f32 %v12349_v12, %v4022_v44  ;;  %v4138_v32 = vmul.f32 %v12353_v38, %v4022_v44 }
0x1560   :  { %10332 = vmatprep.mubr.msk.f32.mxu0 %vm339_vm1, %v4033_v31  ;;  %10346 = vmatprep.mubr.msk.f32.mxu1 %vm339_vm1, %v4138_v32 }
0x1561   :  { %10333 = vmatmul.mubr.msk.f32.gmra.mxu0 %vm339_vm1, %v4034_v24  ;;  %10347 = vmatmul.mubr.msk.f32.gmra.mxu1 %vm339_vm1, %v4139_v62 }
0x161d   :  { %v10331_v1 = vpop.f32.mrf.mxu0  ;;  %v10345_v54 = vpop.f32.mrf.mxu1 }
0x161e   :  { %v4133_v2 = vadd.f32 %v10331_v1, %v3943_v26 }
0x161f   :  { %v4113_v61 = vpop.f32.mrf.mxu0  ;;  %v4218_v56 = vpop.f32.mrf.mxu1 }
0x1620   :  { %v4238_v59 = vadd.f32 %v10345_v54, %v4133_v2  ;;  %v4132_v50 = vadd.f32 %v4113_v61, %v3942_v17 }
0x1621   :  { %v10334_v43 = vpop.f32.mrf.mxu0  ;;  %v10348_v10 = vpop.f32.mrf.mxu1 }
0x1622   :  { %v4242_v4 = vadd.f32 %v12369_v55, %v4238_v59  ;;  %v4237_v57 = vadd.f32 %v4218_v56, %v4132_v50  ;;  %v4135_v5 = vadd.f32 %v10334_v43, %v3945_v52 }
0x1623   :  { %v4123_v11 = vpop.f32.mrf.mxu0  ;;  %v4228_v6 = vpop.f32.mrf.mxu1 }
0x1624   :  { %v4241_v30 = vadd.f32 %v12373_v27, %v4237_v57  ;;  %v4240_v33 = vadd.f32 %v10348_v10, %v4135_v5  ;;  %v4134_v21 = vadd.f32 %v4123_v11, %v3944_v60  ;;  %v4248_v16 = vsel %vm339_vm1, %v4242_v4, -inf }
0x1625   :  { %4249 = vmax.xlane.f32.xlu1 %v4248_v16 }
0x1626   :  { %v4244_v46 = vadd.f32 %v12378_v18, %v4240_v33  ;;  %v4239_v58 = vadd.f32 %v4228_v6, %v4134_v21  ;;  %v4245_v47 = vsel %vm339_vm1, %v4241_v30, -inf }
0x1627   :  { %4246 = vmax.xlane.f32.xlu0 %v4245_v47 }
0x1628   :  { %v4243_v51 = vadd.f32 %v12383_v8, %v4239_v58  ;;  %v4254_v9 = vsel %vm339_vm1, %v4244_v46, -inf }
0x162a   :  { %v4251_v20 = vsel %vm339_vm1, %v4243_v51, -inf }
0x162b   :  { %4255 = vmax.xlane.f32.xlu0 %v4254_v9 }
0x162f   :  { %4252 = vmax.xlane.f32.xlu0 %v4251_v20 }
0x1636   :  { %4285 = vrot.lane.b32.xlu1 %v12249_v23, %s11266_s5 }
0x163a   :  { %4283 = vrot.lane.b32.xlu1 %v12255_v34, %s11266_s5 }
0x163e   :  { %4281 = vrot.lane.b32.xlu1 %v12243_v22, %s11266_s5 }
0x1642   :  { %4401 = vrot.lane.b32.xlu1 %v12255_v34, %s11267_s9 }
0x1645   :  { %4287 = vrot.lane.b32.xlu0 %v12247_v7, %s11266_s5  ;;  %s13114_s5 = sld [smem:[#allocation25_spill]] }
0x1646   :  { %4405 = vrot.lane.b32.xlu1 %v12247_v7, %s11267_s9 }
0x1649   :  { %4399 = vrot.lane.b32.xlu0 %v12243_v22, %s11267_s9 }
0x164a   :  { %4411 = vrot.lane.b32.xlu1 %v12249_v23, %s11268_s29 }
0x164d   :  { %4403 = vrot.lane.b32.xlu0 %v12249_v23, %s11267_s9  ;;  %s13115_s9 = sld [smem:[#allocation24_spill]] }
0x164e   :  { %4407 = vrot.lane.b32.xlu1 %v12243_v22, %s11268_s29 }
0x1651   :  { %4413 = vrot.lane.b32.xlu0 %v12247_v7, %s11268_s29 }
0x1655   :  { %4409 = vrot.lane.b32.xlu0 %v12255_v34, %s11268_s29  ;;  %s13116_s29 = sld [smem:[#allocation27_spill]] }
0x16ae   :  { %v4250_v13 = vpop.xlane.xlu1 %4249 }
0x16af   :  { %v4258_v44 = vsub.f32 %v4242_v4, %v4250_v13 }
0x16b0   :  { %v4247_v31 = vpop.xlane.xlu0 %4246 }
0x16b1   :  { %v4263_v32 = vmul.f32 1.442695, %v4258_v44  ;;  %v4257_v24 = vsub.f32 %v4241_v30, %v4247_v31 }
0x16b2   :  { %v4286_v62 = vpop.permute.xlu1 %4285 }
0x16b3   :  { %11040 = vpow2.f32 %v4263_v32  ;;  %v4261_v26 = vmul.f32 1.442695, %v4257_v24 }
0x16b4   :  { %v4256_v1 = vpop.xlane.xlu0 %4255 }
0x16b5   :  { %11042 = vpow2.f32 %v4261_v26  ;;  %v4260_v54 = vsub.f32 %v4244_v46, %v4256_v1 }
0x16b6   :  { %v4284_v17 = vpop.permute.xlu1 %4283 }
0x16b7   :  { %v4267_v2 = vmul.f32 1.442695, %v4260_v54 }
0x16b8   :  { %v4253_v61 = vpop.xlane.xlu0 %4252 }
0x16b9   :  { %11044 = vpow2.f32 %v4267_v2  ;;  %v4259_v56 = vsub.f32 %v4243_v51, %v4253_v61 }
0x16ba   :  { %v4282_v52 = vpop.permute.xlu1 %4281 }
0x16bb   :  { %v4265_v59 = vmul.f32 1.442695, %v4259_v56 }
0x16bc   :  { %v4288_v50 = vpop.permute.xlu0 %4287 }
0x16bd   :  { %11046 = vpow2.f32 %v4265_v59  ;;  %10349 = vmatprep.subr.mxu0 %v4288_v50 }
0x16be   :  { %v4402_v43 = vpop.permute.xlu1 %4401  ;;  %10350 = vmatpush3.msra.mxu0 %v4288_v50 }
0x16bf   :  { %10351 = vmatprep.subr.mxu0 %v4286_v62 }
0x16c0   :  { %v11041_v10 = vpop.eup %11040  ;;  %10352 = vmatpush3.msra.mxu0 %v4286_v62  ;;  %v4400_v60 = vpop.permute.xlu0 %4399 }
0x16c1   :  { %10353 = vmatprep.subr.mxu0 %v4284_v17  ;;  %10371 = vmatprep.mubr.msk.f32.mxu1 %vm541_vm2, %v4400_v60  ;;  %v4272_v4 = vsel %vm339_vm1, %v11041_v10, 0.0 }
0x16c2   :  { %v11043_v57 = vpop.eup %11042  ;;  %4273 = vadd.xlane.f32.xlu1 %v4272_v4  ;;  %10354 = vmatpush3.msra.mxu0 %v4284_v17  ;;  %v4406_v11 = vpop.permute.xlu1 %4405 }
0x16c3   :  { %10355 = vmatprep.subr.mxu0 %v4282_v52  ;;  %10357 = vmatprep.mubr.msk.f32.mxu0 %vm339_vm1, %v11043_v57  ;;  %v4269_v5 = vsel %vm339_vm1, %v11043_v57, 0.0 }
0x16c4   :  { %4270 = vadd.xlane.f32.xlu0 %v4269_v5  ;;  %10356 = vmatpush3.msra.mxu0 %v4282_v52  ;;  %v4404_v30 = vpop.permute.xlu0 %4403 }
0x16c5   :  { %10358 = vmatmul.mubr.msk.f32.vlgmr.msra.gmra.mxu0 %vm339_vm1, %v11041_v10  ;;  %10377 = vmatprep.subr.mxu0 %v12270_v49 }
0x16c6   :  { %v11045_v33 = vpop.eup %11044  ;;  %10378 = vmatpush3.msra.mxu0 %v12270_v49  ;;  %v4412_v46 = vpop.permute.xlu1 %4411 }
0x16c7   :  { %v4278_v21 = vsel %vm339_vm1, %v11045_v33, 0.0  ;;  %10385 = vmatprep.subr.mxu0 %v12289_v14 }
0x16c8   :  { %4279 = vadd.xlane.f32.xlu1 %v4278_v21  ;;  %v4414_v16 = vpop.permute.xlu0 %4413 }
0x16c9   :  { %10363 = vmatprep.subr.msk.mxu1 %vm541_vm2, %v4414_v16 }
0x16ca   :  { %v11047_v6 = vpop.eup %11046  ;;  %10364 = vmatpush3.xpose.msk.msra.mxu1 %vm541_vm2, %v4414_v16  ;;  %v4408_v51 = vpop.permute.xlu1 %4407 }
0x16cb   :  { %10360 = vmatprep.mubr.msk.f32.mxu0 %vm339_vm1, %v11047_v6  ;;  %10365 = vmatprep.subr.msk.mxu1 %vm541_vm2, %v4412_v46  ;;  %v4275_v58 = vsel %vm339_vm1, %v11047_v6, 0.0 }
0x16cc   :  { %4276 = vadd.xlane.f32.xlu0 %v4275_v58  ;;  %10361 = vmatmul.mubr.msk.f32.gmra.mxu0 %vm339_vm1, %v11045_v33  ;;  %v4410_v47 = vpop.permute.xlu0 %4409 }
0x16cd   :  { %10379 = vmatprep.mubr.msk.f32.mxu0 %vm541_vm2, %v4400_v60 }
0x16ce   :  { %10366 = vmatpush3.xpose.msk.msra.mxu1 %vm541_vm2, %v4412_v46 }
0x16cf   :  { %10367 = vmatprep.subr.msk.mxu1 %vm541_vm2, %v4410_v47 }
0x16d0   :  { %10380 = vmatmul.mubr.msk.f32.vlgmr.msra.gmra.mxu0 %vm541_vm2, %v4402_v43 }
0x16d1   :  { %10382 = vmatprep.mubr.msk.f32.mxu0 %vm541_vm2, %v4404_v30  ;;  %10386 = vmatpush3.msra.mxu0 %v12289_v14 }
0x16d2   :  { %10368 = vmatpush3.xpose.msk.msra.mxu1 %vm541_vm2, %v4410_v47  ;;  %10387 = vmatprep.subr.mxu0 %v12299_v36 }
0x16d3   :  { %10369 = vmatprep.subr.msk.mxu1 %vm541_vm2, %v4408_v51  ;;  %10388 = vmatpush3.msra.mxu0 %v12299_v36 }
0x16d4   :  { %10383 = vmatmul.mubr.msk.f32.gmra.mxu0 %vm541_vm2, %v4406_v11  ;;  %10389 = vmatprep.subr.mxu0 %v12309_v40 }
0x16d5   :  { %10390 = vmatpush3.msra.mxu0 %v12309_v40 }
0x16d6   :  { %10370 = vmatpush3.xpose.msk.msra.mxu1 %vm541_vm2, %v4408_v51  ;;  %10391 = vmatprep.subr.mxu0 %v12319_v42 }
0x16d7   :  { %10399 = vmatprep.subr.mxu1 %v12292_v35  ;;  %10392 = vmatpush3.msra.mxu0 %v12319_v42 }
0x16d9   :  { %10372 = vmatmul.mubr.msk.f32.vlgmr.msra.gmra.mxu1 %vm541_vm2, %v4402_v43 }
0x16da   :  { %10374 = vmatprep.mubr.msk.f32.mxu1 %vm541_vm2, %v4404_v30  ;;  %10400 = vmatpush3.msra.mxu1 %v12292_v35 }
0x16db   :  { %10401 = vmatprep.subr.mxu1 %v12302_v37 }
0x16dc   :  { %10402 = vmatpush3.msra.mxu1 %v12302_v37 }
0x16dd   :  { %10375 = vmatmul.mubr.msk.f32.gmra.mxu1 %vm541_vm2, %v4406_v11  ;;  %10403 = vmatprep.subr.mxu1 %v12312_v41 }
0x16de   :  { %10404 = vmatpush3.msra.mxu1 %v12312_v41 }
0x16df   :  { %10405 = vmatprep.subr.mxu1 %v12322_v45 }
0x16e0   :  { %10406 = vmatpush3.msra.mxu1 %v12322_v45 }
0x1785   :  { %v12454_v9 = vpop.f32.mrf.mxu0 }
0x1787   :  { %v12456_v20 = vpop.f32.mrf.mxu0 }
0x178c   :  { %v12458_v13 = vpop.f32.mrf.mxu0 }
0x178e   :  { %v12460_v44 = vpop.f32.mrf.mxu0 }
0x1790   :  { %v10381_v31 = vpop.f32.mrf.mxu0 }
0x1791   :  { %v4606_v26 = vmul.f32 %v12337_v15, %v10381_v31  ;;  %v4711_v1 = vmul.f32 %v12341_v0, %v10381_v31 }
0x1792   :  { %v4586_v32 = vpop.f32.mrf.mxu0 }
0x1793   :  { %v4605_v24 = vmul.f32 %v12329_v28, %v4586_v32  ;;  %v4710_v62 = vmul.f32 %v12333_v19, %v4586_v32 }
0x1794   :  { %v10384_v54 = vpop.f32.mrf.mxu0 }
0x1795   :  { %10393 = vmatprep.mubr.msk.f32.mxu0 %vm339_vm1, %v4605_v24  ;;  %10407 = vmatprep.mubr.msk.f32.mxu1 %vm339_vm1, %v4710_v62  ;;  %v4608_v56 = vmul.f32 %v12357_v25, %v10384_v54  ;;  %v4713_v52 = vmul.f32 %v12361_v29, %v10384_v54 }
0x1796   :  { %v4596_v17 = vpop.f32.mrf.mxu0  ;;  %10394 = vmatmul.mubr.msk.f32.vlgmr.msra.gmra.mxu0 %vm339_vm1, %v4606_v26  ;;  %10408 = vmatmul.mubr.msk.f32.vlgmr.msra.gmra.mxu1 %vm339_vm1, %v4711_v1 }
0x1797   :  { %v4607_v2 = vmul.f32 %v12349_v12, %v4596_v17  ;;  %v4712_v61 = vmul.f32 %v12353_v38, %v4596_v17 }
0x1799   :  { %10396 = vmatprep.mubr.msk.f32.mxu0 %vm339_vm1, %v4607_v2  ;;  %10410 = vmatprep.mubr.msk.f32.mxu1 %vm339_vm1, %v4712_v61  ;;  %v10373_v59 = vpop.f32.mrf.mxu1 }
0x179a   :  { %10397 = vmatmul.mubr.msk.f32.gmra.mxu0 %vm339_vm1, %v4608_v56  ;;  %10411 = vmatmul.mubr.msk.f32.gmra.mxu1 %vm339_vm1, %v4713_v52  ;;  %v4517_v60 = vmul.f32 0.35355338, %v10373_v59 }
0x179b   :  { %v4497_v50 = vpop.f32.mrf.mxu1 }
0x179c   :  { %v4516_v5 = vmul.f32 0.35355338, %v4497_v50 }
0x179d   :  { %v10376_v43 = vpop.f32.mrf.mxu1 }
0x179e   :  { %v4519_v21 = vmul.f32 0.35355338, %v10376_v43  ;;  %v4274_v43 = vpop.xlane.xlu1 %4273 }
0x179f   :  { %v4507_v10 = vpop.f32.mrf.mxu1 }
0x17a0   :  { %v4518_v47 = vmul.f32 0.35355338, %v4507_v10  ;;  %v4271_v10 = vpop.xlane.xlu0 %4270 }
0x1856   :  { %v10395_v4 = vpop.f32.mrf.mxu0  ;;  %v10409_v57 = vpop.f32.mrf.mxu1 }
0x1857   :  { %v4707_v11 = vadd.f32 %v10395_v4, %v4517_v60  ;;  %v4280_v60 = vpop.xlane.xlu1 %4279  ;;  %v4277_v4 = vpop.xlane.xlu0 %4276 }
0x1858   :  { %v4687_v30 = vpop.f32.mrf.mxu0  ;;  %v4792_v33 = vpop.f32.mrf.mxu1 }
0x1859   :  { %v4812_v16 = vadd.f32 %v10409_v57, %v4707_v11  ;;  %v4706_v6 = vadd.f32 %v4687_v30, %v4516_v5 }
0x185a   :  { %v10398_v46 = vpop.f32.mrf.mxu0  ;;  %v10412_v58 = vpop.f32.mrf.mxu1 }
0x185b   :  { %v4816_v51 = vadd.f32 %v12369_v55, %v4812_v16  ;;  %v4811_v31 = vadd.f32 %v4792_v33, %v4706_v6  ;;  %v4709_v32 = vadd.f32 %v10398_v46, %v4519_v21 }
0x185c   :  { %v4697_v24 = vpop.f32.mrf.mxu0  ;;  %v4802_v17 = vpop.f32.mrf.mxu1 }
0x185d   :  { %v4815_v62 = vadd.f32 %v12373_v27, %v4811_v31  ;;  %v4814_v26 = vadd.f32 %v10412_v58, %v4709_v32  ;;  %v4708_v1 = vadd.f32 %v4697_v24, %v4518_v47  ;;  %v4822_v54 = vsel %vm339_vm1, %v4816_v51, -inf }
0x185e   :  { %4823 = vmax.xlane.f32.xlu1 %v4822_v54 }
0x185f   :  { %v4818_v2 = vadd.f32 %v12378_v18, %v4814_v26  ;;  %v4813_v61 = vadd.f32 %v4802_v17, %v4708_v1  ;;  %v4819_v56 = vsel %vm339_vm1, %v4815_v62, -inf  ;;  %v4398_v17 = vld [vmem:[%s13109_s0] sm:$0xff] }
0x1860   :  { %4820 = vmax.xlane.f32.xlu0 %v4819_v56 }
0x1861   :  { %v4817_v52 = vadd.f32 %v12383_v8, %v4813_v61  ;;  %v4828_v59 = vsel %vm339_vm1, %v4818_v2, -inf }
0x1863   :  { %v4825_v50 = vsel %vm339_vm1, %v4817_v52, -inf }
0x1864   :  { %4829 = vmax.xlane.f32.xlu0 %v4828_v59 }
0x1868   :  { %4826 = vmax.xlane.f32.xlu0 %v4825_v50 }
0x186f   :  { %4859 = vrot.lane.b32.xlu1 %v12249_v23, %s11269_s3 }
0x1873   :  { %4857 = vrot.lane.b32.xlu1 %v12255_v34, %s11269_s3 }
0x1877   :  { %4855 = vrot.lane.b32.xlu1 %v12243_v22, %s11269_s3 }
0x187b   :  { %5169 = vrot.lane.b32.xlu1 %v12255_v34, %s11270_s8 }
0x187e   :  { %4861 = vrot.lane.b32.xlu0 %v12247_v7, %s11269_s3  ;;  %s13117_s3 = sld [smem:[#allocation26_spill]] }
0x187f   :  { %5173 = vrot.lane.b32.xlu1 %v12247_v7, %s11270_s8 }
0x1882   :  { %5167 = vrot.lane.b32.xlu0 %v12243_v22, %s11270_s8 }
0x1886   :  { %5171 = vrot.lane.b32.xlu0 %v12249_v23, %s11270_s8  ;;  %s13118_s8 = sld [smem:[#allocation28_spill]] }
0x18e7   :  { %v4824_v57 = vpop.xlane.xlu1 %4823 }
0x18e8   :  { %v4832_v5 = vsub.f32 %v4816_v51, %v4824_v57 }
0x18e9   :  { %v4821_v11 = vpop.xlane.xlu0 %4820 }
0x18ea   :  { %v4837_v30 = vmul.f32 1.442695, %v4832_v5  ;;  %v4831_v33 = vsub.f32 %v4815_v62, %v4821_v11 }
0x18eb   :  { %v4860_v46 = vpop.permute.xlu1 %4859 }
0x18ec   :  { %11048 = vpow2.f32 %v4837_v30  ;;  %v4835_v21 = vmul.f32 1.442695, %v4831_v33 }
0x18ed   :  { %v4830_v16 = vpop.xlane.xlu0 %4829 }
0x18ee   :  { %11050 = vpow2.f32 %v4835_v21  ;;  %v4834_v6 = vsub.f32 %v4818_v2, %v4830_v16 }
0x18ef   :  { %v4858_v24 = vpop.permute.xlu1 %4857 }
0x18f0   :  { %v4841_v58 = vmul.f32 1.442695, %v4834_v6 }
0x18f1   :  { %v4827_v47 = vpop.xlane.xlu0 %4826 }
0x18f2   :  { %11052 = vpow2.f32 %v4841_v58  ;;  %v4833_v31 = vsub.f32 %v4817_v52, %v4827_v47 }
0x18f3   :  { %11054 = vrcp.f32 %v4271_v10  ;;  %v4856_v54 = vpop.permute.xlu1 %4855 }
0x18f4   :  { %v4839_v32 = vmul.f32 1.442695, %v4833_v31 }
0x18f5   :  { %v4862_v26 = vpop.permute.xlu0 %4861 }
0x18f6   :  { %11056 = vpow2.f32 %v4839_v32  ;;  %10413 = vmatprep.subr.mxu0 %v4862_v26 }
0x18f7   :  { %10414 = vmatpush3.msra.mxu0 %v4862_v26  ;;  %11058 = vrcp.f32 %v4274_v43 }
0x18f8   :  { %10415 = vmatprep.subr.mxu0 %v4860_v46  ;;  %11060 = vrcp.f32 %v4277_v4 }
0x18f9   :  { %v11049_v51 = vpop.eup %11048  ;;  %10416 = vmatpush3.msra.mxu0 %v4860_v46  ;;  %11062 = vrcp.f32 %v4280_v60  ;;  %v5168_v11 = vpop.permute.xlu0 %5167 }
0x18fa   :  { %10417 = vmatprep.subr.mxu0 %v4858_v24  ;;  %v4846_v62 = vsel %vm339_vm1, %v11049_v51, 0.0 }
0x18fb   :  { %v11051_v1 = vpop.eup %11050  ;;  %4847 = vadd.xlane.f32.xlu1 %v4846_v62  ;;  %10418 = vmatpush3.msra.mxu0 %v4858_v24 }
0x18fc   :  { %10419 = vmatprep.subr.mxu0 %v4856_v54  ;;  %10421 = vmatprep.mubr.msk.f32.mxu0 %vm339_vm1, %v11051_v1  ;;  %v4843_v2 = vsel %vm339_vm1, %v11051_v1, 0.0 }
0x18fd   :  { %4844 = vadd.xlane.f32.xlu0 %v4843_v2  ;;  %10420 = vmatpush3.msra.mxu0 %v4856_v54  ;;  %v12530_v30 = vpop.permute.xlu0 %5171 }
0x18fe   :  { %10422 = vmatmul.mubr.msk.f32.vlgmr.msra.gmra.mxu0 %vm339_vm1, %v11049_v51  ;;  %10435 = vmatprep.subr.mxu0 %v4398_v17 }
0x18ff   :  { %v11053_v61 = vpop.eup %11052  ;;  %10436 = vmatpush3.msra.mxu0 %v4398_v17 }
0x1900   :  { %v4852_v56 = vsel %vm339_vm1, %v11053_v61, 0.0  ;;  %10457 = vmatprep.subr.mxu0 %v12270_v49  ;;  %v11055_v52 = vpop.eup %11054 }
0x1901   :  { %4853 = vadd.xlane.f32.xlu0 %v4852_v56  ;;  %v4391_v50 = vmul.f32 %v11055_v52, %v12456_v20 }
0x1903   :  { %v11057_v59 = vpop.eup %11056 }
0x1904   :  { %10424 = vmatprep.mubr.msk.f32.mxu0 %vm339_vm1, %v11057_v59  ;;  %v4849_v43 = vsel %vm339_vm1, %v11057_v59, 0.0  ;;  %v11059_v10 = vpop.eup %11058 }
0x1905   :  { %4850 = vadd.xlane.f32.xlu0 %v4849_v43  ;;  %10425 = vmatmul.mubr.msk.f32.gmra.mxu0 %vm339_vm1, %v11053_v61  ;;  %v11061_v60 = vpop.eup %11060  ;;  %v4393_v4 = vmul.f32 %v11059_v10, %v12454_v9  ;;  %v12524_v9 = vpop.permute.xlu1 %5169 }
0x1906   :  { %10437 = vmatprep.mubr.msk.f32.mxu0 %vm541_vm2, %v4391_v50  ;;  %v4395_v57 = vmul.f32 %v11061_v60, %v12460_v44  ;;  %v11063_v5 = vpop.eup %11062  ;;  %v4972_v44 = vld [vmem:[%s13109_s0 + $0x8] sm:$0xff] }
0x1907   :  { %v4397_v20 = vmul.f32 %v11063_v5, %v12458_v13  ;;  %10427 = vmatprep.subr.mxu1 %v4972_v44 }
0x1908   :  { %10428 = vmatpush3.msra.mxu1 %v4972_v44 }
0x1909   :  { %10438 = vmatmul.mubr.msk.f32.vlgmr.msra.gmra.mxu0 %vm541_vm2, %v4393_v4 }
0x190a   :  { %10440 = vmatprep.mubr.msk.f32.mxu0 %vm541_vm2, %v4395_v57  ;;  %10458 = vmatpush3.msra.mxu0 %v12270_v49  ;;  %v12537_v49 = vpop.permute.xlu1 %5173 }
0x190b   :  { %10465 = vmatprep.subr.mxu0 %v12289_v14 }
0x190c   :  { %5179 = vrot.lane.b32.xlu1 %v12249_v23, %s11271_s19 }
0x190d   :  { %10441 = vmatmul.mubr.msk.f32.gmra.mxu0 %vm541_vm2, %v4397_v20 }
0x190e   :  { %10459 = vmatprep.mubr.msk.f32.mxu0 %vm541_vm2, %v5168_v11 }
0x1910   :  { %5177 = vrot.lane.b32.xlu1 %v12255_v34, %s11271_s19 }
0x1911   :  { %10460 = vmatmul.mubr.msk.f32.vlgmr.msra.gmra.mxu0 %vm541_vm2, %v12524_v9 }
0x1912   :  { %10462 = vmatprep.mubr.msk.f32.mxu0 %vm541_vm2, %v12530_v30  ;;  %10466 = vmatpush3.msra.mxu0 %v12289_v14 }
0x1913   :  { %10467 = vmatprep.subr.mxu0 %v12299_v36 }
0x1914   :  { %5175 = vrot.lane.b32.xlu1 %v12243_v22, %s11271_s19  ;;  %10468 = vmatpush3.msra.mxu0 %v12299_v36 }
0x1915   :  { %10463 = vmatmul.mubr.msk.f32.gmra.mxu0 %vm541_vm2, %v12537_v49  ;;  %10469 = vmatprep.subr.mxu0 %v12309_v40 }
0x1916   :  { %10470 = vmatpush3.msra.mxu0 %v12309_v40 }
0x1917   :  { %10471 = vmatprep.subr.mxu0 %v12319_v42 }
0x1918   :  { %10472 = vmatpush3.msra.mxu0 %v12319_v42 }
0x191b   :  { %5181 = vrot.lane.b32.xlu0 %v12247_v7, %s11271_s19  ;;  %s13119_s19 = sld [smem:[#allocation29_spill]] }
0x1984   :  { %v4848_v16 = vpop.xlane.xlu1 %4847 }
0x1986   :  { %v4845_v14 = vpop.xlane.xlu0 %4844 }
0x1987   :  { %11064 = vrcp.f32 %v4845_v14 }
0x1988   :  { %11066 = vrcp.f32 %v4848_v16  ;;  %v5180_v58 = vpop.permute.xlu1 %5179 }
0x198a   :  { %v4854_v13 = vpop.xlane.xlu0 %4853 }
0x198c   :  { %v5178_v24 = vpop.permute.xlu1 %5177 }
0x198e   :  { %v4851_v33 = vpop.xlane.xlu0 %4850 }
0x198f   :  { %11068 = vrcp.f32 %v4851_v33 }
0x1990   :  { %11070 = vrcp.f32 %v4854_v13  ;;  %v5176_v2 = vpop.permute.xlu1 %5175 }
0x1992   :  { %v5182_v21 = vpop.permute.xlu0 %5181 }
0x1993   :  { %10443 = vmatprep.subr.msk.mxu1 %vm541_vm2, %v5182_v21 }
0x1994   :  { %v11065_v40 = vpop.eup %11064 }
0x1995   :  { %v11067_v46 = vpop.eup %11066 }
0x199c   :  { %v11069_v32 = vpop.eup %11068 }
0x199d   :  { %v11071_v51 = vpop.eup %11070 }
0x19be   :  { %v10423_v36 = vpop.f32.mrf.mxu0 }
0x19bf   :  { %v4967_v47 = vmul.f32 %v11067_v46, %v10423_v36 }
0x19c0   :  { %v4945_v6 = vpop.f32.mrf.mxu0 }
0x19c1   :  { %v4965_v42 = vmul.f32 %v11065_v40, %v4945_v6 }
0x19c3   :  { %10429 = vmatprep.mubr.msk.f32.mxu1 %vm541_vm2, %v4965_v42 }
0x19c4   :  { %10430 = vmatmul.mubr.msk.f32.vlgmr.msra.gmra.mxu1 %vm541_vm2, %v4967_v47 }
0x19c5   :  { %10444 = vmatpush3.xpose.msk.msra.mxu1 %vm541_vm2, %v5182_v21  ;;  %v10426_v31 = vpop.f32.mrf.mxu0 }
0x19c6   :  { %10445 = vmatprep.subr.msk.mxu1 %vm541_vm2, %v5180_v58  ;;  %v4971_v1 = vmul.f32 %v11071_v51, %v10426_v31 }
0x19c7   :  { %v4955_v26 = vpop.f32.mrf.mxu0 }
0x19c8   :  { %v4969_v62 = vmul.f32 %v11069_v32, %v4955_v26 }
0x19c9   :  { %10446 = vmatpush3.xpose.msk.msra.mxu1 %vm541_vm2, %v5180_v58  ;;  %v12557_v54 = vpop.f32.mrf.mxu0 }
0x19ca   :  { %10447 = vmatprep.subr.msk.mxu1 %vm541_vm2, %v5178_v24  ;;  %10432 = vmatprep.mubr.msk.f32.mxu1 %vm541_vm2, %v4969_v62 }
0x19cb   :  { %10433 = vmatmul.mubr.msk.f32.gmra.mxu1 %vm541_vm2, %v4971_v1  ;;  %v12562_v17 = vpop.f32.mrf.mxu0 }
0x19cc   :  { %10451 = vmatprep.mubr.msk.f32.mxu1 %vm541_vm2, %v5168_v11 }
0x19cd   :  { %10448 = vmatpush3.xpose.msk.msra.mxu1 %vm541_vm2, %v5178_v24  ;;  %v12566_v61 = vpop.f32.mrf.mxu0 }
0x19ce   :  { %10449 = vmatprep.subr.msk.mxu1 %vm541_vm2, %v5176_v2 }
0x19cf   :  { %v12569_v56 = vpop.f32.mrf.mxu0 }
0x19d1   :  { %10450 = vmatpush3.xpose.msk.msra.mxu1 %vm541_vm2, %v5176_v2  ;;  %v10461_v52 = vpop.f32.mrf.mxu0 }
0x19d2   :  { %10479 = vmatprep.subr.mxu1 %v12292_v35  ;;  %v5374_v43 = vmul.f32 %v12337_v15, %v10461_v52 }
0x19d3   :  { %v5354_v59 = vpop.f32.mrf.mxu0 }
0x19d4   :  { %10452 = vmatmul.mubr.msk.f32.vlgmr.msra.gmra.mxu1 %vm541_vm2, %v12524_v9  ;;  %v5373_v50 = vmul.f32 %v12329_v28, %v5354_v59  ;;  %v5478_v60 = vmul.f32 %v12333_v19, %v5354_v59  ;;  %v5479_v19 = vmul.f32 %v12341_v0, %v10461_v52 }
0x19d5   :  { %10454 = vmatprep.mubr.msk.f32.mxu1 %vm541_vm2, %v12530_v30  ;;  %10480 = vmatpush3.msra.mxu1 %v12292_v35  ;;  %v10464_v10 = vpop.f32.mrf.mxu0 }
0x19d6   :  { %10481 = vmatprep.subr.mxu1 %v12302_v37  ;;  %10473 = vmatprep.mubr.msk.f32.mxu0 %vm339_vm1, %v5373_v50  ;;  %v5376_v35 = vmul.f32 %v12357_v25, %v10464_v10 }
0x19d7   :  { %10482 = vmatpush3.msra.mxu1 %v12302_v37  ;;  %v5364_v4 = vpop.f32.mrf.mxu0  ;;  %10474 = vmatmul.mubr.msk.f32.vlgmr.msra.gmra.mxu0 %vm339_vm1, %v5374_v43 }
0x19d8   :  { %10455 = vmatmul.mubr.msk.f32.gmra.mxu1 %vm541_vm2, %v12537_v49  ;;  %v5375_v28 = vmul.f32 %v12349_v12, %v5364_v4  ;;  %10483 = vmatprep.subr.mxu1 %v12312_v41  ;;  %v5480_v37 = vmul.f32 %v12353_v38, %v5364_v4 }
0x19d9   :  { %10484 = vmatpush3.msra.mxu1 %v12312_v41  ;;  %10487 = vmatprep.mubr.msk.f32.mxu1 %vm339_vm1, %v5478_v60  ;;  %v5481_v41 = vmul.f32 %v12361_v29, %v10464_v10 }
0x19da   :  { %10485 = vmatprep.subr.mxu1 %v12322_v45  ;;  %10476 = vmatprep.mubr.msk.f32.mxu0 %vm339_vm1, %v5375_v28 }
0x19db   :  { %10486 = vmatpush3.msra.mxu1 %v12322_v45  ;;  %10477 = vmatmul.mubr.msk.f32.gmra.mxu0 %vm339_vm1, %v5376_v35 }
0x19dc   :  { %10488 = vmatmul.mubr.msk.f32.vlgmr.msra.gmra.mxu1 %vm339_vm1, %v5479_v19 }
0x19dd   :  { %10490 = vmatprep.mubr.msk.f32.mxu1 %vm339_vm1, %v5480_v37 }
0x19e0   :  { %10491 = vmatmul.mubr.msk.f32.gmra.mxu1 %vm339_vm1, %v5481_v41 }
0x1a84   :  { %v12602_v15 = vpop.f32.mrf.mxu1 }
0x1a86   :  { %v12604_v0 = vpop.f32.mrf.mxu1 }
0x1a8b   :  { %v12606_v12 = vpop.f32.mrf.mxu1 }
0x1a8d   :  { %v12608_v25 = vpop.f32.mrf.mxu1 }
0x1a94   :  { %v10453_v38 = vpop.f32.mrf.mxu1 }
0x1a95   :  { %v5285_v20 = vmul.f32 0.35355338, %v10453_v38 }
0x1a96   :  { %v5265_v45 = vpop.f32.mrf.mxu1 }
0x1a97   :  { %v10475_v57 = vpop.f32.mrf.mxu0  ;;  %v5284_v44 = vmul.f32 0.35355338, %v5265_v45 }
0x1a98   :  { %v10456_v5 = vpop.f32.mrf.mxu1  ;;  %v5475_v30 = vadd.f32 %v10475_v57, %v5285_v20 }
0x1a99   :  { %v5455_v11 = vpop.f32.mrf.mxu0  ;;  %v5287_v14 = vmul.f32 0.35355338, %v10456_v5 }
0x1a9a   :  { %v5275_v9 = vpop.f32.mrf.mxu1  ;;  %v5474_v13 = vadd.f32 %v5455_v11, %v5284_v44 }
0x1a9b   :  { %v10478_v29 = vpop.f32.mrf.mxu0  ;;  %v5286_v36 = vmul.f32 0.35355338, %v5275_v9 }
0x1a9c   :  { %v10489_v49 = vpop.f32.mrf.mxu1  ;;  %v5477_v40 = vadd.f32 %v10478_v29, %v5287_v14  ;;  %v5740_v29 = vld [vmem:[%s13109_s0 + $0x10] sm:$0xff] }
0x1a9d   :  { %v5580_v33 = vadd.f32 %v10489_v49, %v5475_v30  ;;  %v5465_v21 = vpop.f32.mrf.mxu0  ;;  %10507 = vmatprep.subr.mxu1 %v5740_v29  ;;  %v11178_v49 = vld [vmem:[%s11298_s13] sm:$0xff]  ;;  %s13110_s13 = sld [smem:[#allocation20_spill]] }
0x1a9e   :  { %v5560_v16 = vpop.f32.mrf.mxu1  ;;  %v5476_v42 = vadd.f32 %v5465_v21, %v5286_v36  ;;  %10508 = vmatpush3.msra.mxu1 %v5740_v29 }
0x1a9f   :  { %v5584_v6 = vadd.f32 %v12369_v55, %v5580_v33  ;;  %v5579_v46 = vadd.f32 %v5560_v16, %v5474_v13  ;;  %10529 = vmatprep.subr.mxu1 %v11178_v49 }
0x1aa0   :  { %v10492_v58 = vpop.f32.mrf.mxu1 }
0x1aa1   :  { %v5583_v47 = vadd.f32 %v12373_v27, %v5579_v46  ;;  %v5582_v31 = vadd.f32 %v10492_v58, %v5477_v40  ;;  %v5590_v32 = vsel %vm339_vm1, %v5584_v6, -inf }
0x1aa2   :  { %5591 = vmax.xlane.f32.xlu1 %v5590_v32  ;;  %v5570_v24 = vpop.f32.mrf.mxu1  ;;  %v11180_v32 = vld [vmem:[%s13108_s6 + $0x10] sm:$0xff] }
0x1aa3   :  { %v5586_v26 = vadd.f32 %v12378_v18, %v5582_v31  ;;  %v5581_v51 = vadd.f32 %v5570_v24, %v5476_v42  ;;  %v5587_v62 = vsel %vm339_vm1, %v5583_v47, -inf  ;;  %v11179_v31 = vld [vmem:[%s13108_s6 + $0x18] sm:$0xff]  ;;  %v11181_v24 = vld [vmem:[%s13108_s6 + $0x8] sm:$0xff] }
0x1aa4   :  { %5588 = vmax.xlane.f32.xlu0 %v5587_v62 }
0x1aa5   :  { %v5585_v1 = vadd.f32 %v12383_v8, %v5581_v51  ;;  %v5596_v55 = vsel %vm339_vm1, %v5586_v26, -inf }
0x1aa7   :  { %v5593_v2 = vsel %vm339_vm1, %v5585_v1, -inf }
0x1aa8   :  { %5597 = vmax.xlane.f32.xlu0 %v5596_v55 }
0x1aac   :  { %5594 = vmax.xlane.f32.xlu0 %v5593_v2 }
0x1ab3   :  { %5627 = vrot.lane.b32.xlu1 %v12249_v23, %s11272_s24 }
0x1ab7   :  { %5625 = vrot.lane.b32.xlu1 %v12255_v34, %s11272_s24 }
0x1abb   :  { %5623 = vrot.lane.b32.xlu1 %v12243_v22, %s11272_s24 }
0x1ac2   :  { %5629 = vrot.lane.b32.xlu0 %v12247_v7, %s11272_s24  ;;  %s13120_s24 = sld [smem:[#allocation30_spill]] }
0x1b2b   :  { %v5592_v27 = vpop.xlane.xlu1 %5591 }
0x1b2c   :  { %v5600_v18 = vsub.f32 %v5584_v6, %v5592_v27 }
0x1b2d   :  { %v5589_v8 = vpop.xlane.xlu0 %5588 }
0x1b2e   :  { %v5605_v52 = vmul.f32 1.442695, %v5600_v18  ;;  %v5599_v59 = vsub.f32 %v5583_v47, %v5589_v8  ;;  %v11183_v8 = vld [vmem:[%s13107_s14 + $0x18] sm:$0xff] }
0x1b2f   :  { %v5628_v10 = vpop.permute.xlu1 %5627 }
0x1b30   :  { %11072 = vpow2.f32 %v5605_v52  ;;  %v5603_v50 = vmul.f32 1.442695, %v5599_v59 }
0x1b31   :  { %v5598_v43 = vpop.xlane.xlu0 %5597 }
0x1b32   :  { %11074 = vpow2.f32 %v5603_v50  ;;  %v5602_v60 = vsub.f32 %v5586_v26, %v5598_v43  ;;  %v11182_v26 = vld [vmem:[%s13108_s6] sm:$0xff] }
0x1b33   :  { %v5626_v37 = vpop.permute.xlu1 %5625 }
0x1b34   :  { %v5609_v35 = vmul.f32 1.442695, %v5602_v60  ;;  %v11184_v60 = vld [vmem:[%s13107_s14 + $0x10] sm:$0xff] }
0x1b35   :  { %v5595_v4 = vpop.xlane.xlu0 %5594 }
0x1b36   :  { %v5601_v28 = vsub.f32 %v5585_v1, %v5595_v4  ;;  %v11185_v4 = vld [vmem:[%s13107_s14 + $0x8] sm:$0xff] }
0x1b37   :  { %v5624_v5 = vpop.permute.xlu1 %5623 }
0x1b38   :  { %v5607_v19 = vmul.f32 1.442695, %v5601_v28  ;;  %v11186_v28 = vld [vmem:[%s13107_s14] sm:$0xff] }
0x1b39   :  { %v5630_v41 = vpop.permute.xlu0 %5629 }
0x1b3a   :  { %11076 = vpow2.f32 %v5607_v19  ;;  %10493 = vmatprep.subr.mxu0 %v5630_v41 }
0x1b3b   :  { %11078 = vpow2.f32 %v5609_v35  ;;  %10494 = vmatpush3.msra.mxu0 %v5630_v41  ;;  %v5154_v35 = vadd.f32 %v12557_v54, %v12602_v15 }
0x1b3c   :  { %10495 = vmatprep.subr.mxu0 %v5628_v10 }
0x1b3d   :  { %v11073_v38 = vpop.eup %11072  ;;  %10496 = vmatpush3.msra.mxu0 %v5628_v10 }
0x1b3e   :  { %10497 = vmatprep.subr.mxu0 %v5626_v37  ;;  %v5614_v45 = vsel %vm339_vm1, %v11073_v38, 0.0 }
0x1b3f   :  { %v11075_v57 = vpop.eup %11074  ;;  %5615 = vadd.xlane.f32.xlu1 %v5614_v45  ;;  %10498 = vmatpush3.msra.mxu0 %v5626_v37  ;;  %v5149_v37 = vadd.f32 %v12562_v17, %v12604_v0 }
0x1b40   :  { %10499 = vmatprep.subr.mxu0 %v5624_v5  ;;  %10501 = vmatprep.mubr.msk.f32.mxu0 %vm339_vm1, %v11075_v57  ;;  %v5611_v20 = vsel %vm339_vm1, %v11075_v57, 0.0  ;;  %v5164_v57 = vadd.f32 %v12566_v61, %v12606_v12  ;;  %v11190_v12 = vld [vmem:[%s11308_s21 + $0x8] sm:$0xff] }
0x1b41   :  { %5612 = vadd.xlane.f32.xlu0 %v5611_v20  ;;  %10500 = vmatpush3.msra.mxu0 %v5624_v5  ;;  %v5159_v20 = vadd.f32 %v12569_v56, %v12608_v25 }
0x1b42   :  { %10502 = vmatmul.mubr.msk.f32.vlgmr.msra.gmra.mxu0 %vm339_vm1, %v11073_v38 }
0x1b47   :  { %v11077_v11 = vpop.eup %11076 }
0x1b48   :  { %v11079_v9 = vpop.eup %11078  ;;  %10504 = vmatprep.mubr.msk.f32.mxu0 %vm339_vm1, %v11077_v11  ;;  %v5617_v44 = vsel %vm339_vm1, %v11077_v11, 0.0 }
0x1b49   :  { %5618 = vadd.xlane.f32.xlu0 %v5617_v44  ;;  %10505 = vmatmul.mubr.msk.f32.gmra.mxu0 %vm339_vm1, %v11079_v9  ;;  %v5620_v30 = vsel %vm339_vm1, %v11079_v9, 0.0  ;;  %v11187_v9 = vld [vmem:[%s11303_s17] sm:$0xff] }
0x1b4d   :  { %5621 = vadd.xlane.f32.xlu0 %v5620_v30  ;;  %v11188_v30 = vld [vmem:[%s11308_s21] sm:$0xff] }
0x1b50   :  { %5844 = vrot.lane.b32.xlu1 %v12255_v34, %s11273_s22 }
0x1b54   :  { %5846 = vrot.lane.b32.xlu1 %v12249_v23, %s11273_s22 }
0x1b58   :  { %5848 = vrot.lane.b32.xlu1 %v12247_v7, %s11273_s22 }
0x1b5c   :  { %5854 = vrot.lane.b32.xlu1 %v12249_v23, %s11274_s23 }
0x1b60   :  { %5850 = vrot.lane.b32.xlu1 %v12243_v22, %s11274_s23 }
0x1b63   :  { %5842 = vrot.lane.b32.xlu0 %v12243_v22, %s11273_s22 }
0x1b67   :  { %5856 = vrot.lane.b32.xlu0 %v12247_v7, %s11274_s23 }
0x1b6b   :  { %5852 = vrot.lane.b32.xlu0 %v12255_v34, %s11274_s23 }
0x1bc8   :  { %v5616_v14 = vpop.xlane.xlu1 %5615 }
0x1bca   :  { %v5613_v13 = vpop.xlane.xlu0 %5612 }
0x1bcb   :  { %11080 = vrcp.f32 %v5613_v13  ;;  %v11191_v13 = vld [vmem:[%s11303_s17 + $0x10] sm:$0xff] }
0x1bcc   :  { %v5845_v33 = vpop.permute.xlu1 %5844  ;;  %11082 = vrcp.f32 %v5616_v14 }
0x1bd0   :  { %v5847_v16 = vpop.permute.xlu1 %5846 }
0x1bd2   :  { %v5619_v21 = vpop.xlane.xlu0 %5618 }
0x1bd3   :  { %11084 = vrcp.f32 %v5619_v21  ;;  %v11192_v21 = vld [vmem:[%s11308_s21 + $0x10] sm:$0xff] }
0x1bd4   :  { %v5849_v40 = vpop.permute.xlu1 %5848 }
0x1bd6   :  { %v5622_v36 = vpop.xlane.xlu0 %5621 }
0x1bd7   :  { %11086 = vrcp.f32 %v5622_v36  ;;  %v11193_v36 = vld [vmem:[%s11303_s17 + $0x18] sm:$0xff] }
0x1bd8   :  { %v5855_v58 = vpop.permute.xlu1 %5854  ;;  %v11081_v62 = vpop.eup %11080 }
0x1bd9   :  { %v11083_v55 = vpop.eup %11082 }
0x1bda   :  { %v5843_v6 = vpop.permute.xlu0 %5842 }
0x1bdb   :  { %10523 = vmatprep.mubr.msk.f32.mxu0 %vm541_vm2, %v5843_v6 }
0x1bdc   :  { %v5851_v47 = vpop.permute.xlu1 %5850 }
0x1bde   :  { %v5857_v46 = vpop.permute.xlu0 %5856 }
0x1bdf   :  { %10515 = vmatprep.subr.msk.mxu0 %vm541_vm2, %v5857_v46 }
0x1be0   :  { %10516 = vmatpush3.xpose.msk.msra.mxu0 %vm541_vm2, %v5857_v46  ;;  %v11085_v52 = vpop.eup %11084 }
0x1be1   :  { %10517 = vmatprep.subr.msk.mxu0 %vm541_vm2, %v5855_v58 }
0x1be2   :  { %v5853_v42 = vpop.permute.xlu0 %5852 }
0x1be4   :  { %10518 = vmatpush3.xpose.msk.msra.mxu0 %vm541_vm2, %v5855_v58  ;;  %v11087_v50 = vpop.eup %11086 }
0x1be5   :  { %10519 = vmatprep.subr.msk.mxu0 %vm541_vm2, %v5853_v42 }
0x1be8   :  { %10520 = vmatpush3.xpose.msk.msra.mxu0 %vm541_vm2, %v5853_v42 }
0x1be9   :  { %10521 = vmatprep.subr.msk.mxu0 %vm541_vm2, %v5851_v47 }
0x1bec   :  { %10522 = vmatpush3.xpose.msk.msra.mxu0 %vm541_vm2, %v5851_v47 }
0x1bed   :  { %10551 = vmatprep.subr.mxu0 %v11179_v31 }
0x1bef   :  { %10524 = vmatmul.mubr.msk.f32.vlgmr.msra.gmra.mxu0 %vm541_vm2, %v5845_v33 }
0x1bf0   :  { %10526 = vmatprep.mubr.msk.f32.mxu0 %vm541_vm2, %v5847_v16  ;;  %10552 = vmatpush3.msra.mxu0 %v11179_v31 }
0x1bf1   :  { %10553 = vmatprep.subr.mxu0 %v11180_v32 }
0x1bf2   :  { %10554 = vmatpush3.msra.mxu0 %v11180_v32 }
0x1bf3   :  { %10527 = vmatmul.mubr.msk.f32.gmra.mxu0 %vm541_vm2, %v5849_v40  ;;  %10555 = vmatprep.subr.mxu0 %v11181_v24 }
0x1bf4   :  { %10556 = vmatpush3.msra.mxu0 %v11181_v24 }
0x1bf5   :  { %10557 = vmatprep.subr.mxu0 %v11182_v26 }
0x1bf6   :  { %10558 = vmatpush3.msra.mxu0 %v11182_v26 }
0x1c02   :  { %v10503_v51 = vpop.f32.mrf.mxu0 }
0x1c03   :  { %v5735_v27 = vmul.f32 %v11083_v55, %v10503_v51 }
0x1c04   :  { %v5713_v1 = vpop.f32.mrf.mxu0 }
0x1c05   :  { %v5733_v2 = vmul.f32 %v11081_v62, %v5713_v1 }
0x1c07   :  { %10509 = vmatprep.mubr.msk.f32.mxu1 %vm541_vm2, %v5733_v2 }
0x1c08   :  { %10510 = vmatmul.mubr.msk.f32.vlgmr.msra.gmra.mxu1 %vm541_vm2, %v5735_v27 }
0x1c09   :  { %v10506_v18 = vpop.f32.mrf.mxu0  ;;  %10530 = vmatpush3.msra.mxu1 %v11178_v49  ;;  %v11189_v49 = vld [vmem:[%s11303_s17 + $0x8] sm:$0xff]  ;;  %s13111_s17 = sld [smem:[#allocation23_spill]] }
0x1c0a   :  { %10537 = vmatprep.subr.mxu1 %v11183_v8  ;;  %v5739_v10 = vmul.f32 %v11087_v50, %v10506_v18  ;;  %v11195_v50 = vld [vmem:[%s11313_s25 + $0x8] sm:$0xff] }
0x1c0b   :  { %v5723_v59 = vpop.f32.mrf.mxu0 }
0x1c0c   :  { %v5737_v43 = vmul.f32 %v11085_v52, %v5723_v59 }
0x1c0e   :  { %10512 = vmatprep.mubr.msk.f32.mxu1 %vm541_vm2, %v5737_v43 }
0x1c0f   :  { %10513 = vmatmul.mubr.msk.f32.gmra.mxu1 %vm541_vm2, %v5739_v10 }
0x1c10   :  { %10531 = vmatprep.mubr.msk.f32.mxu1 %vm541_vm2, %v5843_v6  ;;  %v11194_v6 = vld [vmem:[%s11308_s21 + $0x18] sm:$0xff]  ;;  %s13112_s21 = sld [smem:[#allocation21_spill]] }
0x1c13   :  { %10532 = vmatmul.mubr.msk.f32.vlgmr.msra.gmra.mxu1 %vm541_vm2, %v5845_v33 }
0x1c14   :  { %10534 = vmatprep.mubr.msk.f32.mxu1 %vm541_vm2, %v5847_v16  ;;  %10538 = vmatpush3.msra.mxu1 %v11183_v8 }
0x1c15   :  { %10539 = vmatprep.subr.mxu1 %v11184_v60 }
0x1c16   :  { %10540 = vmatpush3.msra.mxu1 %v11184_v60 }
0x1c17   :  { %10535 = vmatmul.mubr.msk.f32.gmra.mxu1 %vm541_vm2, %v5849_v40  ;;  %10541 = vmatprep.subr.mxu1 %v11185_v4 }
0x1c18   :  { %10542 = vmatpush3.msra.mxu1 %v11185_v4 }
0x1c19   :  { %10543 = vmatprep.subr.mxu1 %v11186_v28 }
0x1c1a   :  { %10544 = vmatpush3.msra.mxu1 %v11186_v28  ;;  %v11196_v28 = vld [vmem:[%s11313_s25] sm:$0xff] }
0x1caf   :  { %v10525_v58 = vpop.f32.mrf.mxu0 }
0x1cb0   :  { %v5960_v32 = vmul.f32 0.35355338, %v10525_v58 }
0x1cb1   :  { %v5940_v42 = vpop.f32.mrf.mxu0 }
0x1cb2   :  { %v5959_v51 = vmul.f32 0.35355338, %v5940_v42 }
0x1cb3   :  { %v10528_v47 = vpop.f32.mrf.mxu0 }
0x1cb4   :  { %v5962_v2 = vmul.f32 0.35355338, %v10528_v47 }
0x1cb5   :  { %v5950_v31 = vpop.f32.mrf.mxu0 }
0x1cb6   :  { %v5961_v59 = vmul.f32 0.35355338, %v5950_v31 }
0x1cc8   :  { %v10511_v19 = vpop.f32.mrf.mxu1 }
0x1cc9   :  { %v12684_v41 = vadd.f32 %v10511_v19, %v5154_v35 }
0x1cca   :  { %v5819_v38 = vpop.f32.mrf.mxu1 }
0x1ccb   :  { %v12686_v45 = vadd.f32 %v5819_v38, %v5149_v37 }
0x1ccf   :  { %v10514_v5 = vpop.f32.mrf.mxu1 }
0x1cd0   :  { %v12692_v54 = vadd.f32 %v10514_v5, %v5164_v57  ;;  %v11197_v5 = vld [vmem:[%s11313_s25 + $0x18] sm:$0xff] }
0x1cd1   :  { %v5829_v15 = vpop.f32.mrf.mxu1 }
0x1cd2   :  { %v12694_v11 = vadd.f32 %v5829_v15, %v5159_v20 }
0x1cd3   :  { %v10533_v17 = vpop.f32.mrf.mxu1 }
0x1cd4   :  { %v6049_v61 = vmul.f32 %v11189_v49, %v10533_v17  ;;  %v6154_v14 = vmul.f32 %v11190_v12, %v10533_v17 }
0x1cd5   :  { %v6029_v0 = vpop.f32.mrf.mxu1 }
0x1cd6   :  { %v6048_v44 = vmul.f32 %v11187_v9, %v6029_v0  ;;  %v6153_v29 = vmul.f32 %v11188_v30, %v6029_v0  ;;  %v11198_v0 = vld [vmem:[%s11313_s25 + $0x10] sm:$0xff]  ;;  %s13113_s25 = sld [smem:[#allocation22_spill]] }
0x1cd7   :  { %v10536_v56 = vpop.f32.mrf.mxu1 }
0x1cd8   :  { %10545 = vmatprep.mubr.msk.f32.mxu1 %vm339_vm1, %v6048_v44  ;;  %10559 = vmatprep.mubr.msk.f32.mxu0 %vm339_vm1, %v6153_v29  ;;  %v6051_v40 = vmul.f32 %v11193_v36, %v10536_v56  ;;  %v6156_v46 = vmul.f32 %v11194_v6, %v10536_v56 }
0x1cd9   :  { %v6039_v25 = vpop.f32.mrf.mxu1  ;;  %10546 = vmatmul.mubr.msk.f32.vlgmr.msra.gmra.mxu1 %vm339_vm1, %v6049_v61  ;;  %10560 = vmatmul.mubr.msk.f32.vlgmr.msra.gmra.mxu0 %vm339_vm1, %v6154_v14 }
0x1cda   :  { %v6050_v33 = vmul.f32 %v11191_v13, %v6039_v25  ;;  %v6155_v16 = vmul.f32 %v11192_v21, %v6039_v25 }
0x1cdc   :  { %10548 = vmatprep.mubr.msk.f32.mxu1 %vm339_vm1, %v6050_v33  ;;  %10562 = vmatprep.mubr.msk.f32.mxu0 %vm339_vm1, %v6155_v16 }
0x1cdd   :  { %10549 = vmatmul.mubr.msk.f32.gmra.mxu1 %vm339_vm1, %v6051_v40  ;;  %10563 = vmatmul.mubr.msk.f32.gmra.mxu0 %vm339_vm1, %v6156_v46 }
0x1d99   :  { %v10547_v24 = vpop.f32.mrf.mxu1  ;;  %v10561_v26 = vpop.f32.mrf.mxu0 }
0x1d9a   :  { %v6150_v62 = vadd.f32 %v10547_v24, %v5960_v32  ;;  %v6415_v24 = vld [vmem:[%s13109_s0 + $0x18] sm:$0xff] }
0x1d9b   :  { %v6130_v1 = vpop.f32.mrf.mxu1  ;;  %v6235_v55 = vpop.f32.mrf.mxu0  ;;  %10579 = vmatprep.subr.mxu0 %v6415_v24 }
0x1d9c   :  { %v6255_v27 = vadd.f32 %v10561_v26, %v6150_v62  ;;  %v6149_v18 = vadd.f32 %v6130_v1, %v5959_v51  ;;  %10580 = vmatpush3.msra.mxu0 %v6415_v24 }
0x1d9d   :  { %v10550_v8 = vpop.f32.mrf.mxu1  ;;  %v10564_v52 = vpop.f32.mrf.mxu0 }
0x1d9e   :  { %v6259_v43 = vadd.f32 %v11195_v50, %v6255_v27  ;;  %v6254_v10 = vadd.f32 %v6235_v55, %v6149_v18  ;;  %v6152_v60 = vadd.f32 %v10550_v8, %v5962_v2 }
0x1d9f   :  { %v6140_v4 = vpop.f32.mrf.mxu1  ;;  %v6245_v57 = vpop.f32.mrf.mxu0 }
0x1da0   :  { %v6258_v35 = vadd.f32 %v11196_v28, %v6254_v10  ;;  %v6257_v19 = vadd.f32 %v10564_v52, %v6152_v60  ;;  %v6151_v37 = vadd.f32 %v6140_v4, %v5961_v59  ;;  %v6265_v38 = vsel %vm339_vm1, %v6259_v43, -inf }
0x1da1   :  { %6266 = vmax.xlane.f32.xlu1 %v6265_v38 }
0x1da2   :  { %v6261_v20 = vadd.f32 %v11197_v5, %v6257_v19  ;;  %v6256_v15 = vadd.f32 %v6245_v57, %v6151_v37  ;;  %v6262_v17 = vsel %vm339_vm1, %v6258_v35, -inf  ;;  %v9252_v19 = vld [vmem:[%s13110_s13] ss:$0 sm:$0xff] }
0x1da3   :  { %6263 = vmax.xlane.f32.xlu0 %v6262_v17 }
0x1da4   :  { %v6260_v9 = vadd.f32 %v11198_v0, %v6256_v15  ;;  %v6271_v44 = vsel %vm339_vm1, %v6261_v20, -inf }
0x1da6   :  { %v6268_v30 = vsel %vm339_vm1, %v6260_v9, -inf }
0x1da7   :  { %6272 = vmax.xlane.f32.xlu0 %v6271_v44 }
0x1dab   :  { %6269 = vmax.xlane.f32.xlu0 %v6268_v30 }
0x1db2   :  { %6302 = vrot.lane.b32.xlu1 %v12249_v23, %s11275_s30 }
0x1db6   :  { %6300 = vrot.lane.b32.xlu1 %v12255_v34, %s11275_s30 }
0x1dba   :  { %6298 = vrot.lane.b32.xlu1 %v12243_v22, %s11275_s30 }
0x1dc1   :  { %6304 = vrot.lane.b32.xlu0 %v12247_v7, %s11275_s30 }
0x1e2a   :  { %v6267_v29 = vpop.xlane.xlu1 %6266 }
0x1e2b   :  { %v6275_v49 = vsub.f32 %v6259_v43, %v6267_v29 }
0x1e2c   :  { %v6264_v61 = vpop.xlane.xlu0 %6263 }
0x1e2d   :  { %v6280_v12 = vmul.f32 1.442695, %v6275_v49  ;;  %v6274_v14 = vsub.f32 %v6258_v35, %v6264_v61 }
0x1e2e   :  { %v6303_v13 = vpop.permute.xlu1 %6302 }
0x1e2f   :  { %11088 = vpow2.f32 %v6280_v12  ;;  %v6278_v56 = vmul.f32 1.442695, %v6274_v14 }
0x1e30   :  { %v6273_v25 = vpop.xlane.xlu0 %6272 }
0x1e31   :  { %11090 = vpow2.f32 %v6278_v56  ;;  %v6277_v23 = vsub.f32 %v6261_v20, %v6273_v25 }
0x1e32   :  { %v6301_v36 = vpop.permute.xlu1 %6300 }
0x1e33   :  { %v6284_v34 = vmul.f32 1.442695, %v6277_v23 }
0x1e34   :  { %v6270_v33 = vpop.xlane.xlu0 %6269 }
0x1e35   :  { %v6276_v21 = vsub.f32 %v6260_v9, %v6270_v33 }
0x1e36   :  { %v6299_v46 = vpop.permute.xlu1 %6298 }
0x1e37   :  { %v6282_v16 = vmul.f32 1.442695, %v6276_v21 }
0x1e38   :  { %v6305_v22 = vpop.permute.xlu0 %6304 }
0x1e39   :  { %11092 = vpow2.f32 %v6282_v16  ;;  %10565 = vmatprep.subr.mxu1 %v6305_v22 }
0x1e3a   :  { %11094 = vpow2.f32 %v6284_v34  ;;  %10566 = vmatpush3.msra.mxu1 %v6305_v22 }
0x1e3b   :  { %10567 = vmatprep.subr.mxu1 %v6303_v13 }
0x1e3c   :  { %v11089_v7 = vpop.eup %11088  ;;  %10568 = vmatpush3.msra.mxu1 %v6303_v13 }
0x1e3d   :  { %10569 = vmatprep.subr.mxu1 %v6301_v36  ;;  %v6289_v40 = vsel %vm339_vm1, %v11089_v7, 0.0 }
0x1e3e   :  { %v11091_v6 = vpop.eup %11090  ;;  %6290 = vadd.xlane.f32.xlu1 %v6289_v40  ;;  %10570 = vmatpush3.msra.mxu1 %v6301_v36 }
0x1e3f   :  { %10571 = vmatprep.subr.mxu1 %v6299_v46  ;;  %10573 = vmatprep.mubr.msk.f32.mxu1 %vm339_vm1, %v11091_v6  ;;  %v6286_v58 = vsel %vm339_vm1, %v11091_v6, 0.0 }
0x1e40   :  { %6287 = vadd.xlane.f32.xlu0 %v6286_v58  ;;  %10572 = vmatpush3.msra.mxu1 %v6299_v46  ;;  %v6609_v58 = vld [vmem:[%s13111_s17 + $0x18] sm:$0xff] }
0x1e41   :  { %10574 = vmatmul.mubr.msk.f32.vlgmr.msra.gmra.mxu1 %vm339_vm1, %v11089_v7  ;;  %10587 = vmatprep.subr.mxu1 %v6609_v58 }
0x1e42   :  { %10588 = vmatpush3.msra.mxu1 %v6609_v58 }
0x1e46   :  { %v11093_v42 = vpop.eup %11092 }
0x1e47   :  { %v11095_v47 = vpop.eup %11094  ;;  %10576 = vmatprep.mubr.msk.f32.mxu1 %vm339_vm1, %v11093_v42  ;;  %v6292_v31 = vsel %vm339_vm1, %v11093_v42, 0.0  ;;  %v6608_v42 = vld [vmem:[%s13111_s17 + $0x10] sm:$0xff] }
0x1e48   :  { %6293 = vadd.xlane.f32.xlu0 %v6292_v31  ;;  %10577 = vmatmul.mubr.msk.f32.gmra.mxu1 %vm339_vm1, %v11095_v47  ;;  %v6295_v32 = vsel %vm339_vm1, %v11095_v47, 0.0  ;;  %v6607_v47 = vld [vmem:[%s13111_s17 + $0x8] sm:$0xff]  ;;  %v6606_v31 = vld [vmem:[%s13111_s17] sm:$0xff] }
0x1e49   :  { %10589 = vmatprep.subr.mxu1 %v6608_v42 }
0x1e4a   :  { %10590 = vmatpush3.msra.mxu1 %v6608_v42 }
0x1e4b   :  { %10591 = vmatprep.subr.mxu1 %v6607_v47 }
0x1e4c   :  { %6296 = vadd.xlane.f32.xlu0 %v6295_v32  ;;  %10592 = vmatpush3.msra.mxu1 %v6607_v47 }
0x1e4d   :  { %10593 = vmatprep.subr.mxu1 %v6606_v31 }
0x1e4e   :  { %10594 = vmatpush3.msra.mxu1 %v6606_v31 }
0x1ec7   :  { %v6291_v51 = vpop.xlane.xlu1 %6290 }
0x1ec9   :  { %v6288_v26 = vpop.xlane.xlu0 %6287 }
0x1eca   :  { %11096 = vrcp.f32 %v6288_v26 }
0x1ecb   :  { %11098 = vrcp.f32 %v6291_v51 }
0x1ed1   :  { %v6294_v62 = vpop.xlane.xlu0 %6293 }
0x1ed2   :  { %11100 = vrcp.f32 %v6294_v62 }
0x1ed5   :  { %v6297_v1 = vpop.xlane.xlu0 %6296 }
0x1ed6   :  { %11102 = vrcp.f32 %v6297_v1 }
0x1ed7   :  { %v11097_v2 = vpop.eup %11096 }
0x1ed8   :  { %v11099_v18 = vpop.eup %11098 }
0x1edf   :  { %v11101_v50 = vpop.eup %11100 }
0x1ee3   :  { %v11103_v10 = vpop.eup %11102 }
0x1f01   :  { %v10575_v55 = vpop.f32.mrf.mxu1 }
0x1f02   :  { %v6410_v52 = vmul.f32 %v11099_v18, %v10575_v55 }
0x1f03   :  { %v6388_v27 = vpop.f32.mrf.mxu1 }
0x1f04   :  { %v6408_v8 = vmul.f32 %v11097_v2, %v6388_v27 }
0x1f06   :  { %10581 = vmatprep.mubr.msk.f32.mxu0 %vm541_vm2, %v6408_v8 }
0x1f07   :  { %10582 = vmatmul.mubr.msk.f32.vlgmr.msra.gmra.mxu0 %vm541_vm2, %v6410_v52 }
0x1f08   :  { %v10578_v59 = vpop.f32.mrf.mxu1 }
0x1f09   :  { %v6414_v4 = vmul.f32 %v11103_v10, %v10578_v59 }
0x1f0a   :  { %v6398_v43 = vpop.f32.mrf.mxu1 }
0x1f0b   :  { %v6412_v60 = vmul.f32 %v11101_v50, %v6398_v43  ;;  %v9253_v43 = vld [vmem:[%s13112_s21] ss:$0 sm:$0xff] }
0x1f0d   :  { %10584 = vmatprep.mubr.msk.f32.mxu0 %vm541_vm2, %v6412_v60 }
0x1f0e   :  { %10585 = vmatmul.mubr.msk.f32.gmra.mxu0 %vm541_vm2, %v6414_v4 }
0x1fc7   :  { %v10583_v28 = vpop.f32.mrf.mxu0 }
0x1fc8   :  { %v6514_v35 = vadd.f32 %v10583_v28, %v12684_v41  ;;  %v9254_v28 = vld [vmem:[%s13113_s25] ss:$0 sm:$0xff] }
0x1fc9   :  { %v6494_v37 = vpop.f32.mrf.mxu0 }
0x1fca   :  { %v6518_v38 = vadd.f32 %v6514_v35, %v12205_v53  ;;  %v6513_v57 = vadd.f32 %v6494_v37, %v12686_v45 }
0x1fcc   :  { %v12745_v5 = vadd.f32 %v9252_v19, %v6518_v38  ;;  %v6517_v20 = vadd.f32 %v6513_v57, %v12208_v3 }
0x1fce   :  { %v12748_v15 = vadd.f32 %v9252_v19, %v6517_v20  ;;  %v10586_v17 = vpop.f32.mrf.mxu0  ;;  %v6537_v0 = vsel %vm339_vm1, %v12745_v5, 0.0 }
0x1fcf   :  { %v6516_v9 = vadd.f32 %v10586_v17, %v12692_v54  ;;  %6538 = vadd.xlane.f32.xlu1 %v6537_v0 }
0x1fd0   :  { %v6504_v41 = vpop.f32.mrf.mxu0  ;;  %v6534_v44 = vsel %vm339_vm1, %v12748_v15, 0.0 }
0x1fd1   :  { %v6520_v53 = vadd.f32 %v6516_v9, %v12215_v48  ;;  %v6515_v45 = vadd.f32 %v6504_v41, %v12694_v11  ;;  %6535 = vadd.xlane.f32.xlu0 %v6534_v44 }
0x1fd3   :  { %v12757_v30 = vadd.f32 %v9252_v19, %v6520_v53  ;;  %v6519_v3 = vadd.f32 %v6515_v45, %v12218_v63  ;;  %v6837_v53 = vld [vmem:[%s13114_s5 + $0x78] sm:$0xff]  ;;  %v6836_v45 = vld [vmem:[%s13114_s5 + $0x70] sm:$0xff] }
0x1fd4   :  { %10601 = vmatprep.subr.mxu0 %v6837_v53 }
0x1fd5   :  { %v12760_v29 = vadd.f32 %v9252_v19, %v6519_v3  ;;  %v6543_v49 = vsel %vm339_vm1, %v12757_v30, 0.0  ;;  %10602 = vmatpush3.msra.mxu0 %v6837_v53  ;;  %v6835_v3 = vld [vmem:[%s13114_s5 + $0x68] sm:$0xff] }
0x1fd6   :  { %6544 = vadd.xlane.f32.xlu1 %v6543_v49  ;;  %10603 = vmatprep.subr.mxu0 %v6836_v45  ;;  %v6834_v49 = vld [vmem:[%s13114_s5 + $0x60] sm:$0xff] }
0x1fd7   :  { %v6540_v54 = vsel %vm339_vm1, %v12760_v29, 0.0  ;;  %10604 = vmatpush3.msra.mxu0 %v6836_v45 }
0x1fd8   :  { %6541 = vadd.xlane.f32.xlu0 %v6540_v54  ;;  %10605 = vmatprep.subr.mxu0 %v6835_v3  ;;  %v6833_v54 = vld [vmem:[%s13114_s5 + $0x58] sm:$0xff] }
0x1fd9   :  { %10606 = vmatpush3.msra.mxu0 %v6835_v3 }
0x1fda   :  { %10607 = vmatprep.subr.mxu0 %v6834_v49 }
0x1fdb   :  { %10608 = vmatpush3.msra.mxu0 %v6834_v49 }
0x1fdc   :  { %10609 = vmatprep.subr.mxu0 %v6833_v54 }
0x1fdd   :  { %10610 = vmatpush3.msra.mxu0 %v6833_v54 }
0x2058   :  { %v6539_v61 = vpop.xlane.xlu1 %6538 }
0x2059   :  { %v6547_v12 = vmul.f32 0.03125, %v6539_v61  ;;  %v6832_v61 = vld [vmem:[%s13114_s5 + $0x50] sm:$0xff] }
0x205a   :  { %v6536_v48 = vpop.xlane.xlu0 %6535  ;;  %10611 = vmatprep.subr.mxu0 %v6832_v61 }
0x205b   :  { %v6551_v11 = vsub.f32 %v12745_v5, %v6547_v12  ;;  %v6546_v14 = vmul.f32 0.03125, %v6536_v48  ;;  %10612 = vmatpush3.msra.mxu0 %v6832_v61  ;;  %v6831_v12 = vld [vmem:[%s13114_s5 + $0x48] sm:$0xff]  ;;  %v6830_v48 = vld [vmem:[%s13114_s5 + $0x40] sm:$0xff] }
0x205c   :  { %10613 = vmatprep.subr.mxu0 %v6831_v12 }
0x205d   :  { %v6550_v56 = vsub.f32 %v12748_v15, %v6546_v14  ;;  %v6555_v25 = vmul.f32 %v6551_v11, %v6551_v11  ;;  %10614 = vmatpush3.msra.mxu0 %v6831_v12  ;;  %v6828_v14 = vld [vmem:[%s13114_s5 + $0x30] sm:$0xff] }
0x205e   :  { %10615 = vmatprep.subr.mxu0 %v6830_v48 }
0x205f   :  { %v6545_v63 = vpop.xlane.xlu1 %6544  ;;  %v6561_v13 = vsel %vm339_vm1, %v6555_v25, 0.0  ;;  %v6554_v23 = vmul.f32 %v6550_v56, %v6550_v56  ;;  %10616 = vmatpush3.msra.mxu0 %v6830_v48  ;;  %v6826_v25 = vld [vmem:[%s13114_s5 + $0x20] sm:$0xff] }
0x2060   :  { %v6549_v33 = vmul.f32 0.03125, %v6545_v63  ;;  %6562 = vadd.xlane.f32.xlu1 %v6561_v13  ;;  %v6825_v63 = vld [vmem:[%s13114_s5 + $0x18] sm:$0xff]  ;;  %v6824_v13 = vld [vmem:[%s13114_s5 + $0x10] sm:$0xff] }
0x2061   :  { %v6542_v21 = vpop.xlane.xlu0 %6541  ;;  %v6558_v34 = vsel %vm339_vm1, %v6554_v23, 0.0  ;;  %v6823_v23 = vld [vmem:[%s13114_s5 + $0x8] sm:$0xff] }
0x2062   :  { %v6553_v16 = vsub.f32 %v12757_v30, %v6549_v33  ;;  %v6548_v36 = vmul.f32 0.03125, %v6542_v21  ;;  %6559 = vadd.xlane.f32.xlu0 %v6558_v34  ;;  %v6822_v33 = vld [vmem:[%s13114_s5] sm:$0xff] }
0x2063   :  { %v9255_v21 = vld [vmem:[%s13115_s9] ss:$0 sm:$0xff] }
0x2064   :  { %v6552_v22 = vsub.f32 %v12760_v29, %v6548_v36  ;;  %v6557_v7 = vmul.f32 %v6553_v16, %v6553_v16 }
0x2066   :  { %v6567_v40 = vsel %vm339_vm1, %v6557_v7, 0.0  ;;  %v6556_v6 = vmul.f32 %v6552_v22, %v6552_v22 }
0x2067   :  { %6568 = vadd.xlane.f32.xlu1 %v6567_v40 }
0x2068   :  { %v6564_v46 = vsel %vm339_vm1, %v6556_v6, 0.0 }
0x2069   :  { %6565 = vadd.xlane.f32.xlu0 %v6564_v46 }
0x20e9   :  { %v6563_v32 = vpop.xlane.xlu1 %6562 }
0x20ea   :  { %v6571_v24 = vmul.f32 0.03125, %v6563_v32 }
0x20eb   :  { %v6560_v26 = vpop.xlane.xlu0 %6559 }
0x20ec   :  { %v6575_v51 = vadd.f32 1e-06, %v6571_v24  ;;  %v6570_v62 = vmul.f32 0.03125, %v6560_v26 }
0x20ee   :  { %11104 = vrsqrt.f32 %v6575_v51  ;;  %v6574_v1 = vadd.f32 1e-06, %v6570_v62 }
0x20f0   :  { %11106 = vrsqrt.f32 %v6574_v1  ;;  %v6569_v55 = vpop.xlane.xlu1 %6568 }
0x20f1   :  { %v6573_v2 = vmul.f32 0.03125, %v6569_v55 }
0x20f2   :  { %v6566_v27 = vpop.xlane.xlu0 %6565 }
0x20f3   :  { %v6577_v18 = vadd.f32 1e-06, %v6573_v2  ;;  %v6572_v8 = vmul.f32 0.03125, %v6566_v27 }
0x20f5   :  { %11108 = vrsqrt.f32 %v6577_v18  ;;  %v6576_v52 = vadd.f32 1e-06, %v6572_v8 }
0x20f7   :  { %11110 = vrsqrt.f32 %v6576_v52 }
0x20fb   :  { %v11105_v59 = vpop.eup %11104 }
0x20fc   :  { %v6583_v50 = vmul.f32 %v11105_v59, %v6551_v11  ;;  %v6829_v11 = vld [vmem:[%s13114_s5 + $0x38] sm:$0xff] }
0x20fd   :  { %v11107_v10 = vpop.eup %11106  ;;  %10617 = vmatprep.subr.mxu0 %v6829_v11 }
0x20fe   :  { %v6582_v60 = vmul.f32 %v11107_v10, %v6550_v56  ;;  %v6593_v4 = vmul.f32 %v9253_v43, %v6583_v50  ;;  %10618 = vmatpush3.msra.mxu0 %v6829_v11  ;;  %v6827_v56 = vld [vmem:[%s13114_s5 + $0x28] sm:$0xff] }
0x20ff   :  { %10619 = vmatprep.subr.mxu0 %v6828_v14 }
0x2100   :  { %v6592_v35 = vmul.f32 %v9253_v43, %v6582_v60  ;;  %v6603_v57 = vadd.f32 %v9254_v28, %v6593_v4  ;;  %10620 = vmatpush3.msra.mxu0 %v6828_v14 }
0x2101   :  { %10621 = vmatprep.subr.mxu0 %v6827_v56 }
0x2102   :  { %v11109_v19 = vpop.eup %11108  ;;  %v6602_v37 = vadd.f32 %v9254_v28, %v6592_v35  ;;  %10622 = vmatpush3.msra.mxu0 %v6827_v56 }
0x2103   :  { %v6585_v38 = vmul.f32 %v11109_v19, %v6553_v16  ;;  %10623 = vmatprep.subr.mxu0 %v6826_v25 }
0x2104   :  { %v11111_v20 = vpop.eup %11110  ;;  %10595 = vmatprep.mubr.msk.f32.mxu1 %vm339_vm1, %v6602_v37  ;;  %10624 = vmatpush3.msra.mxu0 %v6826_v25 }
0x2105   :  { %10596 = vmatmul.mubr.msk.f32.vlgmr.msra.gmra.mxu1 %vm339_vm1, %v6603_v57  ;;  %v6584_v17 = vmul.f32 %v11111_v20, %v6552_v22  ;;  %v6595_v0 = vmul.f32 %v9253_v43, %v6585_v38  ;;  %10625 = vmatprep.subr.mxu0 %v6825_v63 }
0x2106   :  { %10626 = vmatpush3.msra.mxu0 %v6825_v63 }
0x2107   :  { %v6594_v9 = vmul.f32 %v9253_v43, %v6584_v17  ;;  %v6605_v44 = vadd.f32 %v9254_v28, %v6595_v0  ;;  %10627 = vmatprep.subr.mxu0 %v6824_v13 }
0x2108   :  { %10628 = vmatpush3.msra.mxu0 %v6824_v13 }
0x2109   :  { %v6604_v41 = vadd.f32 %v9254_v28, %v6594_v9  ;;  %10629 = vmatprep.subr.mxu0 %v6823_v23 }
0x210a   :  { %10630 = vmatpush3.msra.mxu0 %v6823_v23 }
0x210b   :  { %10598 = vmatprep.mubr.msk.f32.mxu1 %vm339_vm1, %v6604_v41  ;;  %10631 = vmatprep.subr.mxu0 %v6822_v33 }
0x210c   :  { %10599 = vmatmul.mubr.msk.f32.gmra.mxu1 %vm339_vm1, %v6605_v44  ;;  %10632 = vmatpush3.msra.mxu0 %v6822_v33 }
0x21c5   :  { %v10597_v34 = vpop.f32.mrf.mxu1 }
0x21c6   :  { %v12801_v16 = vadd.f32 %v10597_v34, %v9255_v21 }
0x21c7   :  { %v6695_v36 = vpop.f32.mrf.mxu1 }
0x21c8   :  { %v12804_v22 = vmul.f32 0.70710677, %v12801_v16  ;;  %v12806_v7 = vadd.f32 %v9255_v21, %v6695_v36 }
0x21ca   :  { %v6731_v40 = vand.u32 2147483647, %v12804_v22  ;;  %v12810_v6 = vmul.f32 0.70710677, %v12806_v7  ;;  %vm6723_vm7 = vcmp.ge.f32.partialorder %v12804_v22, 0.0 }
0x21cc   :  { %v6735_v46 = vmul.f32 0.3275911, %v6731_v40  ;;  %v6730_v58 = vand.u32 2147483647, %v12810_v6  ;;  %v10600_v42 = vpop.f32.mrf.mxu1  ;;  %v6787_v8 = vsub.f32 0.0, %v6731_v40  ;;  %vm6722_vm8 = vcmp.ge.f32.partialorder %v12810_v6, 0.0 }
0x21cd   :  { %v12813_v47 = vadd.f32 %v10600_v42, %v9255_v21  ;;  %v6726_v22 = vsel %vm6722_vm8, 1.0, %v11276_v39 }
0x21ce   :  { %v6739_v31 = vadd.f32 1.0, %v6735_v46  ;;  %v6734_v32 = vmul.f32 0.3275911, %v6730_v58  ;;  %v6705_v24 = vpop.f32.mrf.mxu1  ;;  %v6786_v50 = vsub.f32 0.0, %v6730_v58  ;;  %v6791_v43 = vmul.f32 %v6787_v8, %v6731_v40 }
0x21cf   :  { %v12816_v26 = vmul.f32 0.70710677, %v12813_v47  ;;  %v12818_v51 = vadd.f32 %v9255_v21, %v6705_v24 }
0x21d0   :  { %11112 = vrcp.f32 %v6739_v31  ;;  %v6738_v62 = vadd.f32 1.0, %v6734_v32  ;;  %v6790_v60 = vmul.f32 %v6786_v50, %v6730_v58  ;;  %v6796_v35 = vmul.f32 1.442695, %v6791_v43 }
0x21d1   :  { %v6733_v1 = vand.u32 2147483647, %v12816_v26  ;;  %v12822_v55 = vmul.f32 0.70710677, %v12818_v51  ;;  %vm6725_vm9 = vcmp.ge.f32.partialorder %v12816_v26, 0.0 }
0x21d2   :  { %11114 = vrcp.f32 %v6738_v62  ;;  %v6794_v57 = vmul.f32 1.442695, %v6790_v60 }
0x21d3   :  { %v6737_v2 = vmul.f32 0.3275911, %v6733_v1  ;;  %v6732_v27 = vand.u32 2147483647, %v12822_v55  ;;  %v6789_v4 = vsub.f32 0.0, %v6733_v1  ;;  %vm6724_vm10 = vcmp.ge.f32.partialorder %v12822_v55, 0.0 }
0x21d4   :  { %v6717_v55 = vmul.f32 0.5, %v12813_v47 }
0x21d5   :  { %v6741_v18 = vadd.f32 1.0, %v6737_v2  ;;  %v6736_v52 = vmul.f32 0.3275911, %v6732_v27  ;;  %v6788_v38 = vsub.f32 0.0, %v6732_v27  ;;  %v6793_v20 = vmul.f32 %v6789_v4, %v6733_v1 }
0x21d7   :  { %11116 = vrcp.f32 %v6741_v18  ;;  %v6740_v59 = vadd.f32 1.0, %v6736_v52  ;;  %v6792_v53 = vmul.f32 %v6788_v38, %v6732_v27  ;;  %v6800_v45 = vmul.f32 1.442695, %v6793_v20 }
0x21d9   :  { %11118 = vrcp.f32 %v6740_v59  ;;  %v6798_v14 = vmul.f32 1.442695, %v6792_v53  ;;  %v6727_v59 = vsel %vm6723_vm7, 1.0, %v11276_v39  ;;  %v6729_v53 = vsel %vm6725_vm9, 1.0, %v11276_v39 }
0x21da   :  { %11120 = vpow2.f32 %v6796_v35 }
0x21db   :  { %11122 = vpow2.f32 %v6794_v57 }
0x21dc   :  { %11124 = vpow2.f32 %v6800_v45 }
0x21dd   :  { %v11113_v10 = vpop.eup %11112  ;;  %11126 = vpow2.f32 %v6798_v14  ;;  %v6941_v14 = vld [vmem:[%s13116_s29 + $0x18] sm:$0xff] }
0x21de   :  { %v6751_v28 = vmul.f32 1.0614054, %v11113_v10  ;;  %10639 = vmatprep.subr.mxu1 %v6941_v14 }
0x21df   :  { %v11115_v19 = vpop.eup %11114  ;;  %10640 = vmatpush3.msra.mxu1 %v6941_v14 }
0x21e0   :  { %v6755_v37 = vadd.f32 -1.4531521, %v6751_v28  ;;  %v6750_v17 = vmul.f32 1.0614054, %v11115_v19 }
0x21e2   :  { %v6759_v0 = vmul.f32 %v11113_v10, %v6755_v37  ;;  %v6754_v9 = vadd.f32 -1.4531521, %v6750_v17 }
0x21e4   :  { %v11117_v41 = vpop.eup %11116  ;;  %v6763_v44 = vadd.f32 1.4214138, %v6759_v0  ;;  %v6758_v3 = vmul.f32 %v11115_v19, %v6754_v9  ;;  %v6714_v0 = vmul.f32 0.5, %v12806_v7 }
0x21e5   :  { %v6753_v49 = vmul.f32 1.0614054, %v11117_v41 }
0x21e6   :  { %v6767_v54 = vmul.f32 %v11113_v10, %v6763_v44  ;;  %v11119_v61 = vpop.eup %11118  ;;  %v6762_v12 = vadd.f32 1.4214138, %v6758_v3  ;;  %v6715_v44 = vmul.f32 0.5, %v12801_v16  ;;  %v6716_v16 = vmul.f32 0.5, %v12818_v51 }
0x21e7   :  { %v6757_v48 = vadd.f32 -1.4531521, %v6753_v49  ;;  %v6752_v56 = vmul.f32 1.0614054, %v11119_v61  ;;  %v11121_v31 = vpop.eup %11120 }
0x21e8   :  { %v6771_v11 = vadd.f32 -0.28449672, %v6767_v54  ;;  %v6766_v25 = vmul.f32 %v11115_v19, %v6762_v12  ;;  %v11123_v18 = vpop.eup %11122  ;;  %v6728_v54 = vsel %vm6724_vm10, 1.0, %v11276_v39  ;;  %v6940_v39 = vld [vmem:[%s13116_s29 + $0x10] sm:$0xff] }
0x21e9   :  { %v6761_v63 = vmul.f32 %v11117_v41, %v6757_v48  ;;  %v6756_v23 = vadd.f32 -1.4531521, %v6752_v56  ;;  %v11125_v35 = vpop.eup %11124  ;;  %10641 = vmatprep.subr.mxu1 %v6940_v39  ;;  %v6939_v56 = vld [vmem:[%s13116_s29 + $0x8] sm:$0xff] }
0x21ea   :  { %v6775_v13 = vmul.f32 %v11113_v10, %v6771_v11  ;;  %v6770_v33 = vadd.f32 -0.28449672, %v6766_v25  ;;  %v11127_v17 = vpop.eup %11126  ;;  %10642 = vmatpush3.msra.mxu1 %v6940_v39  ;;  %v6938_v25 = vld [vmem:[%s13116_s29] sm:$0xff] }
0x21eb   :  { %v6765_v21 = vadd.f32 1.4214138, %v6761_v63  ;;  %v6760_v36 = vmul.f32 %v11119_v61, %v6756_v23  ;;  %10643 = vmatprep.subr.mxu1 %v6939_v56 }
0x21ec   :  { %v6779_v34 = vadd.f32 0.2548296, %v6775_v13  ;;  %v6774_v40 = vmul.f32 %v11115_v19, %v6770_v33  ;;  %10644 = vmatpush3.msra.mxu1 %v6939_v56  ;;  %v9260_v13 = vld [vmem:[%s13117_s3] ss:$0 sm:$0xff] }
0x21ed   :  { %v6769_v46 = vmul.f32 %v11117_v41, %v6765_v21  ;;  %v6764_v42 = vadd.f32 1.4214138, %v6760_v36  ;;  %10645 = vmatprep.subr.mxu1 %v6938_v25  ;;  %v9266_v56 = vld [vmem:[%s13119_s19] ss:$0 sm:$0xff] }
0x21ee   :  { %v6783_v58 = vmul.f32 %v11113_v10, %v6779_v34  ;;  %v6778_v32 = vadd.f32 0.2548296, %v6774_v40  ;;  %10646 = vmatpush3.msra.mxu1 %v6938_v25 }
0x21ef   :  { %v6773_v24 = vadd.f32 -0.28449672, %v6769_v46  ;;  %v6768_v1 = vmul.f32 %v11119_v61, %v6764_v42 }
0x21f0   :  { %v6803_v62 = vmul.f32 %v11121_v31, %v6783_v58  ;;  %v6782_v2 = vmul.f32 %v11115_v19, %v6778_v32 }
0x21f1   :  { %v6777_v27 = vmul.f32 %v11117_v41, %v6773_v24  ;;  %v6772_v52 = vadd.f32 -0.28449672, %v6768_v1 }
0x21f2   :  { %v6807_v8 = vsub.f32 1.0, %v6803_v62  ;;  %v6802_v50 = vmul.f32 %v11123_v18, %v6782_v2 }
0x21f3   :  { %v6781_v43 = vadd.f32 0.2548296, %v6777_v27  ;;  %v6776_v60 = vmul.f32 %v11119_v61, %v6772_v52 }
0x21f4   :  { %v6811_v10 = vmul.f32 %v6807_v8, %v6727_v59  ;;  %v6806_v4 = vsub.f32 1.0, %v6802_v50 }
0x21f5   :  { %v6785_v28 = vmul.f32 %v11117_v41, %v6781_v43  ;;  %v6780_v37 = vadd.f32 0.2548296, %v6776_v60 }
0x21f6   :  { %v6810_v19 = vmul.f32 %v6806_v4, %v6726_v22  ;;  %v6815_v57 = vadd.f32 1.0, %v6811_v10 }
0x21f7   :  { %v6805_v38 = vmul.f32 %v11125_v35, %v6785_v28  ;;  %v6784_v20 = vmul.f32 %v11119_v61, %v6780_v37 }
0x21f8   :  { %v6814_v6 = vadd.f32 1.0, %v6810_v19  ;;  %v6819_v26 = vmul.f32 %v6815_v57, %v6715_v44 }
0x21f9   :  { %v6809_v9 = vsub.f32 1.0, %v6805_v38  ;;  %v6804_v41 = vmul.f32 %v11127_v17, %v6784_v20  ;;  %v7120_v17 = vld [vmem:[%s11488_s27 + $0x8] sm:$0xff] }
0x21fa   :  { %v6818_v45 = vmul.f32 %v6814_v6, %v6714_v0  ;;  %10653 = vmatprep.subr.mxu1 %v7120_v17  ;;  %v7119_v0 = vld [vmem:[%s11488_s27] sm:$0xff]  ;;  %v9276_v6 = vld [vmem:[%s11488_s27 + $0x18] sm:$0xff] }
0x21fb   :  { %v6813_v3 = vmul.f32 %v6809_v9, %v6729_v53  ;;  %v6808_v49 = vsub.f32 1.0, %v6804_v41 }
0x21fc   :  { %10633 = vmatprep.mubr.f32.mxu0 %v6818_v45 }
0x21fd   :  { %10634 = vmatmul.mubr.f32.vlgmr.msra.gmra.mxu0 %v6819_v26  ;;  %v6812_v7 = vmul.f32 %v6808_v49, %v6728_v54  ;;  %v6817_v61 = vadd.f32 1.0, %v6813_v3 }
0x21ff   :  { %v6816_v12 = vadd.f32 1.0, %v6812_v7  ;;  %v6821_v11 = vmul.f32 %v6817_v61, %v6717_v55  ;;  %v9265_v55 = vld [vmem:[%s13118_s8] ss:$0 sm:$0xff] }
0x2201   :  { %v6820_v48 = vmul.f32 %v6816_v12, %v6716_v16 }
0x2203   :  { %10636 = vmatprep.mubr.f32.mxu0 %v6820_v48 }
0x2204   :  { %10637 = vmatmul.mubr.f32.gmra.mxu0 %v6821_v11 }
0x22bd   :  { %v10635_v51 = vpop.f32.mrf.mxu0 }
0x22be   :  { %v6924_v47 = vadd.f32 %v10635_v51, %v12745_v5 }
0x22bf   :  { %v6904_v63 = vpop.f32.mrf.mxu0 }
0x22c0   :  { %v6923_v23 = vadd.f32 %v6904_v63, %v12748_v15  ;;  %v6935_v21 = vadd.f32 %v9260_v13, %v6924_v47 }
0x22c2   :  { %v6934_v33 = vadd.f32 %v9260_v13, %v6923_v23 }
0x22c4   :  { %v10638_v34 = vpop.f32.mrf.mxu0  ;;  %10647 = vmatprep.mubr.msk.f32.mxu1 %vm339_vm1, %v6934_v33  ;;  %v9275_v33 = vld [vmem:[%s11488_s27 + $0x10] sm:$0xff] }
0x22c5   :  { %10648 = vmatmul.mubr.msk.f32.vlgmr.msra.gmra.mxu1 %vm339_vm1, %v6935_v21  ;;  %v6926_v36 = vadd.f32 %v10638_v34, %v12757_v30 }
0x22c6   :  { %v6914_v40 = vpop.f32.mrf.mxu0  ;;  %10654 = vmatpush3.msra.mxu1 %v7120_v17  ;;  %v9289_v17 = vld [vmem:[%s13120_s24 + $0x40] sm:$0xff] }
0x22c7   :  { %v6925_v46 = vadd.f32 %v6914_v40, %v12760_v29  ;;  %v6937_v42 = vadd.f32 %v9260_v13, %v6926_v36  ;;  %10655 = vmatprep.subr.mxu1 %v7119_v0 }
0x22c8   :  { %10656 = vmatpush3.msra.mxu1 %v7119_v0 }
0x22c9   :  { %v6936_v58 = vadd.f32 %v9260_v13, %v6925_v46  ;;  %10663 = vmatprep.subr.mxu1 %v9276_v6 }
0x22cb   :  { %10650 = vmatprep.mubr.msk.f32.mxu1 %vm339_vm1, %v6936_v58  ;;  %v9271_v58 = vld [vmem:[%s13120_s24 + $0x20] sm:$0xff] }
0x22cc   :  { %10651 = vmatmul.mubr.msk.f32.gmra.mxu1 %vm339_vm1, %v6937_v42  ;;  %v7115_v42 = vld [vmem:[%s13120_s24] sm:$0xff] }
0x22cd   :  { %10695 = vmatprep.mubr.msk.f32.mxu0 %vm339_vm1, %v7115_v42  ;;  %v9332_v42 = vld [vmem:[%s13120_s24 + $0xa8] sm:$0xff] }
0x2385   :  { %v10649_v5 = vpop.f32.mrf.mxu1 }
0x2386   :  { %v7045_v15 = vsel %vm7041_vm11, %v10649_v5, 0.0 }
0x2387   :  { %7046 = vadd.xlane.f32.xlu1 %v7045_v15  ;;  %v7020_v31 = vpop.f32.mrf.mxu1 }
0x2388   :  { %v7042_v32 = vsel %vm7041_vm11, %v7020_v31, 0.0 }
0x2389   :  { %7043 = vadd.xlane.f32.xlu0 %v7042_v32 }
0x238c   :  { %v10652_v24 = vpop.f32.mrf.mxu1 }
0x238d   :  { %v7051_v30 = vsel %vm7041_vm11, %v10652_v24, 0.0 }
0x238e   :  { %7052 = vadd.xlane.f32.xlu1 %v7051_v30  ;;  %v7030_v29 = vpop.f32.mrf.mxu1 }
0x238f   :  { %v7048_v62 = vsel %vm7041_vm11, %v7030_v29, 0.0 }
0x2390   :  { %7049 = vadd.xlane.f32.xlu0 %v7048_v62  ;;  %v7117_v62 = vld [vmem:[%s13120_s24 + $0x10] sm:$0xff] }
0x2410   :  { %v7047_v1 = vpop.xlane.xlu1 %7046 }
0x2411   :  { %v7056_v2 = vmul.f32 0.0625, %v7047_v1 }
0x2412   :  { %v7044_v27 = vpop.xlane.xlu0 %7043 }
0x2413   :  { %v7060_v18 = vsub.f32 %v10649_v5, %v7056_v2  ;;  %v7055_v8 = vmul.f32 0.0625, %v7044_v27  ;;  %v7118_v27 = vld [vmem:[%s13120_s24 + $0x18] sm:$0xff] }
0x2415   :  { %v7059_v52 = vsub.f32 %v7020_v31, %v7055_v8  ;;  %v7064_v59 = vmul.f32 %v7060_v18, %v7060_v18  ;;  %v9294_v8 = vld [vmem:[%s11488_s27 + $0x28] sm:$0xff] }
0x2417   :  { %v7053_v50 = vpop.xlane.xlu1 %7052  ;;  %v7070_v43 = vsel %vm7041_vm11, %v7064_v59, 0.0  ;;  %v7063_v10 = vmul.f32 %v7059_v52, %v7059_v52  ;;  %v9293_v59 = vld [vmem:[%s11488_s27 + $0x20] sm:$0xff] }
0x2418   :  { %v7058_v60 = vmul.f32 0.0625, %v7053_v50  ;;  %7071 = vadd.xlane.f32.xlu1 %v7070_v43  ;;  %v9274_v50 = vld [vmem:[%s13120_s24 + $0x38] sm:$0xff] }
0x2419   :  { %v7050_v4 = vpop.xlane.xlu0 %7049  ;;  %v7067_v28 = vsel %vm7041_vm11, %v7063_v10, 0.0  ;;  %v9308_v43 = vld [vmem:[%s11488_s27 + $0x38] sm:$0xff]  ;;  %v9307_v10 = vld [vmem:[%s11488_s27 + $0x30] sm:$0xff] }
0x241a   :  { %v7062_v35 = vsub.f32 %v10652_v24, %v7058_v60  ;;  %v7057_v22 = vmul.f32 0.0625, %v7050_v4  ;;  %7068 = vadd.xlane.f32.xlu0 %v7067_v28  ;;  %v9322_v60 = vld [vmem:[%s11488_s27 + $0x48] sm:$0xff]  ;;  %v9321_v4 = vld [vmem:[%s11488_s27 + $0x40] sm:$0xff]  ;;  %v9336_v28 = vld [vmem:[%s11488_s27 + $0x58] sm:$0xff] }
0x241c   :  { %v7061_v37 = vsub.f32 %v7030_v29, %v7057_v22  ;;  %v7066_v19 = vmul.f32 %v7062_v35, %v7062_v35  ;;  %v7116_v29 = vld [vmem:[%s13120_s24 + $0x8] sm:$0xff] }
0x241d   :  { %v9350_v22 = vld [vmem:[%s11488_s27 + $0x68] sm:$0xff] }
0x241e   :  { %v7076_v38 = vsel %vm7041_vm11, %v7066_v19, 0.0  ;;  %v7065_v57 = vmul.f32 %v7061_v37, %v7061_v37  ;;  %v9364_v19 = vld [vmem:[%s11488_s27 + $0x78] sm:$0xff] }
0x241f   :  { %7077 = vadd.xlane.f32.xlu1 %v7076_v38  ;;  %v9363_v38 = vld [vmem:[%s11488_s27 + $0x70] sm:$0xff] }
0x2420   :  { %v7073_v20 = vsel %vm7041_vm11, %v7065_v57, 0.0  ;;  %v9378_v57 = vld [vmem:[%s11488_s27 + $0x88] sm:$0xff] }
0x2421   :  { %7074 = vadd.xlane.f32.xlu0 %v7073_v20  ;;  %v9377_v20 = vld [vmem:[%s11488_s27 + $0x80] sm:$0xff] }
0x24a1   :  { %v7072_v9 = vpop.xlane.xlu1 %7071 }
0x24a2   :  { %v7080_v44 = vmul.f32 0.0625, %v7072_v9 }
0x24a3   :  { %v7069_v53 = vpop.xlane.xlu0 %7068 }
0x24a4   :  { %v7084_v41 = vadd.f32 1e-06, %v7080_v44  ;;  %v7079_v45 = vmul.f32 0.0625, %v7069_v53 }
0x24a6   :  { %11128 = vrsqrt.f32 %v7084_v41  ;;  %v7083_v3 = vadd.f32 1e-06, %v7079_v45 }
0x24a8   :  { %11130 = vrsqrt.f32 %v7083_v3  ;;  %v7078_v26 = vpop.xlane.xlu1 %7077 }
0x24a9   :  { %v7082_v49 = vmul.f32 0.0625, %v7078_v26 }
0x24aa   :  { %v7075_v54 = vpop.xlane.xlu0 %7074 }
0x24ab   :  { %v7086_v7 = vadd.f32 1e-06, %v7082_v49  ;;  %v7081_v61 = vmul.f32 0.0625, %v7075_v54  ;;  %v9290_v54 = vld [vmem:[%s13120_s24 + $0x48] sm:$0xff] }
0x24ad   :  { %11132 = vrsqrt.f32 %v7086_v7  ;;  %v7085_v16 = vadd.f32 1e-06, %v7081_v61  ;;  %v9291_v7 = vld [vmem:[%s13120_s24 + $0x50] sm:$0xff] }
0x24af   :  { %11134 = vrsqrt.f32 %v7085_v16 }
0x24b3   :  { %v11129_v12 = vpop.eup %11128 }
0x24b4   :  { %v7092_v48 = vmul.f32 %v11129_v12, %v7060_v18  ;;  %v9272_v18 = vld [vmem:[%s13120_s24 + $0x28] sm:$0xff]  ;;  %v9292_v12 = vld [vmem:[%s13120_s24 + $0x58] sm:$0xff] }
0x24b5   :  { %v11131_v11 = vpop.eup %11130 }
0x24b6   :  { %v7091_v14 = vmul.f32 %v11131_v11, %v7059_v52  ;;  %v7102_v39 = vmul.f32 %v9265_v55, %v7092_v48  ;;  %v9273_v52 = vld [vmem:[%s13120_s24 + $0x30] sm:$0xff] }
0x24b8   :  { %v7101_v25 = vmul.f32 %v9265_v55, %v7091_v14  ;;  %v12865_v63 = vadd.f32 %v9266_v56, %v7102_v39  ;;  %v9304_v14 = vld [vmem:[%s13120_s24 + $0x68] sm:$0xff]  ;;  %v9305_v39 = vld [vmem:[%s13120_s24 + $0x70] sm:$0xff] }
0x24ba   :  { %v11133_v51 = vpop.eup %11132  ;;  %v12863_v47 = vadd.f32 %v9266_v56, %v7101_v25 }
0x24bb   :  { %v7094_v13 = vmul.f32 %v11133_v51, %v7062_v35  ;;  %v9335_v35 = vld [vmem:[%s11488_s27 + $0x50] sm:$0xff]  ;;  %v9306_v51 = vld [vmem:[%s13120_s24 + $0x78] sm:$0xff] }
0x24bc   :  { %v11135_v23 = vpop.eup %11134  ;;  %10657 = vmatprep.mubr.msk.f32.mxu1 %vm7041_vm11, %v12863_v47 }
0x24bd   :  { %v7093_v21 = vmul.f32 %v11135_v23, %v7061_v37  ;;  %10658 = vmatmul.mubr.msk.f32.vlgmr.msra.gmra.mxu1 %vm7041_vm11, %v12865_v63  ;;  %v7104_v34 = vmul.f32 %v9265_v55, %v7094_v13  ;;  %v9349_v37 = vld [vmem:[%s11488_s27 + $0x60] sm:$0xff]  ;;  %v9318_v23 = vld [vmem:[%s13120_s24 + $0x88] sm:$0xff]  ;;  %s11277_s27 = smov [#allocation2]  }
0x24be   :  { %10664 = vmatpush3.msra.mxu1 %v9276_v6  ;;  %s8946_s22 = sshll.u32 %s11277_s27, 4  ;;  %s8947_s22 = int_to_ptr.vmem [resolvable:$true] %s8946_s22 }
0x24bf   :  { %v7103_v36 = vmul.f32 %v9265_v55, %v7093_v21  ;;  %10665 = vmatprep.subr.mxu1 %v9275_v33  ;;  %v12874_v46 = vadd.f32 %v9266_v56, %v7104_v34  ;;  %v9303_v55 = vld [vmem:[%s13120_s24 + $0x60] sm:$0xff]  ;;  %p11204_p1 = scmp.lt.s32.totalorder %s8947_s22, %s8947_s22 }
0x24c0   :  { %10666 = vmatpush3.msra.mxu1 %v9275_v33  ;;  %v9319_v33 = vld [vmem:[%s13120_s24 + $0x90] sm:$0xff] }
0x24c1   :  { %v12872_v40 = vadd.f32 %v9266_v56, %v7103_v36  ;;  %v9320_v36 = vld [vmem:[%s13120_s24 + $0x98] sm:$0xff] }
0x24c3   :  { %10660 = vmatprep.mubr.msk.f32.mxu1 %vm7041_vm11, %v12872_v40 }
0x24c4   :  { %10661 = vmatmul.mubr.msk.f32.gmra.mxu1 %vm7041_vm11, %v12874_v46 }
0x24c5   :  { %10667 = vmatprep.mubr.msk.f32.mxu1 %vm7041_vm11, %v12863_v47 }
0x24c8   :  { %10668 = vmatmul.mubr.msk.f32.vlgmr.msra.gmra.mxu1 %vm7041_vm11, %v12865_v63 }
0x24c9   :  { %10670 = vmatprep.mubr.msk.f32.mxu1 %vm7041_vm11, %v12872_v40 }
0x24cc   :  { %10671 = vmatmul.mubr.msk.f32.gmra.mxu1 %vm7041_vm11, %v12874_v46 }
0x24cd   :  { %10681 = vmatprep.mubr.msk.f32.mxu1 %vm339_vm1, %v9271_v58 }
0x257d   :  { %v10659_v5 = vpop.f32.mrf.mxu1 }
0x257f   :  { %v7199_v15 = vpop.f32.mrf.mxu1 }
0x2584   :  { %v10662_v31 = vpop.f32.mrf.mxu1 }
0x2585   :  { %10687 = vmatprep.subr.mxu0 %v10662_v31 }
0x2586   :  { %v7209_v32 = vpop.f32.mrf.mxu1  ;;  %10688 = vmatpush3.msra.mxu0 %v10662_v31 }
0x2587   :  { %10689 = vmatprep.subr.mxu0 %v7209_v32 }
0x2588   :  { %v10669_v24 = vpop.f32.mrf.mxu1  ;;  %10690 = vmatpush3.msra.mxu0 %v7209_v32  ;;  %v9334_v32 = vld [vmem:[%s13120_s24 + $0xb8] sm:$0xff] }
0x2589   :  { %10691 = vmatprep.subr.mxu0 %v10659_v5 }
0x258a   :  { %v7292_v30 = vpop.f32.mrf.mxu1  ;;  %10692 = vmatpush3.msra.mxu0 %v10659_v5  ;;  %v9333_v5 = vld [vmem:[%s13120_s24 + $0xb0] sm:$0xff] }
0x258b   :  { %10693 = vmatprep.subr.mxu0 %v7199_v15 }
0x258c   :  { %v10672_v1 = vpop.f32.mrf.mxu1  ;;  %10694 = vmatpush3.msra.mxu0 %v7199_v15 }
0x258d   :  { %10673 = vmatprep.subr.mxu1 %v10672_v1  ;;  %10696 = vmatmul.mubr.msk.f32.vlgmr.msra.gmra.mxu0 %vm339_vm1, %v7116_v29 }
0x258e   :  { %v7302_v2 = vpop.f32.mrf.mxu1  ;;  %10674 = vmatpush3.msra.mxu1 %v10672_v1  ;;  %10698 = vmatprep.mubr.msk.f32.mxu0 %vm339_vm1, %v7117_v62  ;;  %v9346_v62 = vld [vmem:[%s13120_s24 + $0xc8] sm:$0xff]  ;;  %v9347_v1 = vld [vmem:[%s13120_s24 + $0xd0] sm:$0xff] }
0x258f   :  { %10675 = vmatprep.subr.mxu1 %v7302_v2 }
0x2590   :  { %10676 = vmatpush3.msra.mxu1 %v7302_v2 }
0x2591   :  { %10677 = vmatprep.subr.mxu1 %v10669_v24  ;;  %10699 = vmatmul.mubr.msk.f32.gmra.mxu0 %vm339_vm1, %v7118_v27 }
0x2592   :  { %10678 = vmatpush3.msra.mxu1 %v10669_v24  ;;  %10719 = vmatprep.mubr.msk.f32.mxu0 %vm339_vm1, %v9289_v17  ;;  %v9345_v24 = vld [vmem:[%s13120_s24 + $0xc0] sm:$0xff] }
0x2593   :  { %10679 = vmatprep.subr.mxu1 %v7292_v30 }
0x2594   :  { %10680 = vmatpush3.msra.mxu1 %v7292_v30 }
0x2595   :  { %10682 = vmatmul.mubr.msk.f32.vlgmr.msra.gmra.mxu1 %vm339_vm1, %v9272_v18  ;;  %10701 = vmatprep.subr.mxu1 %v9294_v8  ;;  %v9348_v18 = vld [vmem:[%s13120_s24 + $0xd8] sm:$0xff] }
0x2596   :  { %10702 = vmatpush3.msra.mxu1 %v9294_v8  ;;  %10684 = vmatprep.mubr.msk.f32.mxu1 %vm339_vm1, %v9273_v52  ;;  %v9359_v8 = vld [vmem:[%s13120_s24 + $0xe0] sm:$0xff] }
0x2597   :  { %10703 = vmatprep.subr.mxu1 %v9293_v59 }
0x2598   :  { %10704 = vmatpush3.msra.mxu1 %v9293_v59 }
0x2599   :  { %10685 = vmatmul.mubr.msk.f32.gmra.mxu1 %vm339_vm1, %v9274_v50  ;;  %10725 = vmatprep.subr.mxu1 %v9308_v43  ;;  %v9360_v50 = vld [vmem:[%s13120_s24 + $0xe8] sm:$0xff] }
0x259a   :  { %10705 = vmatprep.mubr.msk.f32.mxu1 %vm7041_vm11, %v12863_v47 }
0x259d   :  { %10706 = vmatmul.mubr.msk.f32.vlgmr.msra.gmra.mxu1 %vm7041_vm11, %v12865_v63 }
0x259e   :  { %10708 = vmatprep.mubr.msk.f32.mxu1 %vm7041_vm11, %v12872_v40  ;;  %10726 = vmatpush3.msra.mxu1 %v9308_v43  ;;  %v9361_v43 = vld [vmem:[%s13120_s24 + $0xf0] sm:$0xff] }
0x259f   :  { %10727 = vmatprep.subr.mxu1 %v9307_v10 }
0x25a0   :  { %10728 = vmatpush3.msra.mxu1 %v9307_v10 }
0x25a1   :  { %10709 = vmatmul.mubr.msk.f32.gmra.mxu1 %vm7041_vm11, %v12874_v46  ;;  %10749 = vmatprep.subr.mxu1 %v9322_v60 }
0x25a2   :  { %10729 = vmatprep.mubr.msk.f32.mxu1 %vm7041_vm11, %v12863_v47 }
0x25a5   :  { %10730 = vmatmul.mubr.msk.f32.vlgmr.msra.gmra.mxu1 %vm7041_vm11, %v12865_v63 }
0x25a6   :  { %10732 = vmatprep.mubr.msk.f32.mxu1 %vm7041_vm11, %v12872_v40  ;;  %10750 = vmatpush3.msra.mxu1 %v9322_v60 }
0x25a7   :  { %10751 = vmatprep.subr.mxu1 %v9321_v4 }
0x25a8   :  { %10752 = vmatpush3.msra.mxu1 %v9321_v4  ;;  %v9362_v4 = vld [vmem:[%s13120_s24 + $0xf8] sm:$0xff] }
0x25a9   :  { %10733 = vmatmul.mubr.msk.f32.gmra.mxu1 %vm7041_vm11, %v12874_v46  ;;  %10773 = vmatprep.subr.mxu1 %v9336_v28 }
0x25aa   :  { %10753 = vmatprep.mubr.msk.f32.mxu1 %vm7041_vm11, %v12863_v47 }
0x25ad   :  { %10754 = vmatmul.mubr.msk.f32.vlgmr.msra.gmra.mxu1 %vm7041_vm11, %v12865_v63 }
0x25ae   :  { %10756 = vmatprep.mubr.msk.f32.mxu1 %vm7041_vm11, %v12872_v40  ;;  %10774 = vmatpush3.msra.mxu1 %v9336_v28  ;;  %v9373_v28 = vld [vmem:[%s13120_s24 + $0x100] sm:$0xff] }
0x25af   :  { %10775 = vmatprep.subr.mxu1 %v9335_v35 }
0x25b0   :  { %10776 = vmatpush3.msra.mxu1 %v9335_v35  ;;  %v9374_v35 = vld [vmem:[%s13120_s24 + $0x108] sm:$0xff] }
0x25b1   :  { %10757 = vmatmul.mubr.msk.f32.gmra.mxu1 %vm7041_vm11, %v12874_v46  ;;  %10797 = vmatprep.subr.mxu1 %v9350_v22 }
0x25b2   :  { %10777 = vmatprep.mubr.msk.f32.mxu1 %vm7041_vm11, %v12863_v47 }
0x25b5   :  { %10778 = vmatmul.mubr.msk.f32.vlgmr.msra.gmra.mxu1 %vm7041_vm11, %v12865_v63 }
0x25b6   :  { %10780 = vmatprep.mubr.msk.f32.mxu1 %vm7041_vm11, %v12872_v40  ;;  %10798 = vmatpush3.msra.mxu1 %v9350_v22  ;;  %v9375_v22 = vld [vmem:[%s13120_s24 + $0x110] sm:$0xff] }
0x25b7   :  { %10799 = vmatprep.subr.mxu1 %v9349_v37 }
0x25b8   :  { %10800 = vmatpush3.msra.mxu1 %v9349_v37  ;;  %v9376_v37 = vld [vmem:[%s13120_s24 + $0x118] sm:$0xff] }
0x25b9   :  { %10781 = vmatmul.mubr.msk.f32.gmra.mxu1 %vm7041_vm11, %v12874_v46  ;;  %10821 = vmatprep.subr.mxu1 %v9364_v19 }
0x25ba   :  { %10801 = vmatprep.mubr.msk.f32.mxu1 %vm7041_vm11, %v12863_v47 }
0x25bd   :  { %10802 = vmatmul.mubr.msk.f32.vlgmr.msra.gmra.mxu1 %vm7041_vm11, %v12865_v63 }
0x25be   :  { %10804 = vmatprep.mubr.msk.f32.mxu1 %vm7041_vm11, %v12872_v40  ;;  %10822 = vmatpush3.msra.mxu1 %v9364_v19 }
0x25bf   :  { %10823 = vmatprep.subr.mxu1 %v9363_v38 }
0x25c0   :  { %10824 = vmatpush3.msra.mxu1 %v9363_v38 }
0x25c1   :  { %10805 = vmatmul.mubr.msk.f32.gmra.mxu1 %vm7041_vm11, %v12874_v46  ;;  %10845 = vmatprep.subr.mxu1 %v9378_v57 }
0x25c2   :  { %10825 = vmatprep.mubr.msk.f32.mxu1 %vm7041_vm11, %v12863_v47 }
0x25c5   :  { %10826 = vmatmul.mubr.msk.f32.vlgmr.msra.gmra.mxu1 %vm7041_vm11, %v12865_v63 }
0x25c6   :  { %10828 = vmatprep.mubr.msk.f32.mxu1 %vm7041_vm11, %v12872_v40  ;;  %10846 = vmatpush3.msra.mxu1 %v9378_v57 }
0x25c7   :  { %10847 = vmatprep.subr.mxu1 %v9377_v20 }
0x25c8   :  { %10848 = vmatpush3.msra.mxu1 %v9377_v20 }
0x25c9   :  { %10829 = vmatmul.mubr.msk.f32.gmra.mxu1 %vm7041_vm11, %v12874_v46 }
0x25ca   :  { %10849 = vmatprep.mubr.msk.f32.mxu1 %vm7041_vm11, %v12863_v47  ;;  %v9317_v47 = vld [vmem:[%s13120_s24 + $0x80] sm:$0xff] }
0x25cd   :  { %10850 = vmatmul.mubr.msk.f32.vlgmr.msra.gmra.mxu1 %vm7041_vm11, %v12865_v63 }
0x25ce   :  { %10852 = vmatprep.mubr.msk.f32.mxu1 %vm7041_vm11, %v12872_v40  ;;  %v9331_v40 = vld [vmem:[%s13120_s24 + $0xa0] sm:$0xff] }
0x25d1   :  { %10853 = vmatmul.mubr.msk.f32.gmra.mxu1 %vm7041_vm11, %v12874_v46 }
0x264d   :  { %v10697_v19 = vpop.f32.mrf.mxu0 }
0x264f   :  { %v7486_v38 = vpop.f32.mrf.mxu0 }
0x2651   :  { %v10700_v57 = vpop.f32.mrf.mxu0 }
0x2653   :  { %v7496_v20 = vpop.f32.mrf.mxu0 }
0x2655   :  { %v12976_v0 = vpop.f32.mrf.mxu1 }
0x2657   :  { %v12978_v6 = vpop.f32.mrf.mxu1 }
0x2659   :  { %v12980_v9 = vpop.f32.mrf.mxu1 }
0x265b   :  { %v12982_v44 = vpop.f32.mrf.mxu1 }
0x265d   :  { %v10707_v53 = vpop.f32.mrf.mxu1 }
0x265f   :  { %v7579_v41 = vpop.f32.mrf.mxu1 }
0x2661   :  { %v10710_v45 = vpop.f32.mrf.mxu1 }
0x2662   :  { %10711 = vmatprep.subr.mxu0 %v10710_v45 }
0x2663   :  { %v7589_v3 = vpop.f32.mrf.mxu1  ;;  %10712 = vmatpush3.msra.mxu0 %v10710_v45 }
0x2664   :  { %10713 = vmatprep.subr.mxu0 %v7589_v3 }
0x2665   :  { %10714 = vmatpush3.msra.mxu0 %v7589_v3  ;;  %v10731_v26 = vpop.f32.mrf.mxu1 }
0x2666   :  { %10715 = vmatprep.subr.mxu0 %v10707_v53 }
0x2667   :  { %10716 = vmatpush3.msra.mxu0 %v10707_v53  ;;  %v7773_v49 = vpop.f32.mrf.mxu1 }
0x2668   :  { %10717 = vmatprep.subr.mxu0 %v7579_v41 }
0x2669   :  { %10718 = vmatpush3.msra.mxu0 %v7579_v41  ;;  %v10734_v61 = vpop.f32.mrf.mxu1 }
0x266a   :  { %10720 = vmatmul.mubr.msk.f32.vlgmr.msra.gmra.mxu0 %vm339_vm1, %v9290_v54  ;;  %10735 = vmatprep.subr.mxu0 %v10734_v61 }
0x266b   :  { %v7783_v16 = vpop.f32.mrf.mxu1  ;;  %10736 = vmatpush3.msra.mxu0 %v10734_v61  ;;  %10722 = vmatprep.mubr.msk.f32.mxu0 %vm339_vm1, %v9291_v7 }
0x266c   :  { %10737 = vmatprep.subr.mxu0 %v7783_v16 }
0x266d   :  { %10738 = vmatpush3.msra.mxu0 %v7783_v16  ;;  %v10755_v48 = vpop.f32.mrf.mxu1 }
0x266e   :  { %10723 = vmatmul.mubr.msk.f32.gmra.mxu0 %vm339_vm1, %v9292_v12  ;;  %10739 = vmatprep.subr.mxu0 %v10731_v26 }
0x266f   :  { %10740 = vmatpush3.msra.mxu0 %v10731_v26  ;;  %v7967_v11 = vpop.f32.mrf.mxu1  ;;  %10743 = vmatprep.mubr.msk.f32.mxu0 %vm339_vm1, %v9303_v55 }
0x2670   :  { %10741 = vmatprep.subr.mxu0 %v7773_v49 }
0x2671   :  { %10742 = vmatpush3.msra.mxu0 %v7773_v49  ;;  %v10758_v56 = vpop.f32.mrf.mxu1 }
0x2672   :  { %10744 = vmatmul.mubr.msk.f32.vlgmr.msra.gmra.mxu0 %vm339_vm1, %v9304_v14  ;;  %10759 = vmatprep.subr.mxu0 %v10758_v56 }
0x2673   :  { %v7977_v25 = vpop.f32.mrf.mxu1  ;;  %10760 = vmatpush3.msra.mxu0 %v10758_v56  ;;  %10746 = vmatprep.mubr.msk.f32.mxu0 %vm339_vm1, %v9305_v39 }
0x2674   :  { %10761 = vmatprep.subr.mxu0 %v7977_v25 }
0x2675   :  { %10762 = vmatpush3.msra.mxu0 %v7977_v25  ;;  %v10779_v63 = vpop.f32.mrf.mxu1  ;;  %v7492_v25 = vadd.f32 %v10697_v19, %v12976_v0 }
0x2676   :  { %10747 = vmatmul.mubr.msk.f32.gmra.mxu0 %vm339_vm1, %v9306_v51  ;;  %10763 = vmatprep.subr.mxu0 %v10755_v48 }
0x2677   :  { %10764 = vmatpush3.msra.mxu0 %v10755_v48  ;;  %v8161_v13 = vpop.f32.mrf.mxu1  ;;  %10767 = vmatprep.mubr.msk.f32.mxu0 %vm339_vm1, %v9317_v47  ;;  %v7487_v47 = vadd.f32 %v7486_v38, %v12978_v6 }
0x2678   :  { %10765 = vmatprep.subr.mxu0 %v7967_v11 }
0x2679   :  { %10766 = vmatpush3.msra.mxu0 %v7967_v11  ;;  %v10782_v21 = vpop.f32.mrf.mxu1 }
0x267a   :  { %10768 = vmatmul.mubr.msk.f32.vlgmr.msra.gmra.mxu0 %vm339_vm1, %v9318_v23  ;;  %10783 = vmatprep.subr.mxu0 %v10782_v21  ;;  %v7502_v23 = vadd.f32 %v10700_v57, %v12980_v9 }
0x267b   :  { %v8171_v34 = vpop.f32.mrf.mxu1  ;;  %10784 = vmatpush3.msra.mxu0 %v10782_v21  ;;  %10770 = vmatprep.mubr.msk.f32.mxu0 %vm339_vm1, %v9319_v33 }
0x267c   :  { %10785 = vmatprep.subr.mxu0 %v8171_v34 }
0x267d   :  { %10786 = vmatpush3.msra.mxu0 %v8171_v34  ;;  %v10803_v46 = vpop.f32.mrf.mxu1 }
0x267e   :  { %10771 = vmatmul.mubr.msk.f32.gmra.mxu0 %vm339_vm1, %v9320_v36  ;;  %10787 = vmatprep.subr.mxu0 %v10779_v63  ;;  %v7497_v36 = vadd.f32 %v7496_v20, %v12982_v44 }
0x267f   :  { %10788 = vmatpush3.msra.mxu0 %v10779_v63  ;;  %v8355_v58 = vpop.f32.mrf.mxu1  ;;  %10791 = vmatprep.mubr.msk.f32.mxu0 %vm339_vm1, %v9331_v40 }
0x2680   :  { %10789 = vmatprep.subr.mxu0 %v8161_v13 }
0x2681   :  { %10790 = vmatpush3.msra.mxu0 %v8161_v13  ;;  %v10806_v15 = vpop.f32.mrf.mxu1 }
0x2682   :  { %10792 = vmatmul.mubr.msk.f32.vlgmr.msra.gmra.mxu0 %vm339_vm1, %v9332_v42  ;;  %10807 = vmatprep.subr.mxu0 %v10806_v15 }
0x2683   :  { %v8365_v31 = vpop.f32.mrf.mxu1  ;;  %10808 = vmatpush3.msra.mxu0 %v10806_v15  ;;  %10794 = vmatprep.mubr.msk.f32.mxu0 %vm339_vm1, %v9333_v5 }
0x2684   :  { %10809 = vmatprep.subr.mxu0 %v8365_v31 }
0x2685   :  { %10810 = vmatpush3.msra.mxu0 %v8365_v31  ;;  %v10827_v30 = vpop.f32.mrf.mxu1 }
0x2686   :  { %10795 = vmatmul.mubr.msk.f32.gmra.mxu0 %vm339_vm1, %v9334_v32  ;;  %10811 = vmatprep.subr.mxu0 %v10803_v46 }
0x2687   :  { %10812 = vmatpush3.msra.mxu0 %v10803_v46  ;;  %v8549_v29 = vpop.f32.mrf.mxu1  ;;  %10815 = vmatprep.mubr.msk.f32.mxu0 %vm339_vm1, %v9345_v24 }
0x2688   :  { %10813 = vmatprep.subr.mxu0 %v8355_v58 }
0x2689   :  { %10814 = vmatpush3.msra.mxu0 %v8355_v58  ;;  %v10830_v2 = vpop.f32.mrf.mxu1 }
0x268a   :  { %10816 = vmatmul.mubr.msk.f32.vlgmr.msra.gmra.mxu0 %vm339_vm1, %v9346_v62  ;;  %10831 = vmatprep.subr.mxu0 %v10830_v2 }
0x268b   :  { %v8559_v27 = vpop.f32.mrf.mxu1  ;;  %10832 = vmatpush3.msra.mxu0 %v10830_v2  ;;  %10818 = vmatprep.mubr.msk.f32.mxu0 %vm339_vm1, %v9347_v1 }
0x268c   :  { %10833 = vmatprep.subr.mxu0 %v8559_v27 }
0x268d   :  { %10834 = vmatpush3.msra.mxu0 %v8559_v27  ;;  %v10851_v52 = vpop.f32.mrf.mxu1 }
0x268e   :  { %10819 = vmatmul.mubr.msk.f32.gmra.mxu0 %vm339_vm1, %v9348_v18  ;;  %10835 = vmatprep.subr.mxu0 %v10827_v30 }
0x268f   :  { %10836 = vmatpush3.msra.mxu0 %v10827_v30  ;;  %v8743_v59 = vpop.f32.mrf.mxu1  ;;  %10839 = vmatprep.mubr.msk.f32.mxu0 %vm339_vm1, %v9359_v8 }
0x2690   :  { %10837 = vmatprep.subr.mxu0 %v8549_v29 }
0x2691   :  { %10838 = vmatpush3.msra.mxu0 %v8549_v29  ;;  %v10854_v10 = vpop.f32.mrf.mxu1 }
0x2692   :  { %10840 = vmatmul.mubr.msk.f32.vlgmr.msra.gmra.mxu0 %vm339_vm1, %v9360_v50  ;;  %10855 = vmatprep.subr.mxu0 %v10854_v10 }
0x2693   :  { %v8753_v60 = vpop.f32.mrf.mxu1  ;;  %10856 = vmatpush3.msra.mxu0 %v10854_v10  ;;  %10842 = vmatprep.mubr.msk.f32.mxu0 %vm339_vm1, %v9361_v43 }
0x2694   :  { %10857 = vmatprep.subr.mxu0 %v8753_v60 }
0x2695   :  { %10858 = vmatpush3.msra.mxu0 %v8753_v60 }
0x2696   :  { %10843 = vmatmul.mubr.msk.f32.gmra.mxu0 %vm339_vm1, %v9362_v4  ;;  %10859 = vmatprep.subr.mxu0 %v10851_v52 }
0x2697   :  { %10860 = vmatpush3.msra.mxu0 %v10851_v52  ;;  %10863 = vmatprep.mubr.msk.f32.mxu0 %vm339_vm1, %v9373_v28 }
0x2698   :  { %10861 = vmatprep.subr.mxu0 %v8743_v59 }
0x2699   :  { %10862 = vmatpush3.msra.mxu0 %v8743_v59 }
0x269a   :  { %10864 = vmatmul.mubr.msk.f32.vlgmr.msra.gmra.mxu0 %vm339_vm1, %v9374_v35 }
0x269b   :  { %10866 = vmatprep.mubr.msk.f32.mxu0 %vm339_vm1, %v9375_v22 }
0x269e   :  { %10867 = vmatmul.mubr.msk.f32.gmra.mxu0 %vm339_vm1, %v9376_v37 }
0x272a   :  { %v10721_v17 = vpop.f32.mrf.mxu0 }
0x272b   :  { %v7696_v63 = vadd.f32 %v10721_v17, %v7492_v25 }
0x272c   :  { %v7676_v53 = vpop.f32.mrf.mxu0 }
0x272d   :  { %v7695_v33 = vadd.f32 %v7676_v53, %v7487_v47 }
0x272e   :  { %v10724_v41 = vpop.f32.mrf.mxu0 }
0x272f   :  { %v7698_v40 = vadd.f32 %v10724_v41, %v7502_v23 }
0x2730   :  { %v7686_v45 = vpop.f32.mrf.mxu0 }
0x2731   :  { %v7697_v5 = vadd.f32 %v7686_v45, %v7497_v36 }
0x2732   :  { %v10745_v3 = vpop.f32.mrf.mxu0 }
0x2733   :  { %v7890_v21 = vadd.f32 %v10745_v3, %v7696_v63 }
0x2734   :  { %v7870_v26 = vpop.f32.mrf.mxu0 }
0x2735   :  { %v7889_v46 = vadd.f32 %v7870_v26, %v7695_v33 }
0x2736   :  { %v10748_v49 = vpop.f32.mrf.mxu0 }
0x2737   :  { %v7892_v15 = vadd.f32 %v10748_v49, %v7698_v40 }
0x2738   :  { %v7880_v54 = vpop.f32.mrf.mxu0 }
0x2739   :  { %v7891_v24 = vadd.f32 %v7880_v54, %v7697_v5 }
0x273a   :  { %v10769_v7 = vpop.f32.mrf.mxu0 }
0x273b   :  { %v8084_v58 = vadd.f32 %v10769_v7, %v7890_v21 }
0x273c   :  { %v8064_v61 = vpop.f32.mrf.mxu0 }
0x273d   :  { %v8083_v31 = vadd.f32 %v8064_v61, %v7889_v46 }
0x273e   :  { %v10772_v16 = vpop.f32.mrf.mxu0 }
0x273f   :  { %v8086_v6 = vadd.f32 %v10772_v16, %v7892_v15  ;;  %v9387_v15 = vld [vmem:[%s11493_s4] ss:$0 sm:$0xff] }
0x2740   :  { %v8074_v12 = vpop.f32.mrf.mxu0 }
0x2741   :  { %v8085_v9 = vadd.f32 %v8074_v12, %v7891_v24 }
0x2742   :  { %v10793_v55 = vpop.f32.mrf.mxu0 }
0x2743   :  { %v8278_v0 = vadd.f32 %v10793_v55, %v8084_v58 }
0x2744   :  { %v8258_v48 = vpop.f32.mrf.mxu0 }
0x2745   :  { %v8277_v30 = vadd.f32 %v8258_v48, %v8083_v31 }
0x2746   :  { %v10796_v11 = vpop.f32.mrf.mxu0 }
0x2747   :  { %v8280_v1 = vadd.f32 %v10796_v11, %v8086_v6 }
0x2748   :  { %v8268_v14 = vpop.f32.mrf.mxu0 }
0x2749   :  { %v8279_v44 = vadd.f32 %v8268_v14, %v8085_v9 }
0x274a   :  { %v10817_v39 = vpop.f32.mrf.mxu0 }
0x274b   :  { %v8472_v29 = vadd.f32 %v10817_v39, %v8278_v0 }
0x274c   :  { %v8452_v56 = vpop.f32.mrf.mxu0 }
0x274d   :  { %v8471_v2 = vadd.f32 %v8452_v56, %v8277_v30 }
0x274e   :  { %v10820_v51 = vpop.f32.mrf.mxu0 }
0x274f   :  { %v8474_v8 = vadd.f32 %v10820_v51, %v8280_v1 }
0x2750   :  { %v8462_v13 = vpop.f32.mrf.mxu0 }
0x2751   :  { %v8473_v43 = vadd.f32 %v8462_v13, %v8279_v44 }
0x2752   :  { %v10841_v34 = vpop.f32.mrf.mxu0 }
0x2753   :  { %v8666_v27 = vadd.f32 %v10841_v34, %v8472_v29 }
0x2754   :  { %v8646_v42 = vpop.f32.mrf.mxu0 }
0x2755   :  { %v8665_v52 = vadd.f32 %v8646_v42, %v8471_v2 }
0x2756   :  { %v10844_v32 = vpop.f32.mrf.mxu0 }
0x2757   :  { %v8668_v10 = vadd.f32 %v10844_v32, %v8474_v8  ;;  %v9388_v32 = vld [vmem:[%s11498_s12] ss:$0 sm:$0xff]  ;;  %s11199_s12 = scalar_lea.vmem %s8947_s22, 512 }
0x2758   :  { %v8656_v62 = vpop.f32.mrf.mxu0  ;;  %p11200_p0 = scmp.ne.s32.totalorder %s8947_s22, %s11199_s12  ;;  %p11205_p2 = scmp.lt.s32.totalorder %s11199_s12, %s11199_s12 }
0x2759   :  { %v8667_v35 = vadd.f32 %v8656_v62, %v8473_v43 }
0x275a   :  { %v10865_v18 = vpop.f32.mrf.mxu0  ;;  %p11206_p3 = por %p11205_p2, %p11204_p1 }
0x275b   :  { %v8860_v59 = vadd.f32 %v10865_v18, %v8666_v27 }
0x275c   :  { %v8840_v50 = vpop.f32.mrf.mxu0  ;;  %p11207_p4 = pnand %p11206_p3, %p11200_p0 }
0x275d   :  { %v8859_v60 = vadd.f32 %v8840_v50, %v8665_v52  ;;  %v8868_v4 = vsel %vm7041_vm11, %v8860_v59, 0.0 }
0x275e   :  { %8869 = vadd.xlane.f32.xlu1 %v8868_v4  ;;  %v10868_v28 = vpop.f32.mrf.mxu0 }
0x275f   :  { %v8862_v22 = vadd.f32 %v10868_v28, %v8668_v10  ;;  %v8865_v37 = vsel %vm7041_vm11, %v8859_v60, 0.0 }
0x2760   :  { %8866 = vadd.xlane.f32.xlu0 %v8865_v37  ;;  %v8850_v19 = vpop.f32.mrf.mxu0 }
0x2761   :  { %v8861_v38 = vadd.f32 %v8850_v19, %v8667_v35  ;;  %v8874_v57 = vsel %vm7041_vm11, %v8862_v22, 0.0 }
0x2762   :  { %8875 = vadd.xlane.f32.xlu1 %v8874_v57 }
0x2763   :  { %v8871_v20 = vsel %vm7041_vm11, %v8861_v38, 0.0 }
0x2764   :  { %8872 = vadd.xlane.f32.xlu0 %v8871_v20 }
0x27e7   :  { %v8870_v17 = vpop.xlane.xlu1 %8869 }
0x27e8   :  { %v8878_v53 = vmul.f32 0.0625, %v8870_v17 }
0x27e9   :  { %v8867_v41 = vpop.xlane.xlu0 %8866 }
0x27ea   :  { %v8882_v45 = vsub.f32 %v8860_v59, %v8878_v53  ;;  %v8877_v3 = vmul.f32 0.0625, %v8867_v41 }
0x27eb   :  { %v8876_v26 = vpop.xlane.xlu1 %8875 }
0x27ec   :  { %v8881_v49 = vsub.f32 %v8859_v60, %v8877_v3  ;;  %v8880_v54 = vmul.f32 0.0625, %v8876_v26  ;;  %v8886_v7 = vmul.f32 %v8882_v45, %v8882_v45 }
0x27ed   :  { %v8873_v61 = vpop.xlane.xlu0 %8872 }
0x27ee   :  { %v8884_v16 = vsub.f32 %v8862_v22, %v8880_v54  ;;  %v8879_v12 = vmul.f32 0.0625, %v8873_v61  ;;  %v8892_v55 = vsel %vm7041_vm11, %v8886_v7, 0.0  ;;  %v8885_v48 = vmul.f32 %v8881_v49, %v8881_v49 }
0x27ef   :  { %8893 = vadd.xlane.f32.xlu1 %v8892_v55 }
0x27f0   :  { %v8883_v11 = vsub.f32 %v8861_v38, %v8879_v12  ;;  %v8889_v14 = vsel %vm7041_vm11, %v8885_v48, 0.0  ;;  %v8888_v39 = vmul.f32 %v8884_v16, %v8884_v16 }
0x27f1   :  { %8890 = vadd.xlane.f32.xlu0 %v8889_v14 }
0x27f2   :  { %v8898_v56 = vsel %vm7041_vm11, %v8888_v39, 0.0  ;;  %v8887_v25 = vmul.f32 %v8883_v11, %v8883_v11 }
0x27f3   :  { %8899 = vadd.xlane.f32.xlu1 %v8898_v56 }
0x27f4   :  { %v8895_v51 = vsel %vm7041_vm11, %v8887_v25, 0.0 }
0x27f5   :  { %8896 = vadd.xlane.f32.xlu0 %v8895_v51 }
0x2878   :  { %v8894_v47 = vpop.xlane.xlu1 %8893 }
0x2879   :  { %v8902_v63 = vmul.f32 0.0625, %v8894_v47 }
0x287a   :  { %v8891_v13 = vpop.xlane.xlu0 %8890 }
0x287b   :  { %v8906_v23 = vadd.f32 1e-06, %v8902_v63  ;;  %v8901_v33 = vmul.f32 0.0625, %v8891_v13 }
0x287c   :  { %v8900_v21 = vpop.xlane.xlu1 %8899 }
0x287d   :  { %11136 = vrsqrt.f32 %v8906_v23  ;;  %v8905_v34 = vadd.f32 1e-06, %v8901_v33  ;;  %v8904_v36 = vmul.f32 0.0625, %v8900_v21 }
0x287e   :  { %v8897_v40 = vpop.xlane.xlu0 %8896 }
0x287f   :  { %11138 = vrsqrt.f32 %v8905_v34  ;;  %v8908_v46 = vadd.f32 1e-06, %v8904_v36  ;;  %v8903_v58 = vmul.f32 0.0625, %v8897_v40 }
0x2881   :  { %11140 = vrsqrt.f32 %v8908_v46  ;;  %v8907_v42 = vadd.f32 1e-06, %v8903_v58 }
0x2883   :  { %11142 = vrsqrt.f32 %v8907_v42 }
0x288a   :  { %v11137_v5 = vpop.eup %11136 }
0x288b   :  { %v8914_v31 = vmul.f32 %v11137_v5, %v8882_v45 }
0x288c   :  { %v11139_v0 = vpop.eup %11138 }
0x288d   :  { %v8924_v24 = vmul.f32 %v9387_v15, %v8914_v31  ;;  %v8913_v6 = vmul.f32 %v11139_v0, %v8881_v49 }
0x288e   :  { %v11141_v30 = vpop.eup %11140 }
0x288f   :  { %v8923_v29 = vmul.f32 %v9387_v15, %v8913_v6  ;;  %v8916_v62 = vmul.f32 %v11141_v30, %v8884_v16  ;;  %v8934_v9 = vadd.f32 %v9388_v32, %v8924_v24 }
0x2890   :  { %v11143_v1 = vpop.eup %11142 }
0x2891   :  { %v8926_v2 = vmul.f32 %v9387_v15, %v8916_v62  ;;  %v8915_v27 = vmul.f32 %v11143_v1, %v8883_v11  ;;  %v8933_v18 = vadd.f32 %v9388_v32, %v8923_v29  ;;  %8938 = vst.msk [vmem:[#allocation2 + $0x8] sm:$0xff] %vm7041_vm11, %v8934_v9 }
0x2893   :  { %v8925_v44 = vmul.f32 %v9387_v15, %v8915_v27  ;;  %v8936_v8 = vadd.f32 %v9388_v32, %v8926_v2  ;;  %8937 = vst.msk [vmem:[#allocation2] sm:$0xff] %vm7041_vm11, %v8933_v18 }
0x2895   :  { %v8935_v52 = vadd.f32 %v9388_v32, %v8925_v44  ;;  %8940 = vst.msk [vmem:[#allocation2 + $0x18] sm:$0xff] %vm7041_vm11, %v8936_v8 }
0x2897   :  { %8939 = vst.msk [vmem:[#allocation2 + $0x10] sm:$0xff] %vm7041_vm11, %v8935_v52 }
0x2898   :  { %11210 = shalt.err (!%p11207_p4)
}
0x2899   :  { %s11278_s4 = smov 128   ;;  %s11279_s23 = smov 8  }
0x289a   :  { %8952 = dma.vmem_to_hbm [thread:$0]  %s8947_s22, 512, %s11503_s20, [#allocation3], %s11278_s4, %s11278_s4, %s11279_s23  }
0x289b   :  { %11219 = dma.done.wait [#allocation3], 512  }
0x289c   :  { %11220 = vsyncadd [#allocation3], 4294966784 }
0x289d   :  { %8956 = vsyncpa [#allocation3], 1 }

</bundles_post_ra>
